<compile_context>
chip_gen: v5e
topology: v5e:2x2
jax: 0.10.0
libtpu: 0.0.40
codegen_flags: <defaults>
</compile_context>

<pallas_src>
import math

import jax
import jax.numpy as jnp
from jax.experimental import pallas as pl
from jax.experimental.pallas import tpu as pltpu

LANE = 128          # lane width; every channel / K dim is padded to this
NUM_CLASSES = 10
NEG_INF = -1e30


def _round_up(x, m):
    return (x + m - 1) // m * m


# --------------------------- kernel 1: conv1 + conv2 ---------------------------
#
# Grid over batch tiles.  Per step (bt images):
#   conv1 : one (bt*256, 128) x (128, 128) matmul (+bias, ReLU) -> y1
#   y1 is scattered into zero-padded phase maps in VMEM scratch,
#   phase p = (oh % 2) * 2 + (ow % 2), each map (10, 10, 128) incl. 1-pixel pad.
#   conv2 (5x5, stride 2, pad 2) then == 25 unit-stride shifted-window matmuls
#   over those maps, accumulated in f32 (+bias, ReLU).

def _make_conv12_kernel(bt):
    def kernel(a1_ref, w1_ref, b1_ref, w2_ref, b2_ref, o_ref, y1p_ref, acc_ref):
        # ---- conv1 ----
        y1 = jnp.dot(a1_ref[...], w1_ref[...],
                     preferred_element_type=jnp.float32)          # (bt*256, 128)
        y1 = jnp.maximum(y1 + b1_ref[...], 0.0).astype(jnp.bfloat16)
        y1_r = y1.reshape(bt, 4, 8, 8, 128)            # rows = (n, phase, k, l)

        # ---- scatter into zero-padded phase maps (1-pixel border = conv2 pad) --
        y1p_ref[...] = jnp.zeros(y1p_ref.shape, y1p_ref.dtype)
        for p in range(4):
            y1p_ref[p, :, pl.ds(1, 8), pl.ds(1, 8), :] = y1_r[:, p]

        # ---- conv2 as 25 shifted-window matmuls, f32 accumulation ----
        acc_ref[...] = jnp.broadcast_to(b2_ref[...], (bt * 64, 128))
        for i in range(5):            # kernel row
            for j in range(5):        # kernel col
                di, pi = i // 2, i % 2
                dj, pj = j // 2, j % 2
                p = pi * 2 + pj
                tap = y1p_ref[p, :, pl.ds(di, 8), pl.ds(dj, 8), :]  # (bt,8,8,128)
                acc_ref[...] += jnp.dot(tap.reshape(bt * 64, 128),
                                        w2_ref[i * 5 + j],
                                        preferred_element_type=jnp.float32)

        o_ref[...] = jnp.maximum(acc_ref[...], 0.0).astype(o_ref.dtype)

    return kernel


def fused_conv12(a1, w1_mat, b1, w2_taps, b2, n_images, *, bt=8):
    """a1: (n_images*256, 128) bf16 phase-ordered conv1 patches.
    Returns relu(conv2(relu(conv1(x)))) as (n_images*64, 128) bf16,
    rows ordered (image, oh, ow), channels padded 64 -> 128."""
    bt = max(1, min(bt, n_images))
    g = -(-n_images // bt)
    n_pad = g * bt
    if n_pad != n_images:
        a1 = jnp.pad(a1, ((0, (n_pad - n_images) * 256), (0, 0)))

    out = pl.pallas_call(
        _make_conv12_kernel(bt),
        out_shape=jax.ShapeDtypeStruct((n_pad * 64, LANE), jnp.bfloat16),
        grid=(g,),
        in_specs=[
            pl.BlockSpec((bt * 256, LANE), lambda i: (i, 0)),      # a1 (tiled)
            pl.BlockSpec((LANE, LANE), lambda i: (0, 0)),          # w1 (resident)
            pl.BlockSpec((1, LANE), lambda i: (0, 0)),             # b1
            pl.BlockSpec((25, LANE, LANE), lambda i: (0, 0, 0)),   # w2 taps
            pl.BlockSpec((1, LANE), lambda i: (0, 0)),             # b2
        ],
        out_specs=pl.BlockSpec((bt * 64, LANE), lambda i: (i, 0)),
        scratch_shapes=[
            pltpu.VMEM((4, bt, 10, 10, LANE), jnp.bfloat16),   # padded phase maps
            pltpu.VMEM((bt * 64, LANE), jnp.float32),          # conv2 accumulator
        ],
        compiler_params=pltpu.CompilerParams(
            dimension_semantics=("parallel",)),
        cost_estimate=pl.CostEstimate(
            flops=2 * n_pad * (256 * 128 * 128 + 25 * 64 * 128 * 128),
            transcendentals=0,
            bytes_accessed=n_pad * (256 + 64) * 128 * 2
                           + (128 * 128 + 25 * 128 * 128) * 2 + 2 * 128 * 4,
        ),
    )(a1, w1_mat, b1, w2_taps, b2)
    return out[: n_images * 64]


# --------------------------- kernel 2: fused tail -------------------------------
# conv3 (8x8 valid over an 8x8 map == dense 8192 -> 128padded) + conv4
# (1x1 == dense 128 -> 128padded) + ReLU + masked softmax.  Tiled over batch,
# weights resident, padded logit columns masked to -inf before the softmax.

def _tail_kernel(x_ref, w3_ref, b3_ref, w4_ref, b4_ref, o_ref):
    h = jnp.dot(x_ref[...], w3_ref[...], preferred_element_type=jnp.float32)
    h = jnp.maximum(h + b3_ref[...], 0.0)                          # (tb, 128)
    logits = jnp.dot(h.astype(w4_ref.dtype), w4_ref[...],
                     preferred_element_type=jnp.float32)
    logits = jnp.maximum(logits + b4_ref[...], 0.0)                # F.relu(conv_4)
    col = jax.lax.broadcasted_iota(jnp.int32, logits.shape, 1)
    logits = jnp.where(col < NUM_CLASSES, logits, NEG_INF)         # mask pad cols
    m = jnp.max(logits, axis=-1, keepdims=True)
    e = jnp.exp(logits - m)
    o_ref[...] = e / jnp.sum(e, axis=-1, keepdims=True)


def fused_tail(x2, w3_mat, b3, w4_mat, b4, *, tb=128):
    m = x2.shape[0]
    tb = max(1, min(tb, m))
    g = -(-m // tb)
    mp = g * tb
    if mp != m:
        x2 = jnp.pad(x2, ((0, mp - m), (0, 0)))

    out = pl.pallas_call(
        _tail_kernel,
        out_shape=jax.ShapeDtypeStruct((mp, LANE), jnp.float32),
        grid=(g,),
        in_specs=[
            pl.BlockSpec((tb, 64 * LANE), lambda i: (i, 0)),       # x2 (tiled)
            pl.BlockSpec((64 * LANE, LANE), lambda i: (0, 0)),     # w3 (resident)
            pl.BlockSpec((1, LANE), lambda i: (0, 0)),             # b3
            pl.BlockSpec((LANE, LANE), lambda i: (0, 0)),          # w4
            pl.BlockSpec((1, LANE), lambda i: (0, 0)),             # b4
        ],
        out_specs=pl.BlockSpec((tb, LANE), lambda i: (i, 0)),
        compiler_params=pltpu.CompilerParams(
            dimension_semantics=("parallel",)),
        cost_estimate=pl.CostEstimate(
            flops=2 * mp * (64 * LANE * LANE + LANE * LANE),
            transcendentals=mp * LANE,
            bytes_accessed=mp * 64 * LANE * 2 + (64 * LANE + LANE) * LANE * 2
                           + mp * LANE * 4,
        ),
    )(x2, w3_mat, b3, w4_mat, b4)
    return out[:m]


# ----------------------------------- glue ---------------------------------------

def _conv1_patches_phase_major(x_nhwc):
    """(N,32,32,3) f32 -> (N*256, 128) bf16 conv1 im2col patches.
    Rows ordered (n, oh%2, ow%2, oh//2, ow//2); K ordered (kh, kw, cin),
    zero-padded 75 -> 128."""
    n = x_nhwc.shape[0]
    xp = jnp.pad(x_nhwc, ((0, 0), (2, 2), (2, 2), (0, 0)))      # (N,36,36,3)
    cols = []
    for i in range(5):
        for j in range(5):
            cols.append(xp[:, i:i + 31:2, j:j + 31:2, :])       # (N,16,16,3)
    pat = jnp.stack(cols, axis=3).reshape(n, 16, 16, 75)
    pat = pat.reshape(n, 8, 2, 8, 2, 75).transpose(0, 2, 4, 1, 3, 5)
    pat = pat.reshape(n * 256, 75)
    pat = jnp.pad(pat, ((0, 0), (0, LANE - 75)))
    return pat.astype(jnp.bfloat16)


def _prep_weights(params):
    (w1, b1) = params["conv1"]
    (w2, b2) = params["conv2"]
    (w3, b3) = params["conv3"]
    (w4, b4) = params["conv4"]

    # conv1: (32,3,5,5) -> (128,128); rows (kh,kw,cin) padded 75->128, cols 32->128
    w1p = jnp.pad(w1, ((0, LANE - 32), (0, 0), (0, 0), (0, 0)))
    w1_mat = jnp.transpose(w1p, (2, 3, 1, 0)).reshape(75, LANE)
    w1_mat = jnp.pad(w1_mat, ((0, LANE - 75), (0, 0))).astype(jnp.bfloat16)
    b1p = jnp.pad(b1, (0, LANE - 32)).reshape(1, LANE).astype(jnp.float32)

    # conv2: (64,32,5,5) -> 25 taps of (cin=128, cout=128)
    w2p = jnp.pad(w2, ((0, LANE - 64), (0, LANE - 32), (0, 0), (0, 0)))
    w2_taps = (jnp.transpose(w2p, (2, 3, 1, 0))
               .reshape(25, LANE, LANE).astype(jnp.bfloat16))
    b2p = jnp.pad(b2, (0, LANE - 64)).reshape(1, LANE).astype(jnp.float32)

    # conv3: 8x8 valid over 8x8 == dense (8*8*128 -> 128); rows (kh,kw,cin)
    w3p = jnp.pad(w3, ((0, LANE - 64), (0, LANE - 64), (0, 0), (0, 0)))
    w3_mat = (jnp.transpose(w3p, (2, 3, 1, 0))
              .reshape(8 * 8 * LANE, LANE).astype(jnp.bfloat16))
    b3p = jnp.pad(b3, (0, LANE - 64)).reshape(1, LANE).astype(jnp.float32)

    # conv4: 1x1 conv == dense (128 -> 128); padded logit cols masked in-kernel
    w4_mat = jnp.pad(jnp.transpose(w4.reshape(NUM_CLASSES, 64)),
                     ((0, LANE - 64), (0, LANE - NUM_CLASSES))).astype(jnp.bfloat16)
    b4p = jnp.pad(b4, (0, LANE - NUM_CLASSES)).reshape(1, LANE).astype(jnp.float32)

    return (w1_mat, b1p, w2_taps, b2p, w3_mat, b3p, w4_mat, b4p)


def allcnnc_short_forward(x_nchw, params, *, bt=8, tb=128):
    n = x_nchw.shape[0]
    assert x_nchw.shape[1:] == (3, 32, 32), x_nchw.shape  # conv3 8x8 needs 32x32
    (w1_mat, b1p, w2_taps, b2p, w3_mat, b3p, w4_mat, b4p) = _prep_weights(params)

    x_nhwc = jnp.transpose(x_nchw, (0, 2, 3, 1))
    a1 = _conv1_patches_phase_major(x_nhwc)                       # (n*256, 128)

    y2 = fused_conv12(a1, w1_mat, b1p, w2_taps, b2p, n, bt=bt)    # (n*64, 128)
    x2 = y2.reshape(n, 64 * LANE)     # free in HBM: per-image (oh, ow, c) flatten

    probs = fused_tail(x2, w3_mat, b3p, w4_mat, b4p, tb=tb)       # (n, 128) f32
    return probs[:, :NUM_CLASSES]     # avg_pool(1x1)+flatten fold away (1x1 spatial)


# --------------------------------- reference ------------------------------------

def reference_forward(x, params):
    def conv(h, w, b, stride, pad):
        out = jax.lax.conv_general_dilated(
            h, w, window_strides=(stride, stride),
            padding=((pad, pad), (pad, pad)),
            dimension_numbers=("NCHW", "OIHW", "NCHW"),
            precision=jax.lax.Precision.HIGHEST)
        return out + b.reshape(1, -1, 1, 1)

    h = jax.nn.relu(conv(x, *params["conv1"], 2, 2))
    h = jax.nn.relu(conv(h, *params["conv2"], 2, 2))
    h = jax.nn.relu(conv(h, *params["conv3"], 1, 0))
    h = jax.nn.relu(conv(h, *params["conv4"], 1, 0))
    h = h.reshape(h.shape[0], -1)
    return jax.nn.softmax(h, axis=-1)


def init_conv_params(key, cout, cin, kh, kw):
    """PyTorch Conv2d default init: U(-1/sqrt(fan_in), +1/sqrt(fan_in))."""
    fan_in = cin * kh * kw
    bound = 1.0 / math.sqrt(fan_in)
    kw_key, kb_key = jax.random.split(key)
    w = jax.random.uniform(kw_key, (cout, cin, kh, kw), jnp.float32, -bound, bound)
    b = jax.random.uniform(kb_key, (cout,), jnp.float32, -bound, bound)
    return w, b


if __name__ == "__main__":
    key = jax.random.PRNGKey(0)
    k_x, k1, k2, k3, k4 = jax.random.split(key, 5)
    params = {
        "conv1": init_conv_params(k1, 32, 3, 5, 5),
        "conv2": init_conv_params(k2, 64, 32, 5, 5),
        "conv3": init_conv_params(k3, 64, 64, 8, 8),
        "conv4": init_conv_params(k4, 10, 64, 1, 1),
    }
    # 32x32 spatial so conv_3's 8x8 valid conv yields 1x1 (CIFAR-sized input).
    x = jax.random.normal(k_x, (2, 3, 32, 32), jnp.float32)

    out = jax.jit(allcnnc_short_forward)(x, params)
    out = jax.block_until_ready(out)

    ref = reference_forward(x, params)

    assert out.shape == (2, 10), out.shape
    assert bool(jnp.all(jnp.isfinite(out)))
    assert bool(jnp.allclose(jnp.sum(out, axis=-1), 1.0, atol=1e-4))
    assert bool(jnp.allclose(out, ref, atol=0.05)), float(jnp.max(jnp.abs(out - ref)))
    print("KERNEL_OK")
</pallas_src>

<mosaic_0001>
module attributes {stable_mosaic.version = 11 : i64} {
  func.func @kernel(%arg0: i32, %arg1: memref<512x128xbf16, #tpu.memory_space<vmem>>, %arg2: memref<128x128xbf16, #tpu.memory_space<vmem>>, %arg3: memref<1x128xf32, #tpu.memory_space<vmem>>, %arg4: memref<25x128x128xbf16, #tpu.memory_space<vmem>>, %arg5: memref<1x128xf32, #tpu.memory_space<vmem>>, %arg6: memref<128x128xbf16, #tpu.memory_space<vmem>>, %arg7: memref<4x2x10x10x128xbf16, #tpu.memory_space<vmem>>, %arg8: memref<128x128xf32, #tpu.memory_space<vmem>>) attributes {dimension_semantics = [#tpu.dimension_semantics<parallel>], iteration_bounds = array<i64: 1>, scalar_prefetch = 0 : i64, scratch_operands = 2 : i64, tpu.core_type = #tpu.core_type<tc>, window_params = [{transform_indices = @transform_0, window_bounds = array<i64: 512, 128>}, {pipeline_mode = #tpu.pipeline_mode<synchronous>, transform_indices = @transform_1, window_bounds = array<i64: 128, 128>}, {pipeline_mode = #tpu.pipeline_mode<synchronous>, transform_indices = @transform_2, window_bounds = array<i64: 1, 128>}, {pipeline_mode = #tpu.pipeline_mode<synchronous>, transform_indices = @transform_3, window_bounds = array<i64: 25, 128, 128>}, {pipeline_mode = #tpu.pipeline_mode<synchronous>, transform_indices = @transform_4, window_bounds = array<i64: 1, 128>}, {transform_indices = @transform_5, window_bounds = array<i64: 128, 128>}]} {
    %c0 = arith.constant 0 : index
    %c0_0 = arith.constant 0 : index
    %0 = vector.load %arg1[%c0, %c0_0] : memref<512x128xbf16, #tpu.memory_space<vmem>>, vector<512x128xbf16>
    %c0_1 = arith.constant 0 : index
    %c0_2 = arith.constant 0 : index
    %1 = vector.load %arg2[%c0_1, %c0_2] : memref<128x128xbf16, #tpu.memory_space<vmem>>, vector<128x128xbf16>
    %cst = arith.constant dense<0.000000e+00> : vector<512x128xf32>
    %2 = tpu.matmul %0, %1, %cst {dimension_numbers = #tpu.dot_dimension_numbers<[1], [0], [0], [1], [0, 0, 1, 1], [], []>} : vector<512x128xbf16>, vector<128x128xbf16>, vector<512x128xf32> -> vector<512x128xf32>
    %c0_3 = arith.constant 0 : index
    %c0_4 = arith.constant 0 : index
    %3 = vector.load %arg3[%c0_3, %c0_4] : memref<1x128xf32, #tpu.memory_space<vmem>>, vector<1x128xf32>
    %4 = vector.broadcast %3 : vector<1x128xf32> to vector<512x128xf32>
    %5 = arith.addf %2, %4 : vector<512x128xf32>
    %cst_5 = arith.constant 0.000000e+00 : f32
    %6 = vector.broadcast %cst_5 : f32 to vector<512x128xf32>
    %7 = arith.maximumf %5, %6 : vector<512x128xf32>
    %8 = arith.truncf %7 : vector<512x128xf32> to vector<512x128xbf16>
    %9 = vector.shape_cast %8 : vector<512x128xbf16> to vector<2x4x8x8x128xbf16>
    %cst_6 = arith.constant 0.000000e+00 : bf16
    %10 = vector.broadcast %cst_6 : bf16 to vector<4x2x10x10x128xbf16>
    %c0_7 = arith.constant 0 : index
    %c0_8 = arith.constant 0 : index
    %c0_9 = arith.constant 0 : index
    %c0_10 = arith.constant 0 : index
    %c0_11 = arith.constant 0 : index
    %11 = vector.load %arg7[%c0_7, %c0_8, %c0_9, %c0_10, %c0_11] : memref<4x2x10x10x128xbf16, #tpu.memory_space<vmem>>, vector<4x2x10x10x128xbf16>
    tpu.vector_store %arg7[%c0_7, %c0_8, %c0_9, %c0_10, %c0_11], %10 {strides = array<i32>} : memref<4x2x10x10x128xbf16, #tpu.memory_space<vmem>>, vector<4x2x10x10x128xbf16>,
    %12 = vector.extract_strided_slice %9 {offsets = [0, 0, 0, 0, 0], sizes = [2, 1, 8, 8, 128], strides = [1, 1, 1, 1, 1]} : vector<2x4x8x8x128xbf16> to vector<2x1x8x8x128xbf16>
    %13 = vector.shape_cast %12 : vector<2x1x8x8x128xbf16> to vector<2x8x8x128xbf16>
    %c0_12 = arith.constant 0 : index
    %c0_13 = arith.constant 0 : index
    %c1 = arith.constant 1 : index
    %c1_14 = arith.constant 1 : index
    %c0_15 = arith.constant 0 : index
    %14 = vector.load %arg7[%c0_12, %c0_13, %c1, %c1_14, %c0_15] : memref<4x2x10x10x128xbf16, #tpu.memory_space<vmem>>, vector<1x2x8x8x128xbf16>
    %15 = vector.shape_cast %14 : vector<1x2x8x8x128xbf16> to vector<2x8x8x128xbf16>
    %16 = vector.shape_cast %13 : vector<2x8x8x128xbf16> to vector<1x2x8x8x128xbf16>
    tpu.vector_store %arg7[%c0_12, %c0_13, %c1, %c1_14, %c0_15], %16 {strides = array<i32>} : memref<4x2x10x10x128xbf16, #tpu.memory_space<vmem>>, vector<1x2x8x8x128xbf16>,
    %17 = vector.extract_strided_slice %9 {offsets = [0, 1, 0, 0, 0], sizes = [2, 1, 8, 8, 128], strides = [1, 1, 1, 1, 1]} : vector<2x4x8x8x128xbf16> to vector<2x1x8x8x128xbf16>
    %18 = vector.shape_cast %17 : vector<2x1x8x8x128xbf16> to vector<2x8x8x128xbf16>
    %c1_16 = arith.constant 1 : index
    %c0_17 = arith.constant 0 : index
    %c1_18 = arith.constant 1 : index
    %c1_19 = arith.constant 1 : index
    %c0_20 = arith.constant 0 : index
    %19 = vector.load %arg7[%c1_16, %c0_17, %c1_18, %c1_19, %c0_20] : memref<4x2x10x10x128xbf16, #tpu.memory_space<vmem>>, vector<1x2x8x8x128xbf16>
    %20 = vector.shape_cast %19 : vector<1x2x8x8x128xbf16> to vector<2x8x8x128xbf16>
    %21 = vector.shape_cast %18 : vector<2x8x8x128xbf16> to vector<1x2x8x8x128xbf16>
    tpu.vector_store %arg7[%c1_16, %c0_17, %c1_18, %c1_19, %c0_20], %21 {strides = array<i32>} : memref<4x2x10x10x128xbf16, #tpu.memory_space<vmem>>, vector<1x2x8x8x128xbf16>,
    %22 = vector.extract_strided_slice %9 {offsets = [0, 2, 0, 0, 0], sizes = [2, 1, 8, 8, 128], strides = [1, 1, 1, 1, 1]} : vector<2x4x8x8x128xbf16> to vector<2x1x8x8x128xbf16>
    %23 = vector.shape_cast %22 : vector<2x1x8x8x128xbf16> to vector<2x8x8x128xbf16>
    %c2 = arith.constant 2 : index
    %c0_21 = arith.constant 0 : index
    %c1_22 = arith.constant 1 : index
    %c1_23 = arith.constant 1 : index
    %c0_24 = arith.constant 0 : index
    %24 = vector.load %arg7[%c2, %c0_21, %c1_22, %c1_23, %c0_24] : memref<4x2x10x10x128xbf16, #tpu.memory_space<vmem>>, vector<1x2x8x8x128xbf16>
    %25 = vector.shape_cast %24 : vector<1x2x8x8x128xbf16> to vector<2x8x8x128xbf16>
    %26 = vector.shape_cast %23 : vector<2x8x8x128xbf16> to vector<1x2x8x8x128xbf16>
    tpu.vector_store %arg7[%c2, %c0_21, %c1_22, %c1_23, %c0_24], %26 {strides = array<i32>} : memref<4x2x10x10x128xbf16, #tpu.memory_space<vmem>>, vector<1x2x8x8x128xbf16>,
    %27 = vector.extract_strided_slice %9 {offsets = [0, 3, 0, 0, 0], sizes = [2, 1, 8, 8, 128], strides = [1, 1, 1, 1, 1]} : vector<2x4x8x8x128xbf16> to vector<2x1x8x8x128xbf16>
    %28 = vector.shape_cast %27 : vector<2x1x8x8x128xbf16> to vector<2x8x8x128xbf16>
    %c3 = arith.constant 3 : index
    %c0_25 = arith.constant 0 : index
    %c1_26 = arith.constant 1 : index
    %c1_27 = arith.constant 1 : index
    %c0_28 = arith.constant 0 : index
    %29 = vector.load %arg7[%c3, %c0_25, %c1_26, %c1_27, %c0_28] : memref<4x2x10x10x128xbf16, #tpu.memory_space<vmem>>, vector<1x2x8x8x128xbf16>
    %30 = vector.shape_cast %29 : vector<1x2x8x8x128xbf16> to vector<2x8x8x128xbf16>
    %31 = vector.shape_cast %28 : vector<2x8x8x128xbf16> to vector<1x2x8x8x128xbf16>
    tpu.vector_store %arg7[%c3, %c0_25, %c1_26, %c1_27, %c0_28], %31 {strides = array<i32>} : memref<4x2x10x10x128xbf16, #tpu.memory_space<vmem>>, vector<1x2x8x8x128xbf16>,
    %c0_29 = arith.constant 0 : index
    %c0_30 = arith.constant 0 : index
    %32 = vector.load %arg5[%c0_29, %c0_30] : memref<1x128xf32, #tpu.memory_space<vmem>>, vector<1x128xf32>
    %33 = vector.shape_cast %32 : vector<1x128xf32> to vector<1x128xf32>
    %34 = vector.broadcast %33 : vector<1x128xf32> to vector<128x128xf32>
    %c0_31 = arith.constant 0 : index
    %c0_32 = arith.constant 0 : index
    %35 = vector.load %arg8[%c0_31, %c0_32] : memref<128x128xf32, #tpu.memory_space<vmem>>, vector<128x128xf32>
    tpu.vector_store %arg8[%c0_31, %c0_32], %34 {strides = array<i32>} : memref<128x128xf32, #tpu.memory_space<vmem>>, vector<128x128xf32>,
    %c0_33 = arith.constant 0 : index
    %c0_34 = arith.constant 0 : index
    %c0_35 = arith.constant 0 : index
    %c0_36 = arith.constant 0 : index
    %c0_37 = arith.constant 0 : index
    %36 = vector.load %arg7[%c0_33, %c0_34, %c0_35, %c0_36, %c0_37] : memref<4x2x10x10x128xbf16, #tpu.memory_space<vmem>>, vector<1x2x8x8x128xbf16>
    %37 = vector.shape_cast %36 : vector<1x2x8x8x128xbf16> to vector<2x8x8x128xbf16>
    %c0_38 = arith.constant 0 : index
    %c0_39 = arith.constant 0 : index
    %38 = vector.load %arg8[%c0_38, %c0_39] : memref<128x128xf32, #tpu.memory_space<vmem>>, vector<128x128xf32>
    %39 = vector.shape_cast %37 : vector<2x8x8x128xbf16> to vector<128x128xbf16>
    %c0_40 = arith.constant 0 : index
    %c0_41 = arith.constant 0 : index
    %c0_42 = arith.constant 0 : index
    %40 = vector.load %arg4[%c0_40, %c0_41, %c0_42] : memref<25x128x128xbf16, #tpu.memory_space<vmem>>, vector<1x128x128xbf16>
    %41 = vector.shape_cast %40 : vector<1x128x128xbf16> to vector<128x128xbf16>
    %cst_43 = arith.constant dense<0.000000e+00> : vector<128x128xf32>
    %42 = tpu.matmul %39, %41, %cst_43 {dimension_numbers = #tpu.dot_dimension_numbers<[1], [0], [0], [1], [0, 0, 1, 1], [], []>} : vector<128x128xbf16>, vector<128x128xbf16>, vector<128x128xf32> -> vector<128x128xf32>
    %43 = arith.addf %38, %42 : vector<128x128xf32>
    %c0_44 = arith.constant 0 : index
    %c0_45 = arith.constant 0 : index
    %44 = vector.load %arg8[%c0_44, %c0_45] : memref<128x128xf32, #tpu.memory_space<vmem>>, vector<128x128xf32>
    tpu.vector_store %arg8[%c0_44, %c0_45], %43 {strides = array<i32>} : memref<128x128xf32, #tpu.memory_space<vmem>>, vector<128x128xf32>,
    %c1_46 = arith.constant 1 : index
    %c0_47 = arith.constant 0 : index
    %c0_48 = arith.constant 0 : index
    %c0_49 = arith.constant 0 : index
    %c0_50 = arith.constant 0 : index
    %45 = vector.load %arg7[%c1_46, %c0_47, %c0_48, %c0_49, %c0_50] : memref<4x2x10x10x128xbf16, #tpu.memory_space<vmem>>, vector<1x2x8x8x128xbf16>
    %46 = vector.shape_cast %45 : vector<1x2x8x8x128xbf16> to vector<2x8x8x128xbf16>
    %c0_51 = arith.constant 0 : index
    %c0_52 = arith.constant 0 : index
    %47 = vector.load %arg8[%c0_51, %c0_52] : memref<128x128xf32, #tpu.memory_space<vmem>>, vector<128x128xf32>
    %48 = vector.shape_cast %46 : vector<2x8x8x128xbf16> to vector<128x128xbf16>
    %c1_53 = arith.constant 1 : index
    %c0_54 = arith.constant 0 : index
    %c0_55 = arith.constant 0 : index
    %49 = vector.load %arg4[%c1_53, %c0_54, %c0_55] : memref<25x128x128xbf16, #tpu.memory_space<vmem>>, vector<1x128x128xbf16>
    %50 = vector.shape_cast %49 : vector<1x128x128xbf16> to vector<128x128xbf16>
    %cst_56 = arith.constant dense<0.000000e+00> : vector<128x128xf32>
    %51 = tpu.matmul %48, %50, %cst_56 {dimension_numbers = #tpu.dot_dimension_numbers<[1], [0], [0], [1], [0, 0, 1, 1], [], []>} : vector<128x128xbf16>, vector<128x128xbf16>, vector<128x128xf32> -> vector<128x128xf32>
    %52 = arith.addf %47, %51 : vector<128x128xf32>
    %c0_57 = arith.constant 0 : index
    %c0_58 = arith.constant 0 : index
    %53 = vector.load %arg8[%c0_57, %c0_58] : memref<128x128xf32, #tpu.memory_space<vmem>>, vector<128x128xf32>
    tpu.vector_store %arg8[%c0_57, %c0_58], %52 {strides = array<i32>} : memref<128x128xf32, #tpu.memory_space<vmem>>, vector<128x128xf32>,
    %c0_59 = arith.constant 0 : index
    %c0_60 = arith.constant 0 : index
    %c0_61 = arith.constant 0 : index
    %c1_62 = arith.constant 1 : index
    %c0_63 = arith.constant 0 : index
    %54 = vector.load %arg7[%c0_59, %c0_60, %c0_61, %c1_62, %c0_63] : memref<4x2x10x10x128xbf16, #tpu.memory_space<vmem>>, vector<1x2x8x8x128xbf16>
    %55 = vector.shape_cast %54 : vector<1x2x8x8x128xbf16> to vector<2x8x8x128xbf16>
    %c0_64 = arith.constant 0 : index
    %c0_65 = arith.constant 0 : index
    %56 = vector.load %arg8[%c0_64, %c0_65] : memref<128x128xf32, #tpu.memory_space<vmem>>, vector<128x128xf32>
    %57 = vector.shape_cast %55 : vector<2x8x8x128xbf16> to vector<128x128xbf16>
    %c2_66 = arith.constant 2 : index
    %c0_67 = arith.constant 0 : index
    %c0_68 = arith.constant 0 : index
    %58 = vector.load %arg4[%c2_66, %c0_67, %c0_68] : memref<25x128x128xbf16, #tpu.memory_space<vmem>>, vector<1x128x128xbf16>
    %59 = vector.shape_cast %58 : vector<1x128x128xbf16> to vector<128x128xbf16>
    %cst_69 = arith.constant dense<0.000000e+00> : vector<128x128xf32>
    %60 = tpu.matmul %57, %59, %cst_69 {dimension_numbers = #tpu.dot_dimension_numbers<[1], [0], [0], [1], [0, 0, 1, 1], [], []>} : vector<128x128xbf16>, vector<128x128xbf16>, vector<128x128xf32> -> vector<128x128xf32>
    %61 = arith.addf %56, %60 : vector<128x128xf32>
    %c0_70 = arith.constant 0 : index
    %c0_71 = arith.constant 0 : index
    %62 = vector.load %arg8[%c0_70, %c0_71] : memref<128x128xf32, #tpu.memory_space<vmem>>, vector<128x128xf32>
    tpu.vector_store %arg8[%c0_70, %c0_71], %61 {strides = array<i32>} : memref<128x128xf32, #tpu.memory_space<vmem>>, vector<128x128xf32>,
    %c1_72 = arith.constant 1 : index
    %c0_73 = arith.constant 0 : index
    %c0_74 = arith.constant 0 : index
    %c1_75 = arith.constant 1 : index
    %c0_76 = arith.constant 0 : index
    %63 = vector.load %arg7[%c1_72, %c0_73, %c0_74, %c1_75, %c0_76] : memref<4x2x10x10x128xbf16, #tpu.memory_space<vmem>>, vector<1x2x8x8x128xbf16>
    %64 = vector.shape_cast %63 : vector<1x2x8x8x128xbf16> to vector<2x8x8x128xbf16>
    %c0_77 = arith.constant 0 : index
    %c0_78 = arith.constant 0 : index
    %65 = vector.load %arg8[%c0_77, %c0_78] : memref<128x128xf32, #tpu.memory_space<vmem>>, vector<128x128xf32>
    %66 = vector.shape_cast %64 : vector<2x8x8x128xbf16> to vector<128x128xbf16>
    %c3_79 = arith.constant 3 : index
    %c0_80 = arith.constant 0 : index
    %c0_81 = arith.constant 0 : index
    %67 = vector.load %arg4[%c3_79, %c0_80, %c0_81] : memref<25x128x128xbf16, #tpu.memory_space<vmem>>, vector<1x128x128xbf16>
    %68 = vector.shape_cast %67 : vector<1x128x128xbf16> to vector<128x128xbf16>
    %cst_82 = arith.constant dense<0.000000e+00> : vector<128x128xf32>
    %69 = tpu.matmul %66, %68, %cst_82 {dimension_numbers = #tpu.dot_dimension_numbers<[1], [0], [0], [1], [0, 0, 1, 1], [], []>} : vector<128x128xbf16>, vector<128x128xbf16>, vector<128x128xf32> -> vector<128x128xf32>
    %70 = arith.addf %65, %69 : vector<128x128xf32>
    %c0_83 = arith.constant 0 : index
    %c0_84 = arith.constant 0 : index
    %71 = vector.load %arg8[%c0_83, %c0_84] : memref<128x128xf32, #tpu.memory_space<vmem>>, vector<128x128xf32>
    tpu.vector_store %arg8[%c0_83, %c0_84], %70 {strides = array<i32>} : memref<128x128xf32, #tpu.memory_space<vmem>>, vector<128x128xf32>,
    %c0_85 = arith.constant 0 : index
    %c0_86 = arith.constant 0 : index
    %c0_87 = arith.constant 0 : index
    %c2_88 = arith.constant 2 : index
    %c0_89 = arith.constant 0 : index
    %72 = vector.load %arg7[%c0_85, %c0_86, %c0_87, %c2_88, %c0_89] : memref<4x2x10x10x128xbf16, #tpu.memory_space<vmem>>, vector<1x2x8x8x128xbf16>
    %73 = vector.shape_cast %72 : vector<1x2x8x8x128xbf16> to vector<2x8x8x128xbf16>
    %c0_90 = arith.constant 0 : index
    %c0_91 = arith.constant 0 : index
    %74 = vector.load %arg8[%c0_90, %c0_91] : memref<128x128xf32, #tpu.memory_space<vmem>>, vector<128x128xf32>
    %75 = vector.shape_cast %73 : vector<2x8x8x128xbf16> to vector<128x128xbf16>
    %c4 = arith.constant 4 : index
    %c0_92 = arith.constant 0 : index
    %c0_93 = arith.constant 0 : index
    %76 = vector.load %arg4[%c4, %c0_92, %c0_93] : memref<25x128x128xbf16, #tpu.memory_space<vmem>>, vector<1x128x128xbf16>
    %77 = vector.shape_cast %76 : vector<1x128x128xbf16> to vector<128x128xbf16>
    %cst_94 = arith.constant dense<0.000000e+00> : vector<128x128xf32>
    %78 = tpu.matmul %75, %77, %cst_94 {dimension_numbers = #tpu.dot_dimension_numbers<[1], [0], [0], [1], [0, 0, 1, 1], [], []>} : vector<128x128xbf16>, vector<128x128xbf16>, vector<128x128xf32> -> vector<128x128xf32>
    %79 = arith.addf %74, %78 : vector<128x128xf32>
    %c0_95 = arith.constant 0 : index
    %c0_96 = arith.constant 0 : index
    %80 = vector.load %arg8[%c0_95, %c0_96] : memref<128x128xf32, #tpu.memory_space<vmem>>, vector<128x128xf32>
    tpu.vector_store %arg8[%c0_95, %c0_96], %79 {strides = array<i32>} : memref<128x128xf32, #tpu.memory_space<vmem>>, vector<128x128xf32>,
    %c2_97 = arith.constant 2 : index
    %c0_98 = arith.constant 0 : index
    %c0_99 = arith.constant 0 : index
    %c0_100 = arith.constant 0 : index
    %c0_101 = arith.constant 0 : index
    %81 = vector.load %arg7[%c2_97, %c0_98, %c0_99, %c0_100, %c0_101] : memref<4x2x10x10x128xbf16, #tpu.memory_space<vmem>>, vector<1x2x8x8x128xbf16>
    %82 = vector.shape_cast %81 : vector<1x2x8x8x128xbf16> to vector<2x8x8x128xbf16>
    %c0_102 = arith.constant 0 : index
    %c0_103 = arith.constant 0 : index
    %83 = vector.load %arg8[%c0_102, %c0_103] : memref<128x128xf32, #tpu.memory_space<vmem>>, vector<128x128xf32>
    %84 = vector.shape_cast %82 : vector<2x8x8x128xbf16> to vector<128x128xbf16>
    %c5 = arith.constant 5 : index
    %c0_104 = arith.constant 0 : index
    %c0_105 = arith.constant 0 : index
    %85 = vector.load %arg4[%c5, %c0_104, %c0_105] : memref<25x128x128xbf16, #tpu.memory_space<vmem>>, vector<1x128x128xbf16>
    %86 = vector.shape_cast %85 : vector<1x128x128xbf16> to vector<128x128xbf16>
    %cst_106 = arith.constant dense<0.000000e+00> : vector<128x128xf32>
    %87 = tpu.matmul %84, %86, %cst_106 {dimension_numbers = #tpu.dot_dimension_numbers<[1], [0], [0], [1], [0, 0, 1, 1], [], []>} : vector<128x128xbf16>, vector<128x128xbf16>, vector<128x128xf32> -> vector<128x128xf32>
    %88 = arith.addf %83, %87 : vector<128x128xf32>
    %c0_107 = arith.constant 0 : index
    %c0_108 = arith.constant 0 : index
    %89 = vector.load %arg8[%c0_107, %c0_108] : memref<128x128xf32, #tpu.memory_space<vmem>>, vector<128x128xf32>
    tpu.vector_store %arg8[%c0_107, %c0_108], %88 {strides = array<i32>} : memref<128x128xf32, #tpu.memory_space<vmem>>, vector<128x128xf32>,
    %c3_109 = arith.constant 3 : index
    %c0_110 = arith.constant 0 : index
    %c0_111 = arith.constant 0 : index
    %c0_112 = arith.constant 0 : index
    %c0_113 = arith.constant 0 : index
    %90 = vector.load %arg7[%c3_109, %c0_110, %c0_111, %c0_112, %c0_113] : memref<4x2x10x10x128xbf16, #tpu.memory_space<vmem>>, vector<1x2x8x8x128xbf16>
    %91 = vector.shape_cast %90 : vector<1x2x8x8x128xbf16> to vector<2x8x8x128xbf16>
    %c0_114 = arith.constant 0 : index
    %c0_115 = arith.constant 0 : index
    %92 = vector.load %arg8[%c0_114, %c0_115] : memref<128x128xf32, #tpu.memory_space<vmem>>, vector<128x128xf32>
    %93 = vector.shape_cast %91 : vector<2x8x8x128xbf16> to vector<128x128xbf16>
    %c6 = arith.constant 6 : index
    %c0_116 = arith.constant 0 : index
    %c0_117 = arith.constant 0 : index
    %94 = vector.load %arg4[%c6, %c0_116, %c0_117] : memref<25x128x128xbf16, #tpu.memory_space<vmem>>, vector<1x128x128xbf16>
    %95 = vector.shape_cast %94 : vector<1x128x128xbf16> to vector<128x128xbf16>
    %cst_118 = arith.constant dense<0.000000e+00> : vector<128x128xf32>
    %96 = tpu.matmul %93, %95, %cst_118 {dimension_numbers = #tpu.dot_dimension_numbers<[1], [0], [0], [1], [0, 0, 1, 1], [], []>} : vector<128x128xbf16>, vector<128x128xbf16>, vector<128x128xf32> -> vector<128x128xf32>
    %97 = arith.addf %92, %96 : vector<128x128xf32>
    %c0_119 = arith.constant 0 : index
    %c0_120 = arith.constant 0 : index
    %98 = vector.load %arg8[%c0_119, %c0_120] : memref<128x128xf32, #tpu.memory_space<vmem>>, vector<128x128xf32>
    tpu.vector_store %arg8[%c0_119, %c0_120], %97 {strides = array<i32>} : memref<128x128xf32, #tpu.memory_space<vmem>>, vector<128x128xf32>,
    %c2_121 = arith.constant 2 : index
    %c0_122 = arith.constant 0 : index
    %c0_123 = arith.constant 0 : index
    %c1_124 = arith.constant 1 : index
    %c0_125 = arith.constant 0 : index
    %99 = vector.load %arg7[%c2_121, %c0_122, %c0_123, %c1_124, %c0_125] : memref<4x2x10x10x128xbf16, #tpu.memory_space<vmem>>, vector<1x2x8x8x128xbf16>
    %100 = vector.shape_cast %99 : vector<1x2x8x8x128xbf16> to vector<2x8x8x128xbf16>
    %c0_126 = arith.constant 0 : index
    %c0_127 = arith.constant 0 : index
    %101 = vector.load %arg8[%c0_126, %c0_127] : memref<128x128xf32, #tpu.memory_space<vmem>>, vector<128x128xf32>
    %102 = vector.shape_cast %100 : vector<2x8x8x128xbf16> to vector<128x128xbf16>
    %c7 = arith.constant 7 : index
    %c0_128 = arith.constant 0 : index
    %c0_129 = arith.constant 0 : index
    %103 = vector.load %arg4[%c7, %c0_128, %c0_129] : memref<25x128x128xbf16, #tpu.memory_space<vmem>>, vector<1x128x128xbf16>
    %104 = vector.shape_cast %103 : vector<1x128x128xbf16> to vector<128x128xbf16>
    %cst_130 = arith.constant dense<0.000000e+00> : vector<128x128xf32>
    %105 = tpu.matmul %102, %104, %cst_130 {dimension_numbers = #tpu.dot_dimension_numbers<[1], [0], [0], [1], [0, 0, 1, 1], [], []>} : vector<128x128xbf16>, vector<128x128xbf16>, vector<128x128xf32> -> vector<128x128xf32>
    %106 = arith.addf %101, %105 : vector<128x128xf32>
    %c0_131 = arith.constant 0 : index
    %c0_132 = arith.constant 0 : index
    %107 = vector.load %arg8[%c0_131, %c0_132] : memref<128x128xf32, #tpu.memory_space<vmem>>, vector<128x128xf32>
    tpu.vector_store %arg8[%c0_131, %c0_132], %106 {strides = array<i32>} : memref<128x128xf32, #tpu.memory_space<vmem>>, vector<128x128xf32>,
    %c3_133 = arith.constant 3 : index
    %c0_134 = arith.constant 0 : index
    %c0_135 = arith.constant 0 : index
    %c1_136 = arith.constant 1 : index
    %c0_137 = arith.constant 0 : index
    %108 = vector.load %arg7[%c3_133, %c0_134, %c0_135, %c1_136, %c0_137] : memref<4x2x10x10x128xbf16, #tpu.memory_space<vmem>>, vector<1x2x8x8x128xbf16>
    %109 = vector.shape_cast %108 : vector<1x2x8x8x128xbf16> to vector<2x8x8x128xbf16>
    %c0_138 = arith.constant 0 : index
    %c0_139 = arith.constant 0 : index
    %110 = vector.load %arg8[%c0_138, %c0_139] : memref<128x128xf32, #tpu.memory_space<vmem>>, vector<128x128xf32>
    %111 = vector.shape_cast %109 : vector<2x8x8x128xbf16> to vector<128x128xbf16>
    %c8 = arith.constant 8 : index
    %c0_140 = arith.constant 0 : index
    %c0_141 = arith.constant 0 : index
    %112 = vector.load %arg4[%c8, %c0_140, %c0_141] : memref<25x128x128xbf16, #tpu.memory_space<vmem>>, vector<1x128x128xbf16>
    %113 = vector.shape_cast %112 : vector<1x128x128xbf16> to vector<128x128xbf16>
    %cst_142 = arith.constant dense<0.000000e+00> : vector<128x128xf32>
    %114 = tpu.matmul %111, %113, %cst_142 {dimension_numbers = #tpu.dot_dimension_numbers<[1], [0], [0], [1], [0, 0, 1, 1], [], []>} : vector<128x128xbf16>, vector<128x128xbf16>, vector<128x128xf32> -> vector<128x128xf32>
    %115 = arith.addf %110, %114 : vector<128x128xf32>
    %c0_143 = arith.constant 0 : index
    %c0_144 = arith.constant 0 : index
    %116 = vector.load %arg8[%c0_143, %c0_144] : memref<128x128xf32, #tpu.memory_space<vmem>>, vector<128x128xf32>
    tpu.vector_store %arg8[%c0_143, %c0_144], %115 {strides = array<i32>} : memref<128x128xf32, #tpu.memory_space<vmem>>, vector<128x128xf32>,
    %c2_145 = arith.constant 2 : index
    %c0_146 = arith.constant 0 : index
    %c0_147 = arith.constant 0 : index
    %c2_148 = arith.constant 2 : index
    %c0_149 = arith.constant 0 : index
    %117 = vector.load %arg7[%c2_145, %c0_146, %c0_147, %c2_148, %c0_149] : memref<4x2x10x10x128xbf16, #tpu.memory_space<vmem>>, vector<1x2x8x8x128xbf16>
    %118 = vector.shape_cast %117 : vector<1x2x8x8x128xbf16> to vector<2x8x8x128xbf16>
    %c0_150 = arith.constant 0 : index
    %c0_151 = arith.constant 0 : index
    %119 = vector.load %arg8[%c0_150, %c0_151] : memref<128x128xf32, #tpu.memory_space<vmem>>, vector<128x128xf32>
    %120 = vector.shape_cast %118 : vector<2x8x8x128xbf16> to vector<128x128xbf16>
    %c9 = arith.constant 9 : index
    %c0_152 = arith.constant 0 : index
    %c0_153 = arith.constant 0 : index
    %121 = vector.load %arg4[%c9, %c0_152, %c0_153] : memref<25x128x128xbf16, #tpu.memory_space<vmem>>, vector<1x128x128xbf16>
    %122 = vector.shape_cast %121 : vector<1x128x128xbf16> to vector<128x128xbf16>
    %cst_154 = arith.constant dense<0.000000e+00> : vector<128x128xf32>
    %123 = tpu.matmul %120, %122, %cst_154 {dimension_numbers = #tpu.dot_dimension_numbers<[1], [0], [0], [1], [0, 0, 1, 1], [], []>} : vector<128x128xbf16>, vector<128x128xbf16>, vector<128x128xf32> -> vector<128x128xf32>
    %124 = arith.addf %119, %123 : vector<128x128xf32>
    %c0_155 = arith.constant 0 : index
    %c0_156 = arith.constant 0 : index
    %125 = vector.load %arg8[%c0_155, %c0_156] : memref<128x128xf32, #tpu.memory_space<vmem>>, vector<128x128xf32>
    tpu.vector_store %arg8[%c0_155, %c0_156], %124 {strides = array<i32>} : memref<128x128xf32, #tpu.memory_space<vmem>>, vector<128x128xf32>,
    %c0_157 = arith.constant 0 : index
    %c0_158 = arith.constant 0 : index
    %c1_159 = arith.constant 1 : index
    %c0_160 = arith.constant 0 : index
    %c0_161 = arith.constant 0 : index
    %126 = vector.load %arg7[%c0_157, %c0_158, %c1_159, %c0_160, %c0_161] : memref<4x2x10x10x128xbf16, #tpu.memory_space<vmem>>, vector<1x2x8x8x128xbf16>
    %127 = vector.shape_cast %126 : vector<1x2x8x8x128xbf16> to vector<2x8x8x128xbf16>
    %c0_162 = arith.constant 0 : index
    %c0_163 = arith.constant 0 : index
    %128 = vector.load %arg8[%c0_162, %c0_163] : memref<128x128xf32, #tpu.memory_space<vmem>>, vector<128x128xf32>
    %129 = vector.shape_cast %127 : vector<2x8x8x128xbf16> to vector<128x128xbf16>
    %c10 = arith.constant 10 : index
    %c0_164 = arith.constant 0 : index
    %c0_165 = arith.constant 0 : index
    %130 = vector.load %arg4[%c10, %c0_164, %c0_165] : memref<25x128x128xbf16, #tpu.memory_space<vmem>>, vector<1x128x128xbf16>
    %131 = vector.shape_cast %130 : vector<1x128x128xbf16> to vector<128x128xbf16>
    %cst_166 = arith.constant dense<0.000000e+00> : vector<128x128xf32>
    %132 = tpu.matmul %129, %131, %cst_166 {dimension_numbers = #tpu.dot_dimension_numbers<[1], [0], [0], [1], [0, 0, 1, 1], [], []>} : vector<128x128xbf16>, vector<128x128xbf16>, vector<128x128xf32> -> vector<128x128xf32>
    %133 = arith.addf %128, %132 : vector<128x128xf32>
    %c0_167 = arith.constant 0 : index
    %c0_168 = arith.constant 0 : index
    %134 = vector.load %arg8[%c0_167, %c0_168] : memref<128x128xf32, #tpu.memory_space<vmem>>, vector<128x128xf32>
    tpu.vector_store %arg8[%c0_167, %c0_168], %133 {strides = array<i32>} : memref<128x128xf32, #tpu.memory_space<vmem>>, vector<128x128xf32>,
    %c1_169 = arith.constant 1 : index
    %c0_170 = arith.constant 0 : index
    %c1_171 = arith.constant 1 : index
    %c0_172 = arith.constant 0 : index
    %c0_173 = arith.constant 0 : index
    %135 = vector.load %arg7[%c1_169, %c0_170, %c1_171, %c0_172, %c0_173] : memref<4x2x10x10x128xbf16, #tpu.memory_space<vmem>>, vector<1x2x8x8x128xbf16>
    %136 = vector.shape_cast %135 : vector<1x2x8x8x128xbf16> to vector<2x8x8x128xbf16>
    %c0_174 = arith.constant 0 : index
    %c0_175 = arith.constant 0 : index
    %137 = vector.load %arg8[%c0_174, %c0_175] : memref<128x128xf32, #tpu.memory_space<vmem>>, vector<128x128xf32>
    %138 = vector.shape_cast %136 : vector<2x8x8x128xbf16> to vector<128x128xbf16>
    %c11 = arith.constant 11 : index
    %c0_176 = arith.constant 0 : index
    %c0_177 = arith.constant 0 : index
    %139 = vector.load %arg4[%c11, %c0_176, %c0_177] : memref<25x128x128xbf16, #tpu.memory_space<vmem>>, vector<1x128x128xbf16>
    %140 = vector.shape_cast %139 : vector<1x128x128xbf16> to vector<128x128xbf16>
    %cst_178 = arith.constant dense<0.000000e+00> : vector<128x128xf32>
    %141 = tpu.matmul %138, %140, %cst_178 {dimension_numbers = #tpu.dot_dimension_numbers<[1], [0], [0], [1], [0, 0, 1, 1], [], []>} : vector<128x128xbf16>, vector<128x128xbf16>, vector<128x128xf32> -> vector<128x128xf32>
    %142 = arith.addf %137, %141 : vector<128x128xf32>
    %c0_179 = arith.constant 0 : index
    %c0_180 = arith.constant 0 : index
    %143 = vector.load %arg8[%c0_179, %c0_180] : memref<128x128xf32, #tpu.memory_space<vmem>>, vector<128x128xf32>
    tpu.vector_store %arg8[%c0_179, %c0_180], %142 {strides = array<i32>} : memref<128x128xf32, #tpu.memory_space<vmem>>, vector<128x128xf32>,
    %c0_181 = arith.constant 0 : index
    %c0_182 = arith.constant 0 : index
    %c1_183 = arith.constant 1 : index
    %c1_184 = arith.constant 1 : index
    %c0_185 = arith.constant 0 : index
    %144 = vector.load %arg7[%c0_181, %c0_182, %c1_183, %c1_184, %c0_185] : memref<4x2x10x10x128xbf16, #tpu.memory_space<vmem>>, vector<1x2x8x8x128xbf16>
    %145 = vector.shape_cast %144 : vector<1x2x8x8x128xbf16> to vector<2x8x8x128xbf16>
    %c0_186 = arith.constant 0 : index
    %c0_187 = arith.constant 0 : index
    %146 = vector.load %arg8[%c0_186, %c0_187] : memref<128x128xf32, #tpu.memory_space<vmem>>, vector<128x128xf32>
    %147 = vector.shape_cast %145 : vector<2x8x8x128xbf16> to vector<128x128xbf16>
    %c12 = arith.constant 12 : index
    %c0_188 = arith.constant 0 : index
    %c0_189 = arith.constant 0 : index
    %148 = vector.load %arg4[%c12, %c0_188, %c0_189] : memref<25x128x128xbf16, #tpu.memory_space<vmem>>, vector<1x128x128xbf16>
    %149 = vector.shape_cast %148 : vector<1x128x128xbf16> to vector<128x128xbf16>
    %cst_190 = arith.constant dense<0.000000e+00> : vector<128x128xf32>
    %150 = tpu.matmul %147, %149, %cst_190 {dimension_numbers = #tpu.dot_dimension_numbers<[1], [0], [0], [1], [0, 0, 1, 1], [], []>} : vector<128x128xbf16>, vector<128x128xbf16>, vector<128x128xf32> -> vector<128x128xf32>
    %151 = arith.addf %146, %150 : vector<128x128xf32>
    %c0_191 = arith.constant 0 : index
    %c0_192 = arith.constant 0 : index
    %152 = vector.load %arg8[%c0_191, %c0_192] : memref<128x128xf32, #tpu.memory_space<vmem>>, vector<128x128xf32>
    tpu.vector_store %arg8[%c0_191, %c0_192], %151 {strides = array<i32>} : memref<128x128xf32, #tpu.memory_space<vmem>>, vector<128x128xf32>,
    %c1_193 = arith.constant 1 : index
    %c0_194 = arith.constant 0 : index
    %c1_195 = arith.constant 1 : index
    %c1_196 = arith.constant 1 : index
    %c0_197 = arith.constant 0 : index
    %153 = vector.load %arg7[%c1_193, %c0_194, %c1_195, %c1_196, %c0_197] : memref<4x2x10x10x128xbf16, #tpu.memory_space<vmem>>, vector<1x2x8x8x128xbf16>
    %154 = vector.shape_cast %153 : vector<1x2x8x8x128xbf16> to vector<2x8x8x128xbf16>
    %c0_198 = arith.constant 0 : index
    %c0_199 = arith.constant 0 : index
    %155 = vector.load %arg8[%c0_198, %c0_199] : memref<128x128xf32, #tpu.memory_space<vmem>>, vector<128x128xf32>
    %156 = vector.shape_cast %154 : vector<2x8x8x128xbf16> to vector<128x128xbf16>
    %c13 = arith.constant 13 : index
    %c0_200 = arith.constant 0 : index
    %c0_201 = arith.constant 0 : index
    %157 = vector.load %arg4[%c13, %c0_200, %c0_201] : memref<25x128x128xbf16, #tpu.memory_space<vmem>>, vector<1x128x128xbf16>
    %158 = vector.shape_cast %157 : vector<1x128x128xbf16> to vector<128x128xbf16>
    %cst_202 = arith.constant dense<0.000000e+00> : vector<128x128xf32>
    %159 = tpu.matmul %156, %158, %cst_202 {dimension_numbers = #tpu.dot_dimension_numbers<[1], [0], [0], [1], [0, 0, 1, 1], [], []>} : vector<128x128xbf16>, vector<128x128xbf16>, vector<128x128xf32> -> vector<128x128xf32>
    %160 = arith.addf %155, %159 : vector<128x128xf32>
    %c0_203 = arith.constant 0 : index
    %c0_204 = arith.constant 0 : index
    %161 = vector.load %arg8[%c0_203, %c0_204] : memref<128x128xf32, #tpu.memory_space<vmem>>, vector<128x128xf32>
    tpu.vector_store %arg8[%c0_203, %c0_204], %160 {strides = array<i32>} : memref<128x128xf32, #tpu.memory_space<vmem>>, vector<128x128xf32>,
    %c0_205 = arith.constant 0 : index
    %c0_206 = arith.constant 0 : index
    %c1_207 = arith.constant 1 : index
    %c2_208 = arith.constant 2 : index
    %c0_209 = arith.constant 0 : index
    %162 = vector.load %arg7[%c0_205, %c0_206, %c1_207, %c2_208, %c0_209] : memref<4x2x10x10x128xbf16, #tpu.memory_space<vmem>>, vector<1x2x8x8x128xbf16>
    %163 = vector.shape_cast %162 : vector<1x2x8x8x128xbf16> to vector<2x8x8x128xbf16>
    %c0_210 = arith.constant 0 : index
    %c0_211 = arith.constant 0 : index
    %164 = vector.load %arg8[%c0_210, %c0_211] : memref<128x128xf32, #tpu.memory_space<vmem>>, vector<128x128xf32>
    %165 = vector.shape_cast %163 : vector<2x8x8x128xbf16> to vector<128x128xbf16>
    %c14 = arith.constant 14 : index
    %c0_212 = arith.constant 0 : index
    %c0_213 = arith.constant 0 : index
    %166 = vector.load %arg4[%c14, %c0_212, %c0_213] : memref<25x128x128xbf16, #tpu.memory_space<vmem>>, vector<1x128x128xbf16>
    %167 = vector.shape_cast %166 : vector<1x128x128xbf16> to vector<128x128xbf16>
    %cst_214 = arith.constant dense<0.000000e+00> : vector<128x128xf32>
    %168 = tpu.matmul %165, %167, %cst_214 {dimension_numbers = #tpu.dot_dimension_numbers<[1], [0], [0], [1], [0, 0, 1, 1], [], []>} : vector<128x128xbf16>, vector<128x128xbf16>, vector<128x128xf32> -> vector<128x128xf32>
    %169 = arith.addf %164, %168 : vector<128x128xf32>
    %c0_215 = arith.constant 0 : index
    %c0_216 = arith.constant 0 : index
    %170 = vector.load %arg8[%c0_215, %c0_216] : memref<128x128xf32, #tpu.memory_space<vmem>>, vector<128x128xf32>
    tpu.vector_store %arg8[%c0_215, %c0_216], %169 {strides = array<i32>} : memref<128x128xf32, #tpu.memory_space<vmem>>, vector<128x128xf32>,
    %c2_217 = arith.constant 2 : index
    %c0_218 = arith.constant 0 : index
    %c1_219 = arith.constant 1 : index
    %c0_220 = arith.constant 0 : index
    %c0_221 = arith.constant 0 : index
    %171 = vector.load %arg7[%c2_217, %c0_218, %c1_219, %c0_220, %c0_221] : memref<4x2x10x10x128xbf16, #tpu.memory_space<vmem>>, vector<1x2x8x8x128xbf16>
    %172 = vector.shape_cast %171 : vector<1x2x8x8x128xbf16> to vector<2x8x8x128xbf16>
    %c0_222 = arith.constant 0 : index
    %c0_223 = arith.constant 0 : index
    %173 = vector.load %arg8[%c0_222, %c0_223] : memref<128x128xf32, #tpu.memory_space<vmem>>, vector<128x128xf32>
    %174 = vector.shape_cast %172 : vector<2x8x8x128xbf16> to vector<128x128xbf16>
    %c15 = arith.constant 15 : index
    %c0_224 = arith.constant 0 : index
    %c0_225 = arith.constant 0 : index
    %175 = vector.load %arg4[%c15, %c0_224, %c0_225] : memref<25x128x128xbf16, #tpu.memory_space<vmem>>, vector<1x128x128xbf16>
    %176 = vector.shape_cast %175 : vector<1x128x128xbf16> to vector<128x128xbf16>
    %cst_226 = arith.constant dense<0.000000e+00> : vector<128x128xf32>
    %177 = tpu.matmul %174, %176, %cst_226 {dimension_numbers = #tpu.dot_dimension_numbers<[1], [0], [0], [1], [0, 0, 1, 1], [], []>} : vector<128x128xbf16>, vector<128x128xbf16>, vector<128x128xf32> -> vector<128x128xf32>
    %178 = arith.addf %173, %177 : vector<128x128xf32>
    %c0_227 = arith.constant 0 : index
    %c0_228 = arith.constant 0 : index
    %179 = vector.load %arg8[%c0_227, %c0_228] : memref<128x128xf32, #tpu.memory_space<vmem>>, vector<128x128xf32>
    tpu.vector_store %arg8[%c0_227, %c0_228], %178 {strides = array<i32>} : memref<128x128xf32, #tpu.memory_space<vmem>>, vector<128x128xf32>,
    %c3_229 = arith.constant 3 : index
    %c0_230 = arith.constant 0 : index
    %c1_231 = arith.constant 1 : index
    %c0_232 = arith.constant 0 : index
    %c0_233 = arith.constant 0 : index
    %180 = vector.load %arg7[%c3_229, %c0_230, %c1_231, %c0_232, %c0_233] : memref<4x2x10x10x128xbf16, #tpu.memory_space<vmem>>, vector<1x2x8x8x128xbf16>
    %181 = vector.shape_cast %180 : vector<1x2x8x8x128xbf16> to vector<2x8x8x128xbf16>
    %c0_234 = arith.constant 0 : index
    %c0_235 = arith.constant 0 : index
    %182 = vector.load %arg8[%c0_234, %c0_235] : memref<128x128xf32, #tpu.memory_space<vmem>>, vector<128x128xf32>
    %183 = vector.shape_cast %181 : vector<2x8x8x128xbf16> to vector<128x128xbf16>
    %c16 = arith.constant 16 : index
    %c0_236 = arith.constant 0 : index
    %c0_237 = arith.constant 0 : index
    %184 = vector.load %arg4[%c16, %c0_236, %c0_237] : memref<25x128x128xbf16, #tpu.memory_space<vmem>>, vector<1x128x128xbf16>
    %185 = vector.shape_cast %184 : vector<1x128x128xbf16> to vector<128x128xbf16>
    %cst_238 = arith.constant dense<0.000000e+00> : vector<128x128xf32>
    %186 = tpu.matmul %183, %185, %cst_238 {dimension_numbers = #tpu.dot_dimension_numbers<[1], [0], [0], [1], [0, 0, 1, 1], [], []>} : vector<128x128xbf16>, vector<128x128xbf16>, vector<128x128xf32> -> vector<128x128xf32>
    %187 = arith.addf %182, %186 : vector<128x128xf32>
    %c0_239 = arith.constant 0 : index
    %c0_240 = arith.constant 0 : index
    %188 = vector.load %arg8[%c0_239, %c0_240] : memref<128x128xf32, #tpu.memory_space<vmem>>, vector<128x128xf32>
    tpu.vector_store %arg8[%c0_239, %c0_240], %187 {strides = array<i32>} : memref<128x128xf32, #tpu.memory_space<vmem>>, vector<128x128xf32>,
    %c2_241 = arith.constant 2 : index
    %c0_242 = arith.constant 0 : index
    %c1_243 = arith.constant 1 : index
    %c1_244 = arith.constant 1 : index
    %c0_245 = arith.constant 0 : index
    %189 = vector.load %arg7[%c2_241, %c0_242, %c1_243, %c1_244, %c0_245] : memref<4x2x10x10x128xbf16, #tpu.memory_space<vmem>>, vector<1x2x8x8x128xbf16>
    %190 = vector.shape_cast %189 : vector<1x2x8x8x128xbf16> to vector<2x8x8x128xbf16>
    %c0_246 = arith.constant 0 : index
    %c0_247 = arith.constant 0 : index
    %191 = vector.load %arg8[%c0_246, %c0_247] : memref<128x128xf32, #tpu.memory_space<vmem>>, vector<128x128xf32>
    %192 = vector.shape_cast %190 : vector<2x8x8x128xbf16> to vector<128x128xbf16>
    %c17 = arith.constant 17 : index
    %c0_248 = arith.constant 0 : index
    %c0_249 = arith.constant 0 : index
    %193 = vector.load %arg4[%c17, %c0_248, %c0_249] : memref<25x128x128xbf16, #tpu.memory_space<vmem>>, vector<1x128x128xbf16>
    %194 = vector.shape_cast %193 : vector<1x128x128xbf16> to vector<128x128xbf16>
    %cst_250 = arith.constant dense<0.000000e+00> : vector<128x128xf32>
    %195 = tpu.matmul %192, %194, %cst_250 {dimension_numbers = #tpu.dot_dimension_numbers<[1], [0], [0], [1], [0, 0, 1, 1], [], []>} : vector<128x128xbf16>, vector<128x128xbf16>, vector<128x128xf32> -> vector<128x128xf32>
    %196 = arith.addf %191, %195 : vector<128x128xf32>
    %c0_251 = arith.constant 0 : index
    %c0_252 = arith.constant 0 : index
    %197 = vector.load %arg8[%c0_251, %c0_252] : memref<128x128xf32, #tpu.memory_space<vmem>>, vector<128x128xf32>
    tpu.vector_store %arg8[%c0_251, %c0_252], %196 {strides = array<i32>} : memref<128x128xf32, #tpu.memory_space<vmem>>, vector<128x128xf32>,
    %c3_253 = arith.constant 3 : index
    %c0_254 = arith.constant 0 : index
    %c1_255 = arith.constant 1 : index
    %c1_256 = arith.constant 1 : index
    %c0_257 = arith.constant 0 : index
    %198 = vector.load %arg7[%c3_253, %c0_254, %c1_255, %c1_256, %c0_257] : memref<4x2x10x10x128xbf16, #tpu.memory_space<vmem>>, vector<1x2x8x8x128xbf16>
    %199 = vector.shape_cast %198 : vector<1x2x8x8x128xbf16> to vector<2x8x8x128xbf16>
    %c0_258 = arith.constant 0 : index
    %c0_259 = arith.constant 0 : index
    %200 = vector.load %arg8[%c0_258, %c0_259] : memref<128x128xf32, #tpu.memory_space<vmem>>, vector<128x128xf32>
    %201 = vector.shape_cast %199 : vector<2x8x8x128xbf16> to vector<128x128xbf16>
    %c18 = arith.constant 18 : index
    %c0_260 = arith.constant 0 : index
    %c0_261 = arith.constant 0 : index
    %202 = vector.load %arg4[%c18, %c0_260, %c0_261] : memref<25x128x128xbf16, #tpu.memory_space<vmem>>, vector<1x128x128xbf16>
    %203 = vector.shape_cast %202 : vector<1x128x128xbf16> to vector<128x128xbf16>
    %cst_262 = arith.constant dense<0.000000e+00> : vector<128x128xf32>
    %204 = tpu.matmul %201, %203, %cst_262 {dimension_numbers = #tpu.dot_dimension_numbers<[1], [0], [0], [1], [0, 0, 1, 1], [], []>} : vector<128x128xbf16>, vector<128x128xbf16>, vector<128x128xf32> -> vector<128x128xf32>
    %205 = arith.addf %200, %204 : vector<128x128xf32>
    %c0_263 = arith.constant 0 : index
    %c0_264 = arith.constant 0 : index
    %206 = vector.load %arg8[%c0_263, %c0_264] : memref<128x128xf32, #tpu.memory_space<vmem>>, vector<128x128xf32>
    tpu.vector_store %arg8[%c0_263, %c0_264], %205 {strides = array<i32>} : memref<128x128xf32, #tpu.memory_space<vmem>>, vector<128x128xf32>,
    %c2_265 = arith.constant 2 : index
    %c0_266 = arith.constant 0 : index
    %c1_267 = arith.constant 1 : index
    %c2_268 = arith.constant 2 : index
    %c0_269 = arith.constant 0 : index
    %207 = vector.load %arg7[%c2_265, %c0_266, %c1_267, %c2_268, %c0_269] : memref<4x2x10x10x128xbf16, #tpu.memory_space<vmem>>, vector<1x2x8x8x128xbf16>
    %208 = vector.shape_cast %207 : vector<1x2x8x8x128xbf16> to vector<2x8x8x128xbf16>
    %c0_270 = arith.constant 0 : index
    %c0_271 = arith.constant 0 : index
    %209 = vector.load %arg8[%c0_270, %c0_271] : memref<128x128xf32, #tpu.memory_space<vmem>>, vector<128x128xf32>
    %210 = vector.shape_cast %208 : vector<2x8x8x128xbf16> to vector<128x128xbf16>
    %c19 = arith.constant 19 : index
    %c0_272 = arith.constant 0 : index
    %c0_273 = arith.constant 0 : index
    %211 = vector.load %arg4[%c19, %c0_272, %c0_273] : memref<25x128x128xbf16, #tpu.memory_space<vmem>>, vector<1x128x128xbf16>
    %212 = vector.shape_cast %211 : vector<1x128x128xbf16> to vector<128x128xbf16>
    %cst_274 = arith.constant dense<0.000000e+00> : vector<128x128xf32>
    %213 = tpu.matmul %210, %212, %cst_274 {dimension_numbers = #tpu.dot_dimension_numbers<[1], [0], [0], [1], [0, 0, 1, 1], [], []>} : vector<128x128xbf16>, vector<128x128xbf16>, vector<128x128xf32> -> vector<128x128xf32>
    %214 = arith.addf %209, %213 : vector<128x128xf32>
    %c0_275 = arith.constant 0 : index
    %c0_276 = arith.constant 0 : index
    %215 = vector.load %arg8[%c0_275, %c0_276] : memref<128x128xf32, #tpu.memory_space<vmem>>, vector<128x128xf32>
    tpu.vector_store %arg8[%c0_275, %c0_276], %214 {strides = array<i32>} : memref<128x128xf32, #tpu.memory_space<vmem>>, vector<128x128xf32>,
    %c0_277 = arith.constant 0 : index
    %c0_278 = arith.constant 0 : index
    %c2_279 = arith.constant 2 : index
    %c0_280 = arith.constant 0 : index
    %c0_281 = arith.constant 0 : index
    %216 = vector.load %arg7[%c0_277, %c0_278, %c2_279, %c0_280, %c0_281] : memref<4x2x10x10x128xbf16, #tpu.memory_space<vmem>>, vector<1x2x8x8x128xbf16>
    %217 = vector.shape_cast %216 : vector<1x2x8x8x128xbf16> to vector<2x8x8x128xbf16>
    %c0_282 = arith.constant 0 : index
    %c0_283 = arith.constant 0 : index
    %218 = vector.load %arg8[%c0_282, %c0_283] : memref<128x128xf32, #tpu.memory_space<vmem>>, vector<128x128xf32>
    %219 = vector.shape_cast %217 : vector<2x8x8x128xbf16> to vector<128x128xbf16>
    %c20 = arith.constant 20 : index
    %c0_284 = arith.constant 0 : index
    %c0_285 = arith.constant 0 : index
    %220 = vector.load %arg4[%c20, %c0_284, %c0_285] : memref<25x128x128xbf16, #tpu.memory_space<vmem>>, vector<1x128x128xbf16>
    %221 = vector.shape_cast %220 : vector<1x128x128xbf16> to vector<128x128xbf16>
    %cst_286 = arith.constant dense<0.000000e+00> : vector<128x128xf32>
    %222 = tpu.matmul %219, %221, %cst_286 {dimension_numbers = #tpu.dot_dimension_numbers<[1], [0], [0], [1], [0, 0, 1, 1], [], []>} : vector<128x128xbf16>, vector<128x128xbf16>, vector<128x128xf32> -> vector<128x128xf32>
    %223 = arith.addf %218, %222 : vector<128x128xf32>
    %c0_287 = arith.constant 0 : index
    %c0_288 = arith.constant 0 : index
    %224 = vector.load %arg8[%c0_287, %c0_288] : memref<128x128xf32, #tpu.memory_space<vmem>>, vector<128x128xf32>
    tpu.vector_store %arg8[%c0_287, %c0_288], %223 {strides = array<i32>} : memref<128x128xf32, #tpu.memory_space<vmem>>, vector<128x128xf32>,
    %c1_289 = arith.constant 1 : index
    %c0_290 = arith.constant 0 : index
    %c2_291 = arith.constant 2 : index
    %c0_292 = arith.constant 0 : index
    %c0_293 = arith.constant 0 : index
    %225 = vector.load %arg7[%c1_289, %c0_290, %c2_291, %c0_292, %c0_293] : memref<4x2x10x10x128xbf16, #tpu.memory_space<vmem>>, vector<1x2x8x8x128xbf16>
    %226 = vector.shape_cast %225 : vector<1x2x8x8x128xbf16> to vector<2x8x8x128xbf16>
    %c0_294 = arith.constant 0 : index
    %c0_295 = arith.constant 0 : index
    %227 = vector.load %arg8[%c0_294, %c0_295] : memref<128x128xf32, #tpu.memory_space<vmem>>, vector<128x128xf32>
    %228 = vector.shape_cast %226 : vector<2x8x8x128xbf16> to vector<128x128xbf16>
    %c21 = arith.constant 21 : index
    %c0_296 = arith.constant 0 : index
    %c0_297 = arith.constant 0 : index
    %229 = vector.load %arg4[%c21, %c0_296, %c0_297] : memref<25x128x128xbf16, #tpu.memory_space<vmem>>, vector<1x128x128xbf16>
    %230 = vector.shape_cast %229 : vector<1x128x128xbf16> to vector<128x128xbf16>
    %cst_298 = arith.constant dense<0.000000e+00> : vector<128x128xf32>
    %231 = tpu.matmul %228, %230, %cst_298 {dimension_numbers = #tpu.dot_dimension_numbers<[1], [0], [0], [1], [0, 0, 1, 1], [], []>} : vector<128x128xbf16>, vector<128x128xbf16>, vector<128x128xf32> -> vector<128x128xf32>
    %232 = arith.addf %227, %231 : vector<128x128xf32>
    %c0_299 = arith.constant 0 : index
    %c0_300 = arith.constant 0 : index
    %233 = vector.load %arg8[%c0_299, %c0_300] : memref<128x128xf32, #tpu.memory_space<vmem>>, vector<128x128xf32>
    tpu.vector_store %arg8[%c0_299, %c0_300], %232 {strides = array<i32>} : memref<128x128xf32, #tpu.memory_space<vmem>>, vector<128x128xf32>,
    %c0_301 = arith.constant 0 : index
    %c0_302 = arith.constant 0 : index
    %c2_303 = arith.constant 2 : index
    %c1_304 = arith.constant 1 : index
    %c0_305 = arith.constant 0 : index
    %234 = vector.load %arg7[%c0_301, %c0_302, %c2_303, %c1_304, %c0_305] : memref<4x2x10x10x128xbf16, #tpu.memory_space<vmem>>, vector<1x2x8x8x128xbf16>
    %235 = vector.shape_cast %234 : vector<1x2x8x8x128xbf16> to vector<2x8x8x128xbf16>
    %c0_306 = arith.constant 0 : index
    %c0_307 = arith.constant 0 : index
    %236 = vector.load %arg8[%c0_306, %c0_307] : memref<128x128xf32, #tpu.memory_space<vmem>>, vector<128x128xf32>
    %237 = vector.shape_cast %235 : vector<2x8x8x128xbf16> to vector<128x128xbf16>
    %c22 = arith.constant 22 : index
    %c0_308 = arith.constant 0 : index
    %c0_309 = arith.constant 0 : index
    %238 = vector.load %arg4[%c22, %c0_308, %c0_309] : memref<25x128x128xbf16, #tpu.memory_space<vmem>>, vector<1x128x128xbf16>
    %239 = vector.shape_cast %238 : vector<1x128x128xbf16> to vector<128x128xbf16>
    %cst_310 = arith.constant dense<0.000000e+00> : vector<128x128xf32>
    %240 = tpu.matmul %237, %239, %cst_310 {dimension_numbers = #tpu.dot_dimension_numbers<[1], [0], [0], [1], [0, 0, 1, 1], [], []>} : vector<128x128xbf16>, vector<128x128xbf16>, vector<128x128xf32> -> vector<128x128xf32>
    %241 = arith.addf %236, %240 : vector<128x128xf32>
    %c0_311 = arith.constant 0 : index
    %c0_312 = arith.constant 0 : index
    %242 = vector.load %arg8[%c0_311, %c0_312] : memref<128x128xf32, #tpu.memory_space<vmem>>, vector<128x128xf32>
    tpu.vector_store %arg8[%c0_311, %c0_312], %241 {strides = array<i32>} : memref<128x128xf32, #tpu.memory_space<vmem>>, vector<128x128xf32>,
    %c1_313 = arith.constant 1 : index
    %c0_314 = arith.constant 0 : index
    %c2_315 = arith.constant 2 : index
    %c1_316 = arith.constant 1 : index
    %c0_317 = arith.constant 0 : index
    %243 = vector.load %arg7[%c1_313, %c0_314, %c2_315, %c1_316, %c0_317] : memref<4x2x10x10x128xbf16, #tpu.memory_space<vmem>>, vector<1x2x8x8x128xbf16>
    %244 = vector.shape_cast %243 : vector<1x2x8x8x128xbf16> to vector<2x8x8x128xbf16>
    %c0_318 = arith.constant 0 : index
    %c0_319 = arith.constant 0 : index
    %245 = vector.load %arg8[%c0_318, %c0_319] : memref<128x128xf32, #tpu.memory_space<vmem>>, vector<128x128xf32>
    %246 = vector.shape_cast %244 : vector<2x8x8x128xbf16> to vector<128x128xbf16>
    %c23 = arith.constant 23 : index
    %c0_320 = arith.constant 0 : index
    %c0_321 = arith.constant 0 : index
    %247 = vector.load %arg4[%c23, %c0_320, %c0_321] : memref<25x128x128xbf16, #tpu.memory_space<vmem>>, vector<1x128x128xbf16>
    %248 = vector.shape_cast %247 : vector<1x128x128xbf16> to vector<128x128xbf16>
    %cst_322 = arith.constant dense<0.000000e+00> : vector<128x128xf32>
    %249 = tpu.matmul %246, %248, %cst_322 {dimension_numbers = #tpu.dot_dimension_numbers<[1], [0], [0], [1], [0, 0, 1, 1], [], []>} : vector<128x128xbf16>, vector<128x128xbf16>, vector<128x128xf32> -> vector<128x128xf32>
    %250 = arith.addf %245, %249 : vector<128x128xf32>
    %c0_323 = arith.constant 0 : index
    %c0_324 = arith.constant 0 : index
    %251 = vector.load %arg8[%c0_323, %c0_324] : memref<128x128xf32, #tpu.memory_space<vmem>>, vector<128x128xf32>
    tpu.vector_store %arg8[%c0_323, %c0_324], %250 {strides = array<i32>} : memref<128x128xf32, #tpu.memory_space<vmem>>, vector<128x128xf32>,
    %c0_325 = arith.constant 0 : index
    %c0_326 = arith.constant 0 : index
    %c2_327 = arith.constant 2 : index
    %c2_328 = arith.constant 2 : index
    %c0_329 = arith.constant 0 : index
    %252 = vector.load %arg7[%c0_325, %c0_326, %c2_327, %c2_328, %c0_329] : memref<4x2x10x10x128xbf16, #tpu.memory_space<vmem>>, vector<1x2x8x8x128xbf16>
    %253 = vector.shape_cast %252 : vector<1x2x8x8x128xbf16> to vector<2x8x8x128xbf16>
    %c0_330 = arith.constant 0 : index
    %c0_331 = arith.constant 0 : index
    %254 = vector.load %arg8[%c0_330, %c0_331] : memref<128x128xf32, #tpu.memory_space<vmem>>, vector<128x128xf32>
    %255 = vector.shape_cast %253 : vector<2x8x8x128xbf16> to vector<128x128xbf16>
    %c24 = arith.constant 24 : index
    %c0_332 = arith.constant 0 : index
    %c0_333 = arith.constant 0 : index
    %256 = vector.load %arg4[%c24, %c0_332, %c0_333] : memref<25x128x128xbf16, #tpu.memory_space<vmem>>, vector<1x128x128xbf16>
    %257 = vector.shape_cast %256 : vector<1x128x128xbf16> to vector<128x128xbf16>
    %cst_334 = arith.constant dense<0.000000e+00> : vector<128x128xf32>
    %258 = tpu.matmul %255, %257, %cst_334 {dimension_numbers = #tpu.dot_dimension_numbers<[1], [0], [0], [1], [0, 0, 1, 1], [], []>} : vector<128x128xbf16>, vector<128x128xbf16>, vector<128x128xf32> -> vector<128x128xf32>
    %259 = arith.addf %254, %258 : vector<128x128xf32>
    %c0_335 = arith.constant 0 : index
    %c0_336 = arith.constant 0 : index
    %260 = vector.load %arg8[%c0_335, %c0_336] : memref<128x128xf32, #tpu.memory_space<vmem>>, vector<128x128xf32>
    tpu.vector_store %arg8[%c0_335, %c0_336], %259 {strides = array<i32>} : memref<128x128xf32, #tpu.memory_space<vmem>>, vector<128x128xf32>,
    %c0_337 = arith.constant 0 : index
    %c0_338 = arith.constant 0 : index
    %261 = vector.load %arg8[%c0_337, %c0_338] : memref<128x128xf32, #tpu.memory_space<vmem>>, vector<128x128xf32>
    %cst_339 = arith.constant 0.000000e+00 : f32
    %262 = vector.broadcast %cst_339 : f32 to vector<128x128xf32>
    %263 = arith.maximumf %261, %262 : vector<128x128xf32>
    %264 = arith.truncf %263 : vector<128x128xf32> to vector<128x128xbf16>
    %c0_340 = arith.constant 0 : index
    %c0_341 = arith.constant 0 : index
    %265 = vector.load %arg6[%c0_340, %c0_341] : memref<128x128xbf16, #tpu.memory_space<vmem>>, vector<128x128xbf16>
    tpu.vector_store %arg6[%c0_340, %c0_341], %264 {strides = array<i32>} : memref<128x128xbf16, #tpu.memory_space<vmem>>, vector<128x128xbf16>,
    return
  }
  func.func @transform_0(%arg0: i32) -> (i32, i32) {
    %c0_i32 = arith.constant 0 : i32
    %c0_i32_0 = arith.constant 0 : i32
    return %arg0, %c0_i32 : i32, i32
  }
  func.func @transform_1(%arg0: i32) -> (i32, i32) {
    %c0_i32 = arith.constant 0 : i32
    %c0_i32_0 = arith.constant 0 : i32
    %c0_i32_1 = arith.constant 0 : i32
    return %c0_i32, %c0_i32_0 : i32, i32
  }
  func.func @transform_2(%arg0: i32) -> (i32, i32) {
    %c0_i32 = arith.constant 0 : i32
    %c0_i32_0 = arith.constant 0 : i32
    %c0_i32_1 = arith.constant 0 : i32
    return %c0_i32, %c0_i32_0 : i32, i32
  }
  func.func @transform_3(%arg0: i32) -> (i32, i32, i32) {
    %c0_i32 = arith.constant 0 : i32
    %c0_i32_0 = arith.constant 0 : i32
    %c0_i32_1 = arith.constant 0 : i32
    %c0_i32_2 = arith.constant 0 : i32
    return %c0_i32, %c0_i32_0, %c0_i32_1 : i32, i32, i32
  }
  func.func @transform_4(%arg0: i32) -> (i32, i32) {
    %c0_i32 = arith.constant 0 : i32
    %c0_i32_0 = arith.constant 0 : i32
    %c0_i32_1 = arith.constant 0 : i32
    return %c0_i32, %c0_i32_0 : i32, i32
  }
  func.func @transform_5(%arg0: i32) -> (i32, i32) {
    %c0_i32 = arith.constant 0 : i32
    %c0_i32_0 = arith.constant 0 : i32
    return %arg0, %c0_i32 : i32, i32
  }
}

module attributes {stable_mosaic.version = 11 : i64} {
  func.func @_tail_kernel(%arg0: i32, %arg1: memref<2x8192xbf16, #tpu.memory_space<vmem>>, %arg2: memref<8192x128xbf16, #tpu.memory_space<vmem>>, %arg3: memref<1x128xf32, #tpu.memory_space<vmem>>, %arg4: memref<128x128xbf16, #tpu.memory_space<vmem>>, %arg5: memref<1x128xf32, #tpu.memory_space<vmem>>, %arg6: memref<2x128xf32, #tpu.memory_space<vmem>>) attributes {dimension_semantics = [#tpu.dimension_semantics<parallel>], iteration_bounds = array<i64: 1>, scalar_prefetch = 0 : i64, scratch_operands = 0 : i64, tpu.core_type = #tpu.core_type<tc>, window_params = [{transform_indices = @transform_0, window_bounds = array<i64: 2, 8192>}, {pipeline_mode = #tpu.pipeline_mode<synchronous>, transform_indices = @transform_1, window_bounds = array<i64: 8192, 128>}, {pipeline_mode = #tpu.pipeline_mode<synchronous>, transform_indices = @transform_2, window_bounds = array<i64: 1, 128>}, {pipeline_mode = #tpu.pipeline_mode<synchronous>, transform_indices = @transform_3, window_bounds = array<i64: 128, 128>}, {pipeline_mode = #tpu.pipeline_mode<synchronous>, transform_indices = @transform_4, window_bounds = array<i64: 1, 128>}, {transform_indices = @transform_5, window_bounds = array<i64: 2, 128>}]} {
    %c0 = arith.constant 0 : index
    %c0_0 = arith.constant 0 : index
    %0 = vector.load %arg1[%c0, %c0_0] : memref<2x8192xbf16, #tpu.memory_space<vmem>>, vector<2x8192xbf16>
    %c0_1 = arith.constant 0 : index
    %c0_2 = arith.constant 0 : index
    %1 = vector.load %arg2[%c0_1, %c0_2] : memref<8192x128xbf16, #tpu.memory_space<vmem>>, vector<8192x128xbf16>
    %cst = arith.constant dense<0.000000e+00> : vector<2x128xf32>
    %2 = tpu.matmul %0, %1, %cst {dimension_numbers = #tpu.dot_dimension_numbers<[1], [0], [0], [1], [0, 0, 1, 1], [], []>} : vector<2x8192xbf16>, vector<8192x128xbf16>, vector<2x128xf32> -> vector<2x128xf32>
    %c0_3 = arith.constant 0 : index
    %c0_4 = arith.constant 0 : index
    %3 = vector.load %arg3[%c0_3, %c0_4] : memref<1x128xf32, #tpu.memory_space<vmem>>, vector<1x128xf32>
    %4 = vector.broadcast %3 : vector<1x128xf32> to vector<2x128xf32>
    %5 = arith.addf %2, %4 : vector<2x128xf32>
    %cst_5 = arith.constant 0.000000e+00 : f32
    %6 = vector.broadcast %cst_5 : f32 to vector<2x128xf32>
    %7 = arith.maximumf %5, %6 : vector<2x128xf32>
    %8 = arith.truncf %7 : vector<2x128xf32> to vector<2x128xbf16>
    %c0_6 = arith.constant 0 : index
    %c0_7 = arith.constant 0 : index
    %9 = vector.load %arg4[%c0_6, %c0_7] : memref<128x128xbf16, #tpu.memory_space<vmem>>, vector<128x128xbf16>
    %cst_8 = arith.constant dense<0.000000e+00> : vector<2x128xf32>
    %10 = tpu.matmul %8, %9, %cst_8 {dimension_numbers = #tpu.dot_dimension_numbers<[1], [0], [0], [1], [0, 0, 1, 1], [], []>} : vector<2x128xbf16>, vector<128x128xbf16>, vector<2x128xf32> -> vector<2x128xf32>
    %c0_9 = arith.constant 0 : index
    %c0_10 = arith.constant 0 : index
    %11 = vector.load %arg5[%c0_9, %c0_10] : memref<1x128xf32, #tpu.memory_space<vmem>>, vector<1x128xf32>
    %12 = vector.broadcast %11 : vector<1x128xf32> to vector<2x128xf32>
    %13 = arith.addf %10, %12 : vector<2x128xf32>
    %cst_11 = arith.constant 0.000000e+00 : f32
    %14 = vector.broadcast %cst_11 : f32 to vector<2x128xf32>
    %15 = arith.maximumf %13, %14 : vector<2x128xf32>
    %16 = tpu.iota {dimensions = array<i32: 1>} : vector<2x128xi32>
    %c10_i32 = arith.constant 10 : i32
    %17 = vector.broadcast %c10_i32 : i32 to vector<2x128xi32>
    %18 = arith.cmpi slt, %16, %17 : vector<2x128xi32>
    %cst_12 = arith.constant -1.000000e+30 : f32
    %19 = vector.broadcast %cst_12 : f32 to vector<2x128xf32>
    %20 = arith.select %18, %15, %19 : vector<2x128xi1>, vector<2x128xf32>
    %cst_13 = arith.constant dense<0xFF800000> : vector<2xf32>
    %21 = vector.multi_reduction <maximumf>, %20, %cst_13 [1] : vector<2x128xf32> to vector<2xf32>
    %22 = vector.shape_cast %21 : vector<2xf32> to vector<2x1xf32>
    %23 = vector.broadcast %22 : vector<2x1xf32> to vector<2x128xf32>
    %24 = arith.subf %20, %23 : vector<2x128xf32>
    %25 = math.exp %24 : vector<2x128xf32>
    %cst_14 = arith.constant dense<0.000000e+00> : vector<2xf32>
    %26 = vector.multi_reduction <add>, %25, %cst_14 [1] : vector<2x128xf32> to vector<2xf32>
    %27 = vector.shape_cast %26 : vector<2xf32> to vector<2x1xf32>
    %28 = vector.broadcast %27 : vector<2x1xf32> to vector<2x128xf32>
    %29 = arith.divf %25, %28 : vector<2x128xf32>
    %c0_15 = arith.constant 0 : index
    %c0_16 = arith.constant 0 : index
    %30 = vector.load %arg6[%c0_15, %c0_16] : memref<2x128xf32, #tpu.memory_space<vmem>>, vector<2x128xf32>
    tpu.vector_store %arg6[%c0_15, %c0_16], %29 {strides = array<i32>} : memref<2x128xf32, #tpu.memory_space<vmem>>, vector<2x128xf32>,
    return
  }
  func.func @transform_0(%arg0: i32) -> (i32, i32) {
    %c0_i32 = arith.constant 0 : i32
    %c0_i32_0 = arith.constant 0 : i32
    return %arg0, %c0_i32 : i32, i32
  }
  func.func @transform_1(%arg0: i32) -> (i32, i32) {
    %c0_i32 = arith.constant 0 : i32
    %c0_i32_0 = arith.constant 0 : i32
    %c0_i32_1 = arith.constant 0 : i32
    return %c0_i32, %c0_i32_0 : i32, i32
  }
  func.func @transform_2(%arg0: i32) -> (i32, i32) {
    %c0_i32 = arith.constant 0 : i32
    %c0_i32_0 = arith.constant 0 : i32
    %c0_i32_1 = arith.constant 0 : i32
    return %c0_i32, %c0_i32_0 : i32, i32
  }
  func.func @transform_3(%arg0: i32) -> (i32, i32) {
    %c0_i32 = arith.constant 0 : i32
    %c0_i32_0 = arith.constant 0 : i32
    %c0_i32_1 = arith.constant 0 : i32
    return %c0_i32, %c0_i32_0 : i32, i32
  }
  func.func @transform_4(%arg0: i32) -> (i32, i32) {
    %c0_i32 = arith.constant 0 : i32
    %c0_i32_0 = arith.constant 0 : i32
    %c0_i32_1 = arith.constant 0 : i32
    return %c0_i32, %c0_i32_0 : i32, i32
  }
  func.func @transform_5(%arg0: i32) -> (i32, i32) {
    %c0_i32 = arith.constant 0 : i32
    %c0_i32_0 = arith.constant 0 : i32
    return %arg0, %c0_i32 : i32, i32
  }
}

</mosaic_0001>

<bundles_post_ra>
// kernel: allcnnc_short_forward.2
= control target key start
LH: loop header
LB: loop body
LE: loop exit
PB: predicated region body
PF: predicated region fallthrough
CT: control target
= control target key end

     0   :  { %v12446_v22 = vmov 0   ;;  %vm963_vm0 = vcmask 1043456   ;;  %vm964_vm1 = vsmask.f32 7938  ;;  %vm969_vm2 = vcmask 1040384   ;;  %s15435_s1 = inlined_call_operand.vmem [shape: bf16[128,128], index: 1, kind: input, shape index: {}]   ;;  %s15436_s2 = inlined_call_operand.vmem [shape: f32[1,128], index: 2, kind: input, shape index: {}]   ;;  %s15437_s0 = inlined_call_operand.vmem [shape: bf16[512,128], index: 0, kind: input, shape index: {}]   ;;  %s15438_s3 = inlined_call_operand.vmem [shape: bf16[25,128,128], index: 3, kind: input, shape index: {}]   ;;  %s15439_s4 = inlined_call_operand.vmem [shape: f32[1,128], index: 4, kind: input, shape index: {}]   ;;  %s15440_s5 = inlined_call_operand.vmem [shape: bf16[128,128], index: 5, kind: output, shape index: {}]  }
   0x1   :  { %v12087_v0 = vld [vmem:[%s15435_s1 + $0x38] sm:$0xff]  ;;  %v12086_v1 = vld [vmem:[%s15435_s1 + $0x30] sm:$0xff]  ;;  %v12085_v2 = vld [vmem:[%s15435_s1 + $0x28] sm:$0xff]  ;;  %644 = vst [vmem:[#allocation2 + $0x8] sm:$0xf] %v12446_v22  ;;  %vm3291_vm9 = vcmask 1042432  }
   0x2   :  { %345 = vmatpush.bf16.msra.mxu0 %v12087_v0  ;;  %12415 = vmatpush.bf16.msra.mxu1 %v12087_v0  ;;  %v12084_v3 = vld [vmem:[%s15435_s1 + $0x20] sm:$0xff]  ;;  %v12083_v4 = vld [vmem:[%s15435_s1 + $0x18] sm:$0xff]  ;;  %v12082_v5 = vld [vmem:[%s15435_s1 + $0x10] sm:$0xff]  ;;  %645 = vst [vmem:[#allocation2 + $0xc] sm:$0x1] %v12446_v22  ;;  %vm3292_vm10 = vcmask 1046532  }
   0x3   :  { %12417 = vmatpush.bf16.msra.mxu3 %v12087_v0  ;;  %12416 = vmatpush.bf16.msra.mxu2 %v12087_v0  ;;  %v12081_v6 = vld [vmem:[%s15435_s1 + $0x8] sm:$0xff]  ;;  %v12080_v7 = vld [vmem:[%s15435_s1] sm:$0xff]  ;;  %v12050_v10 = vld [vmem:[%s15437_s0 + $0x10] sm:$0xff]  ;;  %642 = vst [vmem:[#allocation2] sm:$0xf] %v12446_v22 }
   0x4   :  { %v12048_v8 = vld [vmem:[%s15437_s0] sm:$0xff]  ;;  %v12049_v9 = vld [vmem:[%s15437_s0 + $0x8] sm:$0xff]  ;;  %v12051_v11 = vld [vmem:[%s15437_s0 + $0x18] sm:$0xff]  ;;  %643 = vst [vmem:[#allocation2 + $0x4] sm:$0x1] %v12446_v22 }
   0x5   :  { %v12052_v12 = vld [vmem:[%s15437_s0 + $0x20] sm:$0xff]  ;;  %v12053_v13 = vld [vmem:[%s15437_s0 + $0x28] sm:$0xff]  ;;  %v12074_v14 = vld [vmem:[%s15437_s0 + $0xd0] sm:$0xff]  ;;  %646 = vst [vmem:[#allocation2 + $0x10] sm:$0xf] %v12446_v22 }
   0x6   :  { %346 = vmatpush.bf16.msra.mxu0 %v12086_v1  ;;  %12418 = vmatpush.bf16.msra.mxu1 %v12086_v1  ;;  %v12103_v15 = vld [vmem:[%s15438_s3 + $0x38] sm:$0xff]  ;;  %v12102_v16 = vld [vmem:[%s15438_s3 + $0x30] sm:$0xff]  ;;  %v12101_v18 = vld [vmem:[%s15438_s3 + $0x28] sm:$0xff]  ;;  %647 = vst [vmem:[#allocation2 + $0x14] sm:$0x1] %v12446_v22 }
   0x7   :  { %12420 = vmatpush.bf16.msra.mxu3 %v12086_v1  ;;  %12419 = vmatpush.bf16.msra.mxu2 %v12086_v1  ;;  %v12054_v17 = vld [vmem:[%s15437_s0 + $0x30] sm:$0xff]  ;;  %v12127_v20 = vld [vmem:[%s15438_s3 + $0xb8] sm:$0xff]  ;;  %v12100_v21 = vld [vmem:[%s15438_s3 + $0x20] sm:$0xff]  ;;  %648 = vst [vmem:[#allocation2 + $0x18] sm:$0xf] %v12446_v22 }
   0x8   :  { %v12078_v19 = vld [vmem:[%s15437_s0 + $0xf0] sm:$0xff]  ;;  %649 = vst [vmem:[#allocation2 + $0x1c] sm:$0x1] %v12446_v22  ;;  %v12055_v23 = vld [vmem:[%s15437_s0 + $0x38] sm:$0xff]  ;;  %v12572_v24 = vld [vmem:[%s15436_s2] ss:$0 sm:$0xff] }
   0x9   :  { %650 = vst [vmem:[#allocation2 + $0x20] sm:$0xf] %v12446_v22  ;;  %v12056_v25 = vld [vmem:[%s15437_s0 + $0x40] sm:$0xff]  ;;  %vm970_vm3 = vsmask.f32 256  ;;  %vm12590_vm4 = vmand %vm963_vm0, %vm964_vm1  ;;  %v12075_v42 = vld [vmem:[%s15437_s0 + $0xd8] sm:$0xff] }
   0xa   :  { %347 = vmatpush.bf16.msra.mxu0 %v12085_v2  ;;  %12421 = vmatpush.bf16.msra.mxu1 %v12085_v2  ;;  %651 = vst [vmem:[#allocation2 + $0x24] sm:$0x1] %v12446_v22  ;;  %v966_v34 = vld [vmem:[#allocation2 + $0x8] sm:$0xf]  ;;  %vm12595_vm5 = vmand %vm969_vm2, %vm970_vm3  ;;  %v972_v36 = vld [vmem:[#allocation2 + $0xc] sm:$0x1] }
   0xb   :  { %12423 = vmatpush.bf16.msra.mxu3 %v12085_v2  ;;  %12422 = vmatpush.bf16.msra.mxu2 %v12085_v2  ;;  %652 = vst [vmem:[#allocation2 + $0x28] sm:$0xf] %v12446_v22  ;;  %v12126_v43 = vld [vmem:[%s15438_s3 + $0xb0] sm:$0xff]  ;;  %v12099_v44 = vld [vmem:[%s15438_s3 + $0x18] sm:$0xff]  ;;  %v12125_v45 = vld [vmem:[%s15438_s3 + $0xa8] sm:$0xff] }
   0xc   :  { %653 = vst [vmem:[#allocation2 + $0x2c] sm:$0x1] %v12446_v22  ;;  %v12098_v46 = vld [vmem:[%s15438_s3 + $0x10] sm:$0xff]  ;;  %v12124_v47 = vld [vmem:[%s15438_s3 + $0xa0] sm:$0xff]  ;;  %v12097_v48 = vld [vmem:[%s15438_s3 + $0x8] sm:$0xff] }
   0xd   :  { %654 = vst [vmem:[#allocation2 + $0x30] sm:$0xf] %v12446_v22  ;;  %v12057_v50 = vld [vmem:[%s15437_s0 + $0x48] sm:$0xff]  ;;  %v12079_v51 = vld [vmem:[%s15437_s0 + $0xf8] sm:$0xff]  ;;  %v12096_v53 = vld [vmem:[%s15438_s3] sm:$0xff] }
   0xe   :  { %348 = vmatpush.bf16.msra.mxu0 %v12084_v3  ;;  %12424 = vmatpush.bf16.msra.mxu1 %v12084_v3  ;;  %655 = vst [vmem:[#allocation2 + $0x34] sm:$0x1] %v12446_v22  ;;  %v12123_v52 = vld [vmem:[%s15438_s3 + $0x98] sm:$0xff]  ;;  %v10466_v54 = vld [vmem:[#allocation2] sm:$0xf]  ;;  %v12122_v57 = vld [vmem:[%s15438_s3 + $0x90] sm:$0xff] }
   0xf   :  { %12426 = vmatpush.bf16.msra.mxu3 %v12084_v3  ;;  %12425 = vmatpush.bf16.msra.mxu2 %v12084_v3  ;;  %656 = vst [vmem:[#allocation2 + $0x38] sm:$0xf] %v12446_v22  ;;  %v2308_v60 = vld [vmem:[#allocation2] sm:$0xf]  ;;  %v12121_v61 = vld [vmem:[%s15438_s3 + $0x88] sm:$0xff]  ;;  %vm13586_vm11 = vmor %vm3291_vm9, %vm3292_vm10 }
  0x10   :  { %657 = vst [vmem:[#allocation2 + $0x3c] sm:$0x1] %v12446_v22  ;;  %v2360_v62 = vshrl.u32 %v2308_v60, 16  ;;  %v2363_v63 = vshll.u32 %v2308_v60, 16  ;;  %v12120_v2 = vld [vmem:[%s15438_s3 + $0x80] sm:$0xff]  ;;  %v12059_v60 = vld [vmem:[%s15437_s0 + $0x58] sm:$0xff] }
  0x11   :  { %658 = vst [vmem:[#allocation2 + $0x40] sm:$0xf] %v12446_v22  ;;  %vm2356_vm6 = vsmask.f32 3328  ;;  %vm2357_vm7 = vsmask.f32 7440 }
  0x12   :  { %349 = vmatpush.bf16.msra.mxu0 %v12083_v4  ;;  %12427 = vmatpush.bf16.msra.mxu1 %v12083_v4  ;;  %659 = vst [vmem:[#allocation2 + $0x44] sm:$0x1] %v12446_v22  ;;  %vm12754_vm8 = vmor %vm2356_vm6, %vm2357_vm7 }
  0x13   :  { %12429 = vmatpush.bf16.msra.mxu3 %v12083_v4  ;;  %12428 = vmatpush.bf16.msra.mxu2 %v12083_v4  ;;  %660 = vst [vmem:[#allocation2 + $0x48] sm:$0xf] %v12446_v22  ;;  %v12058_v4 = vld [vmem:[%s15437_s0 + $0x50] sm:$0xff] }
  0x14   :  { %661 = vst [vmem:[#allocation2 + $0x4c] sm:$0x1] %v12446_v22 }
  0x15   :  { %662 = vst [vmem:[#allocation2 + $0x50] sm:$0xf] %v12446_v22 }
  0x16   :  { %350 = vmatpush.bf16.msra.mxu0 %v12082_v5  ;;  %12430 = vmatpush.bf16.msra.mxu1 %v12082_v5  ;;  %663 = vst [vmem:[#allocation2 + $0x54] sm:$0x1] %v12446_v22 }
  0x17   :  { %12432 = vmatpush.bf16.msra.mxu3 %v12082_v5  ;;  %12431 = vmatpush.bf16.msra.mxu2 %v12082_v5  ;;  %664 = vst [vmem:[#allocation2 + $0x58] sm:$0xf] %v12446_v22  ;;  %v2309_v5 = vld [vmem:[#allocation2 + $0x4] sm:$0x1] }
  0x18   :  { %665 = vst [vmem:[#allocation2 + $0x5c] sm:$0x1] %v12446_v22 }
  0x19   :  { %666 = vst [vmem:[#allocation2 + $0x60] sm:$0xf] %v12446_v22 }
  0x1a   :  { %351 = vmatpush.bf16.msra.mxu0 %v12081_v6  ;;  %12433 = vmatpush.bf16.msra.mxu1 %v12081_v6  ;;  %667 = vst [vmem:[#allocation2 + $0x64] sm:$0x1] %v12446_v22 }
  0x1b   :  { %12435 = vmatpush.bf16.msra.mxu3 %v12081_v6  ;;  %12434 = vmatpush.bf16.msra.mxu2 %v12081_v6  ;;  %668 = vst [vmem:[#allocation2 + $0x68] sm:$0xf] %v12446_v22 }
  0x1c   :  { %669 = vst [vmem:[#allocation2 + $0x6c] sm:$0x1] %v12446_v22 }
  0x1d   :  { %670 = vst [vmem:[#allocation2 + $0x70] sm:$0xf] %v12446_v22 }
  0x1e   :  { %352 = vmatpush.bf16.msra.mxu0 %v12080_v7  ;;  %12436 = vmatpush.bf16.msra.mxu1 %v12080_v7  ;;  %671 = vst [vmem:[#allocation2 + $0x74] sm:$0x1] %v12446_v22 }
  0x1f   :  { %12438 = vmatpush.bf16.msra.mxu3 %v12080_v7  ;;  %12437 = vmatpush.bf16.msra.mxu2 %v12080_v7  ;;  %672 = vst [vmem:[#allocation2 + $0x78] sm:$0xf] %v12446_v22 }
  0x20   :  { %673 = vst [vmem:[#allocation2 + $0x7c] sm:$0x1] %v12446_v22 }
  0x21   :  { %353 = vmatmul.bf16.vlgmr.msra.gmra.mxu0 %v12048_v8  ;;  %483 = vmatmul.bf16.vlgmr.msra.gmra.mxu1 %v12074_v14  ;;  %674 = vst [vmem:[#allocation2 + $0x80] sm:$0xf] %v12446_v22  ;;  %v2362_v8 = vrot.slane %v2360_v62, 4  ;;  %v981_v62 = vld [vmem:[#allocation2 + $0x18] sm:$0xf] }
  0x22   :  { %2000 = vmatpush.bf16.msrb.mxu1 %v12103_v15  ;;  %503 = vmatmul.bf16.vlgmr.msra.gmra.mxu3 %v12078_v19  ;;  %675 = vst [vmem:[#allocation2 + $0x84] sm:$0x1] %v12446_v22 }
  0x23   :  { %2680 = vmatpush.bf16.msrb.mxu3 %v12127_v20  ;;  %676 = vst [vmem:[#allocation2 + $0x88] sm:$0xf] %v12446_v22 }
  0x24   :  { %677 = vst [vmem:[#allocation2 + $0x8c] sm:$0x1] %v12446_v22 }
  0x25   :  { %678 = vst [vmem:[#allocation2 + $0x90] sm:$0xf] %v12446_v22 }
  0x26   :  { %2001 = vmatpush.bf16.msrb.mxu1 %v12102_v16  ;;  %679 = vst [vmem:[#allocation2 + $0x94] sm:$0x1] %v12446_v22 }
  0x27   :  { %680 = vst [vmem:[#allocation2 + $0x98] sm:$0xf] %v12446_v22  ;;  %2681 = vmatpush.bf16.msrb.mxu3 %v12126_v43 }
  0x28   :  { %681 = vst [vmem:[#allocation2 + $0x9c] sm:$0x1] %v12446_v22 }
  0x29   :  { %682 = vst [vmem:[#allocation2 + $0xa0] sm:$0xf] %v12446_v22 }
  0x2a   :  { %2002 = vmatpush.bf16.msrb.mxu1 %v12101_v18  ;;  %683 = vst [vmem:[#allocation2 + $0xa4] sm:$0x1] %v12446_v22 }
  0x2b   :  { %684 = vst [vmem:[#allocation2 + $0xa8] sm:$0xf] %v12446_v22  ;;  %2682 = vmatpush.bf16.msrb.mxu3 %v12125_v45 }
  0x2c   :  { %685 = vst [vmem:[#allocation2 + $0xac] sm:$0x1] %v12446_v22 }
  0x2d   :  { %686 = vst [vmem:[#allocation2 + $0xb0] sm:$0xf] %v12446_v22 }
  0x2e   :  { %2003 = vmatpush.bf16.msrb.mxu1 %v12100_v21  ;;  %687 = vst [vmem:[#allocation2 + $0xb4] sm:$0x1] %v12446_v22 }
  0x2f   :  { %688 = vst [vmem:[#allocation2 + $0xb8] sm:$0xf] %v12446_v22  ;;  %2683 = vmatpush.bf16.msrb.mxu3 %v12124_v47 }
  0x30   :  { %689 = vst [vmem:[#allocation2 + $0xbc] sm:$0x1] %v12446_v22 }
  0x31   :  { %358 = vmatmul.bf16.gmra.mxu0 %v12049_v9  ;;  %690 = vst [vmem:[#allocation2 + $0xc0] sm:$0xf] %v12446_v22  ;;  %488 = vmatmul.bf16.gmra.mxu1 %v12075_v42  ;;  %v2365_v9 = vrot.slane %v2363_v63, 5 }
  0x32   :  { %691 = vst [vmem:[#allocation2 + $0xc4] sm:$0x1] %v12446_v22  ;;  %2004 = vmatpush.bf16.msrb.mxu1 %v12099_v44  ;;  %508 = vmatmul.bf16.gmra.mxu3 %v12079_v51  ;;  %v975_v51 = vld [vmem:[#allocation2 + $0x10] sm:$0xf] }
  0x33   :  { %692 = vst [vmem:[#allocation2 + $0xc8] sm:$0xf] %v12446_v22  ;;  %2684 = vmatpush.bf16.msrb.mxu3 %v12123_v52  ;;  %v2366_v18 = vor.u32 %v2365_v9, %v2362_v8  ;;  %v987_v8 = vld [vmem:[#allocation2 + $0x20] sm:$0xf] }
  0x34   :  { %693 = vst [vmem:[#allocation2 + $0xcc] sm:$0x1] %v12446_v22 }
  0x35   :  { %694 = vst [vmem:[#allocation2 + $0xd0] sm:$0xf] %v12446_v22 }
  0x36   :  { %695 = vst [vmem:[#allocation2 + $0xd4] sm:$0x1] %v12446_v22  ;;  %2005 = vmatpush.bf16.msrb.mxu1 %v12098_v46 }
  0x37   :  { %696 = vst [vmem:[#allocation2 + $0xd8] sm:$0xf] %v12446_v22  ;;  %2685 = vmatpush.bf16.msrb.mxu3 %v12122_v57  ;;  %v12076_v57 = vld [vmem:[%s15437_s0 + $0xe0] sm:$0xff] }
  0x38   :  { %697 = vst [vmem:[#allocation2 + $0xdc] sm:$0x1] %v12446_v22  ;;  %493 = vmatmul.bf16.vlgmr.msra.gmra.mxu2 %v12076_v57 }
  0x39   :  { %698 = vst [vmem:[#allocation2 + $0xe0] sm:$0xf] %v12446_v22 }
  0x3a   :  { %699 = vst [vmem:[#allocation2 + $0xe4] sm:$0x1] %v12446_v22  ;;  %2006 = vmatpush.bf16.msrb.mxu1 %v12097_v48 }
  0x3b   :  { %700 = vst [vmem:[#allocation2 + $0xe8] sm:$0xf] %v12446_v22  ;;  %2686 = vmatpush.bf16.msrb.mxu3 %v12121_v61 }
  0x3c   :  { %701 = vst [vmem:[#allocation2 + $0xec] sm:$0x1] %v12446_v22 }
  0x3d   :  { %702 = vst [vmem:[#allocation2 + $0xf0] sm:$0xf] %v12446_v22 }
  0x3e   :  { %703 = vst [vmem:[#allocation2 + $0xf4] sm:$0x1] %v12446_v22  ;;  %2007 = vmatpush.bf16.msrb.mxu1 %v12096_v53 }
  0x3f   :  { %704 = vst [vmem:[#allocation2 + $0xf8] sm:$0xf] %v12446_v22  ;;  %2687 = vmatpush.bf16.msrb.mxu3 %v12120_v2 }
  0x40   :  { %705 = vst [vmem:[#allocation2 + $0xfc] sm:$0x1] %v12446_v22 }
  0x41   :  { %363 = vmatmul.bf16.gmra.mxu0 %v12050_v10  ;;  %706 = vst [vmem:[#allocation2 + $0x100] sm:$0xf] %v12446_v22 }
  0x42   :  { %707 = vst [vmem:[#allocation2 + $0x104] sm:$0x1] %v12446_v22 }
  0x43   :  { %708 = vst [vmem:[#allocation2 + $0x108] sm:$0xf] %v12446_v22 }
  0x44   :  { %709 = vst [vmem:[#allocation2 + $0x10c] sm:$0x1] %v12446_v22 }
  0x45   :  { %710 = vst [vmem:[#allocation2 + $0x110] sm:$0xf] %v12446_v22 }
  0x46   :  { %711 = vst [vmem:[#allocation2 + $0x114] sm:$0x1] %v12446_v22 }
  0x47   :  { %712 = vst [vmem:[#allocation2 + $0x118] sm:$0xf] %v12446_v22 }
  0x48   :  { %713 = vst [vmem:[#allocation2 + $0x11c] sm:$0x1] %v12446_v22 }
  0x49   :  { %714 = vst [vmem:[#allocation2 + $0x120] sm:$0xf] %v12446_v22 }
  0x4a   :  { %715 = vst [vmem:[#allocation2 + $0x124] sm:$0x1] %v12446_v22 }
  0x4b   :  { %716 = vst [vmem:[#allocation2 + $0x128] sm:$0xf] %v12446_v22 }
  0x4c   :  { %717 = vst [vmem:[#allocation2 + $0x12c] sm:$0x1] %v12446_v22 }
  0x4d   :  { %718 = vst [vmem:[#allocation2 + $0x130] sm:$0xf] %v12446_v22 }
  0x4e   :  { %719 = vst [vmem:[#allocation2 + $0x134] sm:$0x1] %v12446_v22 }
  0x4f   :  { %720 = vst [vmem:[#allocation2 + $0x138] sm:$0xf] %v12446_v22 }
  0x50   :  { %721 = vst [vmem:[#allocation2 + $0x13c] sm:$0x1] %v12446_v22 }
  0x51   :  { %368 = vmatmul.bf16.gmra.mxu0 %v12051_v11  ;;  %722 = vst [vmem:[#allocation2 + $0x140] sm:$0xf] %v12446_v22 }
  0x52   :  { %723 = vst [vmem:[#allocation2 + $0x144] sm:$0x1] %v12446_v22 }
  0x53   :  { %724 = vst [vmem:[#allocation2 + $0x148] sm:$0xf] %v12446_v22 }
  0x54   :  { %725 = vst [vmem:[#allocation2 + $0x14c] sm:$0x1] %v12446_v22 }
  0x55   :  { %726 = vst [vmem:[#allocation2 + $0x150] sm:$0xf] %v12446_v22 }
  0x56   :  { %727 = vst [vmem:[#allocation2 + $0x154] sm:$0x1] %v12446_v22 }
  0x57   :  { %728 = vst [vmem:[#allocation2 + $0x158] sm:$0xf] %v12446_v22 }
  0x58   :  { %729 = vst [vmem:[#allocation2 + $0x15c] sm:$0x1] %v12446_v22 }
  0x59   :  { %730 = vst [vmem:[#allocation2 + $0x160] sm:$0xf] %v12446_v22 }
  0x5a   :  { %731 = vst [vmem:[#allocation2 + $0x164] sm:$0x1] %v12446_v22 }
  0x5b   :  { %732 = vst [vmem:[#allocation2 + $0x168] sm:$0xf] %v12446_v22 }
  0x5c   :  { %733 = vst [vmem:[#allocation2 + $0x16c] sm:$0x1] %v12446_v22 }
  0x5d   :  { %734 = vst [vmem:[#allocation2 + $0x170] sm:$0xf] %v12446_v22 }
  0x5e   :  { %735 = vst [vmem:[#allocation2 + $0x174] sm:$0x1] %v12446_v22 }
  0x5f   :  { %736 = vst [vmem:[#allocation2 + $0x178] sm:$0xf] %v12446_v22 }
  0x60   :  { %737 = vst [vmem:[#allocation2 + $0x17c] sm:$0x1] %v12446_v22 }
  0x61   :  { %373 = vmatmul.bf16.gmra.mxu0 %v12052_v12  ;;  %738 = vst [vmem:[#allocation2 + $0x180] sm:$0xf] %v12446_v22  ;;  %v2369_v12 = vshll.u32 %v2309_v5, 16  ;;  %v12119_v5 = vld [vmem:[%s15438_s3 + $0x78] sm:$0xff] }
  0x62   :  { %739 = vst [vmem:[#allocation2 + $0x184] sm:$0x1] %v12446_v22  ;;  %2227 = vmatpush.bf16.msrb.mxu2 %v12119_v5 }
  0x63   :  { %742 = vst [vmem:[#allocation2 + $0x190] sm:$0xf] %v12446_v22  ;;  %v2371_v20 = vrot.slane %v2369_v12, 5 }
  0x64   :  { %743 = vst [vmem:[#allocation2 + $0x194] sm:$0x1] %v12446_v22 }
  0x65   :  { %744 = vst [vmem:[#allocation2 + $0x198] sm:$0xf] %v12446_v22 }
  0x66   :  { %745 = vst [vmem:[#allocation2 + $0x19c] sm:$0x1] %v12446_v22 }
  0x67   :  { %746 = vst [vmem:[#allocation2 + $0x1a0] sm:$0xf] %v12446_v22 }
  0x68   :  { %747 = vst [vmem:[#allocation2 + $0x1a4] sm:$0x1] %v12446_v22 }
  0x69   :  { %748 = vst [vmem:[#allocation2 + $0x1a8] sm:$0xf] %v12446_v22 }
  0x6a   :  { %749 = vst [vmem:[#allocation2 + $0x1ac] sm:$0x1] %v12446_v22 }
  0x6b   :  { %750 = vst [vmem:[#allocation2 + $0x1b0] sm:$0xf] %v12446_v22 }
  0x6c   :  { %751 = vst [vmem:[#allocation2 + $0x1b4] sm:$0x1] %v12446_v22 }
  0x6d   :  { %752 = vst [vmem:[#allocation2 + $0x1b8] sm:$0xf] %v12446_v22 }
  0x6e   :  { %753 = vst [vmem:[#allocation2 + $0x1bc] sm:$0x1] %v12446_v22 }
  0x6f   :  { %754 = vst [vmem:[#allocation2 + $0x1c0] sm:$0xf] %v12446_v22 }
  0x70   :  { %755 = vst [vmem:[#allocation2 + $0x1c4] sm:$0x1] %v12446_v22 }
  0x71   :  { %378 = vmatmul.bf16.gmra.mxu0 %v12053_v13  ;;  %756 = vst [vmem:[#allocation2 + $0x1c8] sm:$0xf] %v12446_v22 }
  0x72   :  { %757 = vst [vmem:[#allocation2 + $0x1cc] sm:$0x1] %v12446_v22 }
  0x73   :  { %758 = vst [vmem:[#allocation2 + $0x1d0] sm:$0xf] %v12446_v22 }
  0x74   :  { %759 = vst [vmem:[#allocation2 + $0x1d4] sm:$0x1] %v12446_v22 }
  0x75   :  { %762 = vst [vmem:[#allocation2 + $0x1e0] sm:$0xf] %v12446_v22 }
  0x76   :  { %763 = vst [vmem:[#allocation2 + $0x1e4] sm:$0x1] %v12446_v22 }
  0x77   :  { %764 = vst [vmem:[#allocation2 + $0x1e8] sm:$0xf] %v12446_v22 }
  0x78   :  { %765 = vst [vmem:[#allocation2 + $0x1ec] sm:$0x1] %v12446_v22 }
  0x79   :  { %766 = vst [vmem:[#allocation2 + $0x1f0] sm:$0xf] %v12446_v22 }
  0x7a   :  { %767 = vst [vmem:[#allocation2 + $0x1f4] sm:$0x1] %v12446_v22 }
  0x7b   :  { %768 = vst [vmem:[#allocation2 + $0x1f8] sm:$0xf] %v12446_v22 }
  0x7c   :  { %769 = vst [vmem:[#allocation2 + $0x1fc] sm:$0x1] %v12446_v22 }
  0x7d   :  { %770 = vst [vmem:[#allocation2 + $0x200] sm:$0xf] %v12446_v22 }
  0x7e   :  { %771 = vst [vmem:[#allocation2 + $0x204] sm:$0x1] %v12446_v22 }
  0x7f   :  { %772 = vst [vmem:[#allocation2 + $0x208] sm:$0xf] %v12446_v22 }
  0x80   :  { %773 = vst [vmem:[#allocation2 + $0x20c] sm:$0x1] %v12446_v22 }
  0x81   :  { %383 = vmatmul.bf16.gmra.mxu0 %v12054_v17  ;;  %774 = vst [vmem:[#allocation2 + $0x210] sm:$0xf] %v12446_v22 }
  0x82   :  { %775 = vst [vmem:[#allocation2 + $0x214] sm:$0x1] %v12446_v22 }
  0x83   :  { %776 = vst [vmem:[#allocation2 + $0x218] sm:$0xf] %v12446_v22 }
  0x84   :  { %777 = vst [vmem:[#allocation2 + $0x21c] sm:$0x1] %v12446_v22 }
  0x85   :  { %778 = vst [vmem:[#allocation2 + $0x220] sm:$0xf] %v12446_v22 }
  0x86   :  { %779 = vst [vmem:[#allocation2 + $0x224] sm:$0x1] %v12446_v22 }
  0x87   :  { %782 = vst [vmem:[#allocation2 + $0x230] sm:$0xf] %v12446_v22 }
  0x88   :  { %783 = vst [vmem:[#allocation2 + $0x234] sm:$0x1] %v12446_v22 }
  0x89   :  { %784 = vst [vmem:[#allocation2 + $0x238] sm:$0xf] %v12446_v22 }
  0x8a   :  { %785 = vst [vmem:[#allocation2 + $0x23c] sm:$0x1] %v12446_v22 }
  0x8b   :  { %786 = vst [vmem:[#allocation2 + $0x240] sm:$0xf] %v12446_v22 }
  0x8c   :  { %787 = vst [vmem:[#allocation2 + $0x244] sm:$0x1] %v12446_v22 }
  0x8d   :  { %788 = vst [vmem:[#allocation2 + $0x248] sm:$0xf] %v12446_v22 }
  0x8e   :  { %789 = vst [vmem:[#allocation2 + $0x24c] sm:$0x1] %v12446_v22 }
  0x8f   :  { %790 = vst [vmem:[#allocation2 + $0x250] sm:$0xf] %v12446_v22 }
  0x90   :  { %791 = vst [vmem:[#allocation2 + $0x254] sm:$0x1] %v12446_v22 }
  0x91   :  { %388 = vmatmul.bf16.gmra.mxu0 %v12055_v23  ;;  %792 = vst [vmem:[#allocation2 + $0x258] sm:$0xf] %v12446_v22 }
  0x92   :  { %793 = vst [vmem:[#allocation2 + $0x25c] sm:$0x1] %v12446_v22 }
  0x93   :  { %794 = vst [vmem:[#allocation2 + $0x260] sm:$0xf] %v12446_v22 }
  0x94   :  { %795 = vst [vmem:[#allocation2 + $0x264] sm:$0x1] %v12446_v22 }
  0x95   :  { %796 = vst [vmem:[#allocation2 + $0x268] sm:$0xf] %v12446_v22 }
  0x96   :  { %797 = vst [vmem:[#allocation2 + $0x26c] sm:$0x1] %v12446_v22 }
  0x97   :  { %798 = vst [vmem:[#allocation2 + $0x270] sm:$0xf] %v12446_v22 }
  0x98   :  { %799 = vst [vmem:[#allocation2 + $0x274] sm:$0x1] %v12446_v22 }
  0x9e   :  { %v354_v26 = vpop.f32.mrf.mxu0 }
  0x9f   :  { %v355_v27 = vadd.f32 %v12572_v24, %v354_v26  ;;  %v2367_v26 = vrot.slane %v2366_v18, 4 }
  0xa1   :  { %v514_v28 = vmax.f32 %v355_v27, 0.0  ;;  %393 = vmatmul.bf16.gmra.mxu0 %v12056_v25 }
  0xa3   :  { %v578_v29 = vpack.c.bf16 %v514_v28, %v514_v28 }
  0xa5   :  { %v803_v30 = vshrl.u32 %v578_v29, 16  ;;  %v806_v32 = vshll.u32 %v578_v29, 16 }
  0xa6   :  { %v356_v41 = vpop.f32.mrf.mxu0 }
  0xa7   :  { %v805_v31 = vrot.slane %v803_v30, 7  ;;  %v357_v58 = vadd.f32 %v12572_v24, %v356_v41  ;;  %v2372_v30 = vsel %vm12754_vm8, %v2367_v26, %v2371_v20  ;;  %v996_v26 = vld [vmem:[#allocation2 + $0x2c] sm:$0x1] }
  0xa9   :  { %v808_v37 = vor.u32 %v806_v32, %v805_v31  ;;  %v809_v38 = vrot.slane %v805_v31, 4  ;;  %v515_v0 = vmax.f32 %v357_v58, 0.0  ;;  %v978_v58 = vld [vmem:[#allocation2 + $0x14] sm:$0x1] }
  0xab   :  { %v967_v39 = vsel %vm12590_vm4, %v808_v37, %v966_v34  ;;  %v973_v40 = vsel %vm12595_vm5, %v809_v38, %v972_v36  ;;  %v579_v15 = vpack.c.bf16 %v515_v0, %v515_v0  ;;  %v2600_v37 = vunpack.c.l.b16 %v2372_v30 }
  0xac   :  { %968 = vst [vmem:[#allocation2 + $0x8] sm:$0xf] %v967_v39 }
  0xad   :  { %974 = vst [vmem:[#allocation2 + $0xc] sm:$0x1] %v973_v40  ;;  %v811_v31 = vshrl.u32 %v579_v15, 16  ;;  %v814_v48 = vshll.u32 %v579_v15, 16  ;;  %v990_v15 = vld [vmem:[#allocation2 + $0x24] sm:$0x1] }
  0xae   :  { %v359_v49 = vpop.f32.mrf.mxu0 }
  0xaf   :  { %v360_v1 = vadd.f32 %v12572_v24, %v359_v49  ;;  %v813_v44 = vrot.slane %v811_v31, 7 }
  0xb1   :  { %398 = vmatmul.bf16.gmra.mxu0 %v12057_v50  ;;  %v516_v10 = vmax.f32 %v360_v1, 0.0  ;;  %v816_v53 = vor.u32 %v814_v48, %v813_v44 }
  0xb3   :  { %v12088_v55 = vld [vmem:[#allocation2 + $0x4] sm:$0xf0]  ;;  %v580_v27 = vpack.c.bf16 %v516_v10, %v516_v10 }
  0xb4   :  { %v10467_v56 = vor.u32 %v12088_v55, %v10466_v54  ;;  %v2310_v6 = vld [vmem:[#allocation2 + $0x8] sm:$0xf]  ;;  %v2311_v7 = vld [vmem:[#allocation2 + $0xc] sm:$0x1]  ;;  %v817_v54 = vrot.slane %v813_v44, 4 }
  0xb5   :  { %v2374_v13 = vshrl.u32 %v2310_v6, 16  ;;  %v2377_v14 = vshll.u32 %v2310_v6, 16  ;;  %v2383_v25 = vshll.u32 %v2311_v7, 16  ;;  %v819_v38 = vshrl.u32 %v580_v27, 16  ;;  %v1008_v44 = vld [vmem:[#allocation2 + $0x3c] sm:$0x1] }
  0xb6   :  { %v361_v59 = vpop.f32.mrf.mxu0  ;;  %2008 = vmatmul.bf16.vlgmr.msrb.gmra.mxu1 %v10467_v56  ;;  %v822_v55 = vshll.u32 %v580_v27, 16  ;;  %v976_v6 = vsel %vm12590_vm4, %v816_v53, %v975_v51 }
  0xb7   :  { %v362_v3 = vadd.f32 %v12572_v24, %v361_v59  ;;  %v2376_v21 = vrot.slane %v2374_v13, 4  ;;  %v2379_v23 = vrot.slane %v2377_v14, 5  ;;  %v2385_v36 = vrot.slane %v2383_v25, 5  ;;  %v12118_v14 = vld [vmem:[%s15438_s3 + $0x70] sm:$0xff]  ;;  %977 = vst [vmem:[#allocation2 + $0x10] sm:$0xf] %v976_v6 }
  0xb8   :  { %v821_v49 = vrot.slane %v819_v38, 7  ;;  %2228 = vmatpush.bf16.msrb.mxu2 %v12118_v14 }
  0xb9   :  { %v517_v16 = vmax.f32 %v362_v3, 0.0  ;;  %v2380_v29 = vor.u32 %v2379_v23, %v2376_v21  ;;  %v984_v3 = vld [vmem:[#allocation2 + $0x1c] sm:$0x1]  ;;  %v993_v21 = vld [vmem:[#allocation2 + $0x28] sm:$0xf] }
  0xba   :  { %v824_v61 = vor.u32 %v822_v55, %v821_v49  ;;  %v825_v2 = vrot.slane %v821_v49, 4 }
  0xbb   :  { %v581_v32 = vpack.c.bf16 %v517_v16, %v517_v16  ;;  %v2381_v34 = vrot.slane %v2380_v29, 4 }
  0xbc   :  { %v982_v22 = vsel %vm12590_vm4, %v824_v61, %v981_v62  ;;  %v985_v18 = vsel %vm12595_vm5, %v825_v2, %v984_v3 }
  0xbd   :  { %v2386_v40 = vsel %vm12754_vm8, %v2381_v34, %v2385_v36  ;;  %v827_v45 = vshrl.u32 %v581_v32, 16  ;;  %v830_v63 = vshll.u32 %v581_v32, 16  ;;  %983 = vst [vmem:[#allocation2 + $0x18] sm:$0xf] %v982_v22  ;;  %v12117_v32 = vld [vmem:[%s15438_s3 + $0x68] sm:$0xff] }
  0xbe   :  { %v364_v11 = vpop.f32.mrf.mxu0  ;;  %v2601_v42 = vunpack.c.l.b16 %v2386_v40  ;;  %986 = vst [vmem:[#allocation2 + $0x1c] sm:$0x1] %v985_v18  ;;  %v1002_v36 = vld [vmem:[#allocation2 + $0x34] sm:$0x1]  ;;  %2229 = vmatpush.bf16.msrb.mxu2 %v12117_v32  ;;  %v10470_v49 = vld [vmem:[#allocation2 + $0x10] sm:$0xf] }
  0xbf   :  { %v365_v17 = vadd.f32 %v12572_v24, %v364_v11  ;;  %v829_v56 = vrot.slane %v827_v45, 7  ;;  %v979_v11 = vsel %vm12595_vm5, %v817_v54, %v978_v58  ;;  %v1014_v18 = vld [vmem:[#allocation2 + $0x44] sm:$0x1] }
  0xc0   :  { %v2616_v46 = vpack.c.b16 %v2601_v42, %v2600_v37  ;;  %980 = vst [vmem:[#allocation2 + $0x14] sm:$0x1] %v979_v11 }
  0xc1   :  { %403 = vmatmul.bf16.gmra.mxu0 %v12058_v4  ;;  %v518_v28 = vmax.f32 %v365_v17, 0.0  ;;  %v832_v7 = vor.u32 %v830_v63, %v829_v56  ;;  %v833_v12 = vrot.slane %v829_v56, 4  ;;  %v12060_v56 = vld [vmem:[%s15437_s0 + $0x60] sm:$0xff] }
  0xc2   :  { %2688 = vmatmul.bf16.vlgmr.msrb.gmra.mxu3 %v2616_v46 }
  0xc3   :  { %v582_v39 = vpack.c.bf16 %v518_v28, %v518_v28  ;;  %v988_v25 = vsel %vm12590_vm4, %v832_v7, %v987_v8  ;;  %v999_v28 = vld [vmem:[#allocation2 + $0x30] sm:$0xf]  ;;  %v991_v29 = vsel %vm12595_vm5, %v833_v12, %v990_v15  ;;  %v12116_v15 = vld [vmem:[%s15438_s3 + $0x60] sm:$0xff] }
  0xc4   :  { %989 = vst [vmem:[#allocation2 + $0x20] sm:$0xf] %v988_v25  ;;  %v12089_v57 = vld [vmem:[#allocation2 + $0x14] sm:$0xf0]  ;;  %2230 = vmatpush.bf16.msrb.mxu2 %v12116_v15 }
  0xc5   :  { %v835_v50 = vshrl.u32 %v582_v39, 16  ;;  %v838_v9 = vshll.u32 %v582_v39, 16  ;;  %992 = vst [vmem:[#allocation2 + $0x24] sm:$0x1] %v991_v29  ;;  %v2314_v58 = vld [vmem:[#allocation2 + $0x18] sm:$0xf] }
  0xc6   :  { %v366_v41 = vpop.f32.mrf.mxu0  ;;  %v2315_v61 = vld [vmem:[#allocation2 + $0x1c] sm:$0x1]  ;;  %v2405_v2 = vshll.u32 %v2314_v58, 16  ;;  %v12077_v29 = vld [vmem:[%s15437_s0 + $0xe8] sm:$0xff] }
  0xc7   :  { %v367_v43 = vadd.f32 %v12572_v24, %v366_v41  ;;  %v837_v0 = vrot.slane %v835_v50, 7  ;;  %v2312_v50 = vld [vmem:[#allocation2 + $0x10] sm:$0xf]  ;;  %v2313_v53 = vld [vmem:[#allocation2 + $0x14] sm:$0x1]  ;;  %498 = vmatmul.bf16.gmra.mxu2 %v12077_v29 }
  0xc8   :  { %v2388_v54 = vshrl.u32 %v2312_v50, 16  ;;  %v2391_v55 = vshll.u32 %v2312_v50, 16  ;;  %v10546_v29 = vld [vmem:[#allocation2 + $0xa0] sm:$0xf] }
  0xc9   :  { %v519_v47 = vmax.f32 %v367_v43, 0.0  ;;  %v840_v16 = vor.u32 %v838_v9, %v837_v0  ;;  %v841_v20 = vrot.slane %v837_v0, 4  ;;  %v1005_v43 = vld [vmem:[#allocation2 + $0x38] sm:$0xf]  ;;  %v2397_v0 = vshll.u32 %v2313_v53, 16 }
  0xca   :  { %v2390_v62 = vrot.slane %v2388_v54, 4  ;;  %v2393_v63 = vrot.slane %v2391_v55, 5  ;;  %v2407_v9 = vrot.slane %v2405_v2, 5 }
  0xcb   :  { %v583_v52 = vpack.c.bf16 %v519_v47, %v519_v47  ;;  %v994_v34 = vsel %vm12590_vm4, %v840_v16, %v993_v21  ;;  %v997_v38 = vsel %vm12595_vm5, %v841_v20, %v996_v26  ;;  %v2316_v7 = vld [vmem:[#allocation2 + $0x20] sm:$0xf] }
  0xcc   :  { %995 = vst [vmem:[#allocation2 + $0x28] sm:$0xf] %v994_v34  ;;  %v2416_v20 = vshrl.u32 %v2316_v7, 16  ;;  %v2419_v21 = vshll.u32 %v2316_v7, 16  ;;  %v2317_v53 = vld [vmem:[#allocation2 + $0x24] sm:$0x1] }
  0xcd   :  { %v843_v59 = vshrl.u32 %v583_v52, 16  ;;  %v846_v17 = vshll.u32 %v583_v52, 16  ;;  %998 = vst [vmem:[#allocation2 + $0x2c] sm:$0x1] %v997_v38 }
  0xce   :  { %v369_v1 = vpop.f32.mrf.mxu0  ;;  %v2418_v32 = vrot.slane %v2416_v20, 4  ;;  %v2421_v34 = vrot.slane %v2419_v21, 5 }
  0xcf   :  { %v370_v4 = vadd.f32 %v12572_v24, %v369_v1  ;;  %v845_v10 = vrot.slane %v843_v59, 7  ;;  %v2402_v1 = vshrl.u32 %v2314_v58, 16  ;;  %v10474_v58 = vld [vmem:[#allocation2 + $0x20] sm:$0xf] }
  0xd0   :  { %v2422_v54 = vor.u32 %v2421_v34, %v2418_v32 }
  0xd1   :  { %v520_v13 = vmax.f32 %v370_v4, 0.0  ;;  %408 = vmatmul.bf16.gmra.mxu0 %v12059_v60  ;;  %v848_v27 = vor.u32 %v846_v17, %v845_v10  ;;  %v849_v30 = vrot.slane %v845_v10, 4  ;;  %v10471_v60 = vor.u32 %v12089_v57, %v10470_v49  ;;  %v1011_v17 = vld [vmem:[#allocation2 + $0x40] sm:$0xf] }
  0xd2   :  { %v2394_v4 = vor.u32 %v2393_v63, %v2390_v62  ;;  %v2404_v8 = vrot.slane %v2402_v1, 4  ;;  %v2411_v10 = vshll.u32 %v2315_v61, 16 }
  0xd3   :  { %v584_v23 = vpack.c.bf16 %v520_v13, %v520_v13  ;;  %v1000_v42 = vsel %vm12590_vm4, %v848_v27, %v999_v28  ;;  %v1003_v45 = vsel %vm12595_vm5, %v849_v30, %v1002_v36  ;;  %2013 = vmatmul.bf16.gmra.mxu1 %v10471_v60  ;;  %v2399_v13 = vrot.slane %v2397_v0, 5  ;;  %v2318_v28 = vld [vmem:[#allocation2 + $0x28] sm:$0xf]  ;;  %v12115_v36 = vld [vmem:[%s15438_s3 + $0x58] sm:$0xff] }
  0xd4   :  { %1001 = vst [vmem:[#allocation2 + $0x30] sm:$0xf] %v1000_v42  ;;  %v2395_v12 = vrot.slane %v2394_v4, 4  ;;  %v2408_v16 = vor.u32 %v2407_v9, %v2404_v8  ;;  %v2433_v50 = vshll.u32 %v2318_v28, 16  ;;  %2231 = vmatpush.bf16.msrb.mxu2 %v12115_v36  ;;  %v2423_v8 = vrot.slane %v2422_v54, 4 }
  0xd5   :  { %v851_v31 = vshrl.u32 %v584_v23, 16  ;;  %v854_v40 = vshll.u32 %v584_v23, 16  ;;  %1004 = vst [vmem:[#allocation2 + $0x34] sm:$0x1] %v1003_v45  ;;  %v2430_v45 = vshrl.u32 %v2318_v28, 16 }
  0xd6   :  { %v371_v37 = vpop.f32.mrf.mxu0  ;;  %v2400_v23 = vsel %vm12754_vm8, %v2395_v12, %v2399_v13  ;;  %v2409_v30 = vrot.slane %v2408_v16, 4  ;;  %v2435_v61 = vrot.slane %v2433_v50, 5 }
  0xd7   :  { %v853_v39 = vrot.slane %v851_v31, 7  ;;  %v372_v41 = vadd.f32 %v12572_v24, %v371_v37  ;;  %v2413_v31 = vrot.slane %v2411_v10, 5  ;;  %v2602_v42 = vunpack.c.l.b16 %v2400_v23  ;;  %v12061_v10 = vld [vmem:[%s15437_s0 + $0x68] sm:$0xff]  ;;  %v1232_v23 = vld [vmem:[#allocation2 + $0xb0] sm:$0xf] }
  0xd8   :  { %v2432_v55 = vrot.slane %v2430_v45, 4 }
  0xd9   :  { %v856_v46 = vor.u32 %v854_v40, %v853_v39  ;;  %v857_v47 = vrot.slane %v853_v39, 4  ;;  %v521_v48 = vmax.f32 %v372_v41, 0.0  ;;  %v12090_v39 = vld [vmem:[#allocation2 + $0x24] sm:$0xf0]  ;;  %v2414_v41 = vsel %vm12754_vm8, %v2409_v30, %v2413_v31 }
  0xda   :  { %v10475_v62 = vor.u32 %v12090_v39, %v10474_v58  ;;  %v2436_v4 = vor.u32 %v2435_v61, %v2432_v55  ;;  %v1238_v55 = vld [vmem:[#allocation2 + $0xb8] sm:$0xf] }
  0xdb   :  { %v1006_v51 = vsel %vm12590_vm4, %v856_v46, %v1005_v43  ;;  %v1009_v52 = vsel %vm12595_vm5, %v857_v47, %v1008_v44  ;;  %v585_v59 = vpack.c.bf16 %v521_v48, %v521_v48  ;;  %v1226_v43 = vld [vmem:[#allocation2 + $0xa8] sm:$0xf]  ;;  %v2319_v44 = vld [vmem:[#allocation2 + $0x2c] sm:$0x1]  ;;  %v2603_v47 = vunpack.c.l.b16 %v2414_v41  ;;  %v2320_v15 = vld [vmem:[#allocation2 + $0x30] sm:$0xf] }
  0xdc   :  { %1007 = vst [vmem:[#allocation2 + $0x38] sm:$0xf] %v1006_v51  ;;  %v12114_v51 = vld [vmem:[%s15438_s3 + $0x50] sm:$0xff]  ;;  %v2439_v63 = vshll.u32 %v2319_v44, 16  ;;  %v2437_v9 = vrot.slane %v2436_v4, 4  ;;  %v2444_v32 = vshrl.u32 %v2320_v15, 16 }
  0xdd   :  { %1010 = vst [vmem:[#allocation2 + $0x3c] sm:$0x1] %v1009_v52  ;;  %v859_v5 = vshrl.u32 %v585_v59, 16  ;;  %v862_v11 = vshll.u32 %v585_v59, 16  ;;  %v1229_v52 = vld [vmem:[#allocation2 + $0xac] sm:$0x1]  ;;  %v2617_v57 = vpack.c.b16 %v2603_v47, %v2602_v42  ;;  %2232 = vmatpush.bf16.msrb.mxu2 %v12114_v51 }
  0xde   :  { %v374_v3 = vpop.f32.mrf.mxu0  ;;  %v2447_v34 = vshll.u32 %v2320_v15, 16 }
  0xdf   :  { %v375_v6 = vadd.f32 %v12572_v24, %v374_v3  ;;  %v861_v14 = vrot.slane %v859_v5, 7  ;;  %2693 = vmatmul.bf16.gmra.mxu3 %v2617_v57  ;;  %v2425_v3 = vshll.u32 %v2317_v53, 16  ;;  %v12113_v5 = vld [vmem:[%s15438_s3 + $0x48] sm:$0xff] }
  0xe0   :  { %v2449_v47 = vrot.slane %v2447_v34, 5 }
  0xe1   :  { %v522_v22 = vmax.f32 %v375_v6, 0.0  ;;  %413 = vmatmul.bf16.gmra.mxu0 %v12060_v56  ;;  %v864_v25 = vor.u32 %v862_v11, %v861_v14  ;;  %v865_v26 = vrot.slane %v861_v14, 4  ;;  %v2441_v11 = vrot.slane %v2439_v63, 5  ;;  %2233 = vmatpush.bf16.msrb.mxu2 %v12113_v5 }
  0xe2   :  { %v2427_v14 = vrot.slane %v2425_v3, 5 }
  0xe3   :  { %v586_v27 = vpack.c.bf16 %v522_v22, %v522_v22  ;;  %v1012_v37 = vsel %vm12590_vm4, %v864_v25, %v1011_v17  ;;  %v1015_v38 = vsel %vm12595_vm5, %v865_v26, %v1014_v18  ;;  %v2322_v7 = vld [vmem:[#allocation2 + $0x38] sm:$0xf]  ;;  %2018 = vmatmul.bf16.gmra.mxu1 %v10475_v62  ;;  %v12112_v17 = vld [vmem:[%s15438_s3 + $0x40] sm:$0xff]  ;;  %v2442_v18 = vsel %vm12754_vm8, %v2437_v9, %v2441_v11  ;;  %v10478_v62 = vld [vmem:[#allocation2 + $0x30] sm:$0xf]  ;;  %v484_v9 = vpop.f32.mrf.mxu1 }
  0xe4   :  { %1013 = vst [vmem:[#allocation2 + $0x40] sm:$0xf] %v1012_v37  ;;  %v2458_v16 = vshrl.u32 %v2322_v7, 16  ;;  %v2461_v25 = vshll.u32 %v2322_v7, 16  ;;  %v2428_v26 = vsel %vm12754_vm8, %v2423_v8, %v2427_v14  ;;  %v2605_v36 = vunpack.c.l.b16 %v2442_v18  ;;  %v12091_v54 = vld [vmem:[#allocation2 + $0x34] sm:$0xf0] }
  0xe5   :  { %v1066_v40 = vshrl.u32 %v586_v27, 16  ;;  %1016 = vst [vmem:[#allocation2 + $0x44] sm:$0x1] %v1015_v38  ;;  %v1069_v49 = vshll.u32 %v586_v27, 16  ;;  %v1235_v27 = vld [vmem:[#allocation2 + $0xb4] sm:$0x1]  ;;  %2234 = vmatpush.bf16.msrb.mxu2 %v12112_v17  ;;  %v2604_v44 = vunpack.c.l.b16 %v2428_v26 }
  0xe6   :  { %v376_v46 = vpop.f32.mrf.mxu0  ;;  %v2460_v38 = vrot.slane %v2458_v16, 4  ;;  %v2463_v42 = vrot.slane %v2461_v25, 5  ;;  %v12062_v8 = vld [vmem:[%s15437_s0 + $0x70] sm:$0xff]  ;;  %v1244_v18 = vld [vmem:[#allocation2 + $0xc0] sm:$0xf] }
  0xe7   :  { %v1068_v48 = vrot.slane %v1066_v40, 7  ;;  %v377_v56 = vadd.f32 %v12572_v24, %v376_v46  ;;  %v2446_v46 = vrot.slane %v2444_v32, 4 }
  0xe8   :  { %v2464_v57 = vor.u32 %v2463_v42, %v2460_v38 }
  0xe9   :  { %v1071_v59 = vor.u32 %v1069_v49, %v1068_v48  ;;  %v1072_v60 = vrot.slane %v1068_v48, 4  ;;  %v523_v0 = vmax.f32 %v377_v56, 0.0  ;;  %v2618_v49 = vpack.c.b16 %v2605_v36, %v2604_v44  ;;  %v1241_v56 = vld [vmem:[#allocation2 + $0xbc] sm:$0x1]  ;;  %v12888_v44 = vld [vmem:[%s15436_s2] ss:$0 sm:$0xff] }
  0xea   :  { %v2450_v63 = vor.u32 %v2449_v47, %v2446_v46 }
  0xeb   :  { %v1227_v1 = vsel %vm12590_vm4, %v1071_v59, %v1226_v43  ;;  %v1230_v2 = vsel %vm12595_vm5, %v1072_v60, %v1229_v52  ;;  %v587_v6 = vpack.c.bf16 %v523_v0, %v523_v0  ;;  %v2323_v52 = vld [vmem:[#allocation2 + $0x3c] sm:$0x1]  ;;  %v2321_v60 = vld [vmem:[#allocation2 + $0x34] sm:$0x1] }
  0xec   :  { %1228 = vst [vmem:[#allocation2 + $0xa8] sm:$0xf] %v1227_v1  ;;  %v2467_v0 = vshll.u32 %v2323_v52, 16  ;;  %v10479_v1 = vor.u32 %v12091_v54, %v10478_v62  ;;  %v2453_v5 = vshll.u32 %v2321_v60, 16  ;;  %v1250_v52 = vld [vmem:[#allocation2 + $0xc8] sm:$0xf] }
  0xed   :  { %1231 = vst [vmem:[#allocation2 + $0xac] sm:$0x1] %v1230_v2  ;;  %v1074_v12 = vshrl.u32 %v587_v6, 16  ;;  %v1077_v21 = vshll.u32 %v587_v6, 16  ;;  %v2465_v6 = vrot.slane %v2464_v57, 4 }
  0xee   :  { %v379_v13 = vpop.f32.mrf.mxu0  ;;  %v2469_v11 = vrot.slane %v2467_v0, 5  ;;  %v2455_v16 = vrot.slane %v2453_v5, 5  ;;  %v12063_v5 = vld [vmem:[%s15437_s0 + $0x78] sm:$0xff] }
  0xef   :  { %v380_v22 = vadd.f32 %v12572_v24, %v379_v13  ;;  %v1076_v20 = vrot.slane %v1074_v12, 7  ;;  %2698 = vmatmul.bf16.gmra.mxu3 %v2618_v49  ;;  %v485_v13 = vadd.f32 %v12572_v24, %v484_v9 }
  0xf0   :  { %v2470_v17 = vsel %vm12754_vm8, %v2465_v6, %v2469_v11  ;;  %v1561_v11 = vld [vmem:[#allocation2 + $0x1c0] sm:$0xf] }
  0xf1   :  { %v524_v28 = vmax.f32 %v380_v22, 0.0  ;;  %418 = vmatmul.bf16.gmra.mxu0 %v12061_v10  ;;  %v1079_v30 = vor.u32 %v1077_v21, %v1076_v20  ;;  %v1080_v31 = vrot.slane %v1076_v20, 4  ;;  %v2451_v10 = vrot.slane %v2450_v63, 4  ;;  %v1247_v20 = vld [vmem:[#allocation2 + $0xc4] sm:$0x1] }
  0xf2   :  { %v566_v21 = vmax.f32 %v485_v13, 0.0  ;;  %v1256_v13 = vld [vmem:[#allocation2 + $0xd0] sm:$0xf] }
  0xf3   :  { %v588_v37 = vpack.c.bf16 %v524_v28, %v524_v28  ;;  %v12104_v39 = vld [vmem:[#allocation2 + $0xa4] sm:$0xf0]  ;;  %v1233_v40 = vsel %vm12590_vm4, %v1079_v30, %v1232_v23  ;;  %v1236_v41 = vsel %vm12595_vm5, %v1080_v31, %v1235_v27  ;;  %2023 = vmatmul.bf16.gmra.mxu1 %v10479_v1  ;;  %v2456_v27 = vsel %vm12754_vm8, %v2451_v10, %v2455_v16 }
  0xf4   :  { %v10547_v43 = vor.u32 %v12104_v39, %v10546_v29  ;;  %1234 = vst [vmem:[#allocation2 + $0xb0] sm:$0xf] %v1233_v40  ;;  %v630_v28 = vpack.c.bf16 %v566_v21, %v566_v21  ;;  %v2607_v29 = vunpack.c.l.b16 %v2470_v17  ;;  %v2606_v39 = vunpack.c.l.b16 %v2456_v27 }
  0xf5   :  { %v1082_v45 = vshrl.u32 %v588_v37, 16  ;;  %1237 = vst [vmem:[#allocation2 + $0xb4] sm:$0x1] %v1236_v41  ;;  %v1085_v51 = vshll.u32 %v588_v37, 16  ;;  %v486_v41 = vpop.f32.mrf.mxu1 }
  0xf6   :  { %v381_v48 = vpop.f32.mrf.mxu0  ;;  %2235 = vmatmul.bf16.vlgmr.msrb.gmra.mxu2 %v10547_v43  ;;  %v1419_v37 = vshrl.u32 %v630_v28, 16  ;;  %v1422_v38 = vshll.u32 %v630_v28, 16  ;;  %v2619_v46 = vpack.c.b16 %v2607_v29, %v2606_v39 }
  0xf7   :  { %v1084_v50 = vrot.slane %v1082_v45, 7  ;;  %v382_v53 = vadd.f32 %v12572_v24, %v381_v48  ;;  %v487_v45 = vadd.f32 %v12888_v44, %v486_v41  ;;  %v1265_v41 = vld [vmem:[#allocation2 + $0xdc] sm:$0x1] }
  0xf8   :  { %v1421_v43 = vrot.slane %v1419_v37, 7 }
  0xf9   :  { %v1087_v58 = vor.u32 %v1085_v51, %v1084_v50  ;;  %v1088_v59 = vrot.slane %v1084_v50, 4  ;;  %v525_v61 = vmax.f32 %v382_v53, 0.0  ;;  %v1555_v50 = vld [vmem:[#allocation2 + $0x1b8] sm:$0xf]  ;;  %v1558_v51 = vld [vmem:[#allocation2 + $0x1bc] sm:$0x1] }
  0xfa   :  { %v1253_v53 = vld [vmem:[#allocation2 + $0xcc] sm:$0x1]  ;;  %v1424_v54 = vor.u32 %v1422_v38, %v1421_v43 }
  0xfb   :  { %v1239_v2 = vsel %vm12590_vm4, %v1087_v58, %v1238_v55  ;;  %v1242_v3 = vsel %vm12595_vm5, %v1088_v59, %v1241_v56  ;;  %v589_v4 = vpack.c.bf16 %v525_v61, %v525_v61  ;;  %v10550_v32 = vld [vmem:[#allocation2 + $0xb0] sm:$0xf]  ;;  %v1425_v55 = vrot.slane %v1421_v43, 4 }
  0xfc   :  { %1240 = vst [vmem:[#allocation2 + $0xb8] sm:$0xf] %v1239_v2  ;;  %v567_v56 = vmax.f32 %v487_v45, 0.0  ;;  %v1556_v60 = vsel %vm12590_vm4, %v1424_v54, %v1555_v50  ;;  %v1815_v54 = vld [vmem:[#allocation2 + $0x25c] sm:$0x1] }
  0xfd   :  { %1243 = vst [vmem:[#allocation2 + $0xbc] sm:$0x1] %v1242_v3  ;;  %v1090_v7 = vshrl.u32 %v589_v4, 16  ;;  %v1093_v22 = vshll.u32 %v589_v4, 16  ;;  %v1559_v61 = vsel %vm12595_vm5, %v1425_v55, %v1558_v51 }
  0xfe   :  { %v384_v12 = vpop.f32.mrf.mxu0  ;;  %v631_v62 = vpack.c.bf16 %v567_v56, %v567_v56  ;;  %1557 = vst [vmem:[#allocation2 + $0x1b8] sm:$0xf] %v1556_v60 }
  0xff   :  { %v1092_v14 = vrot.slane %v1090_v7, 7  ;;  %v385_v15 = vadd.f32 %v12572_v24, %v384_v12  ;;  %2703 = vmatmul.bf16.gmra.mxu3 %v2619_v46  ;;  %1560 = vst [vmem:[#allocation2 + $0x1bc] sm:$0x1] %v1559_v61  ;;  %v1564_v12 = vld [vmem:[#allocation2 + $0x1c4] sm:$0x1] }
 0x100   :  { %v1427_v2 = vshrl.u32 %v631_v62, 16  ;;  %v1430_v3 = vshll.u32 %v631_v62, 16 }
 0x101   :  { %v1095_v23 = vor.u32 %v1093_v22, %v1092_v14  ;;  %v1096_v25 = vrot.slane %v1092_v14, 4  ;;  %v526_v26 = vmax.f32 %v385_v15, 0.0  ;;  %423 = vmatmul.bf16.gmra.mxu0 %v12062_v8  ;;  %v1259_v14 = vld [vmem:[#allocation2 + $0xd4] sm:$0x1] }
 0x102   :  { %v1429_v7 = vrot.slane %v1427_v2, 7 }
 0x103   :  { %v1245_v30 = vsel %vm12590_vm4, %v1095_v23, %v1244_v18  ;;  %v1248_v24 = vsel %vm12595_vm5, %v1096_v25, %v1247_v20  ;;  %v590_v31 = vpack.c.bf16 %v526_v26, %v526_v26  ;;  %v12105_v34 = vld [vmem:[#allocation2 + $0xb4] sm:$0xf0]  ;;  %v504_v23 = vpop.f32.mrf.mxu3 }
 0x104   :  { %1246 = vst [vmem:[#allocation2 + $0xc0] sm:$0xf] %v1245_v30  ;;  %v10551_v36 = vor.u32 %v12105_v34, %v10550_v32  ;;  %v1432_v22 = vor.u32 %v1430_v3, %v1429_v7  ;;  %v1433_v15 = vrot.slane %v1429_v7, 4  ;;  %v505_v30 = vadd.f32 %v12888_v44, %v504_v23  ;;  %v1268_v3 = vld [vmem:[#allocation2 + $0xe0] sm:$0xf] }
 0x105   :  { %1249 = vst [vmem:[#allocation2 + $0xc4] sm:$0x1] %v1248_v24  ;;  %v1098_v40 = vshrl.u32 %v590_v31, 16  ;;  %v1101_v48 = vshll.u32 %v590_v31, 16  ;;  %v1821_v23 = vld [vmem:[#allocation2 + $0x264] sm:$0x1] }
 0x106   :  { %v386_v42 = vpop.f32.mrf.mxu0  ;;  %2240 = vmatmul.bf16.gmra.mxu2 %v10551_v36  ;;  %v1562_v20 = vsel %vm12590_vm4, %v1432_v22, %v1561_v11  ;;  %v1565_v21 = vsel %vm12595_vm5, %v1433_v15, %v1564_v12  ;;  %v574_v32 = vmax.f32 %v505_v30, 0.0 }
 0x107   :  { %v1100_v47 = vrot.slane %v1098_v40, 7  ;;  %v387_v49 = vadd.f32 %v12888_v44, %v386_v42  ;;  %1563 = vst [vmem:[#allocation2 + $0x1c0] sm:$0xf] %v1562_v20  ;;  %v1262_v40 = vld [vmem:[#allocation2 + $0xd8] sm:$0xf] }
 0x108   :  { %1566 = vst [vmem:[#allocation2 + $0x1c4] sm:$0x1] %v1565_v21  ;;  %v638_v39 = vpack.c.bf16 %v574_v32, %v574_v32  ;;  %v1818_v20 = vld [vmem:[#allocation2 + $0x260] sm:$0xf]  ;;  %v1486_v32 = vld [vmem:[#allocation2 + $0x14c] sm:$0x1] }
 0x109   :  { %v1103_v57 = vor.u32 %v1101_v48, %v1100_v47  ;;  %v1104_v58 = vrot.slane %v1100_v47, 4  ;;  %v527_v59 = vmax.f32 %v387_v49, 0.0 }
 0x10a   :  { %v1676_v46 = vshrl.u32 %v638_v39, 16  ;;  %v1679_v47 = vshll.u32 %v638_v39, 16 }
 0x10b   :  { %v1251_v63 = vsel %vm12590_vm4, %v1103_v57, %v1250_v52  ;;  %v1254_v0 = vsel %vm12595_vm5, %v1104_v58, %v1253_v53  ;;  %v591_v1 = vpack.c.bf16 %v527_v59, %v527_v59  ;;  %v10554_v28 = vld [vmem:[#allocation2 + $0xc0] sm:$0xf]  ;;  %v506_v52 = vpop.f32.mrf.mxu3  ;;  %v1812_v53 = vld [vmem:[#allocation2 + $0x258] sm:$0xf] }
 0x10c   :  { %1252 = vst [vmem:[#allocation2 + $0xc8] sm:$0xf] %v1251_v63  ;;  %v1678_v51 = vrot.slane %v1676_v46, 7  ;;  %v507_v55 = vadd.f32 %v12888_v44, %v506_v52  ;;  %v12064_v57 = vld [vmem:[%s15437_s0 + $0x80] sm:$0xff] }
 0x10d   :  { %1255 = vst [vmem:[#allocation2 + $0xcc] sm:$0x1] %v1254_v0  ;;  %v1106_v4 = vshrl.u32 %v591_v1, 16  ;;  %v1109_v9 = vshll.u32 %v591_v1, 16 }
 0x10e   :  { %v389_v6 = vpop.f32.mrf.mxu0  ;;  %v1681_v58 = vor.u32 %v1679_v47, %v1678_v51  ;;  %v1682_v59 = vrot.slane %v1678_v51, 4  ;;  %v575_v62 = vmax.f32 %v507_v55, 0.0  ;;  %v1570_v51 = vld [vmem:[#allocation2 + $0x1cc] sm:$0x1] }
 0x10f   :  { %v1108_v8 = vrot.slane %v1106_v4, 7  ;;  %v390_v10 = vadd.f32 %v12888_v44, %v389_v6  ;;  %v1271_v4 = vld [vmem:[#allocation2 + $0xe4] sm:$0x1] }
 0x110   :  { %v1813_v1 = vsel %vm12590_vm4, %v1681_v58, %v1812_v53  ;;  %v1816_v2 = vsel %vm12595_vm5, %v1682_v59, %v1815_v54  ;;  %v12065_v53 = vld [vmem:[%s15437_s0 + $0x88] sm:$0xff] }
 0x111   :  { %v1111_v16 = vor.u32 %v1109_v9, %v1108_v8  ;;  %v1112_v17 = vrot.slane %v1108_v8, 4  ;;  %v528_v18 = vmax.f32 %v390_v10, 0.0  ;;  %428 = vmatmul.bf16.gmra.mxu0 %v12063_v5  ;;  %1814 = vst [vmem:[#allocation2 + $0x258] sm:$0xf] %v1813_v1  ;;  %v639_v5 = vpack.c.bf16 %v575_v62, %v575_v62 }
 0x112   :  { %1817 = vst [vmem:[#allocation2 + $0x25c] sm:$0x1] %v1816_v2 }
 0x113   :  { %v1257_v25 = vsel %vm12590_vm4, %v1111_v16, %v1256_v13  ;;  %v1260_v26 = vsel %vm12595_vm5, %v1112_v17, %v1259_v14  ;;  %v592_v27 = vpack.c.bf16 %v528_v18, %v528_v18  ;;  %v12106_v29 = vld [vmem:[#allocation2 + $0xc4] sm:$0xf0]  ;;  %v1684_v9 = vshrl.u32 %v639_v5, 16  ;;  %v489_v14 = vpop.f32.mrf.mxu1 }
 0x114   :  { %1258 = vst [vmem:[#allocation2 + $0xd0] sm:$0xf] %v1257_v25  ;;  %v10555_v24 = vor.u32 %v12106_v29, %v10554_v28  ;;  %v1687_v10 = vshll.u32 %v639_v5, 16  ;;  %v490_v16 = vadd.f32 %v12888_v44, %v489_v14 }
 0x115   :  { %1261 = vst [vmem:[#allocation2 + $0xd4] sm:$0x1] %v1260_v26  ;;  %v1114_v31 = vshrl.u32 %v592_v27, 16  ;;  %v1117_v37 = vshll.u32 %v592_v27, 16  ;;  %v1686_v18 = vrot.slane %v1684_v9, 7 }
 0x116   :  { %v391_v34 = vpop.f32.mrf.mxu0  ;;  %2245 = vmatmul.bf16.gmra.mxu2 %v10555_v24  ;;  %v568_v25 = vmax.f32 %v490_v16, 0.0 }
 0x117   :  { %v1116_v36 = vrot.slane %v1114_v31, 7  ;;  %v392_v38 = vadd.f32 %v12888_v44, %v391_v34  ;;  %v1689_v27 = vor.u32 %v1687_v10, %v1686_v18  ;;  %v1690_v28 = vrot.slane %v1686_v18, 4  ;;  %v1483_v31 = vld [vmem:[#allocation2 + $0x148] sm:$0xf] }
 0x118   :  { %v632_v34 = vpack.c.bf16 %v568_v25, %v568_v25 }
 0x119   :  { %v1119_v42 = vor.u32 %v1117_v37, %v1116_v36  ;;  %v1120_v43 = vrot.slane %v1116_v36, 4  ;;  %v529_v45 = vmax.f32 %v392_v38, 0.0  ;;  %v1819_v36 = vsel %vm12590_vm4, %v1689_v27, %v1818_v20  ;;  %v1495_v27 = vld [vmem:[#allocation2 + $0x158] sm:$0xf] }
 0x11a   :  { %v1822_v37 = vsel %vm12595_vm5, %v1690_v28, %v1821_v23  ;;  %1820 = vst [vmem:[#allocation2 + $0x260] sm:$0xf] %v1819_v36  ;;  %v1498_v28 = vld [vmem:[#allocation2 + $0x15c] sm:$0x1] }
 0x11b   :  { %v1263_v48 = vsel %vm12590_vm4, %v1119_v42, %v1262_v40  ;;  %v1266_v49 = vsel %vm12595_vm5, %v1120_v43, %v1265_v41  ;;  %v593_v50 = vpack.c.bf16 %v529_v45, %v529_v45  ;;  %v10558_v22 = vld [vmem:[#allocation2 + $0xd0] sm:$0xf]  ;;  %v1435_v41 = vshrl.u32 %v632_v34, 16  ;;  %1823 = vst [vmem:[#allocation2 + $0x264] sm:$0x1] %v1822_v37  ;;  %v491_v47 = vpop.f32.mrf.mxu1 }
 0x11c   :  { %1264 = vst [vmem:[#allocation2 + $0xd8] sm:$0xf] %v1263_v48  ;;  %v1438_v42 = vshll.u32 %v632_v34, 16 }
 0x11d   :  { %1267 = vst [vmem:[#allocation2 + $0xdc] sm:$0x1] %v1266_v49  ;;  %v1122_v56 = vshrl.u32 %v593_v50, 16  ;;  %v1125_v60 = vshll.u32 %v593_v50, 16  ;;  %v1437_v48 = vrot.slane %v1435_v41, 7  ;;  %v492_v50 = vadd.f32 %v12888_v44, %v491_v47 }
 0x11e   :  { %v394_v61 = vpop.f32.mrf.mxu0  ;;  %v1567_v49 = vld [vmem:[#allocation2 + $0x1c8] sm:$0xf] }
 0x11f   :  { %v1124_v63 = vrot.slane %v1122_v56, 7  ;;  %v395_v0 = vadd.f32 %v12888_v44, %v394_v61  ;;  %v1440_v54 = vor.u32 %v1438_v42, %v1437_v48  ;;  %v1441_v55 = vrot.slane %v1437_v48, 4  ;;  %v12066_v42 = vld [vmem:[%s15437_s0 + $0x90] sm:$0xff] }
 0x120   :  { %v569_v56 = vmax.f32 %v492_v50, 0.0 }
 0x121   :  { %v1127_v6 = vor.u32 %v1125_v60, %v1124_v63  ;;  %v1128_v7 = vrot.slane %v1124_v63, 4  ;;  %v530_v8 = vmax.f32 %v395_v0, 0.0  ;;  %433 = vmatmul.bf16.gmra.mxu0 %v12064_v57  ;;  %v1568_v61 = vsel %vm12590_vm4, %v1440_v54, %v1567_v49  ;;  %v1489_v63 = vld [vmem:[#allocation2 + $0x150] sm:$0xf]  ;;  %v1492_v0 = vld [vmem:[#allocation2 + $0x154] sm:$0x1] }
 0x122   :  { %v1571_v62 = vsel %vm12595_vm5, %v1441_v55, %v1570_v51  ;;  %v633_v1 = vpack.c.bf16 %v569_v56, %v569_v56  ;;  %1569 = vst [vmem:[#allocation2 + $0x1c8] sm:$0xf] %v1568_v61  ;;  %v1501_v56 = vld [vmem:[#allocation2 + $0x160] sm:$0xf] }
 0x123   :  { %v1269_v11 = vsel %vm12590_vm4, %v1127_v6, %v1268_v3  ;;  %v1272_v12 = vsel %vm12595_vm5, %v1128_v7, %v1271_v4  ;;  %v594_v13 = vpack.c.bf16 %v530_v8, %v530_v8  ;;  %v12107_v15 = vld [vmem:[#allocation2 + $0xd4] sm:$0xf0]  ;;  %1572 = vst [vmem:[#allocation2 + $0x1cc] sm:$0x1] %v1571_v62 }
 0x124   :  { %1270 = vst [vmem:[#allocation2 + $0xe0] sm:$0xf] %v1269_v11  ;;  %v10559_v17 = vor.u32 %v12107_v15, %v10558_v22  ;;  %v1443_v5 = vshrl.u32 %v633_v1, 16  ;;  %v1446_v6 = vshll.u32 %v633_v1, 16  ;;  %v1573_v11 = vld [vmem:[#allocation2 + $0x1d0] sm:$0xf] }
 0x125   :  { %1273 = vst [vmem:[#allocation2 + $0xe4] sm:$0x1] %v1272_v12  ;;  %v1323_v21 = vshrl.u32 %v594_v13, 16  ;;  %v1326_v30 = vshll.u32 %v594_v13, 16  ;;  %v509_v12 = vpop.f32.mrf.mxu3  ;;  %v1576_v13 = vld [vmem:[#allocation2 + $0x1d4] sm:$0x1] }
 0x126   :  { %v396_v26 = vpop.f32.mrf.mxu0  ;;  %2250 = vmatmul.bf16.gmra.mxu2 %v10559_v17  ;;  %v1445_v10 = vrot.slane %v1443_v5, 7  ;;  %v510_v22 = vadd.f32 %v12888_v44, %v509_v12 }
 0x127   :  { %v1325_v29 = vrot.slane %v1323_v21, 7  ;;  %v397_v24 = vadd.f32 %v12888_v44, %v396_v26 }
 0x128   :  { %v1448_v15 = vor.u32 %v1446_v6, %v1445_v10  ;;  %v1449_v16 = vrot.slane %v1445_v10, 4  ;;  %v576_v21 = vmax.f32 %v510_v22, 0.0  ;;  %v1833_v6 = vld [vmem:[#allocation2 + $0x274] sm:$0x1] }
 0x129   :  { %v1328_v38 = vor.u32 %v1326_v30, %v1325_v29  ;;  %v1329_v39 = vrot.slane %v1325_v29, 4  ;;  %v531_v40 = vmax.f32 %v397_v24, 0.0 }
 0x12a   :  { %v1574_v25 = vsel %vm12590_vm4, %v1448_v15, %v1573_v11  ;;  %v1577_v26 = vsel %vm12595_vm5, %v1449_v16, %v1576_v13  ;;  %v640_v24 = vpack.c.bf16 %v576_v21, %v576_v21  ;;  %v1507_v13 = vld [vmem:[#allocation2 + $0x168] sm:$0xf] }
 0x12b   :  { %v1484_v43 = vsel %vm12590_vm4, %v1328_v38, %v1483_v31  ;;  %v1487_v45 = vsel %vm12595_vm5, %v1329_v39, %v1486_v32  ;;  %v595_v46 = vpack.c.bf16 %v531_v40, %v531_v40  ;;  %1575 = vst [vmem:[#allocation2 + $0x1d0] sm:$0xf] %v1574_v25  ;;  %v12067_v25 = vld [vmem:[%s15437_s0 + $0x98] sm:$0xff] }
 0x12c   :  { %1485 = vst [vmem:[#allocation2 + $0x148] sm:$0xf] %v1484_v43  ;;  %v1692_v36 = vshrl.u32 %v640_v24, 16  ;;  %v1695_v37 = vshll.u32 %v640_v24, 16  ;;  %v1824_v43 = vld [vmem:[#allocation2 + $0x268] sm:$0xf] }
 0x12d   :  { %1488 = vst [vmem:[#allocation2 + $0x14c] sm:$0x1] %v1487_v45  ;;  %v1331_v52 = vshrl.u32 %v595_v46, 16  ;;  %v1334_v59 = vshll.u32 %v595_v46, 16  ;;  %v511_v39 = vpop.f32.mrf.mxu3  ;;  %v1827_v45 = vld [vmem:[#allocation2 + $0x26c] sm:$0x1] }
 0x12e   :  { %v399_v57 = vpop.f32.mrf.mxu0  ;;  %1578 = vst [vmem:[#allocation2 + $0x1d4] sm:$0x1] %v1577_v26  ;;  %v1694_v40 = vrot.slane %v1692_v36, 7  ;;  %v512_v41 = vadd.f32 %v12888_v44, %v511_v39  ;;  %v1513_v24 = vld [vmem:[#allocation2 + $0x170] sm:$0xf] }
 0x12f   :  { %v1333_v58 = vrot.slane %v1331_v52, 7  ;;  %v400_v60 = vadd.f32 %v12888_v44, %v399_v57  ;;  %v1504_v57 = vld [vmem:[#allocation2 + $0x164] sm:$0x1] }
 0x130   :  { %v1697_v48 = vor.u32 %v1695_v37, %v1694_v40  ;;  %v1698_v49 = vrot.slane %v1694_v40, 4  ;;  %v577_v50 = vmax.f32 %v512_v41, 0.0 }
 0x131   :  { %v1336_v2 = vor.u32 %v1334_v59, %v1333_v58  ;;  %v1337_v3 = vrot.slane %v1333_v58, 4  ;;  %v532_v4 = vmax.f32 %v400_v60, 0.0  ;;  %438 = vmatmul.bf16.gmra.mxu0 %v12065_v53 }
 0x132   :  { %v1825_v54 = vsel %vm12590_vm4, %v1697_v48, %v1824_v43  ;;  %v1828_v55 = vsel %vm12595_vm5, %v1698_v49, %v1827_v45  ;;  %v641_v58 = vpack.c.bf16 %v577_v50, %v577_v50  ;;  %v1519_v50 = vld [vmem:[#allocation2 + $0x178] sm:$0xf] }
 0x133   :  { %v1490_v7 = vsel %vm12590_vm4, %v1336_v2, %v1489_v63  ;;  %v1493_v8 = vsel %vm12595_vm5, %v1337_v3, %v1492_v0  ;;  %v596_v9 = vpack.c.bf16 %v532_v4, %v532_v4  ;;  %1826 = vst [vmem:[#allocation2 + $0x268] sm:$0xf] %v1825_v54  ;;  %v1830_v4 = vld [vmem:[#allocation2 + $0x270] sm:$0xf] }
 0x134   :  { %1491 = vst [vmem:[#allocation2 + $0x150] sm:$0xf] %v1490_v7  ;;  %v1700_v62 = vshrl.u32 %v641_v58, 16  ;;  %v1703_v63 = vshll.u32 %v641_v58, 16 }
 0x135   :  { %1494 = vst [vmem:[#allocation2 + $0x154] sm:$0x1] %v1493_v8  ;;  %v1339_v14 = vshrl.u32 %v596_v9, 16  ;;  %v1342_v20 = vshll.u32 %v596_v9, 16 }
 0x136   :  { %v401_v17 = vpop.f32.mrf.mxu0  ;;  %1829 = vst [vmem:[#allocation2 + $0x26c] sm:$0x1] %v1828_v55  ;;  %v1702_v3 = vrot.slane %v1700_v62, 7 }
 0x137   :  { %v1341_v18 = vrot.slane %v1339_v14, 7  ;;  %v402_v23 = vadd.f32 %v12888_v44, %v401_v17  ;;  %v1510_v14 = vld [vmem:[#allocation2 + $0x16c] sm:$0x1] }
 0x138   :  { %v1705_v9 = vor.u32 %v1703_v63, %v1702_v3  ;;  %v1706_v10 = vrot.slane %v1702_v3, 4  ;;  %v1788_v63 = vld [vmem:[#allocation2 + $0x238] sm:$0xf] }
 0x139   :  { %v1344_v29 = vor.u32 %v1342_v20, %v1341_v18  ;;  %v1345_v30 = vrot.slane %v1341_v18, 4  ;;  %v533_v31 = vmax.f32 %v402_v23, 0.0 }
 0x13a   :  { %v1831_v22 = vsel %vm12590_vm4, %v1705_v9, %v1830_v4  ;;  %v1834_v15 = vsel %vm12595_vm5, %v1706_v10, %v1833_v6 }
 0x13b   :  { %v1496_v32 = vsel %vm12590_vm4, %v1344_v29, %v1495_v27  ;;  %v1499_v34 = vsel %vm12595_vm5, %v1345_v30, %v1498_v28  ;;  %v597_v38 = vpack.c.bf16 %v533_v31, %v533_v31  ;;  %1832 = vst [vmem:[#allocation2 + $0x270] sm:$0xf] %v1831_v22  ;;  %v1516_v31 = vld [vmem:[#allocation2 + $0x174] sm:$0x1] }
 0x13c   :  { %1497 = vst [vmem:[#allocation2 + $0x158] sm:$0xf] %v1496_v32 }
 0x13d   :  { %1500 = vst [vmem:[#allocation2 + $0x15c] sm:$0x1] %v1499_v34  ;;  %v1347_v46 = vshrl.u32 %v597_v38, 16  ;;  %v1350_v53 = vshll.u32 %v597_v38, 16  ;;  %v494_v34 = vpop.f32.mrf.mxu2 }
 0x13e   :  { %v404_v47 = vpop.f32.mrf.mxu0  ;;  %1835 = vst [vmem:[#allocation2 + $0x274] sm:$0x1] %v1834_v15  ;;  %v495_v38 = vadd.f32 %v12888_v44, %v494_v34 }
 0x13f   :  { %v405_v51 = vadd.f32 %v12888_v44, %v404_v47  ;;  %v1349_v52 = vrot.slane %v1347_v46, 7 }
 0x141   :  { %v534_v59 = vmax.f32 %v405_v51, 0.0  ;;  %443 = vmatmul.bf16.gmra.mxu0 %v12066_v42  ;;  %v1352_v60 = vor.u32 %v1350_v53, %v1349_v52  ;;  %v1353_v61 = vrot.slane %v1349_v52, 4  ;;  %v570_v42 = vmax.f32 %v495_v38, 0.0  ;;  %v1522_v51 = vld [vmem:[#allocation2 + $0x17c] sm:$0x1] }
 0x142   :  { %v1740_v38 = vld [vmem:[#allocation2 + $0x1e8] sm:$0xf] }
 0x143   :  { %v598_v0 = vpack.c.bf16 %v534_v59, %v534_v59  ;;  %v1502_v1 = vsel %vm12590_vm4, %v1352_v60, %v1501_v56  ;;  %v1505_v2 = vsel %vm12595_vm5, %v1353_v61, %v1504_v57  ;;  %v634_v46 = vpack.c.bf16 %v570_v42, %v570_v42 }
 0x144   :  { %1503 = vst [vmem:[#allocation2 + $0x160] sm:$0xf] %v1502_v1 }
 0x145   :  { %v1355_v5 = vshrl.u32 %v598_v0, 16  ;;  %1506 = vst [vmem:[#allocation2 + $0x164] sm:$0x1] %v1505_v2  ;;  %v1358_v7 = vshll.u32 %v598_v0, 16  ;;  %v1644_v52 = vshrl.u32 %v634_v46, 16  ;;  %v1647_v53 = vshll.u32 %v634_v46, 16  ;;  %v496_v57 = vpop.f32.mrf.mxu2 }
 0x146   :  { %v406_v8 = vpop.f32.mrf.mxu0  ;;  %v497_v59 = vadd.f32 %v12888_v44, %v496_v57  ;;  %v1791_v0 = vld [vmem:[#allocation2 + $0x23c] sm:$0x1] }
 0x147   :  { %v1357_v11 = vrot.slane %v1355_v5, 7  ;;  %v407_v12 = vadd.f32 %v12888_v44, %v406_v8  ;;  %v1646_v58 = vrot.slane %v1644_v52, 7  ;;  %v12068_v5 = vld [vmem:[%s15437_s0 + $0xa0] sm:$0xff] }
 0x148   :  { %v571_v3 = vmax.f32 %v497_v59, 0.0 }
 0x149   :  { %v1360_v16 = vor.u32 %v1358_v7, %v1357_v11  ;;  %v1361_v17 = vrot.slane %v1357_v11, 4  ;;  %v535_v18 = vmax.f32 %v407_v12, 0.0  ;;  %v1649_v1 = vor.u32 %v1647_v53, %v1646_v58  ;;  %v1525_v12 = vld [vmem:[#allocation2 + $0x180] sm:$0xf]  ;;  %v12069_v53 = vld [vmem:[%s15437_s0 + $0xa8] sm:$0xff] }
 0x14a   :  { %v1650_v2 = vrot.slane %v1646_v58, 4  ;;  %v635_v9 = vpack.c.bf16 %v571_v3, %v571_v3  ;;  %v1800_v3 = vld [vmem:[#allocation2 + $0x248] sm:$0xf] }
 0x14b   :  { %v1508_v20 = vsel %vm12590_vm4, %v1360_v16, %v1507_v13  ;;  %v1511_v21 = vsel %vm12595_vm5, %v1361_v17, %v1510_v14  ;;  %v599_v23 = vpack.c.bf16 %v535_v18, %v535_v18  ;;  %v1789_v6 = vsel %vm12590_vm4, %v1649_v1, %v1788_v63  ;;  %v1528_v14 = vld [vmem:[#allocation2 + $0x184] sm:$0x1] }
 0x14c   :  { %1509 = vst [vmem:[#allocation2 + $0x168] sm:$0xf] %v1508_v20  ;;  %v1792_v7 = vsel %vm12595_vm5, %v1650_v2, %v1791_v0  ;;  %v1652_v22 = vshrl.u32 %v635_v9, 16  ;;  %v1655_v15 = vshll.u32 %v635_v9, 16 }
 0x14d   :  { %1512 = vst [vmem:[#allocation2 + $0x16c] sm:$0x1] %v1511_v21  ;;  %v1363_v26 = vshrl.u32 %v599_v23, 16  ;;  %v1366_v30 = vshll.u32 %v599_v23, 16 }
 0x14e   :  { %v409_v27 = vpop.f32.mrf.mxu0  ;;  %1790 = vst [vmem:[#allocation2 + $0x238] sm:$0xf] %v1789_v6  ;;  %v1654_v20 = vrot.slane %v1652_v22, 7  ;;  %v13031_v6 = vld [vmem:[%s15439_s4] ss:$0 sm:$0xff] }
 0x14f   :  { %v410_v28 = vadd.f32 %v12888_v44, %v409_v27  ;;  %v1365_v29 = vrot.slane %v1363_v26, 7  ;;  %1793 = vst [vmem:[#allocation2 + $0x23c] sm:$0x1] %v1792_v7  ;;  %v1794_v26 = vld [vmem:[#allocation2 + $0x240] sm:$0xf] }
 0x150   :  { %v1797_v27 = vld [vmem:[#allocation2 + $0x244] sm:$0x1] }
 0x151   :  { %v536_v32 = vmax.f32 %v410_v28, 0.0  ;;  %448 = vmatmul.bf16.gmra.mxu0 %v12067_v25  ;;  %v1368_v36 = vor.u32 %v1366_v30, %v1365_v29  ;;  %v1369_v37 = vrot.slane %v1365_v29, 4  ;;  %v1657_v28 = vor.u32 %v1655_v15, %v1654_v20 }
 0x152   :  { %v1658_v29 = vrot.slane %v1654_v20, 4 }
 0x153   :  { %v600_v39 = vpack.c.bf16 %v536_v32, %v536_v32  ;;  %v1514_v40 = vsel %vm12590_vm4, %v1368_v36, %v1513_v24  ;;  %v1517_v41 = vsel %vm12595_vm5, %v1369_v37, %v1516_v31  ;;  %v1795_v24 = vsel %vm12590_vm4, %v1657_v28, %v1794_v26  ;;  %v1755_v28 = vld [vmem:[#allocation2 + $0x1fc] sm:$0x1] }
 0x154   :  { %1515 = vst [vmem:[#allocation2 + $0x170] sm:$0xf] %v1514_v40  ;;  %v1798_v31 = vsel %vm12595_vm5, %v1658_v29, %v1797_v27  ;;  %v499_v40 = vpop.f32.mrf.mxu2  ;;  %v1752_v27 = vld [vmem:[#allocation2 + $0x1f8] sm:$0xf] }
 0x155   :  { %v1371_v43 = vshrl.u32 %v600_v39, 16  ;;  %1518 = vst [vmem:[#allocation2 + $0x174] sm:$0x1] %v1517_v41  ;;  %v1374_v48 = vshll.u32 %v600_v39, 16  ;;  %v1743_v39 = vld [vmem:[#allocation2 + $0x1ec] sm:$0x1]  ;;  %v2009_v41 = vpop.f32.mrf.mxu1  ;;  %v500_v46 = vadd.f32 %v12888_v44, %v499_v40 }
 0x156   :  { %v411_v45 = vpop.f32.mrf.mxu0  ;;  %1796 = vst [vmem:[#allocation2 + $0x240] sm:$0xf] %v1795_v24 }
 0x157   :  { %v1373_v47 = vrot.slane %v1371_v43, 7  ;;  %v412_v49 = vadd.f32 %v12888_v44, %v411_v45  ;;  %1799 = vst [vmem:[#allocation2 + $0x244] sm:$0x1] %v1798_v31 }
 0x159   :  { %v1376_v54 = vor.u32 %v1374_v48, %v1373_v47  ;;  %v1377_v55 = vrot.slane %v1373_v47, 4  ;;  %v537_v56 = vmax.f32 %v412_v49, 0.0 }
 0x15b   :  { %v1520_v60 = vsel %vm12590_vm4, %v1376_v54, %v1519_v50  ;;  %v1523_v61 = vsel %vm12595_vm5, %v1377_v55, %v1522_v51  ;;  %v601_v62 = vpack.c.bf16 %v537_v56, %v537_v56  ;;  %v572_v50 = vmax.f32 %v500_v46, 0.0  ;;  %v12070_v46 = vld [vmem:[%s15437_s0 + $0xb0] sm:$0xff] }
 0x15c   :  { %1521 = vst [vmem:[#allocation2 + $0x178] sm:$0xf] %v1520_v60  ;;  %v1746_v60 = vld [vmem:[#allocation2 + $0x1f0] sm:$0xf] }
 0x15d   :  { %1524 = vst [vmem:[#allocation2 + $0x17c] sm:$0x1] %v1523_v61  ;;  %v1379_v4 = vshrl.u32 %v601_v62, 16  ;;  %v1382_v11 = vshll.u32 %v601_v62, 16  ;;  %v636_v52 = vpack.c.bf16 %v572_v50, %v572_v50  ;;  %v1749_v61 = vld [vmem:[#allocation2 + $0x1f4] sm:$0x1]  ;;  %v501_v62 = vpop.f32.mrf.mxu2  ;;  %v13033_v7 = vpop.f32.mrf.mxu1 }
 0x15e   :  { %v414_v8 = vpop.f32.mrf.mxu0 }
 0x15f   :  { %v1381_v10 = vrot.slane %v1379_v4, 7  ;;  %v415_v13 = vadd.f32 %v12888_v44, %v414_v8  ;;  %v1660_v57 = vshrl.u32 %v636_v52, 16  ;;  %v1663_v58 = vshll.u32 %v636_v52, 16  ;;  %v1803_v4 = vld [vmem:[#allocation2 + $0x24c] sm:$0x1] }
 0x161   :  { %v1384_v16 = vor.u32 %v1382_v11, %v1381_v10  ;;  %v1385_v17 = vrot.slane %v1381_v10, 4  ;;  %v538_v18 = vmax.f32 %v415_v13, 0.0  ;;  %453 = vmatmul.bf16.gmra.mxu0 %v12068_v5  ;;  %v1662_v1 = vrot.slane %v1660_v57, 7 }
 0x162   :  { %v502_v5 = vadd.f32 %v12888_v44, %v501_v62 }
 0x163   :  { %v1526_v21 = vsel %vm12590_vm4, %v1384_v16, %v1525_v12  ;;  %v1529_v23 = vsel %vm12595_vm5, %v1385_v17, %v1528_v14  ;;  %v602_v25 = vpack.c.bf16 %v538_v18, %v538_v18  ;;  %v1665_v10 = vor.u32 %v1663_v58, %v1662_v1 }
 0x164   :  { %1527 = vst [vmem:[#allocation2 + $0x180] sm:$0xf] %v1526_v21  ;;  %v1666_v11 = vrot.slane %v1662_v1, 4  ;;  %v573_v13 = vmax.f32 %v502_v5, 0.0  ;;  %v2049_v18 = vadd.f32 %v13031_v6, %v2009_v41  ;;  %v1764_v5 = vld [vmem:[#allocation2 + $0x208] sm:$0xf] }
 0x165   :  { %1530 = vst [vmem:[#allocation2 + $0x184] sm:$0x1] %v1529_v23  ;;  %v1580_v30 = vshrl.u32 %v602_v25, 16  ;;  %v1583_v36 = vshll.u32 %v602_v25, 16  ;;  %v1801_v14 = vsel %vm12590_vm4, %v1665_v10, %v1800_v3 }
 0x166   :  { %v416_v32 = vpop.f32.mrf.mxu0  ;;  %v1804_v22 = vsel %vm12595_vm5, %v1666_v11, %v1803_v4  ;;  %1802 = vst [vmem:[#allocation2 + $0x248] sm:$0xf] %v1801_v14  ;;  %v637_v16 = vpack.c.bf16 %v573_v13, %v573_v13 }
 0x167   :  { %v1582_v34 = vrot.slane %v1580_v30, 7  ;;  %v417_v37 = vadd.f32 %v12888_v44, %v416_v32  ;;  %1805 = vst [vmem:[#allocation2 + $0x24c] sm:$0x1] %v1804_v22 }
 0x168   :  { %v1668_v25 = vshrl.u32 %v637_v16, 16  ;;  %v1671_v26 = vshll.u32 %v637_v16, 16 }
 0x169   :  { %v1585_v42 = vor.u32 %v1583_v36, %v1582_v34  ;;  %v1586_v43 = vrot.slane %v1582_v34, 4  ;;  %v539_v45 = vmax.f32 %v417_v37, 0.0  ;;  %v1806_v36 = vld [vmem:[#allocation2 + $0x250] sm:$0xf]  ;;  %v1809_v37 = vld [vmem:[#allocation2 + $0x254] sm:$0x1] }
 0x16a   :  { %v1670_v32 = vrot.slane %v1668_v25, 7 }
 0x16b   :  { %v1741_v47 = vsel %vm12590_vm4, %v1585_v42, %v1740_v38  ;;  %v1744_v48 = vsel %vm12595_vm5, %v1586_v43, %v1743_v39  ;;  %v603_v49 = vpack.c.bf16 %v539_v45, %v539_v45  ;;  %v2014_v43 = vpop.f32.mrf.mxu1 }
 0x16c   :  { %1742 = vst [vmem:[#allocation2 + $0x1e8] sm:$0xf] %v1741_v47  ;;  %v1673_v41 = vor.u32 %v1671_v26, %v1670_v32  ;;  %v1674_v42 = vrot.slane %v1670_v32, 4  ;;  %v2051_v4 = vadd.f32 %v13031_v6, %v2014_v43  ;;  %v5664_v26 = vld [vmem:[#allocation2 + $0x8] sm:$0xf]  ;;  %v12238_v43 = vld [vmem:[%s15438_s3 + $0x330] sm:$0xff] }
 0x16d   :  { %1745 = vst [vmem:[#allocation2 + $0x1ec] sm:$0x1] %v1744_v48  ;;  %v1588_v51 = vshrl.u32 %v603_v49, 16  ;;  %v1591_v54 = vshll.u32 %v603_v49, 16 }
 0x16e   :  { %v419_v55 = vpop.f32.mrf.mxu0  ;;  %v1807_v47 = vsel %vm12590_vm4, %v1673_v41, %v1806_v36  ;;  %v1810_v48 = vsel %vm12595_vm5, %v1674_v42, %v1809_v37  ;;  %v5713_v36 = vshrl.u32 %v5664_v26, 16  ;;  %v5716_v41 = vshll.u32 %v5664_v26, 16 }
 0x16f   :  { %v1590_v56 = vrot.slane %v1588_v51, 7  ;;  %v420_v59 = vadd.f32 %v12888_v44, %v419_v55  ;;  %1808 = vst [vmem:[#allocation2 + $0x250] sm:$0xf] %v1807_v47 }
 0x170   :  { %1811 = vst [vmem:[#allocation2 + $0x254] sm:$0x1] %v1810_v48 }
 0x171   :  { %v1593_v63 = vor.u32 %v1591_v54, %v1590_v56  ;;  %v1594_v0 = vrot.slane %v1590_v56, 4  ;;  %v540_v2 = vmax.f32 %v420_v59, 0.0  ;;  %458 = vmatmul.bf16.gmra.mxu0 %v12069_v53  ;;  %v1758_v53 = vld [vmem:[#allocation2 + $0x200] sm:$0xf]  ;;  %v1761_v54 = vld [vmem:[#allocation2 + $0x204] sm:$0x1] }
 0x173   :  { %v1747_v8 = vsel %vm12590_vm4, %v1593_v63, %v1746_v60  ;;  %v1750_v9 = vsel %vm12595_vm5, %v1594_v0, %v1749_v61  ;;  %v604_v12 = vpack.c.bf16 %v540_v2, %v540_v2  ;;  %v13065_v0 = vpop.f32.mrf.mxu1 }
 0x174   :  { %1748 = vst [vmem:[#allocation2 + $0x1f0] sm:$0xf] %v1747_v8  ;;  %v1767_v8 = vld [vmem:[#allocation2 + $0x20c] sm:$0x1] }
 0x175   :  { %1751 = vst [vmem:[#allocation2 + $0x1f4] sm:$0x1] %v1750_v9  ;;  %v1596_v15 = vshrl.u32 %v604_v12, 16  ;;  %v1599_v23 = vshll.u32 %v604_v12, 16 }
 0x176   :  { %v421_v17 = vpop.f32.mrf.mxu0 }
 0x177   :  { %v422_v20 = vadd.f32 %v12888_v44, %v421_v17  ;;  %v1598_v21 = vrot.slane %v1596_v15, 7  ;;  %v12071_v17 = vld [vmem:[%s15437_s0 + $0xb8] sm:$0xff] }
 0x179   :  { %v541_v29 = vmax.f32 %v422_v20, 0.0  ;;  %v2236_v30 = vpop.f32.mrf.mxu2  ;;  %v1601_v24 = vor.u32 %v1599_v23, %v1598_v21  ;;  %v1602_v31 = vrot.slane %v1598_v21, 4 }
 0x17a   :  { %v13045_v34 = vadd.f32 %v2236_v30, %v2049_v18  ;;  %v12239_v18 = vld [vmem:[%s15438_s3 + $0x338] sm:$0xff] }
 0x17b   :  { %v605_v38 = vpack.c.bf16 %v541_v29, %v541_v29  ;;  %v1753_v39 = vsel %vm12590_vm4, %v1601_v24, %v1752_v27  ;;  %v1756_v40 = vsel %vm12595_vm5, %v1602_v31, %v1755_v28  ;;  %6033 = vmatpush.bf16.msrb.mxu0 %v12239_v18  ;;  %v1770_v27 = vld [vmem:[#allocation2 + $0x210] sm:$0xf]  ;;  %v1773_v28 = vld [vmem:[#allocation2 + $0x214] sm:$0x1]  ;;  %v2019_v29 = vpop.f32.mrf.mxu1 }
 0x17c   :  { %1754 = vst [vmem:[#allocation2 + $0x1f8] sm:$0xf] %v1753_v39 }
 0x17d   :  { %v1604_v45 = vshrl.u32 %v605_v38, 16  ;;  %1757 = vst [vmem:[#allocation2 + $0x1fc] sm:$0x1] %v1756_v40  ;;  %v1607_v51 = vshll.u32 %v605_v38, 16  ;;  %v5666_v40 = vld [vmem:[#allocation2 + $0x10] sm:$0xf] }
 0x17e   :  { %v424_v49 = vpop.f32.mrf.mxu0  ;;  %v5727_v47 = vshrl.u32 %v5666_v40, 16  ;;  %v5730_v48 = vshll.u32 %v5666_v40, 16 }
 0x17f   :  { %v1606_v50 = vrot.slane %v1604_v45, 7  ;;  %v425_v52 = vadd.f32 %v12888_v44, %v424_v49  ;;  %6034 = vmatpush.bf16.msrb.mxu0 %v12238_v43 }
 0x181   :  { %v1609_v55 = vor.u32 %v1607_v51, %v1606_v50  ;;  %v1610_v56 = vrot.slane %v1606_v50, 4  ;;  %v542_v57 = vmax.f32 %v425_v52, 0.0  ;;  %463 = vmatmul.bf16.gmra.mxu0 %v12070_v46  ;;  %v13059_v58 = vpop.f32.mrf.mxu2  ;;  %v5715_v46 = vrot.slane %v5713_v36, 4  ;;  %v12237_v52 = vld [vmem:[%s15438_s3 + $0x328] sm:$0xff] }
 0x183   :  { %v1759_v59 = vsel %vm12590_vm4, %v1609_v55, %v1758_v53  ;;  %v1762_v60 = vsel %vm12595_vm5, %v1610_v56, %v1761_v54  ;;  %v606_v61 = vpack.c.bf16 %v542_v57, %v542_v57  ;;  %v5718_v53 = vrot.slane %v5716_v41, 5  ;;  %v1776_v55 = vld [vmem:[#allocation2 + $0x218] sm:$0xf]  ;;  %v1779_v56 = vld [vmem:[#allocation2 + $0x21c] sm:$0x1]  ;;  %6035 = vmatpush.bf16.msrb.mxu0 %v12237_v52 }
 0x184   :  { %1760 = vst [vmem:[#allocation2 + $0x200] sm:$0xf] %v1759_v59  ;;  %v2053_v54 = vadd.f32 %v13031_v6, %v2019_v29  ;;  %v1782_v29 = vld [vmem:[#allocation2 + $0x220] sm:$0xf]  ;;  %v5672_v52 = vld [vmem:[#allocation2 + $0x28] sm:$0xf] }
 0x185   :  { %1763 = vst [vmem:[#allocation2 + $0x204] sm:$0x1] %v1762_v60  ;;  %v1612_v62 = vshrl.u32 %v606_v61, 16  ;;  %v1615_v2 = vshll.u32 %v606_v61, 16 }
 0x186   :  { %v426_v63 = vpop.f32.mrf.mxu0 }
 0x187   :  { %v1614_v1 = vrot.slane %v1612_v62, 7  ;;  %v427_v3 = vadd.f32 %v12888_v44, %v426_v63  ;;  %v5729_v63 = vrot.slane %v5727_v47, 4 }
 0x189   :  { %v1617_v9 = vor.u32 %v1615_v2, %v1614_v1  ;;  %v1618_v10 = vrot.slane %v1614_v1, 4  ;;  %v543_v11 = vmax.f32 %v427_v3, 0.0  ;;  %v2241_v12 = vpop.f32.mrf.mxu2  ;;  %v5732_v1 = vrot.slane %v5730_v48, 5  ;;  %v13098_v2 = vpop.f32.mrf.mxu1 }
 0x18a   :  { %v13069_v13 = vadd.f32 %v2241_v12, %v2051_v4 }
 0x18b   :  { %v1765_v14 = vsel %vm12590_vm4, %v1617_v9, %v1764_v5  ;;  %v1768_v22 = vsel %vm12595_vm5, %v1618_v10, %v1767_v8  ;;  %v607_v15 = vpack.c.bf16 %v543_v11, %v543_v11  ;;  %v5665_v5 = vld [vmem:[#allocation2 + $0xc] sm:$0x1]  ;;  %v5719_v8 = vor.u32 %v5718_v53, %v5715_v46  ;;  %v5668_v9 = vld [vmem:[#allocation2 + $0x18] sm:$0xf]  ;;  %v5667_v10 = vld [vmem:[#allocation2 + $0x14] sm:$0x1] }
 0x18c   :  { %1766 = vst [vmem:[#allocation2 + $0x208] sm:$0xf] %v1765_v14  ;;  %v5670_v11 = vld [vmem:[#allocation2 + $0x20] sm:$0xf]  ;;  %v5741_v18 = vshrl.u32 %v5668_v9, 16 }
 0x18d   :  { %1769 = vst [vmem:[#allocation2 + $0x20c] sm:$0x1] %v1768_v22  ;;  %v1620_v16 = vshrl.u32 %v607_v15, 16  ;;  %v1623_v23 = vshll.u32 %v607_v15, 16  ;;  %v12072_v14 = vld [vmem:[%s15437_s0 + $0xc0] sm:$0xff]  ;;  %v5758_v40 = vshll.u32 %v5670_v11, 16 }
 0x18e   :  { %v429_v20 = vpop.f32.mrf.mxu0  ;;  %v12236_v22 = vld [vmem:[%s15438_s3 + $0x320] sm:$0xff] }
 0x18f   :  { %v1622_v21 = vrot.slane %v1620_v16, 7  ;;  %v430_v25 = vadd.f32 %v12888_v44, %v429_v20  ;;  %v5722_v16 = vshll.u32 %v5665_v5, 16  ;;  %v5744_v20 = vshll.u32 %v5668_v9, 16  ;;  %6036 = vmatpush.bf16.msrb.mxu0 %v12236_v22  ;;  %v1020_v22 = vld [vmem:[#allocation2 + $0x5c] sm:$0x1] }
 0x191   :  { %v1625_v30 = vor.u32 %v1623_v23, %v1622_v21  ;;  %v1626_v24 = vrot.slane %v1622_v21, 4  ;;  %v544_v31 = vmax.f32 %v430_v25, 0.0  ;;  %468 = vmatmul.bf16.gmra.mxu0 %v12071_v17  ;;  %v13082_v32 = vpop.f32.mrf.mxu2  ;;  %v5733_v17 = vor.u32 %v5732_v1, %v5729_v63  ;;  %v13113_v25 = vld [vmem:[%s15436_s2] ss:$0 sm:$0xff]  ;;  %v2024_v53 = vpop.f32.mrf.mxu1  ;;  %v12159_v63 = vld [vmem:[%s15438_s3 + $0x178] sm:$0xff] }
 0x192   :  { %v5746_v43 = vrot.slane %v5744_v20, 5  ;;  %v5724_v48 = vrot.slane %v5722_v16, 5  ;;  %v5772_v16 = vshll.u32 %v5672_v52, 16  ;;  %3682 = vmatpush.bf16.msra.mxu3 %v12159_v63 }
 0x193   :  { %v1771_v37 = vsel %vm12590_vm4, %v1625_v30, %v1770_v27  ;;  %v1774_v38 = vsel %vm12595_vm5, %v1626_v24, %v1773_v28  ;;  %v608_v39 = vpack.c.bf16 %v544_v31, %v544_v31  ;;  %v12235_v27 = vld [vmem:[%s15438_s3 + $0x318] sm:$0xff]  ;;  %v5720_v28 = vrot.slane %v5719_v8, 4  ;;  %v1785_v30 = vld [vmem:[#allocation2 + $0x224] sm:$0x1] }
 0x194   :  { %1772 = vst [vmem:[#allocation2 + $0x210] sm:$0xf] %v1771_v37  ;;  %v5736_v24 = vshll.u32 %v5667_v10, 16  ;;  %v5755_v31 = vshrl.u32 %v5670_v11, 16  ;;  %v5734_v41 = vrot.slane %v5733_v17, 4  ;;  %6037 = vmatpush.bf16.msrb.mxu0 %v12235_v27  ;;  %v12135_v10 = vld [vmem:[%s15438_s3 + $0xf8] sm:$0xff] }
 0x195   :  { %1775 = vst [vmem:[#allocation2 + $0x214] sm:$0x1] %v1774_v38  ;;  %v1628_v42 = vshrl.u32 %v608_v39, 16  ;;  %v1631_v50 = vshll.u32 %v608_v39, 16  ;;  %v5769_v11 = vshrl.u32 %v5672_v52, 16  ;;  %3130 = vmatpush.bf16.msra.mxu1 %v12135_v10 }
 0x196   :  { %v431_v45 = vpop.f32.mrf.mxu0 }
 0x197   :  { %v1630_v49 = vrot.slane %v1628_v42, 7  ;;  %v432_v51 = vadd.f32 %v12888_v44, %v431_v45  ;;  %v5743_v42 = vrot.slane %v5741_v18, 4 }
 0x199   :  { %v1633_v57 = vor.u32 %v1631_v50, %v1630_v49  ;;  %v1634_v59 = vrot.slane %v1630_v49, 4  ;;  %v545_v60 = vmax.f32 %v432_v51, 0.0  ;;  %v2246_v61 = vpop.f32.mrf.mxu2  ;;  %v5669_v49 = vld [vmem:[#allocation2 + $0x1c] sm:$0x1]  ;;  %v5671_v50 = vld [vmem:[#allocation2 + $0x24] sm:$0x1] }
 0x19a   :  { %v13096_v62 = vadd.f32 %v2246_v61, %v2053_v54  ;;  %v5738_v51 = vrot.slane %v5736_v24, 5  ;;  %v12234_v61 = vld [vmem:[%s15438_s3 + $0x310] sm:$0xff] }
 0x19b   :  { %v1777_v44 = vsel %vm12590_vm4, %v1633_v57, %v1776_v55  ;;  %v1780_v3 = vsel %vm12595_vm5, %v1634_v59, %v1779_v56  ;;  %v609_v4 = vpack.c.bf16 %v545_v60, %v545_v60  ;;  %v5725_v55 = vsel %vm12754_vm8, %v5720_v28, %v5724_v48  ;;  %v12143_v60 = vld [vmem:[%s15438_s3 + $0x138] sm:$0xff]  ;;  %6038 = vmatpush.bf16.msrb.mxu0 %v12234_v61 }
 0x19c   :  { %1778 = vst [vmem:[#allocation2 + $0x218] sm:$0xf] %v1777_v44  ;;  %v5757_v56 = vrot.slane %v5755_v31, 4  ;;  %v5760_v57 = vrot.slane %v5758_v40, 5  ;;  %v5739_v1 = vsel %vm12754_vm8, %v5734_v41, %v5738_v51  ;;  %v5747_v44 = vor.u32 %v5746_v43, %v5743_v42  ;;  %3455 = vmatpush.bf16.msra.mxu2 %v12143_v60  ;;  %v5673_v31 = vld [vmem:[#allocation2 + $0x2c] sm:$0x1] }
 0x19d   :  { %1781 = vst [vmem:[#allocation2 + $0x21c] sm:$0x1] %v1780_v3  ;;  %v1636_v12 = vshrl.u32 %v609_v4, 16  ;;  %v1639_v23 = vshll.u32 %v609_v4, 16  ;;  %v5750_v3 = vshll.u32 %v5669_v49, 16  ;;  %v5764_v4 = vshll.u32 %v5671_v50, 16 }
 0x19e   :  { %v434_v15 = vpop.f32.mrf.mxu0  ;;  %v13148_v27 = vunpack.c.l.b16 %v5725_v55  ;;  %v13156_v24 = vrot.slane %v5747_v44, 4  ;;  %v5771_v40 = vrot.slane %v5769_v11, 4  ;;  %v5774_v41 = vrot.slane %v5772_v16, 5  ;;  %v12073_v43 = vld [vmem:[%s15437_s0 + $0xc8] sm:$0xff]  ;;  %v2324_v49 = vld [vmem:[#allocation2 + $0x50] sm:$0xf] }
 0x19f   :  { %v1638_v21 = vrot.slane %v1636_v12, 7  ;;  %v435_v26 = vadd.f32 %v13113_v25, %v434_v15  ;;  %v2055_v12 = vadd.f32 %v13031_v6, %v2024_v53  ;;  %v12233_v15 = vld [vmem:[%s15438_s3 + $0x308] sm:$0xff]  ;;  %v13150_v6 = vunpack.c.l.b16 %v5739_v1  ;;  %v2325_v50 = vld [vmem:[#allocation2 + $0x54] sm:$0x1] }
 0x1a0   :  { %6039 = vmatpush.bf16.msrb.mxu0 %v12233_v15  ;;  %v5778_v52 = vshll.u32 %v5673_v31, 16  ;;  %v2472_v55 = vshrl.u32 %v2324_v49, 16  ;;  %v2481_v60 = vshll.u32 %v2325_v50, 16  ;;  %v5775_v63 = vor.u32 %v5774_v41, %v5771_v40  ;;  %v5675_v11 = vld [vmem:[#allocation2 + $0x34] sm:$0x1] }
 0x1a1   :  { %v1641_v36 = vor.u32 %v1639_v23, %v1638_v21  ;;  %v1642_v37 = vrot.slane %v1638_v21, 4  ;;  %v546_v38 = vmax.f32 %v435_v26, 0.0  ;;  %473 = vmatmul.bf16.gmra.mxu0 %v12072_v14  ;;  %v13119_v39 = vpop.f32.mrf.mxu2  ;;  %v1017_v14 = vld [vmem:[#allocation2 + $0x58] sm:$0xf]  ;;  %v5761_v23 = vor.u32 %v5760_v57, %v5757_v56  ;;  %v1023_v57 = vld [vmem:[#allocation2 + $0x60] sm:$0xf] }
 0x1a2   :  { %15447 = vst [vmem:[#allocation4_spill] sm:$0xff] %v13119_v39  ;;  %v5969_v51 = vpack.c.b16 %v13150_v6, %v13148_v27  ;;  %v2475_v56 = vshll.u32 %v2324_v49, 16  ;;  %v13190_v41 = vrot.slane %v5775_v63, 4  ;;  %v12158_v49 = vld [vmem:[%s15438_s3 + $0x170] sm:$0xff] }
 0x1a3   :  { %v1783_v45 = vsel %vm12590_vm4, %v1641_v36, %v1782_v29  ;;  %v1786_v46 = vsel %vm12595_vm5, %v1642_v37, %v1785_v30  ;;  %v610_v47 = vpack.c.bf16 %v546_v38, %v546_v38  ;;  %v13158_v36 = vld [vmem:[#allocation2 + $0x30] sm:$0xf]  ;;  %v13160_v37 = vrot.slane %v5750_v3, 5  ;;  %3683 = vmatpush.bf16.msra.mxu3 %v12158_v49 }
 0x1a4   :  { %1784 = vst [vmem:[#allocation2 + $0x220] sm:$0xf] %v1783_v45  ;;  %v5766_v38 = vrot.slane %v5764_v4, 5  ;;  %v12232_v45 = vld [vmem:[%s15438_s3 + $0x300] sm:$0xff]  ;;  %v5783_v1 = vshrl.u32 %v13158_v36, 16 }
 0x1a5   :  { %1787 = vst [vmem:[#allocation2 + $0x224] sm:$0x1] %v1786_v46  ;;  %v867_v54 = vshrl.u32 %v610_v47, 16  ;;  %v870_v8 = vshll.u32 %v610_v47, 16  ;;  %v5762_v46 = vrot.slane %v5761_v23, 4  ;;  %6040 = vmatpush.bf16.msrb.mxu0 %v12232_v45  ;;  %v5753_v61 = vsel %vm12754_vm8, %v13156_v24, %v13160_v37 }
 0x1a6   :  { %v436_v59 = vpop.f32.mrf.mxu0 }
 0x1a7   :  { %v869_v5 = vrot.slane %v867_v54, 7  ;;  %v437_v9 = vadd.f32 %v13113_v25, %v436_v59  ;;  %v1026_v59 = vld [vmem:[#allocation2 + $0x64] sm:$0x1]  ;;  %v5767_v10 = vsel %vm12754_vm8, %v5762_v46, %v5766_v38 }
 0x1a8   :  { %v13188_v40 = vunpack.c.l.b16 %v5767_v10 }
 0x1a9   :  { %v872_v17 = vor.u32 %v870_v8, %v869_v5  ;;  %v873_v18 = vrot.slane %v869_v5, 4  ;;  %v547_v20 = vmax.f32 %v437_v9, 0.0  ;;  %v2251_v21 = vpop.f32.mrf.mxu2  ;;  %v10482_v5 = vld [vmem:[#allocation2 + $0x50] sm:$0xf]  ;;  %v2474_v8 = vrot.slane %v2472_v55, 4 }
 0x1aa   :  { %v13146_v26 = vadd.f32 %v2251_v21, %v2055_v12  ;;  %v2477_v9 = vrot.slane %v2475_v56, 5  ;;  %v13178_v12 = vrot.slane %v5778_v52, 5  ;;  %v5676_v21 = vld [vmem:[#allocation2 + $0x38] sm:$0xf]  ;;  %v5792_v55 = vshll.u32 %v5675_v11, 16 }
 0x1ab   :  { %v1018_v28 = vsel %vm12590_vm4, %v872_v17, %v1017_v14  ;;  %v1021_v29 = vsel %vm12595_vm5, %v873_v18, %v1020_v22  ;;  %v611_v30 = vpack.c.bf16 %v547_v20, %v547_v20  ;;  %v5786_v14 = vshll.u32 %v13158_v36, 16  ;;  %v12142_v36 = vld [vmem:[%s15438_s3 + $0x130] sm:$0xff]  ;;  %v5678_v56 = vld [vmem:[#allocation2 + $0x40] sm:$0xf] }
 0x1ac   :  { %1019 = vst [vmem:[#allocation2 + $0x58] sm:$0xf] %v1018_v28  ;;  %v2483_v20 = vrot.slane %v2481_v60, 5  ;;  %3456 = vmatpush.bf16.msra.mxu2 %v12142_v36  ;;  %v5814_v11 = vshll.u32 %v5678_v56, 16 }
 0x1ad   :  { %1022 = vst [vmem:[#allocation2 + $0x5c] sm:$0x1] %v1021_v29  ;;  %v875_v42 = vshrl.u32 %v611_v30, 16  ;;  %v878_v47 = vshll.u32 %v611_v30, 16  ;;  %v2478_v29 = vor.u32 %v2477_v9, %v2474_v8  ;;  %v5677_v8 = vld [vmem:[#allocation2 + $0x3c] sm:$0x1] }
 0x1ae   :  { %v439_v48 = vpop.f32.mrf.mxu0  ;;  %v5800_v9 = vshll.u32 %v5676_v21, 16 }
 0x1af   :  { %v877_v53 = vrot.slane %v875_v42, 7  ;;  %v440_v54 = vadd.f32 %v13113_v25, %v439_v48  ;;  %v13192_v42 = vrot.slane %v5783_v1, 4  ;;  %v2479_v45 = vrot.slane %v2478_v29, 4 }
 0x1b0   :  { %v5788_v1 = vrot.slane %v5786_v14, 5  ;;  %v5802_v36 = vrot.slane %v5800_v9, 5 }
 0x1b1   :  { %v880_v44 = vor.u32 %v878_v47, %v877_v53  ;;  %v881_v3 = vrot.slane %v877_v53, 4  ;;  %v548_v4 = vmax.f32 %v440_v54, 0.0  ;;  %478 = vmatmul.bf16.gmra.mxu0 %v12073_v43  ;;  %v12134_v54 = vld [vmem:[%s15438_s3 + $0xf0] sm:$0xff]  ;;  %v2484_v60 = vsel %vm12754_vm8, %v2479_v45, %v2483_v20 }
 0x1b2   :  { %3131 = vmatpush.bf16.msra.mxu1 %v12134_v54  ;;  %v2608_v20 = vunpack.c.l.b16 %v2484_v60  ;;  %v1035_v54 = vld [vmem:[#allocation2 + $0x70] sm:$0xf] }
 0x1b3   :  { %v1024_v22 = vsel %vm12590_vm4, %v880_v44, %v1023_v57  ;;  %v1027_v15 = vsel %vm12595_vm5, %v881_v3, %v1026_v59  ;;  %v612_v16 = vpack.c.bf16 %v548_v4, %v548_v4  ;;  %v12092_v17 = vld [vmem:[#allocation2 + $0x54] sm:$0xf0]  ;;  %v1029_v57 = vld [vmem:[#allocation2 + $0x68] sm:$0xf]  ;;  %v1032_v59 = vld [vmem:[#allocation2 + $0x6c] sm:$0x1] }
 0x1b4   :  { %v2326_v18 = vld [vmem:[#allocation2 + $0x58] sm:$0xf]  ;;  %1025 = vst [vmem:[#allocation2 + $0x60] sm:$0xf] %v1024_v22  ;;  %v10483_v23 = vor.u32 %v12092_v17, %v10482_v5  ;;  %v2327_v28 = vld [vmem:[#allocation2 + $0x5c] sm:$0x1] }
 0x1b5   :  { %v2486_v30 = vshrl.u32 %v2326_v18, 16  ;;  %v2489_v31 = vshll.u32 %v2326_v18, 16  ;;  %1028 = vst [vmem:[#allocation2 + $0x64] sm:$0x1] %v1027_v15  ;;  %v883_v38 = vshrl.u32 %v612_v16, 16  ;;  %v2495_v48 = vshll.u32 %v2327_v28, 16 }
 0x1b6   :  { %v441_v43 = vpop.f32.mrf.mxu0  ;;  %2028 = vmatmul.bf16.gmra.mxu1 %v10483_v23  ;;  %v886_v52 = vshll.u32 %v612_v16, 16  ;;  %v5797_v44 = vshrl.u32 %v5676_v21, 16  ;;  %v5811_v15 = vshrl.u32 %v5678_v56, 16  ;;  %v13209_v23 = vrot.slane %v5792_v55, 5  ;;  %v1038_v55 = vld [vmem:[#allocation2 + $0x74] sm:$0x1] }
 0x1b7   :  { %v2488_v46 = vrot.slane %v2486_v30, 4  ;;  %v2491_v47 = vrot.slane %v2489_v31, 5  ;;  %v885_v50 = vrot.slane %v883_v38, 7  ;;  %v442_v53 = vadd.f32 %v13113_v25, %v441_v43 }
 0x1b8   :  { %v2497_v22 = vrot.slane %v2495_v48, 5  ;;  %v5799_v28 = vrot.slane %v5797_v44, 4  ;;  %v5806_v21 = vshll.u32 %v5677_v8, 16  ;;  %v5789_v38 = vor.u32 %v5788_v1, %v13192_v42 }
 0x1b9   :  { %v2492_v63 = vor.u32 %v2491_v47, %v2488_v46  ;;  %v888_v3 = vor.u32 %v886_v52, %v885_v50  ;;  %v889_v4 = vrot.slane %v885_v50, 4  ;;  %v549_v5 = vmax.f32 %v442_v53, 0.0 }
 0x1ba   :  { %v5813_v47 = vrot.slane %v5811_v15, 4  ;;  %v5816_v48 = vrot.slane %v5814_v11, 5  ;;  %v13218_v42 = vunpack.c.l.b16 %v5753_v61  ;;  %v5803_v44 = vor.u32 %v5802_v36, %v5799_v28  ;;  %v12141_v36 = vld [vmem:[%s15438_s3 + $0x128] sm:$0xff] }
 0x1bb   :  { %v2493_v10 = vrot.slane %v2492_v63, 4  ;;  %v1030_v16 = vsel %vm12590_vm4, %v888_v3, %v1029_v57  ;;  %v1033_v17 = vsel %vm12595_vm5, %v889_v4, %v1032_v59  ;;  %v613_v18 = vpack.c.bf16 %v549_v5, %v549_v5  ;;  %v2328_v31 = vld [vmem:[#allocation2 + $0x60] sm:$0xf]  ;;  %v5679_v5 = vld [vmem:[#allocation2 + $0x44] sm:$0x1]  ;;  %3457 = vmatpush.bf16.msra.mxu2 %v12141_v36 }
 0x1bc   :  { %1031 = vst [vmem:[#allocation2 + $0x68] sm:$0xf] %v1030_v16  ;;  %v2500_v45 = vshrl.u32 %v2328_v31, 16  ;;  %v2503_v46 = vshll.u32 %v2328_v31, 16  ;;  %v2329_v1 = vld [vmem:[#allocation2 + $0x64] sm:$0x1]  ;;  %v5817_v9 = vor.u32 %v5816_v48, %v5813_v47  ;;  %v5970_v6 = vpack.c.b16 %v13188_v40, %v13218_v42 }
 0x1bd   :  { %v2498_v14 = vsel %vm12754_vm8, %v2493_v10, %v2497_v22  ;;  %1034 = vst [vmem:[#allocation2 + $0x6c] sm:$0x1] %v1033_v17  ;;  %v891_v29 = vshrl.u32 %v613_v18, 16  ;;  %v894_v50 = vshll.u32 %v613_v18, 16  ;;  %v13223_v4 = vrot.slane %v5789_v38, 4  ;;  %v12133_v48 = vld [vmem:[%s15438_s3 + $0xe8] sm:$0xff] }
 0x1be   :  { %v2609_v30 = vunpack.c.l.b16 %v2498_v14  ;;  %v444_v43 = vpop.f32.mrf.mxu0  ;;  %v2502_v56 = vrot.slane %v2500_v45, 4  ;;  %v2505_v57 = vrot.slane %v2503_v46, 5  ;;  %v13225_v8 = vrot.slane %v5806_v21, 5  ;;  %v10486_v10 = vld [vmem:[#allocation2 + $0x60] sm:$0xf]  ;;  %3132 = vmatpush.bf16.msra.mxu1 %v12133_v48 }
 0x1bf   :  { %v893_v49 = vrot.slane %v891_v29, 7  ;;  %v445_v52 = vadd.f32 %v13113_v25, %v444_v43  ;;  %v2509_v16 = vshll.u32 %v2329_v1, 16  ;;  %v5781_v18 = vsel %vm12754_vm8, %v13190_v41, %v13178_v12  ;;  %v12157_v43 = vld [vmem:[%s15438_s3 + $0x168] sm:$0xff]  ;;  %v2765_v1 = vld [vmem:[#allocation2 + $0xb0] sm:$0xf] }
 0x1c0   :  { %v2620_v53 = vpack.c.b16 %v2609_v30, %v2608_v20  ;;  %v2506_v3 = vor.u32 %v2505_v57, %v2502_v56  ;;  %v13239_v28 = vrot.slane %v5803_v44, 4  ;;  %v5820_v21 = vshll.u32 %v5679_v5, 16  ;;  %3684 = vmatpush.bf16.msra.mxu3 %v12157_v43 }
 0x1c1   :  { %v896_v59 = vor.u32 %v894_v50, %v893_v49  ;;  %v897_v60 = vrot.slane %v893_v49, 4  ;;  %v550_v63 = vmax.f32 %v445_v52, 0.0  ;;  %6041 = vmatmul.bf16.vlgmr.msrb.gmra.mxu0 %v5969_v51  ;;  %v13233_v51 = vld [vmem:[#allocation2 + $0xa0] sm:$0xf]  ;;  %v13247_v12 = vrot.slane %v5817_v9, 4 }
 0x1c2   :  { %2708 = vmatmul.bf16.gmra.mxu3 %v2620_v53  ;;  %v2507_v30 = vrot.slane %v2506_v3, 4  ;;  %v1041_v49 = vld [vmem:[#allocation2 + $0x78] sm:$0xf]  ;;  %v1044_v50 = vld [vmem:[#allocation2 + $0x7c] sm:$0x1]  ;;  %v2511_v52 = vrot.slane %v2509_v16, 5  ;;  %v5795_v53 = vsel %vm12754_vm8, %v13223_v4, %v13209_v23 }
 0x1c3   :  { %v1036_v24 = vsel %vm12590_vm4, %v896_v59, %v1035_v54  ;;  %v1039_v37 = vsel %vm12595_vm5, %v897_v60, %v1038_v55  ;;  %v614_v61 = vpack.c.bf16 %v550_v63, %v550_v63  ;;  %v12093_v22 = vld [vmem:[#allocation2 + $0x64] sm:$0xf0]  ;;  %v13257_v54 = vunpack.c.l.b16 %v5781_v18 }
 0x1c4   :  { %v2330_v27 = vld [vmem:[#allocation2 + $0x68] sm:$0xf]  ;;  %1037 = vst [vmem:[#allocation2 + $0x70] sm:$0xf] %v1036_v24  ;;  %v10487_v15 = vor.u32 %v12093_v22, %v10486_v10  ;;  %v2331_v11 = vld [vmem:[#allocation2 + $0x6c] sm:$0x1]  ;;  %v2512_v44 = vsel %vm12754_vm8, %v2507_v30, %v2511_v52  ;;  %v13273_v16 = vunpack.c.l.b16 %v5795_v53 }
 0x1c5   :  { %v2514_v17 = vshrl.u32 %v2330_v27, 16  ;;  %1040 = vst [vmem:[#allocation2 + $0x74] sm:$0x1] %v1039_v37  ;;  %v899_v20 = vshrl.u32 %v614_v61, 16  ;;  %v2517_v14 = vshll.u32 %v2330_v27, 16  ;;  %v2523_v38 = vshll.u32 %v2331_v11, 16 }
 0x1c6   :  { %v446_v29 = vpop.f32.mrf.mxu0  ;;  %2033 = vmatmul.bf16.gmra.mxu1 %v10487_v15  ;;  %v902_v45 = vshll.u32 %v614_v61, 16  ;;  %v2810_v55 = vshrl.u32 %v13233_v51, 16  ;;  %v2763_v63 = vld [vmem:[#allocation2 + $0xa8] sm:$0xf]  ;;  %v13262_v5 = vrot.slane %v5820_v21, 5  ;;  %v2813_v9 = vshll.u32 %v13233_v51, 16 }
 0x1c7   :  { %v2516_v31 = vrot.slane %v2514_v17, 4  ;;  %v901_v41 = vrot.slane %v899_v20, 7  ;;  %v447_v46 = vadd.f32 %v13113_v25, %v446_v29  ;;  %v2519_v47 = vrot.slane %v2517_v14, 5  ;;  %v12132_v30 = vld [vmem:[%s15438_s3 + $0xe0] sm:$0xff] }
 0x1c8   :  { %v2525_v3 = vrot.slane %v2523_v38, 5  ;;  %v13269_v61 = vrot.slane %v2810_v55, 4  ;;  %v2824_v10 = vshrl.u32 %v2763_v63, 16  ;;  %v2827_v22 = vshll.u32 %v2763_v63, 16  ;;  %3133 = vmatpush.bf16.msra.mxu1 %v12132_v30 }
 0x1c9   :  { %v904_v56 = vor.u32 %v902_v45, %v901_v41  ;;  %v905_v57 = vrot.slane %v901_v41, 4  ;;  %v551_v59 = vmax.f32 %v447_v46, 0.0  ;;  %v2520_v60 = vor.u32 %v2519_v47, %v2516_v31  ;;  %v1047_v41 = vld [vmem:[#allocation2 + $0x80] sm:$0xf]  ;;  %v1050_v45 = vld [vmem:[#allocation2 + $0x84] sm:$0x1] }
 0x1ca   :  { %v2838_v27 = vshrl.u32 %v2765_v1, 16  ;;  %v2841_v17 = vshll.u32 %v2765_v1, 16  ;;  %v2610_v20 = vunpack.c.l.b16 %v2512_v44  ;;  %v13279_v43 = vrot.slane %v2813_v9, 5 }
 0x1cb   :  { %v1042_v23 = vsel %vm12590_vm4, %v904_v56, %v1041_v49  ;;  %v1045_v4 = vsel %vm12595_vm5, %v905_v57, %v1044_v50  ;;  %v615_v24 = vpack.c.bf16 %v551_v59, %v551_v59  ;;  %v2521_v37 = vrot.slane %v2520_v60, 4  ;;  %v2332_v51 = vld [vmem:[#allocation2 + $0x70] sm:$0xf]  ;;  %v13288_v56 = vld [vmem:[#allocation2 + $0xac] sm:$0x1] }
 0x1cc   :  { %1043 = vst [vmem:[#allocation2 + $0x78] sm:$0xf] %v1042_v23  ;;  %v2528_v21 = vshrl.u32 %v2332_v51, 16  ;;  %v2531_v29 = vshll.u32 %v2332_v51, 16  ;;  %v5809_v49 = vsel %vm12754_vm8, %v13239_v28, %v13225_v8  ;;  %v2333_v55 = vld [vmem:[#allocation2 + $0x74] sm:$0x1]  ;;  %v5971_v9 = vpack.c.b16 %v13273_v16, %v13257_v54 }
 0x1cd   :  { %1046 = vst [vmem:[#allocation2 + $0x7c] sm:$0x1] %v1045_v4  ;;  %v907_v15 = vshrl.u32 %v615_v24, 16  ;;  %v2526_v11 = vsel %vm12754_vm8, %v2521_v37, %v2525_v3  ;;  %v910_v38 = vshll.u32 %v615_v24, 16  ;;  %v13290_v57 = vrot.slane %v2824_v10, 4 }
 0x1ce   :  { %v449_v18 = vpop.f32.mrf.mxu0  ;;  %v2611_v14 = vunpack.c.l.b16 %v2526_v11  ;;  %v2530_v47 = vrot.slane %v2528_v21, 4  ;;  %v2533_v48 = vrot.slane %v2531_v29, 5  ;;  %v2762_v60 = vld [vmem:[#allocation2 + $0xa4] sm:$0x1]  ;;  %v2829_v63 = vrot.slane %v2827_v22, 5  ;;  %v12131_v21 = vld [vmem:[%s15438_s3 + $0xd8] sm:$0xff] }
 0x1cf   :  { %v909_v31 = vrot.slane %v907_v15, 7  ;;  %v450_v36 = vadd.f32 %v13113_v25, %v449_v18  ;;  %v2840_v1 = vrot.slane %v2838_v27, 4  ;;  %v2843_v44 = vrot.slane %v2841_v17, 5  ;;  %v10490_v40 = vld [vmem:[#allocation2 + $0x70] sm:$0xf]  ;;  %3134 = vmatpush.bf16.msra.mxu1 %v12131_v21 }
 0x1d0   :  { %v2621_v46 = vpack.c.b16 %v2611_v14, %v2610_v20  ;;  %v2534_v59 = vor.u32 %v2533_v48, %v2530_v47  ;;  %v2537_v24 = vshll.u32 %v2333_v55, 16  ;;  %v13298_v10 = vunpack.c.l.b16 %v5809_v49  ;;  %v12140_v14 = vld [vmem:[%s15438_s3 + $0x120] sm:$0xff] }
 0x1d1   :  { %v912_v50 = vor.u32 %v910_v38, %v909_v31  ;;  %v913_v52 = vrot.slane %v909_v31, 4  ;;  %v552_v53 = vmax.f32 %v450_v36, 0.0  ;;  %6046 = vmatmul.bf16.gmra.mxu0 %v5970_v6  ;;  %v2816_v15 = vor.u32 %v13279_v43, %v13269_v61  ;;  %v12156_v36 = vld [vmem:[%s15438_s3 + $0x160] sm:$0xff]  ;;  %v1053_v43 = vld [vmem:[#allocation2 + $0x88] sm:$0xf]  ;;  %3458 = vmatpush.bf16.msra.mxu2 %v12140_v14 }
 0x1d2   :  { %2713 = vmatmul.bf16.gmra.mxu3 %v2621_v46  ;;  %v2819_v11 = vshll.u32 %v2762_v60, 16  ;;  %v2535_v17 = vrot.slane %v2534_v59, 4  ;;  %v2833_v29 = vshll.u32 %v13288_v56, 16  ;;  %v12130_v46 = vld [vmem:[%s15438_s3 + $0xd0] sm:$0xff]  ;;  %v5823_v47 = vsel %vm12754_vm8, %v13247_v12, %v13262_v5  ;;  %v13348_v14 = vld [vmem:[#allocation2 + $0xc0] sm:$0xf] }
 0x1d3   :  { %v1048_v8 = vsel %vm12590_vm4, %v912_v50, %v1047_v41  ;;  %v1051_v28 = vsel %vm12595_vm5, %v913_v52, %v1050_v45  ;;  %v616_v3 = vpack.c.bf16 %v552_v53, %v552_v53  ;;  %v12094_v42 = vld [vmem:[#allocation2 + $0x74] sm:$0xf0]  ;;  %v1056_v41 = vld [vmem:[#allocation2 + $0x8c] sm:$0x1]  ;;  %v2539_v45 = vrot.slane %v2537_v24, 5  ;;  %3685 = vmatpush.bf16.msra.mxu3 %v12156_v36  ;;  %3135 = vmatpush.bf16.msra.mxu1 %v12130_v46 }
 0x1d4   :  { %v2334_v6 = vld [vmem:[#allocation2 + $0x78] sm:$0xf]  ;;  %1049 = vst [vmem:[#allocation2 + $0x80] sm:$0xf] %v1048_v8  ;;  %v10491_v23 = vor.u32 %v12094_v42, %v10490_v40  ;;  %v2335_v4 = vld [vmem:[#allocation2 + $0x7c] sm:$0x1]  ;;  %v2830_v48 = vor.u32 %v2829_v63, %v13290_v57  ;;  %v2844_v49 = vor.u32 %v2843_v44, %v2840_v1 }
 0x1d5   :  { %v2542_v37 = vshrl.u32 %v2334_v6, 16  ;;  %1052 = vst [vmem:[#allocation2 + $0x84] sm:$0x1] %v1051_v28  ;;  %v915_v22 = vshrl.u32 %v616_v3, 16  ;;  %v2545_v27 = vshll.u32 %v2334_v6, 16  ;;  %v2551_v20 = vshll.u32 %v2335_v4, 16 }
 0x1d6   :  { %v451_v51 = vpop.f32.mrf.mxu0  ;;  %2038 = vmatmul.bf16.gmra.mxu1 %v10491_v23  ;;  %v918_v31 = vshll.u32 %v616_v3, 16  ;;  %v13321_v56 = vld [vmem:[#allocation2 + $0xb4] sm:$0x1]  ;;  %v2540_v59 = vsel %vm12754_vm8, %v2535_v17, %v2539_v45  ;;  %v13325_v8 = vrot.slane %v2816_v15, 4  ;;  %v13327_v28 = vrot.slane %v2819_v11, 5  ;;  %v12129_v24 = vld [vmem:[%s15438_s3 + $0xc8] sm:$0xff] }
 0x1d7   :  { %v2544_v18 = vrot.slane %v2542_v37, 4  ;;  %v917_v30 = vrot.slane %v915_v22, 7  ;;  %v452_v61 = vadd.f32 %v13113_v25, %v451_v51  ;;  %v2547_v38 = vrot.slane %v2545_v27, 5  ;;  %v2767_v3 = vld [vmem:[#allocation2 + $0xb8] sm:$0xf]  ;;  %3136 = vmatpush.bf16.msra.mxu1 %v12129_v24 }
 0x1d8   :  { %v2553_v60 = vrot.slane %v2551_v20, 5  ;;  %v13333_v1 = vld [vmem:[#allocation2 + $0xbc] sm:$0x1]  ;;  %v2831_v44 = vrot.slane %v2830_v48, 4  ;;  %v2835_v40 = vrot.slane %v2833_v29, 5  ;;  %v13335_v42 = vrot.slane %v2844_v49, 4 }
 0x1d9   :  { %v920_v50 = vor.u32 %v918_v31, %v917_v30  ;;  %v921_v52 = vrot.slane %v917_v30, 4  ;;  %v553_v53 = vmax.f32 %v452_v61, 0.0  ;;  %v2548_v55 = vor.u32 %v2547_v38, %v2544_v18  ;;  %v12155_v22 = vld [vmem:[%s15438_s3 + $0x158] sm:$0xff]  ;;  %v1059_v29 = vld [vmem:[#allocation2 + $0x90] sm:$0xf] }
 0x1da   :  { %v2847_v6 = vshll.u32 %v13321_v56, 16  ;;  %v13343_v37 = vunpack.c.l.b16 %v5823_v47  ;;  %v2852_v27 = vshrl.u32 %v2767_v3, 16  ;;  %v2612_v51 = vunpack.c.l.b16 %v2540_v59  ;;  %3686 = vmatpush.bf16.msra.mxu3 %v12155_v22  ;;  %v1062_v38 = vld [vmem:[#allocation2 + $0x94] sm:$0x1] }
 0x1db   :  { %v1054_v12 = vsel %vm12590_vm4, %v920_v50, %v1053_v43  ;;  %v1057_v5 = vsel %vm12595_vm5, %v921_v52, %v1056_v41  ;;  %v617_v57 = vpack.c.bf16 %v553_v53, %v553_v53  ;;  %v2549_v63 = vrot.slane %v2548_v55, 4  ;;  %v2336_v18 = vld [vmem:[#allocation2 + $0x80] sm:$0xf] }
 0x1dc   :  { %1055 = vst [vmem:[#allocation2 + $0x88] sm:$0xf] %v1054_v12  ;;  %v2855_v20 = vshll.u32 %v2767_v3, 16  ;;  %v2556_v31 = vshrl.u32 %v2336_v18, 16  ;;  %v2559_v61 = vshll.u32 %v2336_v18, 16  ;;  %v12128_v41 = vld [vmem:[%s15438_s3 + $0xc0] sm:$0xff]  ;;  %v2822_v45 = vsel %vm12754_vm8, %v13325_v8, %v13327_v28 }
 0x1dd   :  { %1058 = vst [vmem:[#allocation2 + $0x8c] sm:$0x1] %v1057_v5  ;;  %v923_v23 = vshrl.u32 %v617_v57, 16  ;;  %v2554_v4 = vsel %vm12754_vm8, %v2549_v63, %v2553_v60  ;;  %v926_v15 = vshll.u32 %v617_v57, 16  ;;  %v2337_v43 = vld [vmem:[#allocation2 + $0x84] sm:$0x1]  ;;  %v2836_v46 = vsel %vm12754_vm8, %v2831_v44, %v2835_v40  ;;  %3137 = vmatpush.bf16.msra.mxu1 %v12128_v41 }
 0x1de   :  { %v454_v11 = vpop.f32.mrf.mxu0  ;;  %v2613_v17 = vunpack.c.l.b16 %v2554_v4  ;;  %v2861_v47 = vshll.u32 %v13333_v1, 16  ;;  %v2558_v52 = vrot.slane %v2556_v31, 4  ;;  %v10494_v53 = vld [vmem:[#allocation2 + $0x80] sm:$0xf]  ;;  %v2561_v55 = vrot.slane %v2559_v61, 5 }
 0x1df   :  { %v925_v21 = vrot.slane %v923_v23, 7  ;;  %v455_v30 = vadd.f32 %v13113_v25, %v454_v11  ;;  %v13364_v59 = vrot.slane %v2852_v27, 4  ;;  %v13366_v60 = vrot.slane %v2855_v20, 5  ;;  %v5680_v23 = vld [vmem:[#allocation2 + $0x58] sm:$0xf] }
 0x1e0   :  { %v2622_v36 = vpack.c.b16 %v2613_v17, %v2612_v51  ;;  %v2866_v8 = vshrl.u32 %v13348_v14, 16  ;;  %v2565_v16 = vshll.u32 %v2337_v43, 16  ;;  %v2562_v63 = vor.u32 %v2561_v55, %v2558_v52  ;;  %v5682_v11 = vld [vmem:[#allocation2 + $0x60] sm:$0xf]  ;;  %v1274_v61 = vld [vmem:[#allocation2 + $0xf8] sm:$0xf] }
 0x1e1   :  { %v928_v48 = vor.u32 %v926_v15, %v925_v21  ;;  %v929_v49 = vrot.slane %v925_v21, 4  ;;  %v554_v50 = vmax.f32 %v455_v30, 0.0  ;;  %6051 = vmatmul.bf16.gmra.mxu0 %v5971_v9  ;;  %v5972_v24 = vpack.c.b16 %v13343_v37, %v13298_v10  ;;  %v12139_v15 = vld [vmem:[%s15438_s3 + $0x118] sm:$0xff] }
 0x1e2   :  { %2718 = vmatmul.bf16.gmra.mxu3 %v2622_v36  ;;  %v13375_v22 = vunpack.c.l.b16 %v2822_v45  ;;  %v13377_v27 = vunpack.c.l.b16 %v2836_v46  ;;  %v2563_v17 = vrot.slane %v2562_v63, 4  ;;  %3459 = vmatpush.bf16.msra.mxu2 %v12139_v15  ;;  %v2869_v36 = vshll.u32 %v13348_v14, 16  ;;  %v1277_v43 = vld [vmem:[#allocation2 + $0xfc] sm:$0x1]  ;;  %v12153_v46 = vld [vmem:[%s15438_s3 + $0x148] sm:$0xff] }
 0x1e3   :  { %v1060_v28 = vsel %vm12590_vm4, %v928_v48, %v1059_v29  ;;  %v1063_v3 = vsel %vm12595_vm5, %v929_v49, %v1062_v38  ;;  %v618_v12 = vpack.c.bf16 %v554_v50, %v554_v50  ;;  %v12095_v5 = vld [vmem:[#allocation2 + $0x84] sm:$0xf0]  ;;  %v12154_v29 = vld [vmem:[%s15438_s3 + $0x150] sm:$0xff]  ;;  %v2567_v41 = vrot.slane %v2565_v16, 5 }
 0x1e4   :  { %v2338_v54 = vld [vmem:[#allocation2 + $0x88] sm:$0xf]  ;;  %1061 = vst [vmem:[#allocation2 + $0x90] sm:$0xf] %v1060_v28  ;;  %v10495_v9 = vor.u32 %v12095_v5, %v10494_v53  ;;  %v2339_v57 = vld [vmem:[#allocation2 + $0x8c] sm:$0x1]  ;;  %3687 = vmatpush.bf16.msra.mxu3 %v12154_v29  ;;  %v3066_v56 = vpack.c.b16 %v13377_v27, %v13375_v22 }
 0x1e5   :  { %v2570_v44 = vshrl.u32 %v2338_v54, 16  ;;  %v2573_v40 = vshll.u32 %v2338_v54, 16  ;;  %1064 = vst [vmem:[#allocation2 + $0x94] sm:$0x1] %v1063_v3  ;;  %v1130_v4 = vshrl.u32 %v618_v12, 16  ;;  %v2579_v21 = vshll.u32 %v2339_v57, 16 }
 0x1e6   :  { %v456_v51 = vpop.f32.mrf.mxu0  ;;  %2043 = vmatmul.bf16.gmra.mxu1 %v10495_v9  ;;  %v1133_v31 = vshll.u32 %v618_v12, 16  ;;  %v5839_v48 = vshrl.u32 %v5682_v11, 16  ;;  %v5842_v49 = vshll.u32 %v5682_v11, 16  ;;  %v5825_v55 = vshrl.u32 %v5680_v23, 16  ;;  %v12152_v11 = vld [vmem:[%s15438_s3 + $0x140] sm:$0xff] }
 0x1e7   :  { %v2572_v18 = vrot.slane %v2570_v44, 4  ;;  %v2575_v20 = vrot.slane %v2573_v40, 5  ;;  %v1132_v30 = vrot.slane %v1130_v4, 7  ;;  %v457_v38 = vadd.f32 %v13113_v25, %v456_v51 }
 0x1e8   :  { %v2568_v28 = vsel %vm12754_vm8, %v2563_v17, %v2567_v41  ;;  %v2581_v12 = vrot.slane %v2579_v21, 5  ;;  %v5828_v14 = vshll.u32 %v5680_v23, 16  ;;  %v2868_v9 = vrot.slane %v2866_v8, 4  ;;  %3688 = vmatpush.bf16.msra.mxu3 %v12153_v46 }
 0x1e9   :  { %v2576_v45 = vor.u32 %v2575_v20, %v2572_v18  ;;  %v1135_v50 = vor.u32 %v1133_v31, %v1132_v30  ;;  %v1136_v52 = vrot.slane %v1132_v30, 4  ;;  %v555_v53 = vmax.f32 %v457_v38, 0.0  ;;  %v5683_v38 = vld [vmem:[#allocation2 + $0x64] sm:$0x1] }
 0x1ea   :  { %v5841_v63 = vrot.slane %v5839_v48, 4  ;;  %v5844_v44 = vrot.slane %v5842_v49, 5  ;;  %v2871_v40 = vrot.slane %v2869_v36, 5  ;;  %v2614_v15 = vunpack.c.l.b16 %v2568_v28  ;;  %v13412_v36 = vld [vmem:[#allocation2 + $0xc4] sm:$0x1] }
 0x1eb   :  { %v2577_v3 = vrot.slane %v2576_v45, 4  ;;  %v1275_v5 = vsel %vm12590_vm4, %v1135_v50, %v1274_v61  ;;  %v1278_v54 = vsel %vm12595_vm5, %v1136_v52, %v1277_v43  ;;  %v619_v16 = vpack.c.bf16 %v555_v53, %v555_v53  ;;  %v1283_v43 = vld [vmem:[#allocation2 + $0x104] sm:$0x1] }
 0x1ec   :  { %1276 = vst [vmem:[#allocation2 + $0xf8] sm:$0xf] %v1275_v5  ;;  %v2858_v51 = vor.u32 %v13366_v60, %v13364_v59  ;;  %v5827_v17 = vrot.slane %v5825_v55, 4  ;;  %v5830_v18 = vrot.slane %v5828_v14, 5  ;;  %v13405_v20 = vrot.slane %v2847_v6, 5  ;;  %3689 = vmatpush.bf16.msra.mxu3 %v12152_v11 }
 0x1ed   :  { %v2582_v57 = vsel %vm12754_vm8, %v2577_v3, %v2581_v12  ;;  %1279 = vst [vmem:[#allocation2 + $0xfc] sm:$0x1] %v1278_v54  ;;  %v1138_v4 = vshrl.u32 %v619_v16, 16  ;;  %v13409_v21 = vrot.slane %v2861_v47, 5  ;;  %v1141_v30 = vshll.u32 %v619_v16, 16  ;;  %v12138_v16 = vld [vmem:[%s15438_s3 + $0x110] sm:$0xff] }
 0x1ee   :  { %v2615_v23 = vunpack.c.l.b16 %v2582_v57  ;;  %v459_v8 = vpop.f32.mrf.mxu0  ;;  %v2771_v59 = vld [vmem:[#allocation2 + $0xc8] sm:$0xf]  ;;  %v1280_v60 = vld [vmem:[#allocation2 + $0x100] sm:$0xf]  ;;  %v5681_v6 = vld [vmem:[#allocation2 + $0x5c] sm:$0x1]  ;;  %v5845_v41 = vor.u32 %v5844_v44, %v5841_v63  ;;  %v2872_v1 = vor.u32 %v2871_v40, %v2868_v9  ;;  %v5831_v49 = vor.u32 %v5830_v18, %v5827_v17  ;;  %v13435_v57 = vpop.f32.mrf.mxu3  ;;  %3460 = vmatpush.bf16.msra.mxu2 %v12138_v16 }
 0x1ef   :  { %v1140_v29 = vrot.slane %v1138_v4, 7  ;;  %v460_v31 = vadd.f32 %v13113_v25, %v459_v8  ;;  %v10562_v25 = vld [vmem:[#allocation2 + $0xf0] sm:$0xf]  ;;  %v13419_v48 = vrot.slane %v2858_v51, 4  ;;  %v5848_v50 = vshll.u32 %v5683_v38, 16 }
 0x1f0   :  { %v2623_v61 = vpack.c.b16 %v2615_v23, %v2614_v15  ;;  %v2880_v52 = vshrl.u32 %v2771_v59, 16  ;;  %v2883_v53 = vshll.u32 %v2771_v59, 16  ;;  %v5834_v3 = vshll.u32 %v5681_v6, 16  ;;  %v5686_v9 = vld [vmem:[#allocation2 + $0x70] sm:$0xf] }
 0x1f1   :  { %v1143_v47 = vor.u32 %v1141_v30, %v1140_v29  ;;  %v1144_v45 = vrot.slane %v1140_v29, 4  ;;  %v556_v46 = vmax.f32 %v460_v31, 0.0  ;;  %6056 = vmatmul.bf16.gmra.mxu0 %v5972_v24  ;;  %v5846_v37 = vrot.slane %v5845_v41, 4  ;;  %v2772_v24 = vld [vmem:[#allocation2 + $0xcc] sm:$0x1] }
 0x1f2   :  { %2723 = vmatmul.bf16.gmra.mxu3 %v2623_v61  ;;  %v13425_v12 = vrot.slane %v2872_v1, 4  ;;  %v2875_v14 = vshll.u32 %v13412_v36, 16  ;;  %v2850_v54 = vsel %vm12754_vm8, %v13335_v42, %v13405_v20  ;;  %v5832_v44 = vrot.slane %v5831_v49, 4  ;;  %v2773_v23 = vld [vmem:[#allocation2 + $0xd0] sm:$0xf] }
 0x1f3   :  { %v1281_v22 = vsel %vm12590_vm4, %v1143_v47, %v1280_v60  ;;  %v1284_v27 = vsel %vm12595_vm5, %v1144_v45, %v1283_v43  ;;  %v620_v55 = vpack.c.bf16 %v556_v46, %v556_v46  ;;  %v12108_v28 = vld [vmem:[#allocation2 + $0xf4] sm:$0xf0]  ;;  %v5850_v40 = vrot.slane %v5848_v50, 5  ;;  %v13440_v42 = vld [vmem:[%s15436_s2] ss:$0 sm:$0xff] }
 0x1f4   :  { %1282 = vst [vmem:[#allocation2 + $0x100] sm:$0xf] %v1281_v22  ;;  %v10563_v10 = vor.u32 %v12108_v28, %v10562_v25  ;;  %v2882_v4 = vrot.slane %v2880_v52, 4  ;;  %v2885_v15 = vrot.slane %v2883_v53, 5  ;;  %v5836_v17 = vrot.slane %v5834_v3, 5 }
 0x1f5   :  { %1285 = vst [vmem:[#allocation2 + $0x104] sm:$0x1] %v1284_v27  ;;  %v1146_v5 = vshrl.u32 %v620_v55, 16  ;;  %v1149_v51 = vshll.u32 %v620_v55, 16  ;;  %v5684_v18 = vld [vmem:[#allocation2 + $0x68] sm:$0xf]  ;;  %v5851_v30 = vsel %vm12754_vm8, %v5846_v37, %v5850_v40  ;;  %v2864_v31 = vsel %vm12754_vm8, %v13419_v48, %v13409_v21 }
 0x1f6   :  { %v461_v63 = vpop.f32.mrf.mxu0  ;;  %2255 = vmatmul.bf16.gmra.mxu2 %v10563_v10  ;;  %3138 = vmatmul.bf16.vlgmr.msra.gmra.mxu1 %v3066_v56  ;;  %v1286_v20 = vld [vmem:[#allocation2 + $0x108] sm:$0xf]  ;;  %v1289_v29 = vld [vmem:[#allocation2 + $0x10c] sm:$0x1]  ;;  %v5867_v61 = vshrl.u32 %v5686_v9, 16  ;;  %v5870_v38 = vshll.u32 %v5686_v9, 16  ;;  %v5837_v56 = vsel %vm12754_vm8, %v5832_v44, %v5836_v17  ;;  %v5962_v21 = vunpack.c.l.b16 %v5851_v30 }
 0x1f7   :  { %v1148_v11 = vrot.slane %v1146_v5, 7  ;;  %v462_v8 = vadd.f32 %v13440_v42, %v461_v63  ;;  %v2889_v43 = vshll.u32 %v2772_v24, 16  ;;  %v5853_v6 = vshrl.u32 %v5684_v18, 16  ;;  %v10786_v25 = vld [vmem:[#allocation2 + $0x140] sm:$0xf] }
 0x1f8   :  { %v5856_v41 = vshll.u32 %v5684_v18, 16  ;;  %v2894_v1 = vshrl.u32 %v2773_v23, 16  ;;  %v3052_v48 = vunpack.c.l.b16 %v2850_v54  ;;  %v5869_v49 = vrot.slane %v5867_v61, 4  ;;  %v12144_v22 = vld [vmem:[#allocation2 + $0x144] sm:$0xf0] }
 0x1f9   :  { %v1151_v36 = vor.u32 %v1149_v51, %v1148_v11  ;;  %v1152_v59 = vrot.slane %v1148_v11, 4  ;;  %v557_v60 = vmax.f32 %v462_v8, 0.0  ;;  %v5872_v50 = vrot.slane %v5870_v38, 5  ;;  %v13459_v16 = vld [vmem:[#allocation2 + $0xd4] sm:$0x1] }
 0x1fa   :  { %v2886_v52 = vor.u32 %v2885_v15, %v2882_v4  ;;  %v5961_v27 = vunpack.c.l.b16 %v5837_v56  ;;  %v3053_v55 = vunpack.c.l.b16 %v2864_v31  ;;  %v2897_v28 = vshll.u32 %v2773_v23, 16  ;;  %v5687_v40 = vld [vmem:[#allocation2 + $0x74] sm:$0x1]  ;;  %v2775_v4 = vld [vmem:[#allocation2 + $0xd8] sm:$0xf]  ;;  %v13462_v15 = vpop.f32.mrf.mxu3 }
 0x1fb   :  { %v1287_v47 = vsel %vm12590_vm4, %v1151_v36, %v1286_v20  ;;  %v1290_v45 = vsel %vm12595_vm5, %v1152_v59, %v1289_v29  ;;  %v621_v46 = vpack.c.bf16 %v557_v60, %v557_v60  ;;  %v5855_v10 = vrot.slane %v5853_v6, 4  ;;  %v1292_v11 = vld [vmem:[#allocation2 + $0x110] sm:$0xf]  ;;  %v1295_v23 = vld [vmem:[#allocation2 + $0x114] sm:$0x1] }
 0x1fc   :  { %1288 = vst [vmem:[#allocation2 + $0x108] sm:$0xf] %v1287_v47  ;;  %v5858_v37 = vrot.slane %v5856_v41, 5  ;;  %v13455_v24 = vrot.slane %v2875_v14, 5  ;;  %v13457_v5 = vrot.slane %v2889_v43, 5  ;;  %v5973_v44 = vpack.c.b16 %v5962_v21, %v5961_v27 }
 0x1fd   :  { %1291 = vst [vmem:[#allocation2 + $0x10c] sm:$0x1] %v1290_v45  ;;  %v1154_v53 = vshrl.u32 %v621_v46, 16  ;;  %v1157_v54 = vshll.u32 %v621_v46, 16  ;;  %v10787_v51 = vor.u32 %v12144_v22, %v10786_v25  ;;  %v5873_v8 = vor.u32 %v5872_v50, %v5869_v49  ;;  %v5685_v30 = vld [vmem:[#allocation2 + $0x6c] sm:$0x1] }
 0x1fe   :  { %v464_v3 = vpop.f32.mrf.mxu0  ;;  %v13464_v17 = vrot.slane %v2886_v52, 4  ;;  %v13466_v14 = vrot.slane %v2894_v1, 4  ;;  %v13468_v31 = vrot.slane %v2897_v28, 5  ;;  %v5859_v61 = vor.u32 %v5858_v37, %v5855_v10  ;;  %v10566_v6 = vld [vmem:[#allocation2 + $0x100] sm:$0xf]  ;;  %v12137_v52 = vld [vmem:[%s15438_s3 + $0x108] sm:$0xff] }
 0x1ff   :  { %v1156_v9 = vrot.slane %v1154_v53, 7  ;;  %v465_v63 = vadd.f32 %v13440_v42, %v464_v3  ;;  %v5876_v38 = vshll.u32 %v5687_v40, 16  ;;  %v2903_v36 = vshll.u32 %v13459_v16, 16  ;;  %v5690_v47 = vld [vmem:[#allocation2 + $0x80] sm:$0xf]  ;;  %3461 = vmatpush.bf16.msra.mxu2 %v12137_v52 }
 0x200   :  { %v2908_v59 = vshrl.u32 %v2775_v4, 16  ;;  %v3067_v1 = vpack.c.b16 %v3053_v55, %v3052_v48  ;;  %v5862_v46 = vshll.u32 %v5685_v30, 16  ;;  %v5874_v21 = vrot.slane %v5873_v8, 4  ;;  %v5688_v53 = vld [vmem:[#allocation2 + $0x78] sm:$0xf] }
 0x201   :  { %v1159_v18 = vor.u32 %v1157_v54, %v1156_v9  ;;  %v1160_v20 = vrot.slane %v1156_v9, 4  ;;  %v558_v29 = vmax.f32 %v465_v63, 0.0  ;;  %6061 = vmatmul.bf16.gmra.mxu0 %v5973_v44  ;;  %v2911_v25 = vshll.u32 %v2775_v4, 16  ;;  %v1298_v37 = vld [vmem:[#allocation2 + $0x118] sm:$0xf] }
 0x202   :  { %3690 = vmatmul.bf16.vlgmr.msra.gmra.mxu3 %v10787_v51  ;;  %v2878_v50 = vsel %vm12754_vm8, %v13425_v12, %v13455_v24  ;;  %v5860_v48 = vrot.slane %v5859_v61, 4  ;;  %v5878_v27 = vrot.slane %v5876_v38, 5  ;;  %v5895_v55 = vshrl.u32 %v5690_v47, 16  ;;  %v1301_v24 = vld [vmem:[#allocation2 + $0x11c] sm:$0x1]  ;;  %v13489_v8 = vpop.f32.mrf.mxu3 }
 0x203   :  { %v1293_v60 = vsel %vm12590_vm4, %v1159_v18, %v1292_v11  ;;  %v1296_v43 = vsel %vm12595_vm5, %v1160_v20, %v1295_v23  ;;  %v622_v56 = vpack.c.bf16 %v558_v29, %v558_v29  ;;  %v12109_v41 = vld [vmem:[#allocation2 + $0x104] sm:$0xf0]  ;;  %v5898_v28 = vshll.u32 %v5690_v47, 16  ;;  %v12145_v38 = vld [vmem:[#allocation2 + $0x154] sm:$0xf0] }
 0x204   :  { %1294 = vst [vmem:[#allocation2 + $0x110] sm:$0xf] %v1293_v60  ;;  %v10567_v45 = vor.u32 %v12109_v41, %v10566_v6  ;;  %v2892_v12 = vsel %vm12754_vm8, %v13464_v17, %v13457_v5  ;;  %v5864_v54 = vrot.slane %v5862_v46, 5  ;;  %v5879_v63 = vsel %vm12754_vm8, %v5874_v21, %v5878_v27  ;;  %v12287_v46 = vld [vmem:[%s15438_s3 + $0x438] sm:$0xff] }
 0x205   :  { %1297 = vst [vmem:[#allocation2 + $0x114] sm:$0x1] %v1296_v43  ;;  %v1162_v49 = vshrl.u32 %v622_v56, 16  ;;  %v1165_v10 = vshll.u32 %v622_v56, 16  ;;  %v5881_v44 = vshrl.u32 %v5688_v53, 16  ;;  %v5884_v40 = vshll.u32 %v5688_v53, 16  ;;  %7257 = vmatpush.bf16.msra.mxu0 %v12287_v46 }
 0x206   :  { %v466_v22 = vpop.f32.mrf.mxu0  ;;  %2260 = vmatmul.bf16.gmra.mxu2 %v10567_v45  ;;  %3143 = vmatmul.bf16.gmra.mxu1 %v3067_v1  ;;  %v2910_v51 = vrot.slane %v2908_v59, 4  ;;  %v5865_v18 = vsel %vm12754_vm8, %v5860_v48, %v5864_v54  ;;  %v5897_v20 = vrot.slane %v5895_v55, 4  ;;  %v5900_v29 = vrot.slane %v5898_v28, 5  ;;  %v2776_v43 = vld [vmem:[#allocation2 + $0xdc] sm:$0x1] }
 0x207   :  { %v1164_v3 = vrot.slane %v1162_v49, 7  ;;  %v467_v9 = vadd.f32 %v13440_v42, %v466_v22  ;;  %v2913_v5 = vrot.slane %v2911_v25, 5  ;;  %v5964_v60 = vunpack.c.l.b16 %v5879_v63  ;;  %v5689_v59 = vld [vmem:[#allocation2 + $0x7c] sm:$0x1]  ;;  %v5691_v45 = vld [vmem:[#allocation2 + $0x84] sm:$0x1] }
 0x208   :  { %v5883_v56 = vrot.slane %v5881_v44, 4  ;;  %v5886_v6 = vrot.slane %v5884_v40, 5  ;;  %v5963_v1 = vunpack.c.l.b16 %v5865_v18  ;;  %v3054_v47 = vunpack.c.l.b16 %v2878_v50  ;;  %v10790_v55 = vld [vmem:[#allocation2 + $0x150] sm:$0xf]  ;;  %v1304_v50 = vld [vmem:[#allocation2 + $0x120] sm:$0xf] }
 0x209   :  { %v1167_v4 = vor.u32 %v1165_v10, %v1164_v3  ;;  %v1168_v11 = vrot.slane %v1164_v3, 4  ;;  %v559_v23 = vmax.f32 %v467_v9, 0.0  ;;  %v3055_v25 = vunpack.c.l.b16 %v2892_v12  ;;  %v1307_v3 = vld [vmem:[#allocation2 + $0x124] sm:$0x1] }
 0x20a   :  { %v5901_v49 = vor.u32 %v5900_v29, %v5897_v20  ;;  %v2900_v52 = vor.u32 %v13468_v31, %v13466_v14  ;;  %v2917_v53 = vshll.u32 %v2776_v43, 16  ;;  %v5974_v28 = vpack.c.b16 %v5964_v60, %v5963_v1 }
 0x20b   :  { %v1299_v17 = vsel %vm12590_vm4, %v1167_v4, %v1298_v37  ;;  %v1302_v30 = vsel %vm12595_vm5, %v1168_v11, %v1301_v24  ;;  %v623_v61 = vpack.c.bf16 %v559_v23, %v559_v23  ;;  %v10791_v10 = vor.u32 %v12145_v38, %v10790_v55  ;;  %v5692_v11 = vld [vmem:[#allocation2 + $0x88] sm:$0xf]  ;;  %v10570_v20 = vld [vmem:[#allocation2 + $0x110] sm:$0xf] }
 0x20c   :  { %1300 = vst [vmem:[#allocation2 + $0x118] sm:$0xf] %v1299_v17  ;;  %v5890_v37 = vshll.u32 %v5689_v59, 16  ;;  %v5904_v9 = vshll.u32 %v5691_v45, 16  ;;  %v2914_v24 = vor.u32 %v2913_v5, %v2910_v51  ;;  %v5887_v44 = vor.u32 %v5886_v6, %v5883_v56  ;;  %v5694_v17 = vld [vmem:[#allocation2 + $0x90] sm:$0xf] }
 0x20d   :  { %1303 = vst [vmem:[#allocation2 + $0x11c] sm:$0x1] %v1302_v30  ;;  %v1170_v41 = vshrl.u32 %v623_v61, 16  ;;  %v1173_v48 = vshll.u32 %v623_v61, 16  ;;  %v5902_v14 = vrot.slane %v5901_v49, 4  ;;  %v13503_v31 = vrot.slane %v2900_v52, 4  ;;  %v13515_v30 = vpop.f32.mrf.mxu3 }
 0x20e   :  { %v469_v21 = vpop.f32.mrf.mxu0  ;;  %v13507_v40 = vrot.slane %v2903_v36, 5  ;;  %v13509_v4 = vrot.slane %v2917_v53, 5  ;;  %v3068_v5 = vpack.c.b16 %v3055_v25, %v3054_v47  ;;  %v5892_v36 = vrot.slane %v5890_v37, 5  ;;  %v12136_v59 = vld [vmem:[%s15438_s3 + $0x100] sm:$0xff]  ;;  %v12286_v56 = vld [vmem:[%s15438_s3 + $0x430] sm:$0xff]  ;;  %v12285_v49 = vld [vmem:[%s15438_s3 + $0x428] sm:$0xff] }
 0x20f   :  { %v1172_v22 = vrot.slane %v1170_v41, 7  ;;  %v470_v27 = vadd.f32 %v13440_v42, %v469_v21  ;;  %v5906_v61 = vrot.slane %v5904_v9, 5  ;;  %v2915_v38 = vrot.slane %v2914_v24, 4  ;;  %3462 = vmatpush.bf16.msra.mxu2 %v12136_v59  ;;  %7258 = vmatpush.bf16.msra.mxu0 %v12286_v56  ;;  %v1310_v53 = vld [vmem:[#allocation2 + $0x128] sm:$0xf] }
 0x210   :  { %v5888_v43 = vrot.slane %v5887_v44, 4  ;;  %v5909_v1 = vshrl.u32 %v5692_v11, 16  ;;  %v5912_v47 = vshll.u32 %v5692_v11, 16  ;;  %v5923_v45 = vshrl.u32 %v5694_v17, 16  ;;  %v2779_v37 = vld [vmem:[#allocation2 + $0xf8] sm:$0xf] }
 0x211   :  { %v1175_v54 = vor.u32 %v1173_v48, %v1172_v22  ;;  %v1176_v12 = vrot.slane %v1172_v22, 4  ;;  %v560_v63 = vmax.f32 %v470_v27, 0.0  ;;  %6066 = vmatmul.bf16.gmra.mxu0 %v5974_v28  ;;  %v5907_v41 = vsel %vm12754_vm8, %v5902_v14, %v5906_v61  ;;  %v1313_v22 = vld [vmem:[#allocation2 + $0x12c] sm:$0x1] }
 0x212   :  { %3695 = vmatmul.bf16.gmra.mxu3 %v10791_v10  ;;  %v5926_v52 = vshll.u32 %v5694_v17, 16  ;;  %v2906_v48 = vsel %vm12754_vm8, %v13503_v31, %v13507_v40  ;;  %v2920_v27 = vsel %vm12754_vm8, %v2915_v38, %v13509_v4  ;;  %v2777_v10 = vld [vmem:[#allocation2 + $0xf0] sm:$0xf]  ;;  %v5966_v9 = vunpack.c.l.b16 %v5907_v41  ;;  %v10794_v31 = vld [vmem:[#allocation2 + $0x160] sm:$0xf] }
 0x213   :  { %v1305_v23 = vsel %vm12590_vm4, %v1175_v54, %v1304_v50  ;;  %v1308_v51 = vsel %vm12595_vm5, %v1176_v12, %v1307_v3  ;;  %v624_v18 = vpack.c.bf16 %v560_v63, %v560_v63  ;;  %v12110_v29 = vld [vmem:[#allocation2 + $0x114] sm:$0xf0]  ;;  %v5893_v3 = vsel %vm12754_vm8, %v5888_v43, %v5892_v36  ;;  %v12146_v40 = vld [vmem:[#allocation2 + $0x164] sm:$0xf0]  ;;  %7259 = vmatpush.bf16.msra.mxu0 %v12285_v49  ;;  %v5695_v4 = vld [vmem:[#allocation2 + $0x94] sm:$0x1] }
 0x214   :  { %1306 = vst [vmem:[#allocation2 + $0x120] sm:$0xf] %v1305_v23  ;;  %v10571_v16 = vor.u32 %v12110_v29, %v10570_v20  ;;  %v5911_v24 = vrot.slane %v5909_v1, 4  ;;  %v5914_v54 = vrot.slane %v5912_v47, 5  ;;  %v5925_v12 = vrot.slane %v5923_v45, 4  ;;  %v12284_v17 = vld [vmem:[%s15438_s3 + $0x420] sm:$0xff] }
 0x215   :  { %1309 = vst [vmem:[#allocation2 + $0x124] sm:$0x1] %v1308_v51  ;;  %v1178_v60 = vshrl.u32 %v624_v18, 16  ;;  %v1181_v21 = vshll.u32 %v624_v18, 16  ;;  %v5928_v11 = vrot.slane %v5926_v52, 5  ;;  %v5965_v23 = vunpack.c.l.b16 %v5893_v3  ;;  %v13545_v36 = vpop.f32.mrf.mxu3 }
 0x216   :  { %v471_v6 = vpop.f32.mrf.mxu0  ;;  %2265 = vmatmul.bf16.gmra.mxu2 %v10571_v16  ;;  %3148 = vmatmul.bf16.gmra.mxu1 %v3068_v5  ;;  %v2922_v51 = vshrl.u32 %v2777_v10, 16  ;;  %v2925_v18 = vshll.u32 %v2777_v10, 16  ;;  %v2936_v20 = vshrl.u32 %v2779_v37, 16  ;;  %v3056_v5 = vunpack.c.l.b16 %v2906_v48  ;;  %v5693_v59 = vld [vmem:[#allocation2 + $0x8c] sm:$0x1] }
 0x217   :  { %v1180_v46 = vrot.slane %v1178_v60, 7  ;;  %v472_v25 = vadd.f32 %v13440_v42, %v471_v6  ;;  %v2939_v16 = vshll.u32 %v2779_v37, 16  ;;  %v10795_v38 = vor.u32 %v12146_v40, %v10794_v31  ;;  %v13547_v6 = vld [vmem:[#allocation2] sm:$0xe]  ;;  %v1316_v47 = vld [vmem:[#allocation2 + $0x130] sm:$0xf]  ;;  %7260 = vmatpush.bf16.msra.mxu0 %v12284_v17 }
 0x218   :  { %v5975_v60 = vpack.c.b16 %v5966_v9, %v5965_v23  ;;  %v3057_v43 = vunpack.c.l.b16 %v2920_v27  ;;  %v5915_v56 = vor.u32 %v5914_v54, %v5911_v24  ;;  %v5932_v49 = vshll.u32 %v5695_v4, 16  ;;  %v13555_v3 = vld [vmem:[#allocation2 + $0x4] sm:$0x1]  ;;  %v13557_v10 = vld [vmem:[#allocation2 + $0x8] sm:$0xe] }
 0x219   :  { %v1183_v55 = vor.u32 %v1181_v21, %v1180_v46  ;;  %v1184_v28 = vrot.slane %v1180_v46, 4  ;;  %v561_v50 = vmax.f32 %v472_v25, 0.0  ;;  %v5929_v46 = vor.u32 %v5928_v11, %v5925_v12  ;;  %v12283_v21 = vld [vmem:[%s15438_s3 + $0x418] sm:$0xff]  ;;  %v1319_v25 = vld [vmem:[#allocation2 + $0x134] sm:$0x1] }
 0x21a   :  { %v2924_v52 = vrot.slane %v2922_v51, 4  ;;  %v3069_v37 = vpack.c.b16 %v3057_v43, %v3056_v5  ;;  %v13559_v9 = vrot.slane %v5915_v56, 4  ;;  %v5918_v24 = vshll.u32 %v5693_v59, 16  ;;  %v3214_v54 = vld [vmem:[#allocation2 + $0xc] sm:$0x1] }
 0x21b   :  { %v1311_v63 = vsel %vm12590_vm4, %v1183_v55, %v1310_v53  ;;  %v1314_v44 = vsel %vm12595_vm5, %v1184_v28, %v1313_v22  ;;  %v625_v14 = vpack.c.bf16 %v561_v50, %v561_v50  ;;  %v2927_v53 = vrot.slane %v2925_v18, 5  ;;  %v2778_v28 = vld [vmem:[#allocation2 + $0xf4] sm:$0x1]  ;;  %v10574_v31 = vld [vmem:[#allocation2 + $0x120] sm:$0xf]  ;;  %7261 = vmatpush.bf16.msra.mxu0 %v12283_v21 }
 0x21c   :  { %1312 = vst [vmem:[#allocation2 + $0x128] sm:$0xf] %v1311_v63  ;;  %v13553_v22 = vrot.slane %v2936_v20, 4  ;;  %v2941_v50 = vrot.slane %v2939_v16, 5  ;;  %v10704_v12 = vrot.slane %v13547_v6, 9  ;;  %v5930_v4 = vrot.slane %v5929_v46, 4 }
 0x21d   :  { %1315 = vst [vmem:[#allocation2 + $0x12c] sm:$0x1] %v1314_v44  ;;  %v1186_v29 = vshrl.u32 %v625_v14, 16  ;;  %v1189_v1 = vshll.u32 %v625_v14, 16  ;;  %v5934_v23 = vrot.slane %v5932_v49, 5  ;;  %v2928_v18 = vor.u32 %v2927_v53, %v2924_v52  ;;  %v12183_v16 = vld [vmem:[%s15438_s3 + $0x1f8] sm:$0xff]  ;;  %v13593_v52 = vpop.f32.mrf.mxu3 }
 0x21e   :  { %v474_v61 = vpop.f32.mrf.mxu0  ;;  %v2780_v51 = vld [vmem:[#allocation2 + $0xfc] sm:$0x1]  ;;  %v2931_v20 = vshll.u32 %v2778_v28, 16  ;;  %v2942_v17 = vor.u32 %v2941_v50, %v13553_v22  ;;  %v3296_v43 = vrot.slane %v13555_v3, 5  ;;  %v10705_v59 = vrot.slane %v13557_v10, 9  ;;  %4359 = vmatpush.bf16.msrb.mxu2 %v12183_v16  ;;  %v12281_v49 = vld [vmem:[%s15438_s3 + $0x408] sm:$0xff] }
 0x21f   :  { %v1188_v41 = vrot.slane %v1186_v29, 7  ;;  %v475_v45 = vadd.f32 %v13440_v42, %v474_v61  ;;  %v12282_v61 = vld [vmem:[%s15438_s3 + $0x410] sm:$0xff]  ;;  %v3300_v56 = vrot.slane %v3214_v54, 5  ;;  %v12191_v6 = vld [vmem:[%s15438_s3 + $0x238] sm:$0xff]  ;;  %v5935_v46 = vsel %vm12754_vm8, %v5930_v4, %v5934_v23  ;;  %15450 = vst [vmem:[#allocation5_spill] sm:$0xff] %v13593_v52 }
 0x220   :  { %v2945_v21 = vshll.u32 %v2780_v51, 16  ;;  %7262 = vmatpush.bf16.msra.mxu0 %v12282_v61  ;;  %v1534_v53 = vld [vmem:[#allocation2 + $0x19c] sm:$0x1]  ;;  %4809 = vmatpush.bf16.msrb.mxu3 %v12191_v6  ;;  %v12190_v28 = vld [vmem:[%s15438_s3 + $0x230] sm:$0xff]  ;;  %v5968_v54 = vunpack.c.l.b16 %v5935_v46  ;;  %v12280_v51 = vld [vmem:[%s15438_s3 + $0x400] sm:$0xff] }
 0x221   :  { %v1191_v48 = vor.u32 %v1189_v1, %v1188_v41  ;;  %v1192_v27 = vrot.slane %v1188_v41, 4  ;;  %v562_v55 = vmax.f32 %v475_v45, 0.0  ;;  %6071 = vmatmul.bf16.gmra.mxu0 %v5975_v60  ;;  %v5920_v60 = vrot.slane %v5918_v24, 5  ;;  %v12175_v41 = vld [vmem:[%s15438_s3 + $0x1b8] sm:$0xff]  ;;  %v2783_v24 = vld [vmem:[#allocation2 + $0x108] sm:$0xf] }
 0x222   :  { %3700 = vmatmul.bf16.gmra.mxu3 %v10795_v38  ;;  %3909 = vmatpush.bf16.msrb.mxu1 %v12175_v41  ;;  %v2947_v23 = vrot.slane %v2945_v21, 5  ;;  %v10798_v16 = vld [vmem:[#allocation2 + $0x170] sm:$0xf]  ;;  %v1537_v46 = vld [vmem:[#allocation2 + $0x1a0] sm:$0xf] }
 0x223   :  { %v1317_v63 = vsel %vm12590_vm4, %v1191_v48, %v1316_v47  ;;  %v1320_v44 = vsel %vm12595_vm5, %v1192_v27, %v1319_v25  ;;  %v626_v14 = vpack.c.bf16 %v562_v55, %v562_v55  ;;  %v12111_v40 = vld [vmem:[#allocation2 + $0x124] sm:$0xf0]  ;;  %v1531_v47 = vld [vmem:[#allocation2 + $0x198] sm:$0xf]  ;;  %v5921_v22 = vsel %vm12754_vm8, %v13559_v9, %v5920_v60  ;;  %v12182_v55 = vld [vmem:[%s15438_s3 + $0x1f0] sm:$0xff] }
 0x224   :  { %1318 = vst [vmem:[#allocation2 + $0x130] sm:$0xf] %v1317_v63  ;;  %v10575_v11 = vor.u32 %v12111_v40, %v10574_v31  ;;  %v2929_v48 = vrot.slane %v2928_v18, 4  ;;  %v2933_v27 = vrot.slane %v2931_v20, 5  ;;  %v12174_v9 = vld [vmem:[%s15438_s3 + $0x1b0] sm:$0xff]  ;;  %v3297_v63 = vsel %vm13586_vm11, %v10704_v12, %v3296_v43  ;;  %7263 = vmatpush.bf16.msra.mxu0 %v12281_v49  ;;  %4360 = vmatpush.bf16.msrb.mxu2 %v12182_v55 }
 0x225   :  { %1321 = vst [vmem:[#allocation2 + $0x134] sm:$0x1] %v1320_v44  ;;  %v1387_v29 = vshrl.u32 %v626_v14, 16  ;;  %v1390_v5 = vshll.u32 %v626_v14, 16  ;;  %v3301_v44 = vsel %vm13586_vm11, %v10705_v59, %v3300_v56  ;;  %v13611_v14 = vpop.f32.mrf.mxu1  ;;  %v2781_v12 = vld [vmem:[#allocation2 + $0x100] sm:$0xf]  ;;  %v5967_v18 = vunpack.c.l.b16 %v5921_v22  ;;  %4810 = vmatpush.bf16.msrb.mxu3 %v12190_v28 }
 0x226   :  { %v476_v38 = vpop.f32.mrf.mxu0  ;;  %2270 = vmatmul.bf16.gmra.mxu2 %v10575_v11  ;;  %3153 = vmatmul.bf16.gmra.mxu1 %v3069_v37  ;;  %v2943_v37 = vrot.slane %v2942_v17, 4  ;;  %v12147_v11 = vld [vmem:[#allocation2 + $0x174] sm:$0xf0]  ;;  %v2964_v20 = vshrl.u32 %v2783_v24, 16  ;;  %v2934_v61 = vsel %vm12754_vm8, %v2929_v48, %v2933_v27  ;;  %v3375_v59 = vunpack.c.l.b16 %v3297_v63  ;;  %v1540_v21 = vld [vmem:[#allocation2 + $0x1a4] sm:$0x1] }
 0x227   :  { %v1389_v1 = vrot.slane %v1387_v29, 7  ;;  %v477_v45 = vadd.f32 %v13440_v42, %v476_v38  ;;  %v2967_v29 = vshll.u32 %v2783_v24, 16  ;;  %3910 = vmatpush.bf16.msrb.mxu1 %v12174_v9  ;;  %v10799_v43 = vor.u32 %v12147_v11, %v10798_v16  ;;  %v3218_v11 = vld [vmem:[#allocation2 + $0x1c] sm:$0x1] }
 0x228   :  { %v2948_v38 = vsel %vm12754_vm8, %v2943_v37, %v2947_v23  ;;  %v3376_v56 = vunpack.c.l.b16 %v3301_v44  ;;  %v2950_v6 = vshrl.u32 %v2781_v12, 16  ;;  %7264 = vmatpush.bf16.msra.mxu0 %v12280_v51  ;;  %v3058_v49 = vunpack.c.l.b16 %v2934_v61  ;;  %v3217_v44 = vld [vmem:[#allocation2 + $0x18] sm:$0xe] }
 0x229   :  { %v1392_v50 = vor.u32 %v1390_v5, %v1389_v1  ;;  %v1393_v3 = vrot.slane %v1389_v1, 4  ;;  %v563_v10 = vmax.f32 %v477_v45, 0.0  ;;  %v2953_v45 = vshll.u32 %v2781_v12, 16  ;;  %v2782_v12 = vld [vmem:[#allocation2 + $0x104] sm:$0x1] }
 0x22a   :  { %v2966_v22 = vrot.slane %v2964_v20, 4  ;;  %v2969_v48 = vrot.slane %v2967_v29, 5  ;;  %v3215_v29 = vld [vmem:[#allocation2 + $0x10] sm:$0xe] }
 0x22b   :  { %v1532_v31 = vsel %vm12590_vm4, %v1392_v50, %v1531_v47  ;;  %v1535_v40 = vsel %vm12595_vm5, %v1393_v3, %v1534_v53  ;;  %v627_v4 = vpack.c.bf16 %v563_v10, %v563_v10  ;;  %v5976_v47 = vpack.c.b16 %v5968_v54, %v5967_v18  ;;  %v13625_v50 = vpop.f32.mrf.mxu3  ;;  %v2784_v54 = vld [vmem:[#allocation2 + $0x10c] sm:$0x1] }
 0x22c   :  { %1533 = vst [vmem:[#allocation2 + $0x198] sm:$0xf] %v1532_v31  ;;  %v3059_v53 = vunpack.c.l.b16 %v2948_v38  ;;  %v2952_v3 = vrot.slane %v2950_v6, 4  ;;  %v2955_v63 = vrot.slane %v2953_v45, 5  ;;  %v2973_v20 = vshll.u32 %v2784_v54, 16 }
 0x22d   :  { %1536 = vst [vmem:[#allocation2 + $0x19c] sm:$0x1] %v1535_v40  ;;  %v1395_v5 = vshrl.u32 %v627_v4, 16  ;;  %v1398_v17 = vshll.u32 %v627_v4, 16  ;;  %v3391_v40 = vpack.c.b16 %v3376_v56, %v3375_v59  ;;  %v2970_v4 = vor.u32 %v2969_v48, %v2966_v22  ;;  %v12189_v59 = vld [vmem:[%s15438_s3 + $0x228] sm:$0xff] }
 0x22e   :  { %v479_v60 = vpop.f32.mrf.mxu0  ;;  %v3070_v31 = vpack.c.b16 %v3059_v53, %v3058_v49  ;;  %v2956_v38 = vor.u32 %v2955_v63, %v2952_v3  ;;  %v12173_v56 = vld [vmem:[%s15438_s3 + $0x1a8] sm:$0xff]  ;;  %4811 = vmatpush.bf16.msrb.mxu3 %v12189_v59  ;;  %v12272_v49 = vld [vmem:[#allocation2 + $0x1ec] sm:$0xf0]  ;;  %v2975_v53 = vrot.slane %v2973_v20, 5  ;;  %v2787_v48 = vld [vmem:[#allocation2 + $0x118] sm:$0xf] }
 0x22f   :  { %v1397_v41 = vrot.slane %v1395_v5, 7  ;;  %v480_v1 = vadd.f32 %v13440_v42, %v479_v60  ;;  %v3216_v5 = vld [vmem:[#allocation2 + $0x14] sm:$0x1]  ;;  %v3308_v60 = vrot.slane %v3218_v11, 5  ;;  %v1543_v6 = vld [vmem:[#allocation2 + $0x1a8] sm:$0xf]  ;;  %3911 = vmatpush.bf16.msrb.mxu1 %v12173_v56 }
 0x230   :  { %v3304_v22 = vrot.slane %v3216_v5, 5  ;;  %v2957_v54 = vrot.slane %v2956_v38, 4 }
 0x231   :  { %v1400_v27 = vor.u32 %v1398_v17, %v1397_v41  ;;  %v1401_v55 = vrot.slane %v1397_v41, 4  ;;  %v564_v28 = vmax.f32 %v480_v1, 0.0  ;;  %6076 = vmatmul.bf16.gmra.mxu0 %v5976_v47  ;;  %v10707_v17 = vrot.slane %v3217_v44, 9  ;;  %v1546_v41 = vld [vmem:[#allocation2 + $0x1ac] sm:$0x1] }
 0x232   :  { %3705 = vmatmul.bf16.gmra.mxu3 %v10799_v43  ;;  %v12181_v43 = vld [vmem:[%s15438_s3 + $0x1e8] sm:$0xff]  ;;  %v2959_v1 = vshll.u32 %v2782_v12, 16  ;;  %v2971_v47 = vrot.slane %v2970_v4, 4  ;;  %v2785_v4 = vld [vmem:[#allocation2 + $0x110] sm:$0xf]  ;;  %v2995_v12 = vshll.u32 %v2787_v48, 16 }
 0x233   :  { %v1538_v10 = vsel %vm12590_vm4, %v1400_v27, %v1537_v46  ;;  %v1541_v37 = vsel %vm12595_vm5, %v1401_v55, %v1540_v21  ;;  %v628_v24 = vpack.c.bf16 %v564_v28, %v564_v28  ;;  %v13631_v9 = vpop.f32.mrf.mxu1  ;;  %v10706_v21 = vrot.slane %v3215_v29, 9  ;;  %4361 = vmatpush.bf16.msrb.mxu2 %v12181_v43  ;;  %v13649_v63 = vpop.f32.mrf.mxu3 }
 0x234   :  { %1539 = vst [vmem:[#allocation2 + $0x1a0] sm:$0xf] %v1538_v10  ;;  %v10802_v10 = vld [vmem:[#allocation2 + $0x190] sm:$0xf]  ;;  %v2961_v44 = vrot.slane %v2959_v1, 5  ;;  %v2978_v38 = vshrl.u32 %v2785_v4, 16 }
 0x235   :  { %1542 = vst [vmem:[#allocation2 + $0x1a4] sm:$0x1] %v1541_v37  ;;  %v1403_v23 = vshrl.u32 %v628_v24, 16  ;;  %v1406_v51 = vshll.u32 %v628_v24, 16  ;;  %v12148_v37 = vld [vmem:[#allocation2 + $0x194] sm:$0xf0]  ;;  %v3305_v5 = vsel %vm13586_vm11, %v10706_v21, %v3304_v22 }
 0x236   :  { %v481_v18 = vpop.f32.mrf.mxu0  ;;  %3158 = vmatmul.bf16.gmra.mxu1 %v3070_v31  ;;  %3463 = vmatmul.bf16.vlgmr.msra.gmra.mxu2 %v3391_v40  ;;  %v11506_v24 = vld [vmem:[#allocation2 + $0x1e8] sm:$0xf]  ;;  %v2976_v31 = vsel %vm12754_vm8, %v2971_v47, %v2975_v53  ;;  %v3309_v40 = vsel %vm13586_vm11, %v10707_v17, %v3308_v60  ;;  %v10803_v20 = vor.u32 %v12148_v37, %v10802_v10  ;;  %v2981_v43 = vshll.u32 %v2785_v4, 16  ;;  %v1549_v17 = vld [vmem:[#allocation2 + $0x1b0] sm:$0xf]  ;;  %v12172_v10 = vld [vmem:[%s15438_s3 + $0x1a0] sm:$0xff] }
 0x237   :  { %v1405_v16 = vrot.slane %v1403_v23, 7  ;;  %v482_v61 = vadd.f32 %v13440_v42, %v481_v18  ;;  %v11507_v29 = vor.u32 %v12272_v49, %v11506_v24  ;;  %v1552_v60 = vld [vmem:[#allocation2 + $0x1b4] sm:$0x1]  ;;  %v3061_v59 = vunpack.c.l.b16 %v2976_v31  ;;  %v3221_v37 = vld [vmem:[#allocation2 + $0x28] sm:$0xe]  ;;  %3912 = vmatpush.bf16.msrb.mxu1 %v12172_v10 }
 0x238   :  { %v3378_v56 = vunpack.c.l.b16 %v3309_v40  ;;  %v2997_v47 = vrot.slane %v2995_v12, 5  ;;  %v2980_v53 = vrot.slane %v2978_v38, 4  ;;  %v2983_v22 = vrot.slane %v2981_v43, 5  ;;  %v3222_v24 = vld [vmem:[#allocation2 + $0x2c] sm:$0x1] }
 0x239   :  { %v1408_v45 = vor.u32 %v1406_v51, %v1405_v16  ;;  %v1409_v42 = vrot.slane %v1405_v16, 4  ;;  %v565_v46 = vmax.f32 %v482_v61, 0.0  ;;  %v2992_v51 = vshrl.u32 %v2787_v48, 16  ;;  %v3220_v4 = vld [vmem:[#allocation2 + $0x24] sm:$0x1] }
 0x23a   :  { %v2962_v61 = vsel %vm12754_vm8, %v2957_v54, %v2961_v44  ;;  %v2786_v54 = vld [vmem:[#allocation2 + $0x114] sm:$0x1]  ;;  %v3219_v44 = vld [vmem:[#allocation2 + $0x20] sm:$0xe]  ;;  %v2984_v31 = vor.u32 %v2983_v22, %v2980_v53  ;;  %v3316_v12 = vrot.slane %v3222_v24, 5 }
 0x23b   :  { %v1544_v27 = vsel %vm12590_vm4, %v1408_v45, %v1543_v6  ;;  %v1547_v55 = vsel %vm12595_vm5, %v1409_v42, %v1546_v41  ;;  %v629_v28 = vpack.c.bf16 %v565_v46, %v565_v46  ;;  %v13647_v3 = vpop.f32.mrf.mxu1  ;;  %v2994_v1 = vrot.slane %v2992_v51, 4  ;;  %v2791_v38 = vld [vmem:[#allocation2 + $0x128] sm:$0xf] }
 0x23c   :  { %1545 = vst [vmem:[#allocation2 + $0x1a8] sm:$0xf] %v1544_v27  ;;  %v3060_v45 = vunpack.c.l.b16 %v2962_v61  ;;  %v3377_v42 = vunpack.c.l.b16 %v3305_v5  ;;  %v10709_v51 = vrot.slane %v3221_v37, 9  ;;  %v3312_v61 = vrot.slane %v3220_v4, 5 }
 0x23d   :  { %1548 = vst [vmem:[#allocation2 + $0x1ac] sm:$0x1] %v1547_v55  ;;  %v1411_v11 = vshrl.u32 %v629_v28, 16  ;;  %v1414_v23 = vshll.u32 %v629_v28, 16  ;;  %v2788_v28 = vld [vmem:[#allocation2 + $0x11c] sm:$0x1]  ;;  %v2998_v33 = vor.u32 %v2997_v47, %v2994_v1 }
 0x23e   :  { %v13655_v18 = vpop.f32.mrf.mxu0  ;;  %v3071_v27 = vpack.c.b16 %v3061_v59, %v3060_v45  ;;  %v3392_v55 = vpack.c.b16 %v3378_v56, %v3377_v42  ;;  %v3001_v40 = vshll.u32 %v2788_v28, 16  ;;  %v2985_v59 = vrot.slane %v2984_v31, 4  ;;  %v2789_v47 = vld [vmem:[#allocation2 + $0x120] sm:$0xf]  ;;  %v12170_v45 = vld [vmem:[%s15438_s3 + $0x190] sm:$0xff] }
 0x23f   :  { %15451 = vst [vmem:[#allocation6_spill] sm:$0xff] %v13655_v18  ;;  %v1413_v16 = vrot.slane %v1411_v11, 7  ;;  %v12180_v11 = vld [vmem:[%s15438_s3 + $0x1e0] sm:$0xff]  ;;  %v2999_v5 = vrot.slane %v2998_v33, 4  ;;  %v3317_v1 = vsel %vm13586_vm11, %v10709_v51, %v3316_v12  ;;  %v3023_v53 = vshll.u32 %v2791_v38, 16  ;;  %v12187_v51 = vld [vmem:[%s15438_s3 + $0x218] sm:$0xff] }
 0x240   :  { %4362 = vmatpush.bf16.msrb.mxu2 %v12180_v11  ;;  %v3003_v56 = vrot.slane %v3001_v40, 5  ;;  %v3006_v37 = vshrl.u32 %v2789_v47, 16  ;;  %v3009_v24 = vshll.u32 %v2789_v47, 16  ;;  %v3380_v31 = vunpack.c.l.b16 %v3317_v1  ;;  %v2790_v1 = vld [vmem:[#allocation2 + $0x124] sm:$0x1]  ;;  %v12179_v47 = vld [vmem:[%s15438_s3 + $0x1d8] sm:$0xff] }
 0x241   :  { %v1416_v6 = vor.u32 %v1414_v23, %v1413_v16  ;;  %v1417_v41 = vrot.slane %v1413_v16, 4  ;;  %7265 = vmatmul.bf16.vlgmr.msra.gmra.mxu0 %v11507_v29  ;;  %v12171_v23 = vld [vmem:[%s15438_s3 + $0x198] sm:$0xff]  ;;  %v2987_v29 = vshll.u32 %v2786_v54, 16  ;;  %v10708_v16 = vrot.slane %v3219_v44, 9  ;;  %v12169_v54 = vld [vmem:[%s15438_s3 + $0x188] sm:$0xff] }
 0x242   :  { %3710 = vmatmul.bf16.gmra.mxu3 %v10803_v20  ;;  %v12188_v20 = vld [vmem:[%s15438_s3 + $0x220] sm:$0xff]  ;;  %3913 = vmatpush.bf16.msrb.mxu1 %v12171_v23  ;;  %v3025_v4 = vrot.slane %v3023_v53, 5  ;;  %v3224_v53 = vld [vmem:[#allocation2 + $0x34] sm:$0x1]  ;;  %v4447_v18 = vld [vmem:[#allocation2 + $0x1fc] sm:$0x1] }
 0x243   :  { %v1550_v46 = vsel %vm12590_vm4, %v1416_v6, %v1549_v17  ;;  %v1553_v21 = vsel %vm12595_vm5, %v1417_v41, %v1552_v60  ;;  %v13665_v49 = vpop.f32.mrf.mxu1  ;;  %4812 = vmatpush.bf16.msrb.mxu3 %v12188_v20  ;;  %v10806_v17 = vld [vmem:[#allocation2 + $0x1a0] sm:$0xf]  ;;  %v12149_v60 = vld [vmem:[#allocation2 + $0x1a4] sm:$0xf0]  ;;  %v2989_v42 = vrot.slane %v2987_v29, 5  ;;  %v3313_v28 = vsel %vm13586_vm11, %v10708_v16, %v3312_v61 }
 0x244   :  { %1551 = vst [vmem:[#allocation2 + $0x1b0] sm:$0xf] %v1550_v46  ;;  %v12273_v41 = vld [vmem:[#allocation2 + $0x1fc] sm:$0xf0]  ;;  %v3004_v46 = vsel %vm12754_vm8, %v2999_v5, %v3003_v56  ;;  %v3379_v23 = vunpack.c.l.b16 %v3313_v28  ;;  %v3008_v20 = vrot.slane %v3006_v37, 4  ;;  %v3011_v29 = vrot.slane %v3009_v24, 5  ;;  %4363 = vmatpush.bf16.msrb.mxu2 %v12179_v47 }
 0x245   :  { %v13667_v48 = vpop.f32.mrf.mxu3  ;;  %1554 = vst [vmem:[#allocation2 + $0x1b4] sm:$0x1] %v1553_v21  ;;  %v3020_v21 = vshrl.u32 %v2791_v38, 16  ;;  %v2990_v33 = vsel %vm12754_vm8, %v2985_v59, %v2989_v42  ;;  %v3063_v44 = vunpack.c.l.b16 %v3004_v46  ;;  %v2792_v61 = vld [vmem:[#allocation2 + $0x12c] sm:$0x1]  ;;  %v12168_v38 = vld [vmem:[%s15438_s3 + $0x180] sm:$0xff] }
 0x246   :  { %3163 = vmatmul.bf16.gmra.mxu1 %v3071_v27  ;;  %3468 = vmatmul.bf16.gmra.mxu2 %v3392_v55  ;;  %v13672_v35 = vpop.f32.mrf.mxu0  ;;  %v10807_v27 = vor.u32 %v12149_v60, %v10806_v17  ;;  %v11510_v55 = vld [vmem:[#allocation2 + $0x1f8] sm:$0xf]  ;;  %v3062_v11 = vunpack.c.l.b16 %v2990_v33  ;;  %v3393_v16 = vpack.c.b16 %v3380_v31, %v3379_v23  ;;  %v3226_v56 = vld [vmem:[#allocation2 + $0x3c] sm:$0x1]  ;;  %v3012_v42 = vor.u32 %v3011_v29, %v3008_v20  ;;  %v12185_v33 = vld [vmem:[%s15438_s3 + $0x208] sm:$0xff] }
 0x247   :  { %15452 = vst [vmem:[#allocation7_spill] sm:$0xff] %v13672_v35  ;;  %v11511_v10 = vor.u32 %v12273_v41, %v11510_v55  ;;  %3914 = vmatpush.bf16.msrb.mxu1 %v12170_v45  ;;  %v3022_v40 = vrot.slane %v3020_v21, 4  ;;  %4813 = vmatpush.bf16.msrb.mxu3 %v12187_v51  ;;  %v3225_v59 = vld [vmem:[#allocation2 + $0x38] sm:$0xe]  ;;  %v12186_v45 = vld [vmem:[%s15438_s3 + $0x210] sm:$0xff]  ;;  %v3029_v46 = vshll.u32 %v2792_v61, 16 }
 0x248   :  { %v3072_v5 = vpack.c.b16 %v3063_v44, %v3062_v11  ;;  %v3223_v21 = vld [vmem:[#allocation2 + $0x30] sm:$0xe]  ;;  %v10711_v28 = vrot.slane %v3225_v59, 9  ;;  %v3013_v24 = vrot.slane %v3012_v42, 4  ;;  %v3320_v31 = vrot.slane %v3224_v53, 5  ;;  %v12184_v29 = vld [vmem:[%s15438_s3 + $0x200] sm:$0xff] }
 0x249   :  { %v3026_v60 = vor.u32 %v3025_v4, %v3022_v40  ;;  %v10710_v44 = vrot.slane %v3223_v21, 9  ;;  %v12274_v40 = vld [vmem:[#allocation2 + $0x20c] sm:$0xf0]  ;;  %v12150_v61 = vld [vmem:[#allocation2 + $0x1b4] sm:$0xf0] }
 0x24a   :  { %v4445_v35 = vld [vmem:[#allocation2 + $0x1f4] sm:$0x1] }
 0x24b   :  { %v13683_v43 = vpop.f32.mrf.mxu1  ;;  %3915 = vmatpush.bf16.msrb.mxu1 %v12169_v54  ;;  %4814 = vmatpush.bf16.msrb.mxu3 %v12186_v45  ;;  %v3027_v55 = vrot.slane %v3026_v60, 4  ;;  %v3031_v54 = vrot.slane %v3029_v46, 5  ;;  %v10810_v11 = vld [vmem:[#allocation2 + $0x1b0] sm:$0xf]  ;;  %v3321_v59 = vsel %vm13586_vm11, %v10710_v44, %v3320_v31  ;;  %v3230_v44 = vld [vmem:[#allocation2 + $0x5c] sm:$0x1] }
 0x24c   :  { %v3381_v42 = vunpack.c.l.b16 %v3321_v59  ;;  %v12178_v31 = vld [vmem:[%s15438_s3 + $0x1d0] sm:$0xff] }
 0x24d   :  { %v13685_v6 = vpop.f32.mrf.mxu3  ;;  %v3032_v51 = vsel %vm12754_vm8, %v3027_v55, %v3031_v54  ;;  %v3229_v54 = vld [vmem:[#allocation2 + $0x58] sm:$0xe]  ;;  %4364 = vmatpush.bf16.msrb.mxu2 %v12178_v31 }
 0x24e   :  { %v13694_v22 = vpop.f32.mrf.mxu0 }
 0x24f   :  { %15453 = vst [vmem:[#allocation8_spill] sm:$0xff] %v13694_v22  ;;  %3916 = vmatpush.bf16.msrb.mxu1 %v12168_v38  ;;  %4815 = vmatpush.bf16.msrb.mxu3 %v12185_v33  ;;  %v4442_v33 = vld [vmem:[#allocation2 + $0x1e8] sm:$0xf]  ;;  %v13760_v22 = vpop.f32.mrf.mxu2 }
 0x251   :  { %7270 = vmatmul.bf16.gmra.mxu0 %v11511_v10  ;;  %v3324_v10 = vrot.slane %v3226_v56, 5  ;;  %v10811_v56 = vor.u32 %v12150_v61, %v10810_v11  ;;  %v3332_v61 = vrot.slane %v3230_v44, 5  ;;  %v4443_v44 = vld [vmem:[#allocation2 + $0x1ec] sm:$0x1] }
 0x252   :  { %3715 = vmatmul.bf16.gmra.mxu3 %v10807_v27  ;;  %v3015_v27 = vshll.u32 %v2790_v1, 16  ;;  %v3065_v1 = vunpack.c.l.b16 %v3032_v51  ;;  %v4506_v51 = vshll.u32 %v4442_v33, 16 }
 0x253   :  { %v13706_v12 = vpop.f32.mrf.mxu1  ;;  %v3325_v20 = vsel %vm13586_vm11, %v10711_v28, %v3324_v10  ;;  %4816 = vmatpush.bf16.msrb.mxu3 %v12184_v29  ;;  %v3227_v28 = vld [vmem:[#allocation2 + $0x50] sm:$0xe]  ;;  %v3228_v10 = vld [vmem:[#allocation2 + $0x54] sm:$0x1] }
 0x254   :  { %v3017_v23 = vrot.slane %v3015_v27, 5  ;;  %v3382_v47 = vunpack.c.l.b16 %v3325_v20  ;;  %v4440_v27 = vld [vmem:[#allocation2 + $0x1e0] sm:$0xf]  ;;  %v10712_v20 = vrot.slane %v3227_v28, 9  ;;  %v3328_v29 = vrot.slane %v3228_v10, 5 }
 0x255   :  { %v13711_v17 = vpop.f32.mrf.mxu3  ;;  %v4492_v11 = vshll.u32 %v4440_v27, 16 }
 0x256   :  { %3168 = vmatmul.bf16.gmra.mxu1 %v3072_v5  ;;  %3473 = vmatmul.bf16.gmra.mxu2 %v3393_v16  ;;  %v13713_v41 = vpop.f32.mrf.mxu0  ;;  %v11514_v16 = vld [vmem:[#allocation2 + $0x208] sm:$0xf]  ;;  %v3018_v60 = vsel %vm12754_vm8, %v3013_v24, %v3017_v23  ;;  %v3394_v53 = vpack.c.b16 %v3382_v47, %v3381_v42  ;;  %v4503_v23 = vshrl.u32 %v4442_v33, 16  ;;  %v11518_v33 = vld [vmem:[#allocation2 + $0x218] sm:$0xf] }
 0x257   :  { %15454 = vst [vmem:[#allocation9_spill] sm:$0xff] %v13713_v41  ;;  %v11515_v38 = vor.u32 %v12274_v40, %v11514_v16  ;;  %v3064_v45 = vunpack.c.l.b16 %v3018_v60  ;;  %v4489_v40 = vshrl.u32 %v4440_v27, 16  ;;  %v10713_v16 = vrot.slane %v3229_v54, 9 }
 0x258   :  { %v4494_v59 = vrot.slane %v4492_v11, 5  ;;  %v4505_v47 = vrot.slane %v4503_v23, 4  ;;  %v3329_v27 = vsel %vm13586_vm11, %v10712_v20, %v3328_v29  ;;  %v2729_v20 = vadd.f32 %v13435_v57, %v13045_v34  ;;  %v12177_v34 = vld [vmem:[%s15438_s3 + $0x1c8] sm:$0xff]  ;;  %v4444_v57 = vld [vmem:[#allocation2 + $0x1f0] sm:$0xf] }
 0x259   :  { %v3073_v21 = vpack.c.b16 %v3065_v1, %v3064_v45  ;;  %v4491_v60 = vrot.slane %v4489_v40, 4  ;;  %v4441_v1 = vld [vmem:[#allocation2 + $0x1e4] sm:$0x1]  ;;  %v4508_v45 = vrot.slane %v4506_v51, 5  ;;  %v3333_v28 = vsel %vm13586_vm11, %v10713_v16, %v3332_v61  ;;  %4365 = vmatpush.bf16.msrb.mxu2 %v12177_v34 }
 0x25a   :  { %v4498_v40 = vshll.u32 %v4441_v1, 16  ;;  %v3383_v23 = vunpack.c.l.b16 %v3329_v27  ;;  %v3384_v51 = vunpack.c.l.b16 %v3333_v28  ;;  %v4512_v29 = vshll.u32 %v4443_v44, 16  ;;  %v3233_v27 = vld [vmem:[#allocation2 + $0x68] sm:$0xe]  ;;  %v3234_v28 = vld [vmem:[#allocation2 + $0x6c] sm:$0x1] }
 0x25b   :  { %v13724_v37 = vpop.f32.mrf.mxu1  ;;  %v4495_v31 = vor.u32 %v4494_v59, %v4491_v60  ;;  %v4509_v41 = vor.u32 %v4508_v45, %v4505_v47  ;;  %v3231_v44 = vld [vmem:[#allocation2 + $0x60] sm:$0xe] }
 0x25c   :  { %v3395_v60 = vpack.c.b16 %v3384_v51, %v3383_v23  ;;  %v4514_v45 = vrot.slane %v4512_v29, 5  ;;  %v3340_v23 = vrot.slane %v3234_v28, 5 }
 0x25d   :  { %v13726_v4 = vpop.f32.mrf.mxu3  ;;  %v4496_v59 = vrot.slane %v4495_v31, 4  ;;  %v4510_v1 = vrot.slane %v4509_v41, 4  ;;  %v3232_v31 = vld [vmem:[#allocation2 + $0x64] sm:$0x1] }
 0x25e   :  { %v13735_v5 = vpop.f32.mrf.mxu0 }
 0x25f   :  { %15455 = vst [vmem:[#allocation10_spill] sm:$0xff] %v13735_v5  ;;  %v12160_v5 = vld [vmem:[#allocation2 + $0x1e4] sm:$0xf0] }
 0x261   :  { %7275 = vmatmul.bf16.gmra.mxu0 %v11515_v38 }
 0x262   :  { %3720 = vmatmul.bf16.gmra.mxu3 %v10811_v56  ;;  %v12275_v56 = vld [vmem:[#allocation2 + $0x21c] sm:$0xf0] }
 0x263   :  { %v13741_v46 = vpop.f32.mrf.mxu1  ;;  %v11519_v54 = vor.u32 %v12275_v56, %v11518_v33  ;;  %v4500_v56 = vrot.slane %v4498_v40, 5 }
 0x265   :  { %v13743_v55 = vpop.f32.mrf.mxu3 }
 0x266   :  { %3173 = vmatmul.bf16.gmra.mxu1 %v3073_v21  ;;  %3478 = vmatmul.bf16.gmra.mxu2 %v3394_v53  ;;  %v13745_v24 = vpop.f32.mrf.mxu0  ;;  %v10814_v21 = vld [vmem:[#allocation2 + $0x1c0] sm:$0xf]  ;;  %v12151_v53 = vld [vmem:[#allocation2 + $0x1c4] sm:$0xf0] }
 0x267   :  { %15456 = vst [vmem:[#allocation11_spill] sm:$0xff] %v13745_v24  ;;  %v10815_v11 = vor.u32 %v12151_v53, %v10814_v21  ;;  %v10866_v24 = vld [vmem:[#allocation2 + $0x1e0] sm:$0xf]  ;;  %v4446_v53 = vld [vmem:[#allocation2 + $0x1f8] sm:$0xf] }
 0x268   :  { %v10867_v61 = vor.u32 %v12160_v5, %v10866_v24  ;;  %v13776_v5 = vld [vmem:[%s15439_s4] ss:$0 sm:$0xff]  ;;  %v4501_v24 = vsel %vm12754_vm8, %v4496_v59, %v4500_v56  ;;  %v4531_v51 = vshrl.u32 %v4446_v53, 16 }
 0x269   :  { %v2057_v41 = vadd.f32 %v13776_v5, %v13631_v9  ;;  %v10714_v9 = vrot.slane %v3231_v44, 9  ;;  %v4729_v56 = vunpack.c.l.b16 %v4501_v24  ;;  %v2058_v24 = vadd.f32 %v13776_v5, %v13647_v3  ;;  %v12327_v3 = vld [vmem:[%s15438_s3 + $0x538] sm:$0xff] }
 0x26a   :  { %v4533_v28 = vrot.slane %v4531_v51, 4  ;;  %8706 = vmatpush.bf16.msrb.mxu0 %v12327_v3 }
 0x26b   :  { %v13750_v38 = vpop.f32.mrf.mxu1 }
 0x26d   :  { %v13752_v42 = vpop.f32.mrf.mxu3 }
 0x26e   :  { %15457 = vst [vmem:[#allocation12_spill] sm:$0xff] %v13752_v42  ;;  %v13758_v10 = vpop.f32.mrf.mxu0 }
 0x26f   :  { %15458 = vst [vmem:[#allocation13_spill] sm:$0xff] %v13758_v10  ;;  %v11522_v10 = vld [vmem:[#allocation2 + $0x238] sm:$0xf] }
 0x271   :  { %7280 = vmatmul.bf16.gmra.mxu0 %v11519_v54  ;;  %v4515_v54 = vsel %vm12754_vm8, %v4510_v1, %v4514_v45  ;;  %v12276_v1 = vld [vmem:[#allocation2 + $0x23c] sm:$0xf0] }
 0x272   :  { %3725 = vmatmul.bf16.gmra.mxu3 %v10815_v11  ;;  %v10715_v11 = vrot.slane %v3233_v27, 9  ;;  %v4730_v59 = vunpack.c.l.b16 %v4515_v54 }
 0x273   :  { %v3139_v16 = vpop.f32.mrf.mxu1 }
 0x274   :  { %v13764_v33 = vadd.f32 %v3139_v16, %v2729_v20  ;;  %v4534_v20 = vshll.u32 %v4446_v53, 16  ;;  %v4517_v16 = vshrl.u32 %v4444_v57, 16  ;;  %v3341_v27 = vsel %vm13586_vm11, %v10715_v11, %v3340_v23  ;;  %v12161_v11 = vld [vmem:[#allocation2 + $0x1f4] sm:$0xf0] }
 0x275   :  { %v13766_v21 = vpop.f32.mrf.mxu3  ;;  %v4745_v54 = vpack.c.b16 %v4730_v59, %v4729_v56  ;;  %v4540_v56 = vshll.u32 %v4447_v18, 16  ;;  %v12176_v18 = vld [vmem:[%s15438_s3 + $0x1c0] sm:$0xff] }
 0x276   :  { %15459 = vst [vmem:[#allocation14_spill] sm:$0xff] %v13766_v21  ;;  %3483 = vmatmul.bf16.gmra.mxu2 %v3395_v60  ;;  %3917 = vmatmul.bf16.vlgmr.msrb.gmra.mxu1 %v10867_v61  ;;  %v13768_v47 = vpop.f32.mrf.mxu0  ;;  %v4520_v61 = vshll.u32 %v4444_v57, 16  ;;  %v4536_v34 = vrot.slane %v4534_v20, 5  ;;  %v11523_v57 = vor.u32 %v12276_v1, %v11522_v10  ;;  %v2731_v10 = vadd.f32 %v13489_v8, %v13069_v13  ;;  %v4450_v13 = vld [vmem:[#allocation2 + $0x208] sm:$0xf] }
 0x277   :  { %15460 = vst [vmem:[#allocation15_spill] sm:$0xff] %v13768_v47  ;;  %v3336_v47 = vrot.slane %v3232_v31, 5  ;;  %v3386_v31 = vunpack.c.l.b16 %v3341_v27  ;;  %4366 = vmatpush.bf16.msrb.mxu2 %v12176_v18 }
 0x278   :  { %v4537_v23 = vor.u32 %v4536_v34, %v4533_v28  ;;  %v3237_v34 = vld [vmem:[#allocation2 + $0x78] sm:$0xe] }
 0x279   :  { %v2256_v40 = vpop.f32.mrf.mxu2  ;;  %v3337_v44 = vsel %vm13586_vm11, %v10714_v9, %v3336_v47  ;;  %v4526_v9 = vshll.u32 %v4445_v35, 16  ;;  %v12326_v35 = vld [vmem:[%s15438_s3 + $0x530] sm:$0xff]  ;;  %v10717_v3 = vrot.slane %v3237_v34, 9 }
 0x27a   :  { %v13784_v29 = vadd.f32 %v2256_v40, %v2057_v41  ;;  %v4519_v41 = vrot.slane %v4517_v16, 4  ;;  %v4522_v40 = vrot.slane %v4520_v61, 5  ;;  %v3385_v20 = vunpack.c.l.b16 %v3337_v44  ;;  %v10870_v61 = vld [vmem:[#allocation2 + $0x1f0] sm:$0xf]  ;;  %8707 = vmatpush.bf16.msrb.mxu0 %v12326_v35 }
 0x27b   :  { %v13786_v60 = vpop.f32.mrf.mxu1  ;;  %v10871_v27 = vor.u32 %v12161_v11, %v10870_v61  ;;  %v4538_v28 = vrot.slane %v4537_v23, 4  ;;  %v4542_v44 = vrot.slane %v4540_v56, 5  ;;  %v3236_v11 = vld [vmem:[#allocation2 + $0x74] sm:$0x1]  ;;  %v4559_v23 = vshrl.u32 %v4450_v13, 16 }
 0x27c   :  { %v4523_v16 = vor.u32 %v4522_v40, %v4519_v41  ;;  %v3396_v1 = vpack.c.b16 %v3386_v31, %v3385_v20  ;;  %v3238_v40 = vld [vmem:[#allocation2 + $0x7c] sm:$0x1]  ;;  %v3235_v31 = vld [vmem:[#allocation2 + $0x70] sm:$0xe] }
 0x27d   :  { %v13788_v45 = vpop.f32.mrf.mxu3  ;;  %v4561_v34 = vrot.slane %v4559_v23, 4 }
 0x27e   :  { %15461 = vst [vmem:[#allocation16_spill] sm:$0xff] %v13788_v45  ;;  %v13792_v53 = vpop.f32.mrf.mxu0  ;;  %v4524_v41 = vrot.slane %v4523_v16, 4  ;;  %v4543_v16 = vsel %vm12754_vm8, %v4538_v28, %v4542_v44  ;;  %v12277_v28 = vld [vmem:[#allocation2 + $0x24c] sm:$0xf0] }
 0x27f   :  { %15462 = vst [vmem:[#allocation17_spill] sm:$0xff] %v13792_v53  ;;  %v4732_v35 = vunpack.c.l.b16 %v4543_v16  ;;  %v2060_v16 = vadd.f32 %v13776_v5, %v13683_v43  ;;  %v12323_v43 = vld [vmem:[%s15438_s3 + $0x518] sm:$0xff] }
 0x281   :  { %v2258_v45 = vpop.f32.mrf.mxu2  ;;  %7285 = vmatmul.bf16.gmra.mxu0 %v11523_v57  ;;  %v4528_v57 = vrot.slane %v4526_v9, 5 }
 0x282   :  { %v13798_v51 = vadd.f32 %v2258_v45, %v2058_v24  ;;  %4817 = vmatmul.bf16.vlgmr.msrb.gmra.mxu3 %v4745_v54  ;;  %v4448_v24 = vld [vmem:[#allocation2 + $0x200] sm:$0xf]  ;;  %v2059_v54 = vadd.f32 %v13776_v5, %v13665_v49  ;;  %v12325_v49 = vld [vmem:[%s15438_s3 + $0x528] sm:$0xff] }
 0x283   :  { %v3144_v47 = vpop.f32.mrf.mxu1  ;;  %v4529_v9 = vsel %vm12754_vm8, %v4524_v41, %v4528_v57  ;;  %v4548_v18 = vshll.u32 %v4448_v24, 16  ;;  %8708 = vmatpush.bf16.msrb.mxu0 %v12325_v49 }
 0x284   :  { %v13805_v59 = vadd.f32 %v3144_v47, %v2731_v10  ;;  %v4562_v10 = vshll.u32 %v4450_v13, 16  ;;  %v3348_v47 = vrot.slane %v3238_v40, 5  ;;  %v4545_v13 = vshrl.u32 %v4448_v24, 16 }
 0x285   :  { %v13807_v45 = vpop.f32.mrf.mxu3  ;;  %v4731_v57 = vunpack.c.l.b16 %v4529_v9 }
 0x286   :  { %15463 = vst [vmem:[#allocation18_spill] sm:$0xff] %v13807_v45  ;;  %3488 = vmatmul.bf16.gmra.mxu2 %v3396_v1  ;;  %3922 = vmatmul.bf16.gmra.mxu1 %v10871_v27  ;;  %v13809_v8 = vpop.f32.mrf.mxu0  ;;  %v10716_v1 = vrot.slane %v3235_v31, 9  ;;  %v3344_v27 = vrot.slane %v3236_v11, 5  ;;  %v4564_v40 = vrot.slane %v4562_v10, 5  ;;  %v3349_v41 = vsel %vm13586_vm11, %v10717_v3, %v3348_v47  ;;  %v12162_v3 = vld [vmem:[#allocation2 + $0x204] sm:$0xf0] }
 0x287   :  { %15464 = vst [vmem:[#allocation19_spill] sm:$0xff] %v13809_v8  ;;  %v11526_v8 = vld [vmem:[#allocation2 + $0x248] sm:$0xf]  ;;  %v4547_v23 = vrot.slane %v4545_v13, 4  ;;  %v4550_v10 = vrot.slane %v4548_v18, 5  ;;  %v4746_v49 = vpack.c.b16 %v4732_v35, %v4731_v57  ;;  %v3388_v53 = vunpack.c.l.b16 %v3349_v41 }
 0x288   :  { %v11527_v11 = vor.u32 %v12277_v28, %v11526_v8  ;;  %v3345_v24 = vsel %vm13586_vm11, %v10716_v1, %v3344_v27  ;;  %v4565_v47 = vor.u32 %v4564_v40, %v4561_v34  ;;  %v2733_v8 = vadd.f32 %v13545_v36, %v13096_v62  ;;  %v10874_v27 = vld [vmem:[#allocation2 + $0x200] sm:$0xf]  ;;  %v3241_v62 = vld [vmem:[#allocation2 + $0x88] sm:$0xe]  ;;  %v3242_v36 = vld [vmem:[#allocation2 + $0x8c] sm:$0x1] }
 0x289   :  { %v2261_v20 = vpop.f32.mrf.mxu2  ;;  %v3387_v1 = vunpack.c.l.b16 %v3345_v24  ;;  %v10875_v35 = vor.u32 %v12162_v3, %v10874_v27  ;;  %v4551_v28 = vor.u32 %v4550_v10, %v4547_v23  ;;  %v4454_v24 = vld [vmem:[#allocation2 + $0x218] sm:$0xf]  ;;  %v4452_v10 = vld [vmem:[#allocation2 + $0x210] sm:$0xf]  ;;  %v3240_v27 = vld [vmem:[#allocation2 + $0x84] sm:$0x1] }
 0x28a   :  { %v13821_v61 = vadd.f32 %v2261_v20, %v2059_v54  ;;  %v12324_v54 = vld [vmem:[%s15438_s3 + $0x520] sm:$0xff]  ;;  %v4451_v20 = vld [vmem:[#allocation2 + $0x20c] sm:$0x1]  ;;  %v4566_v57 = vrot.slane %v4565_v47, 4  ;;  %v2061_v47 = vadd.f32 %v13776_v5, %v13706_v12  ;;  %v4573_v12 = vshrl.u32 %v4452_v10, 16 }
 0x28b   :  { %v13828_v56 = vpop.f32.mrf.mxu1  ;;  %8709 = vmatpush.bf16.msrb.mxu0 %v12324_v54  ;;  %v4568_v13 = vshll.u32 %v4451_v20, 16  ;;  %v3397_v40 = vpack.c.b16 %v3388_v53, %v3387_v1  ;;  %v3990_v54 = vld [vmem:[#allocation2 + $0x140] sm:$0xf]  ;;  %v12322_v53 = vld [vmem:[%s15438_s3 + $0x510] sm:$0xff]  ;;  %v4552_v23 = vrot.slane %v4551_v28, 4  ;;  %v3356_v28 = vrot.slane %v3242_v36, 5 }
 0x28c   :  { %v4039_v3 = vshrl.u32 %v3990_v54, 16  ;;  %v3239_v1 = vld [vmem:[#allocation2 + $0x80] sm:$0xe] }
 0x28d   :  { %v13830_v44 = vpop.f32.mrf.mxu3  ;;  %v4570_v20 = vrot.slane %v4568_v13, 5  ;;  %v4042_v13 = vshll.u32 %v3990_v54, 16  ;;  %v12321_v54 = vld [vmem:[%s15438_s3 + $0x508] sm:$0xff]  ;;  %v10718_v36 = vrot.slane %v3239_v1, 9 }
 0x28e   :  { %15465 = vst [vmem:[#allocation20_spill] sm:$0xff] %v13830_v44  ;;  %v13837_v31 = vpop.f32.mrf.mxu0  ;;  %v4449_v44 = vld [vmem:[#allocation2 + $0x204] sm:$0x1]  ;;  %v4041_v42 = vrot.slane %v4039_v3, 4 }
 0x28f   :  { %15466 = vst [vmem:[#allocation21_spill] sm:$0xff] %v13837_v31  ;;  %v4554_v41 = vshll.u32 %v4449_v44, 16  ;;  %8710 = vmatpush.bf16.msrb.mxu0 %v12323_v43  ;;  %v12231_v44 = vld [vmem:[%s15438_s3 + $0x2f8] sm:$0xff]  ;;  %v4590_v31 = vshll.u32 %v4454_v24, 16  ;;  %v4044_v39 = vrot.slane %v4042_v13, 5 }
 0x290   :  { %5583 = vmatpush.bf16.msra.mxu3 %v12231_v44  ;;  %v11530_v44 = vld [vmem:[#allocation2 + $0x258] sm:$0xf] }
 0x291   :  { %v2263_v9 = vpop.f32.mrf.mxu2  ;;  %7290 = vmatmul.bf16.gmra.mxu0 %v11527_v11  ;;  %v4592_v52 = vrot.slane %v4590_v31, 5 }
 0x292   :  { %v13843_v45 = vadd.f32 %v2263_v9, %v2060_v16  ;;  %4822 = vmatmul.bf16.gmra.mxu3 %v4746_v49  ;;  %v12215_v16 = vld [vmem:[%s15438_s3 + $0x2b8] sm:$0xff]  ;;  %v3992_v49 = vld [vmem:[#allocation2 + $0x148] sm:$0xf]  ;;  %v4556_v9 = vrot.slane %v4554_v41, 5 }
 0x293   :  { %v3149_v18 = vpop.f32.mrf.mxu1  ;;  %5357 = vmatpush.bf16.msra.mxu2 %v12215_v16  ;;  %8711 = vmatpush.bf16.msrb.mxu0 %v12322_v53  ;;  %v4053_v41 = vshrl.u32 %v3992_v49, 16  ;;  %v4056_v21 = vshll.u32 %v3992_v49, 16  ;;  %v4576_v16 = vshll.u32 %v4452_v10, 16  ;;  %v12320_v10 = vld [vmem:[%s15438_s3 + $0x500] sm:$0xff] }
 0x294   :  { %v13850_v34 = vadd.f32 %v3149_v18, %v2733_v8  ;;  %v4571_v8 = vsel %vm12754_vm8, %v4566_v57, %v4570_v20  ;;  %v12199_v57 = vld [vmem:[%s15438_s3 + $0x278] sm:$0xff] }
 0x295   :  { %v13852_v11 = vpop.f32.mrf.mxu3  ;;  %v4734_v53 = vunpack.c.l.b16 %v4571_v8  ;;  %5131 = vmatpush.bf16.msra.mxu1 %v12199_v57  ;;  %v4578_v57 = vrot.slane %v4576_v16, 5  ;;  %v4045_v16 = vor.u32 %v4044_v39, %v4041_v42  ;;  %v4456_v39 = vld [vmem:[#allocation2 + $0x230] sm:$0xf] }
 0x296   :  { %15467 = vst [vmem:[#allocation22_spill] sm:$0xff] %v13850_v34  ;;  %3493 = vmatmul.bf16.gmra.mxu2 %v3397_v40  ;;  %3927 = vmatmul.bf16.gmra.mxu1 %v10875_v35  ;;  %v13867_v43 = vpop.f32.mrf.mxu0  ;;  %v10719_v35 = vrot.slane %v3241_v62, 9  ;;  %v4587_v40 = vshrl.u32 %v4454_v24, 16  ;;  %v4557_v62 = vsel %vm12754_vm8, %v4552_v23, %v4556_v9  ;;  %v3352_v24 = vrot.slane %v3240_v27, 5  ;;  %v3991_v34 = vld [vmem:[#allocation2 + $0x144] sm:$0x1] }
 0x297   :  { %15468 = vst [vmem:[#allocation23_spill] sm:$0xff] %v13852_v11  ;;  %8712 = vmatpush.bf16.msrb.mxu0 %v12321_v54  ;;  %v4055_v23 = vrot.slane %v4053_v41, 4  ;;  %v4058_v9 = vrot.slane %v4056_v21, 5  ;;  %v4575_v27 = vrot.slane %v4573_v12, 4  ;;  %v12163_v21 = vld [vmem:[#allocation2 + $0x214] sm:$0xf0]  ;;  %v2735_v12 = vadd.f32 %v13625_v50, %v13146_v26 }
 0x298   :  { %15469 = vst [vmem:[#allocation24_spill] sm:$0xff] %v13867_v43  ;;  %v4589_v43 = vrot.slane %v4587_v40, 4  ;;  %v3353_v1 = vsel %vm13586_vm11, %v10718_v36, %v3352_v24  ;;  %v3993_v41 = vld [vmem:[#allocation2 + $0x14c] sm:$0x1]  ;;  %v4048_v54 = vshll.u32 %v3991_v34, 16 }
 0x299   :  { %v2266_v18 = vpop.f32.mrf.mxu2  ;;  %v3389_v36 = vunpack.c.l.b16 %v3353_v1  ;;  %v4453_v24 = vld [vmem:[#allocation2 + $0x214] sm:$0x1] }
 0x29a   :  { %v13869_v11 = vadd.f32 %v2266_v18, %v2061_v47  ;;  %v12278_v47 = vld [vmem:[#allocation2 + $0x25c] sm:$0xf0]  ;;  %v3357_v18 = vsel %vm13586_vm11, %v10719_v35, %v3356_v28  ;;  %v2062_v35 = vadd.f32 %v13776_v5, %v13724_v37  ;;  %v4455_v28 = vld [vmem:[#allocation2 + $0x21c] sm:$0x1]  ;;  %v4593_v40 = vor.u32 %v4592_v52, %v4589_v43 }
 0x29b   :  { %v13877_v20 = vpop.f32.mrf.mxu1  ;;  %v11531_v8 = vor.u32 %v12278_v47, %v11530_v44  ;;  %v3390_v3 = vunpack.c.l.b16 %v3357_v18  ;;  %8713 = vmatpush.bf16.msrb.mxu0 %v12320_v10  ;;  %v2056_v37 = vadd.f32 %v13776_v5, %v13611_v14  ;;  %v10878_v44 = vld [vmem:[#allocation2 + $0x210] sm:$0xf]  ;;  %v4579_v47 = vor.u32 %v4578_v57, %v4575_v27 }
 0x29c   :  { %15470 = vst [vmem:[#allocation25_spill] sm:$0xff] %v13877_v20  ;;  %v4733_v20 = vunpack.c.l.b16 %v4557_v62  ;;  %v4596_v52 = vshll.u32 %v4455_v28, 16  ;;  %v4059_v43 = vor.u32 %v4058_v9, %v4055_v23  ;;  %v10879_v10 = vor.u32 %v12163_v21, %v10878_v44  ;;  %v12214_v23 = vld [vmem:[%s15438_s3 + $0x2b0] sm:$0xff] }
 0x29d   :  { %v13881_v49 = vpop.f32.mrf.mxu3  ;;  %v3398_v18 = vpack.c.b16 %v3390_v3, %v3389_v36  ;;  %v4582_v26 = vshll.u32 %v4453_v24, 16  ;;  %v4594_v50 = vrot.slane %v4593_v40, 4  ;;  %v2283_v42 = vadd.f32 %v13760_v22, %v2056_v37  ;;  %v12230_v9 = vld [vmem:[%s15438_s3 + $0x2f0] sm:$0xff]  ;;  %v3996_v40 = vld [vmem:[#allocation2 + $0x158] sm:$0xf]  ;;  %5358 = vmatpush.bf16.msra.mxu2 %v12214_v23 }
 0x29e   :  { %v4747_v31 = vpack.c.b16 %v4734_v53, %v4733_v20  ;;  %v13898_v20 = vpop.f32.mrf.mxu0  ;;  %v4046_v14 = vrot.slane %v4045_v16, 4  ;;  %v4050_v1 = vrot.slane %v4048_v54, 5  ;;  %v4580_v27 = vrot.slane %v4579_v47, 4  ;;  %5584 = vmatpush.bf16.msra.mxu3 %v12230_v9 }
 0x29f   :  { %15471 = vst [vmem:[#allocation26_spill] sm:$0xff] %v13898_v20  ;;  %v4598_v57 = vrot.slane %v4596_v52, 5  ;;  %v4060_v3 = vrot.slane %v4059_v43, 4  ;;  %v2063_v28 = vadd.f32 %v13776_v5, %v13741_v46  ;;  %v4604_v21 = vshll.u32 %v4456_v39, 16  ;;  %v3994_v43 = vld [vmem:[#allocation2 + $0x150] sm:$0xf] }
 0x2a0   :  { %v4584_v54 = vrot.slane %v4582_v26, 5  ;;  %v2736_v37 = vadd.f32 %v13649_v63, %v2283_v42  ;;  %v4051_v46 = vsel %vm12754_vm8, %v4046_v14, %v4050_v1  ;;  %v11534_v26 = vld [vmem:[#allocation2 + $0x268] sm:$0xf] }
 0x2a1   :  { %v2268_v13 = vpop.f32.mrf.mxu2  ;;  %7295 = vmatmul.bf16.gmra.mxu0 %v11531_v8  ;;  %v4062_v8 = vshll.u32 %v3993_v41, 16  ;;  %v4606_v42 = vrot.slane %v4604_v21, 5 }
 0x2a2   :  { %v13892_v62 = vadd.f32 %v2268_v13, %v2062_v35  ;;  %4827 = vmatmul.bf16.gmra.mxu3 %v4747_v31  ;;  %v4458_v31 = vld [vmem:[#allocation2 + $0x238] sm:$0xf]  ;;  %v4601_v13 = vshrl.u32 %v4456_v39, 16  ;;  %v4585_v47 = vsel %vm12754_vm8, %v4580_v27, %v4584_v54 }
 0x2a3   :  { %v3154_v53 = vpop.f32.mrf.mxu1  ;;  %v4064_v22 = vrot.slane %v4062_v8, 5  ;;  %v4615_v36 = vshrl.u32 %v4458_v31, 16  ;;  %v4618_v24 = vshll.u32 %v4458_v31, 16  ;;  %v4457_v31 = vld [vmem:[#allocation2 + $0x234] sm:$0x1]  ;;  %v4735_v27 = vunpack.c.l.b16 %v4585_v47 }
 0x2a4   :  { %v13900_v34 = vadd.f32 %v3154_v53, %v2735_v12  ;;  %v4599_v12 = vsel %vm12754_vm8, %v4594_v50, %v4598_v57  ;;  %v12198_v53 = vld [vmem:[%s15438_s3 + $0x270] sm:$0xff]  ;;  %v4603_v39 = vrot.slane %v4601_v13, 4  ;;  %v4279_v57 = vunpack.c.l.b16 %v4051_v46 }
 0x2a5   :  { %v13902_v35 = vpop.f32.mrf.mxu3  ;;  %v4065_v52 = vsel %vm12754_vm8, %v4060_v3, %v4064_v22  ;;  %v4736_v63 = vunpack.c.l.b16 %v4599_v12  ;;  %v12279_v50 = vld [vmem:[#allocation2 + $0x26c] sm:$0xf0]  ;;  %5132 = vmatpush.bf16.msra.mxu1 %v12198_v53  ;;  %v4617_v23 = vrot.slane %v4615_v36, 4  ;;  %v4620_v9 = vrot.slane %v4618_v24, 5  ;;  %v4459_v3 = vld [vmem:[#allocation2 + $0x23c] sm:$0x1] }
 0x2a6   :  { %3498 = vmatmul.bf16.gmra.mxu2 %v3398_v18  ;;  %3932 = vmatmul.bf16.gmra.mxu1 %v10879_v10  ;;  %v4081_v18 = vshrl.u32 %v3996_v40, 16  ;;  %v4084_v10 = vshll.u32 %v3996_v40, 16  ;;  %v13929_v14 = vpop.f32.mrf.mxu0  ;;  %v4070_v22 = vshll.u32 %v3994_v43, 16  ;;  %v11535_v40 = vor.u32 %v12279_v50, %v11534_v26  ;;  %v10882_v36 = vld [vmem:[#allocation2 + $0x230] sm:$0xf] }
 0x2a7   :  { %15472 = vst [vmem:[#allocation27_spill] sm:$0xff] %v13929_v14  ;;  %v2064_v13 = vadd.f32 %v13776_v5, %v13750_v38  ;;  %v4748_v21 = vpack.c.b16 %v4736_v63, %v4735_v27  ;;  %v4610_v53 = vshll.u32 %v4457_v31, 16  ;;  %v12164_v24 = vld [vmem:[#allocation2 + $0x234] sm:$0xf0]  ;;  %v4621_v47 = vor.u32 %v4620_v9, %v4617_v23 }
 0x2a8   :  { %v4083_v54 = vrot.slane %v4081_v18, 4  ;;  %v4086_v12 = vrot.slane %v4084_v10, 5  ;;  %v4624_v46 = vshll.u32 %v4459_v3, 16  ;;  %v4072_v10 = vrot.slane %v4070_v22, 5  ;;  %v12213_v22 = vld [vmem:[%s15438_s3 + $0x2a8] sm:$0xff] }
 0x2a9   :  { %v2271_v41 = vpop.f32.mrf.mxu2  ;;  %v4612_v27 = vrot.slane %v4610_v53, 5  ;;  %v4622_v9 = vrot.slane %v4621_v47, 4  ;;  %5359 = vmatpush.bf16.msra.mxu2 %v12213_v22 }
 0x2aa   :  { %v13915_v16 = vadd.f32 %v2271_v41, %v2063_v28  ;;  %v4067_v28 = vshrl.u32 %v3994_v43, 16  ;;  %v4280_v41 = vunpack.c.l.b16 %v4065_v52  ;;  %v2737_v52 = vadd.f32 %v13667_v48, %v13784_v29  ;;  %v3997_v43 = vld [vmem:[#allocation2 + $0x15c] sm:$0x1]  ;;  %v4460_v29 = vld [vmem:[#allocation2 + $0x240] sm:$0xf] }
 0x2ab   :  { %v3156_v44 = vpop.f32.mrf.mxu1  ;;  %v4087_v50 = vor.u32 %v4086_v12, %v4083_v54  ;;  %v4626_v3 = vrot.slane %v4624_v46, 5  ;;  %v4090_v48 = vshll.u32 %v3997_v43, 16  ;;  %v3998_v12 = vld [vmem:[#allocation2 + $0x160] sm:$0xf]  ;;  %v4632_v53 = vshll.u32 %v4460_v29, 16 }
 0x2ac   :  { %v13927_v8 = vadd.f32 %v3156_v44, %v2736_v37  ;;  %v4607_v37 = vor.u32 %v4606_v42, %v4603_v39  ;;  %v3995_v44 = vld [vmem:[#allocation2 + $0x154] sm:$0x1]  ;;  %v4069_v18 = vrot.slane %v4067_v28, 4  ;;  %v4295_v63 = vpack.c.b16 %v4280_v41, %v4279_v57  ;;  %v4462_v57 = vld [vmem:[#allocation2 + $0x248] sm:$0xf] }
 0x2ad   :  { %v13931_v1 = vpop.f32.mrf.mxu3  ;;  %v4076_v26 = vshll.u32 %v3995_v44, 16  ;;  %v10883_v42 = vor.u32 %v12164_v24, %v10882_v36  ;;  %v4088_v54 = vrot.slane %v4087_v50, 4  ;;  %v4000_v44 = vld [vmem:[#allocation2 + $0x168] sm:$0xf]  ;;  %v4627_v24 = vsel %vm12754_vm8, %v4622_v9, %v4626_v3  ;;  %v12312_v50 = vld [vmem:[#allocation2 + $0x14] sm:$0xf0] }
 0x2ae   :  { %v4608_v31 = vrot.slane %v4607_v37, 4  ;;  %v4073_v28 = vor.u32 %v4072_v10, %v4069_v18  ;;  %v13952_v41 = vpop.f32.mrf.mxu0  ;;  %v4629_v37 = vshrl.u32 %v4460_v29, 16  ;;  %v4092_v47 = vrot.slane %v4090_v48, 5  ;;  %v11746_v9 = vld [vmem:[#allocation2 + $0x10] sm:$0xf] }
 0x2af   :  { %v4643_v46 = vshrl.u32 %v4462_v57, 16  ;;  %v2738_v43 = vadd.f32 %v13685_v6, %v13798_v51  ;;  %v4095_v10 = vshrl.u32 %v3998_v12, 16  ;;  %v4634_v6 = vrot.slane %v4632_v53, 5  ;;  %v4461_v48 = vld [vmem:[#allocation2 + $0x244] sm:$0x1] }
 0x2b0   :  { %v4074_v18 = vrot.slane %v4073_v28, 4  ;;  %v4631_v3 = vrot.slane %v4629_v37, 4 }
 0x2b1   :  { %v2273_v14 = vpop.f32.mrf.mxu2  ;;  %7300 = vmatmul.bf16.gmra.mxu0 %v11535_v40  ;;  %v12229_v40 = vld [vmem:[%s15438_s3 + $0x2e8] sm:$0xff]  ;;  %v4645_v29 = vrot.slane %v4643_v46, 4 }
 0x2b2   :  { %v13935_v20 = vadd.f32 %v2273_v14, %v2064_v13  ;;  %4832 = vmatmul.bf16.gmra.mxu3 %v4748_v21  ;;  %v2050_v14 = vadd.f32 %v13776_v5, %v13033_v7  ;;  %v4613_v13 = vsel %vm12754_vm8, %v4608_v31, %v4612_v27  ;;  %v4078_v21 = vrot.slane %v4076_v26, 5 }
 0x2b3   :  { %v3159_v38 = vpop.f32.mrf.mxu1  ;;  %5585 = vmatpush.bf16.msra.mxu3 %v12229_v40  ;;  %v4737_v26 = vunpack.c.l.b16 %v4613_v13  ;;  %v4109_v31 = vshrl.u32 %v4000_v44, 16  ;;  %v4112_v27 = vshll.u32 %v4000_v44, 16  ;;  %v11747_v40 = vor.u32 %v12312_v50, %v11746_v9  ;;  %v4463_v13 = vld [vmem:[#allocation2 + $0x24c] sm:$0x1] }
 0x2b4   :  { %v13939_v39 = vadd.f32 %v3159_v38, %v2737_v52  ;;  %v2277_v7 = vadd.f32 %v13059_v58, %v2050_v14  ;;  %v4646_v58 = vshll.u32 %v4462_v57, 16  ;;  %v12197_v38 = vld [vmem:[%s15438_s3 + $0x268] sm:$0xff]  ;;  %v4098_v57 = vshll.u32 %v3998_v12, 16 }
 0x2b5   :  { %v13943_v23 = vpop.f32.mrf.mxu3  ;;  %5133 = vmatpush.bf16.msra.mxu1 %v12197_v38  ;;  %v4638_v38 = vshll.u32 %v4461_v48, 16 }
 0x2b6   :  { %3937 = vmatmul.bf16.gmra.mxu1 %v10883_v42  ;;  %4367 = vmatmul.bf16.vlgmr.msrb.gmra.mxu2 %v4295_v63  ;;  %v4093_v42 = vsel %vm12754_vm8, %v4088_v54, %v4092_v47  ;;  %v4648_v28 = vrot.slane %v4646_v58, 5  ;;  %v2730_v22 = vadd.f32 %v13462_v15, %v2277_v7  ;;  %v4079_v54 = vsel %vm12754_vm8, %v4074_v18, %v4078_v21  ;;  %v13976_v46 = vpop.f32.mrf.mxu0  ;;  %v10886_v15 = vld [vmem:[#allocation2 + $0x240] sm:$0xf]  ;;  %v12165_v7 = vld [vmem:[#allocation2 + $0x244] sm:$0xf0] }
 0x2b7   :  { %v4282_v44 = vunpack.c.l.b16 %v4093_v42  ;;  %v4114_v47 = vrot.slane %v4112_v27, 5  ;;  %15473 = vst [vmem:[#allocation28_spill] sm:$0xff] %v13976_v46  ;;  %v4281_v58 = vunpack.c.l.b16 %v4079_v54  ;;  %v4652_v21 = vshll.u32 %v4463_v13, 16  ;;  %v4466_v13 = vld [vmem:[#allocation2 + $0x258] sm:$0xf] }
 0x2b8   :  { %v3180_v37 = vadd.f32 %v13786_v60, %v2730_v22  ;;  %v4649_v50 = vor.u32 %v4648_v28, %v4645_v29  ;;  %v4100_v18 = vrot.slane %v4098_v57, 5  ;;  %v2739_v60 = vadd.f32 %v13711_v17, %v13821_v61  ;;  %v4464_v57 = vld [vmem:[#allocation2 + $0x250] sm:$0xf]  ;;  %v12196_v22 = vld [vmem:[%s15438_s3 + $0x260] sm:$0xff] }
 0x2b9   :  { %v3464_v36 = vpop.f32.mrf.mxu2  ;;  %v4296_v27 = vpack.c.b16 %v4282_v44, %v4281_v58  ;;  %v10887_v48 = vor.u32 %v12165_v7, %v10886_v15  ;;  %v4640_v28 = vrot.slane %v4638_v38, 5  ;;  %v4660_v38 = vshll.u32 %v4464_v57, 16  ;;  %5134 = vmatpush.bf16.msra.mxu1 %v12196_v22 }
 0x2ba   :  { %v13959_v52 = vadd.f32 %v3464_v36, %v13764_v33  ;;  %v4738_v33 = vunpack.c.l.b16 %v4627_v24  ;;  %v4097_v36 = vrot.slane %v4095_v10, 4  ;;  %v4111_v24 = vrot.slane %v4109_v31, 4  ;;  %v4001_v10 = vld [vmem:[#allocation2 + $0x16c] sm:$0x1] }
 0x2bb   :  { %v3161_v63 = vpop.f32.mrf.mxu1  ;;  %v4650_v61 = vrot.slane %v4649_v50, 4  ;;  %v4118_v54 = vshll.u32 %v4001_v10, 16  ;;  %v4674_v15 = vshll.u32 %v4466_v13, 16  ;;  %v4662_v22 = vrot.slane %v4660_v38, 5 }
 0x2bc   :  { %v13968_v14 = vadd.f32 %v3161_v63, %v2738_v43  ;;  %v4749_v53 = vpack.c.b16 %v4738_v33, %v4737_v26  ;;  %v4635_v43 = vor.u32 %v4634_v6, %v4631_v3  ;;  %v3999_v63 = vld [vmem:[#allocation2 + $0x164] sm:$0x1]  ;;  %v2052_v26 = vadd.f32 %v13776_v5, %v13065_v0  ;;  %v4002_v3 = vld [vmem:[#allocation2 + $0x170] sm:$0xf] }
 0x2bd   :  { %v13970_v51 = vpop.f32.mrf.mxu3  ;;  %v4104_v33 = vshll.u32 %v3999_v63, 16  ;;  %v4115_v9 = vor.u32 %v4114_v47, %v4111_v24  ;;  %v4101_v0 = vor.u32 %v4100_v18, %v4097_v36  ;;  %v4004_v24 = vld [vmem:[#allocation2 + $0x178] sm:$0xf]  ;;  %v12212_v47 = vld [vmem:[%s15438_s3 + $0x2a0] sm:$0xff]  ;;  %v4123_v7 = vshrl.u32 %v4002_v3, 16 }
 0x2be   :  { %v4636_v29 = vrot.slane %v4635_v43, 4  ;;  %v2279_v44 = vadd.f32 %v13082_v32, %v2052_v26  ;;  %v4657_v43 = vshrl.u32 %v4464_v57, 16  ;;  %v12195_v36 = vld [vmem:[%s15438_s3 + $0x258] sm:$0xff]  ;;  %v12228_v32 = vld [vmem:[%s15438_s3 + $0x2e0] sm:$0xff]  ;;  %5360 = vmatpush.bf16.msra.mxu2 %v12212_v47  ;;  %v4120_v18 = vrot.slane %v4118_v54, 5 }
 0x2bf   :  { %5586 = vmatpush.bf16.msra.mxu3 %v12228_v32  ;;  %v2740_v26 = vadd.f32 %v13726_v4, %v13843_v45  ;;  %5135 = vmatpush.bf16.msra.mxu1 %v12195_v36  ;;  %v12194_v4 = vld [vmem:[%s15438_s3 + $0x250] sm:$0xff]  ;;  %v4467_v54 = vld [vmem:[#allocation2 + $0x25c] sm:$0x1] }
 0x2c0   :  { %v4641_v63 = vsel %vm12754_vm8, %v4636_v29, %v4640_v28  ;;  %v12313_v29 = vld [vmem:[#allocation2 + $0x24] sm:$0xf0]  ;;  %v4659_v57 = vrot.slane %v4657_v43, 4  ;;  %v2732_v47 = vadd.f32 %v13515_v30, %v2279_v44  ;;  %v4680_v44 = vshll.u32 %v4467_v54, 16 }
 0x2c1   :  { %v3466_v12 = vpop.f32.mrf.mxu2  ;;  %8714 = vmatmul.bf16.vlgmr.msrb.gmra.mxu0 %v11747_v40  ;;  %v4654_v40 = vrot.slane %v4652_v21, 5  ;;  %v4102_v21 = vrot.slane %v4101_v0, 4  ;;  %v4676_v0 = vrot.slane %v4674_v15, 5 }
 0x2c2   :  { %v13978_v42 = vadd.f32 %v3466_v12, %v3180_v37  ;;  %4837 = vmatmul.bf16.gmra.mxu3 %v4749_v53  ;;  %v4106_v37 = vrot.slane %v4104_v33, 5  ;;  %v4116_v53 = vrot.slane %v4115_v9, 4  ;;  %v4671_v12 = vshrl.u32 %v4466_v13, 16  ;;  %v14010_v33 = vpop.f32.mrf.mxu0 }
 0x2c3   :  { %v3164_v31 = vpop.f32.mrf.mxu1  ;;  %v4655_v50 = vsel %vm12754_vm8, %v4650_v61, %v4654_v40  ;;  %15474 = vst [vmem:[#allocation29_spill] sm:$0xff] %v14010_v33  ;;  %v4465_v61 = vld [vmem:[#allocation2 + $0x254] sm:$0x1]  ;;  %v4125_v13 = vrot.slane %v4123_v7, 4  ;;  %5136 = vmatpush.bf16.msra.mxu1 %v12194_v4  ;;  %v3182_v7 = vadd.f32 %v13828_v56, %v2732_v47  ;;  %v4682_v54 = vrot.slane %v4680_v44, 5 }
 0x2c4   :  { %v13984_v6 = vadd.f32 %v3164_v31, %v2739_v60  ;;  %v4126_v60 = vshll.u32 %v4002_v3, 16  ;;  %v4137_v31 = vshrl.u32 %v4004_v24, 16  ;;  %v4121_v28 = vsel %vm12754_vm8, %v4116_v53, %v4120_v18  ;;  %v11750_v53 = vld [vmem:[#allocation2 + $0x20] sm:$0xf] }
 0x2c5   :  { %v13989_v17 = vpop.f32.mrf.mxu3  ;;  %v4673_v40 = vrot.slane %v4671_v12, 4  ;;  %v4107_v43 = vsel %vm12754_vm8, %v4102_v21, %v4106_v37  ;;  %v11751_v32 = vor.u32 %v12313_v29, %v11750_v53  ;;  %v4663_v12 = vor.u32 %v4662_v22, %v4659_v57  ;;  %v10890_v37 = vld [vmem:[#allocation2 + $0x250] sm:$0xf]  ;;  %v12166_v21 = vld [vmem:[#allocation2 + $0x254] sm:$0xf0] }
 0x2c6   :  { %3942 = vmatmul.bf16.gmra.mxu1 %v10887_v48  ;;  %4372 = vmatmul.bf16.gmra.mxu2 %v4296_v27  ;;  %v4140_v27 = vshll.u32 %v4004_v24, 16  ;;  %v4739_v48 = vunpack.c.l.b16 %v4641_v63  ;;  %v4128_v24 = vrot.slane %v4126_v60, 5  ;;  %v4139_v38 = vrot.slane %v4137_v31, 4  ;;  %v4005_v60 = vld [vmem:[#allocation2 + $0x17c] sm:$0x1] }
 0x2c7   :  { %v4284_v63 = vunpack.c.l.b16 %v4121_v28  ;;  %v4666_v15 = vshll.u32 %v4465_v61, 16  ;;  %v4677_v30 = vor.u32 %v4676_v0, %v4673_v40  ;;  %v4283_v31 = vunpack.c.l.b16 %v4107_v43 }
 0x2c8   :  { %v4142_v36 = vrot.slane %v4140_v27, 5  ;;  %v4129_v27 = vor.u32 %v4128_v24, %v4125_v13  ;;  %v2741_v29 = vadd.f32 %v13743_v55, %v13869_v11  ;;  %v4146_v61 = vshll.u32 %v4005_v60, 16  ;;  %v4468_v13 = vld [vmem:[#allocation2 + $0x260] sm:$0xf]  ;;  %v12227_v24 = vld [vmem:[%s15438_s3 + $0x2d8] sm:$0xff] }
 0x2c9   :  { %v3469_v58 = vpop.f32.mrf.mxu2  ;;  %v4297_v56 = vpack.c.b16 %v4284_v63, %v4283_v31  ;;  %v10891_v0 = vor.u32 %v12166_v21, %v10890_v37  ;;  %v4678_v4 = vrot.slane %v4677_v30, 4  ;;  %v12192_v55 = vld [vmem:[%s15438_s3 + $0x240] sm:$0xff]  ;;  %v2054_v43 = vadd.f32 %v13776_v5, %v13098_v2  ;;  %5587 = vmatpush.bf16.msra.mxu3 %v12227_v24  ;;  %v4006_v5 = vld [vmem:[#allocation2 + $0x190] sm:$0xf]  ;;  %v4008_v21 = vld [vmem:[#allocation2 + $0x198] sm:$0xf] }
 0x2ca   :  { %v14006_v10 = vadd.f32 %v3469_v58, %v13805_v59  ;;  %v4740_v59 = vunpack.c.l.b16 %v4655_v50  ;;  %v4003_v58 = vld [vmem:[#allocation2 + $0x174] sm:$0x1]  ;;  %v12193_v50 = vld [vmem:[%s15438_s3 + $0x248] sm:$0xff]  ;;  %v4143_v57 = vor.u32 %v4142_v36, %v4139_v38  ;;  %v14040_v11 = vpop.f32.mrf.mxu0  ;;  %v4130_v53 = vrot.slane %v4129_v27, 4  ;;  %v4469_v24 = vld [vmem:[#allocation2 + $0x264] sm:$0x1] }
 0x2cb   :  { %v3166_v9 = vpop.f32.mrf.mxu1  ;;  %v4132_v28 = vshll.u32 %v4003_v58, 16  ;;  %5137 = vmatpush.bf16.msra.mxu1 %v12193_v50  ;;  %15475 = vst [vmem:[#allocation30_spill] sm:$0xff] %v14040_v11  ;;  %v4470_v36 = vld [vmem:[#allocation2 + $0x268] sm:$0xf]  ;;  %v12211_v58 = vld [vmem:[%s15438_s3 + $0x298] sm:$0xff]  ;;  %v4683_v50 = vsel %vm12754_vm8, %v4678_v4, %v4682_v54  ;;  %v4148_v2 = vrot.slane %v4146_v61, 5 }
 0x2cc   :  { %v14014_v3 = vadd.f32 %v3166_v9, %v2740_v26  ;;  %v4750_v18 = vpack.c.b16 %v4740_v59, %v4739_v48  ;;  %v4664_v48 = vrot.slane %v4663_v12, 4  ;;  %v4668_v59 = vrot.slane %v4666_v15, 5  ;;  %5361 = vmatpush.bf16.msra.mxu2 %v12211_v58  ;;  %v15477_v31 = vld [vmem:[#allocation22_spill] sm:$0xff]  ;;  %v12225_v54 = vld [vmem:[%s15438_s3 + $0x2c8] sm:$0xff]  ;;  %v10894_v58 = vld [vmem:[#allocation2 + $0x260] sm:$0xf] }
 0x2cd   :  { %v14019_v45 = vpop.f32.mrf.mxu3  ;;  %v4144_v38 = vrot.slane %v4143_v57, 4  ;;  %v4134_v63 = vrot.slane %v4132_v28, 5  ;;  %v4685_v12 = vshrl.u32 %v4468_v13, 16  ;;  %v4688_v15 = vshll.u32 %v4468_v13, 16 }
 0x2ce   :  { %v4702_v37 = vshll.u32 %v4470_v36, 16  ;;  %v4151_v4 = vshrl.u32 %v4006_v5, 16 }
 0x2cf   :  { %5138 = vmatpush.bf16.msra.mxu1 %v12192_v55  ;;  %v4135_v60 = vsel %vm12754_vm8, %v4130_v53, %v4134_v63  ;;  %v4687_v61 = vrot.slane %v4685_v12, 4  ;;  %v4154_v55 = vshll.u32 %v4006_v5, 16  ;;  %v4168_v53 = vshll.u32 %v4008_v21, 16  ;;  %v12167_v5 = vld [vmem:[#allocation2 + $0x264] sm:$0xf0] }
 0x2d0   :  { %v4704_v12 = vrot.slane %v4702_v37, 5  ;;  %v4153_v37 = vrot.slane %v4151_v4, 4 }
 0x2d1   :  { %v3471_v26 = vpop.f32.mrf.mxu2  ;;  %8719 = vmatmul.bf16.gmra.mxu0 %v11751_v32  ;;  %v4669_v32 = vsel %vm12754_vm8, %v4664_v48, %v4668_v59  ;;  %v4742_v48 = vunpack.c.l.b16 %v4683_v50  ;;  %v12314_v59 = vld [vmem:[#allocation2 + $0x34] sm:$0xf0]  ;;  %v4285_v50 = vunpack.c.l.b16 %v4135_v60 }
 0x2d2   :  { %v14028_v9 = vadd.f32 %v3471_v26, %v3182_v7  ;;  %4842 = vmatmul.bf16.gmra.mxu3 %v4750_v18  ;;  %v12226_v7 = vld [vmem:[%s15438_s3 + $0x2d0] sm:$0xff]  ;;  %v15476_v18 = vld [vmem:[#allocation4_spill] sm:$0xff]  ;;  %v4699_v26 = vshrl.u32 %v4470_v36, 16  ;;  %v4741_v57 = vunpack.c.l.b16 %v4669_v32 }
 0x2d3   :  { %v3169_v22 = vpop.f32.mrf.mxu1  ;;  %v2281_v30 = vadd.f32 %v15476_v18, %v2054_v43  ;;  %5588 = vmatpush.bf16.msra.mxu3 %v12226_v7  ;;  %v15479_v43 = vld [vmem:[#allocation5_spill] sm:$0xff]  ;;  %v11754_v32 = vld [vmem:[#allocation2 + $0x30] sm:$0xf] }
 0x2d4   :  { %v14032_v40 = vadd.f32 %v3169_v22, %v2741_v29  ;;  %v15478_v29 = vld [vmem:[#allocation12_spill] sm:$0xff]  ;;  %v4149_v22 = vsel %vm12754_vm8, %v4144_v38, %v4148_v2  ;;  %v4701_v63 = vrot.slane %v4699_v26, 4  ;;  %v4471_v7 = vld [vmem:[#allocation2 + $0x26c] sm:$0x1]  ;;  %v4009_v26 = vld [vmem:[#allocation2 + $0x19c] sm:$0x1] }
 0x2d5   :  { %v14042_v47 = vpop.f32.mrf.mxu3  ;;  %v2742_v28 = vadd.f32 %v15478_v29, %v13892_v62  ;;  %v4165_v62 = vshrl.u32 %v4008_v21, 16  ;;  %v2734_v36 = vadd.f32 %v15479_v43, %v2281_v30  ;;  %v4286_v2 = vunpack.c.l.b16 %v4149_v22  ;;  %v15480_v18 = vld [vmem:[#allocation25_spill] sm:$0xff]  ;;  %v12224_v30 = vld [vmem:[%s15438_s3 + $0x2c0] sm:$0xff] }
 0x2d6   :  { %3947 = vmatmul.bf16.gmra.mxu1 %v10891_v0  ;;  %4377 = vmatmul.bf16.gmra.mxu2 %v4297_v56  ;;  %v4690_v0 = vrot.slane %v4688_v15, 5  ;;  %v11755_v15 = vor.u32 %v12314_v59, %v11754_v32  ;;  %v4751_v29 = vpack.c.b16 %v4742_v48, %v4741_v57  ;;  %v4694_v21 = vshll.u32 %v4469_v24, 16  ;;  %v15482_v57 = vld [vmem:[#allocation14_spill] sm:$0xff] }
 0x2d7   :  { %5589 = vmatpush.bf16.msra.mxu3 %v12225_v54  ;;  %v4156_v59 = vrot.slane %v4154_v55, 5  ;;  %v4167_v60 = vrot.slane %v4165_v62, 4  ;;  %v4170_v22 = vrot.slane %v4168_v53, 5  ;;  %v4708_v32 = vshll.u32 %v4471_v7, 16  ;;  %v4891_v55 = vld [vmem:[#allocation2 + $0x144] sm:$0x1] }
 0x2d8   :  { %v2743_v48 = vadd.f32 %v15482_v57, %v13915_v16  ;;  %v10895_v24 = vor.u32 %v12167_v5, %v10894_v58  ;;  %v4174_v4 = vshll.u32 %v4009_v26, 16  ;;  %v4893_v7 = vld [vmem:[#allocation2 + $0x14c] sm:$0x1]  ;;  %v4012_v57 = vld [vmem:[#allocation2 + $0x1a8] sm:$0xf] }
 0x2d9   :  { %v3474_v44 = vpop.f32.mrf.mxu2  ;;  %v4710_v16 = vrot.slane %v4708_v32, 5  ;;  %v4010_v32 = vld [vmem:[#allocation2 + $0x1a0] sm:$0xf] }
 0x2da   :  { %v14060_v27 = vadd.f32 %v3474_v44, %v15477_v31  ;;  %v3184_v44 = vadd.f32 %v15480_v18, %v2734_v36  ;;  %v14075_v31 = vpop.f32.mrf.mxu0  ;;  %v4705_v36 = vor.u32 %v4704_v12, %v4701_v63  ;;  %v4157_v63 = vor.u32 %v4156_v59, %v4153_v37 }
 0x2db   :  { %v3171_v56 = vpop.f32.mrf.mxu1  ;;  %15481 = vst [vmem:[#allocation4_spill] sm:$0xff] %v14075_v31  ;;  %v4696_v31 = vrot.slane %v4694_v21, 5  ;;  %5590 = vmatpush.bf16.msra.mxu3 %v12224_v30  ;;  %v4171_v12 = vor.u32 %v4170_v22, %v4167_v60  ;;  %v4976_v21 = vrot.slane %v4893_v7, 5  ;;  %v4176_v37 = vrot.slane %v4174_v4, 5  ;;  %v11758_v4 = vld [vmem:[#allocation2 + $0x40] sm:$0xf] }
 0x2dc   :  { %v14069_v13 = vadd.f32 %v3171_v56, %v2742_v28  ;;  %v4691_v28 = vor.u32 %v4690_v0, %v4687_v61  ;;  %v4007_v56 = vld [vmem:[#allocation2 + $0x194] sm:$0x1]  ;;  %v4298_v61 = vpack.c.b16 %v4286_v2, %v4285_v50  ;;  %v4890_v0 = vld [vmem:[#allocation2 + $0x140] sm:$0xe]  ;;  %v4972_v2 = vrot.slane %v4891_v55, 5 }
 0x2dd   :  { %v14072_v38 = vpop.f32.mrf.mxu3  ;;  %v4160_v11 = vshll.u32 %v4007_v56, 16  ;;  %v11024_v50 = vrot.slane %v4890_v0, 9  ;;  %v12210_v56 = vld [vmem:[%s15438_s3 + $0x290] sm:$0xff]  ;;  %v4158_v30 = vrot.slane %v4157_v63, 4  ;;  %v4172_v26 = vrot.slane %v4171_v12, 4 }
 0x2de   :  { %v4692_v53 = vrot.slane %v4691_v28, 4  ;;  %5362 = vmatpush.bf16.msra.mxu2 %v12210_v56  ;;  %v12315_v55 = vld [vmem:[#allocation2 + $0x44] sm:$0xf0]  ;;  %v4179_v63 = vshrl.u32 %v4010_v32, 16  ;;  %v4182_v12 = vshll.u32 %v4010_v32, 16  ;;  %v4196_v7 = vshll.u32 %v4012_v57, 16 }
 0x2df   :  { %v4162_v58 = vrot.slane %v4160_v11, 5 }
 0x2e0   :  { %v4697_v28 = vsel %vm12754_vm8, %v4692_v53, %v4696_v31 }
 0x2e1   :  { %v3476_v43 = vpop.f32.mrf.mxu2  ;;  %8724 = vmatmul.bf16.gmra.mxu0 %v11755_v15  ;;  %v4892_v15 = vld [vmem:[#allocation2 + $0x148] sm:$0xe]  ;;  %v4743_v31 = vunpack.c.l.b16 %v4697_v28  ;;  %v4181_v28 = vrot.slane %v4179_v63, 4  ;;  %v4895_v63 = vld [vmem:[#allocation2 + $0x154] sm:$0x1] }
 0x2e2   :  { %v14080_v18 = vadd.f32 %v3476_v43, %v3184_v44  ;;  %4847 = vmatmul.bf16.gmra.mxu3 %v4751_v29  ;;  %v4706_v29 = vrot.slane %v4705_v36, 4  ;;  %v11025_v5 = vrot.slane %v4892_v15, 9  ;;  %v14093_v59 = vpop.f32.mrf.mxu0  ;;  %v15484_v43 = vld [vmem:[#allocation16_spill] sm:$0xff]  ;;  %v4193_v15 = vshrl.u32 %v4012_v57, 16 }
 0x2e3   :  { %v3174_v54 = vpop.f32.mrf.mxu1  ;;  %15483 = vst [vmem:[#allocation22_spill] sm:$0xff] %v14093_v59  ;;  %v2744_v36 = vadd.f32 %v15484_v43, %v13935_v20  ;;  %v4177_v20 = vsel %vm12754_vm8, %v4172_v26, %v4176_v37  ;;  %v15485_v37 = vld [vmem:[#allocation18_spill] sm:$0xff]  ;;  %v4011_v43 = vld [vmem:[#allocation2 + $0x1a4] sm:$0x1] }
 0x2e4   :  { %v14084_v62 = vadd.f32 %v3174_v54, %v2743_v48  ;;  %v4711_v22 = vsel %vm12754_vm8, %v4706_v29, %v4710_v16  ;;  %v4977_v0 = vsel %vm13586_vm11, %v11025_v5, %v4976_v21  ;;  %v11759_v29 = vor.u32 %v12315_v55, %v11758_v4 }
 0x2e5   :  { %v14086_v44 = vpop.f32.mrf.mxu3  ;;  %v4288_v5 = vunpack.c.l.b16 %v4177_v20  ;;  %v5052_v21 = vunpack.c.l.b16 %v4977_v0  ;;  %v4188_v4 = vshll.u32 %v4011_v43, 16  ;;  %v4897_v20 = vld [vmem:[#allocation2 + $0x15c] sm:$0x1] }
 0x2e6   :  { %3952 = vmatmul.bf16.gmra.mxu1 %v10895_v24  ;;  %4382 = vmatmul.bf16.gmra.mxu2 %v4298_v61  ;;  %v4973_v61 = vsel %vm13586_vm11, %v11024_v50, %v4972_v2  ;;  %v4744_v24 = vunpack.c.l.b16 %v4711_v22  ;;  %v3731_v22 = vadd.f32 %v15485_v37, %v13959_v52  ;;  %v4894_v52 = vld [vmem:[#allocation2 + $0x150] sm:$0xe] }
 0x2e7   :  { %v5051_v16 = vunpack.c.l.b16 %v4973_v61 }
 0x2e8   :  { %v4752_v50 = vpack.c.b16 %v4744_v24, %v4743_v31 }
 0x2e9   :  { %v3479_v60 = vpop.f32.mrf.mxu2  ;;  %v5067_v61 = vpack.c.b16 %v5052_v21, %v5051_v16  ;;  %v4014_v21 = vld [vmem:[#allocation2 + $0x1b0] sm:$0xf] }
 0x2ea   :  { %v14098_v11 = vadd.f32 %v3479_v60, %v13900_v34  ;;  %v4163_v34 = vsel %vm12754_vm8, %v4158_v30, %v4162_v58  ;;  %v4184_v60 = vrot.slane %v4182_v12, 5  ;;  %v4195_v58 = vrot.slane %v4193_v15, 4  ;;  %v14119_v32 = vpop.f32.mrf.mxu0  ;;  %v12209_v12 = vld [vmem:[%s15438_s3 + $0x288] sm:$0xff] }
 0x2eb   :  { %v3176_v48 = vpop.f32.mrf.mxu1  ;;  %v4287_v2 = vunpack.c.l.b16 %v4163_v34  ;;  %v4198_v30 = vrot.slane %v4196_v7, 5  ;;  %15486 = vst [vmem:[#allocation12_spill] sm:$0xff] %v14119_v32  ;;  %v4896_v34 = vld [vmem:[#allocation2 + $0x158] sm:$0xe]  ;;  %v4984_v7 = vrot.slane %v4897_v20, 5  ;;  %5363 = vmatpush.bf16.msra.mxu2 %v12209_v12 }
 0x2ec   :  { %v14106_v54 = vadd.f32 %v3176_v48, %v2744_v36  ;;  %v4013_v36 = vld [vmem:[#allocation2 + $0x1ac] sm:$0x1]  ;;  %v4185_v24 = vor.u32 %v4184_v60, %v4181_v28  ;;  %v11027_v15 = vrot.slane %v4896_v34, 9  ;;  %v15487_v28 = vld [vmem:[#allocation20_spill] sm:$0xff] }
 0x2ed   :  { %v14112_v53 = vpop.f32.mrf.mxu3  ;;  %v4299_v31 = vpack.c.b16 %v4288_v5, %v4287_v2  ;;  %v4199_v55 = vor.u32 %v4198_v30, %v4195_v58  ;;  %v3732_v60 = vadd.f32 %v15487_v28, %v13978_v42  ;;  %v11026_v58 = vrot.slane %v4894_v52, 9  ;;  %v11762_v20 = vld [vmem:[#allocation2 + $0x60] sm:$0xf] }
 0x2ee   :  { %v4186_v16 = vrot.slane %v4185_v24, 4  ;;  %v4980_v30 = vrot.slane %v4895_v63, 5  ;;  %v4210_v24 = vshll.u32 %v4014_v21, 16 }
 0x2ef   :  { %v4200_v2 = vrot.slane %v4199_v55, 4  ;;  %v11186_v55 = vld [vmem:[#allocation2 + $0xa8] sm:$0xf] }
 0x2f0   :  { %v4981_v52 = vsel %vm13586_vm11, %v11026_v58, %v4980_v30  ;;  %v12367_v58 = vld [vmem:[%s15438_s3 + $0x638] sm:$0xff] }
 0x2f1   :  { %v3481_v56 = vpop.f32.mrf.mxu2  ;;  %8729 = vmatmul.bf16.gmra.mxu0 %v11759_v29 }
 0x2f2   :  { %v14115_v26 = vadd.f32 %v3481_v56, %v13927_v8  ;;  %4852 = vmatmul.bf16.gmra.mxu3 %v4752_v50  ;;  %v4202_v8 = vshll.u32 %v4013_v36, 16  ;;  %v4190_v50 = vrot.slane %v4188_v4, 5  ;;  %v12316_v36 = vld [vmem:[#allocation2 + $0x64] sm:$0xf0]  ;;  %v14137_v4 = vpop.f32.mrf.mxu0  ;;  %10155 = vmatpush.bf16.msra.mxu0 %v12367_v58 }
 0x2f3   :  { %v3918_v57 = vpop.f32.mrf.mxu1  ;;  %15488 = vst [vmem:[#allocation5_spill] sm:$0xff] %v14137_v4  ;;  %v11763_v63 = vor.u32 %v12316_v36, %v11762_v20  ;;  %v5053_v4 = vunpack.c.l.b16 %v4981_v52  ;;  %v12365_v58 = vld [vmem:[%s15438_s3 + $0x628] sm:$0xff] }
 0x2f4   :  { %v14121_v48 = vadd.f32 %v3918_v57, %v3731_v22  ;;  %v4204_v5 = vrot.slane %v4202_v8, 5  ;;  %v12216_v22 = vld [vmem:[#allocation2 + $0xac] sm:$0xf0]  ;;  %v4985_v57 = vsel %vm13586_vm11, %v11027_v15, %v4984_v7  ;;  %v4191_v42 = vsel %vm12754_vm8, %v4186_v16, %v4190_v50  ;;  %v4015_v16 = vld [vmem:[#allocation2 + $0x1b4] sm:$0x1] }
 0x2f5   :  { %v14123_v0 = vpop.f32.mrf.mxu3  ;;  %v11187_v34 = vor.u32 %v12216_v22, %v11186_v55  ;;  %v5054_v12 = vunpack.c.l.b16 %v4985_v57 }
 0x2f6   :  { %4387 = vmatmul.bf16.gmra.mxu2 %v4299_v31  ;;  %5139 = vmatmul.bf16.vlgmr.msra.gmra.mxu1 %v5067_v61  ;;  %v4016_v31 = vld [vmem:[#allocation2 + $0x1b8] sm:$0xf]  ;;  %v4207_v61 = vshrl.u32 %v4014_v21, 16  ;;  %v4205_v8 = vsel %vm12754_vm8, %v4200_v2, %v4204_v5 }
 0x2f7   :  { %v4221_v15 = vshrl.u32 %v4016_v31, 16  ;;  %v4224_v7 = vshll.u32 %v4016_v31, 16  ;;  %v4290_v21 = vunpack.c.l.b16 %v4205_v8  ;;  %v15489_v2 = vld [vmem:[#allocation23_spill] sm:$0xff]  ;;  %v5068_v22 = vpack.c.b16 %v5054_v12, %v5053_v4  ;;  %v4900_v8 = vld [vmem:[#allocation2 + $0x168] sm:$0xe]  ;;  %v12366_v12 = vld [vmem:[%s15438_s3 + $0x630] sm:$0xff] }
 0x2f8   :  { %v4209_v28 = vrot.slane %v4207_v61, 4  ;;  %v3733_v5 = vadd.f32 %v15489_v2, %v14006_v10  ;;  %v4898_v4 = vld [vmem:[#allocation2 + $0x160] sm:$0xe]  ;;  %10156 = vmatpush.bf16.msra.mxu0 %v12366_v12 }
 0x2f9   :  { %v3484_v29 = vpop.f32.mrf.mxu2  ;;  %v4223_v36 = vrot.slane %v4221_v15, 4  ;;  %v4226_v57 = vrot.slane %v4224_v7, 5  ;;  %v4018_v2 = vld [vmem:[#allocation2 + $0x1c0] sm:$0xf] }
 0x2fa   :  { %v14129_v56 = vadd.f32 %v3484_v29, %v13939_v39  ;;  %v4289_v29 = vunpack.c.l.b16 %v4191_v42  ;;  %v4216_v42 = vshll.u32 %v4015_v16, 16  ;;  %v14159_v10 = vpop.f32.mrf.mxu0  ;;  %v3734_v16 = vadd.f32 %v13881_v49, %v14028_v9 }
 0x2fb   :  { %v3920_v37 = vpop.f32.mrf.mxu1  ;;  %15490 = vst [vmem:[#allocation25_spill] sm:$0xff] %v14159_v10  ;;  %v4227_v20 = vor.u32 %v4226_v57, %v4223_v36  ;;  %v11028_v57 = vrot.slane %v4898_v4, 9  ;;  %v11190_v4 = vld [vmem:[#allocation2 + $0xb8] sm:$0xf] }
 0x2fc   :  { %v14133_v43 = vadd.f32 %v3920_v37, %v3732_v60  ;;  %v4212_v60 = vrot.slane %v4210_v24, 5  ;;  %v4300_v61 = vpack.c.b16 %v4290_v21, %v4289_v29  ;;  %v4017_v24 = vld [vmem:[#allocation2 + $0x1bc] sm:$0x1]  ;;  %v4218_v7 = vrot.slane %v4216_v42, 5  ;;  %v4899_v29 = vld [vmem:[#allocation2 + $0x164] sm:$0x1]  ;;  %10157 = vmatpush.bf16.msra.mxu0 %v12365_v58 }
 0x2fd   :  { %v14139_v39 = vpop.f32.mrf.mxu3  ;;  %v4230_v52 = vshll.u32 %v4017_v24, 16  ;;  %v11029_v21 = vrot.slane %v4900_v8, 9  ;;  %v12217_v42 = vld [vmem:[#allocation2 + $0xbc] sm:$0xf0]  ;;  %v4235_v8 = vshrl.u32 %v4018_v2, 16 }
 0x2fe   :  { %v4213_v55 = vor.u32 %v4212_v60, %v4209_v28 }
 0x2ff   :  { %v4232_v36 = vrot.slane %v4230_v52, 5  ;;  %v12364_v52 = vld [vmem:[%s15438_s3 + $0x620] sm:$0xff] }
 0x300   :  { %v4214_v15 = vrot.slane %v4213_v55, 4  ;;  %v12317_v55 = vld [vmem:[#allocation2 + $0x74] sm:$0xf0]  ;;  %10158 = vmatpush.bf16.msra.mxu0 %v12364_v52 }
 0x301   :  { %v3486_v37 = vpop.f32.mrf.mxu2  ;;  %8734 = vmatmul.bf16.gmra.mxu0 %v11763_v63  ;;  %v12208_v63 = vld [vmem:[%s15438_s3 + $0x280] sm:$0xff]  ;;  %v12255_v52 = vld [vmem:[%s15438_s3 + $0x3b8] sm:$0xff] }
 0x302   :  { %v14148_v50 = vadd.f32 %v3486_v37, %v13968_v14  ;;  %5591 = vmatmul.bf16.vlgmr.msra.gmra.mxu3 %v11187_v34  ;;  %v4901_v34 = vld [vmem:[#allocation2 + $0x16c] sm:$0x1]  ;;  %5364 = vmatpush.bf16.msra.mxu2 %v12208_v63 }
 0x303   :  { %v3923_v30 = vpop.f32.mrf.mxu1  ;;  %v4992_v28 = vrot.slane %v4901_v34, 5  ;;  %v4238_v34 = vshll.u32 %v4018_v2, 16 }
 0x304   :  { %v14155_v31 = vadd.f32 %v3923_v30, %v3733_v5  ;;  %v4020_v5 = vld [vmem:[#allocation2 + $0x1c8] sm:$0xf] }
 0x305   :  { %v14157_v14 = vpop.f32.mrf.mxu3  ;;  %v4993_v49 = vsel %vm13586_vm11, %v11029_v21, %v4992_v28  ;;  %v4249_v63 = vshrl.u32 %v4020_v5, 16  ;;  %v4252_v12 = vshll.u32 %v4020_v5, 16  ;;  %v11191_v21 = vor.u32 %v12217_v42, %v11190_v4  ;;  %v4905_v4 = vld [vmem:[#allocation2 + $0x17c] sm:$0x1] }
 0x306   :  { %4392 = vmatmul.bf16.gmra.mxu2 %v4300_v61  ;;  %5144 = vmatmul.bf16.gmra.mxu1 %v5068_v22  ;;  %v4228_v22 = vrot.slane %v4227_v20, 4  ;;  %v4988_v61 = vrot.slane %v4899_v29, 5  ;;  %v11766_v20 = vld [vmem:[#allocation2 + $0x70] sm:$0xf]  ;;  %v4237_v5 = vrot.slane %v4235_v8, 4  ;;  %v4240_v58 = vrot.slane %v4238_v34, 5 }
 0x307   :  { %v11767_v29 = vor.u32 %v12317_v55, %v11766_v20  ;;  %v4254_v10 = vrot.slane %v4252_v12, 5  ;;  %v4021_v55 = vld [vmem:[#allocation2 + $0x1cc] sm:$0x1]  ;;  %6805 = vmatpush.bf16.msrb.mxu2 %v12255_v52 }
 0x309   :  { %v3489_v60 = vpop.f32.mrf.mxu2 }
 0x30a   :  { %v14168_v37 = vadd.f32 %v3489_v60, %v13984_v6  ;;  %v4219_v6 = vsel %vm12754_vm8, %v4214_v15, %v4218_v7  ;;  %v4233_v15 = vsel %vm12754_vm8, %v4228_v22, %v4232_v36  ;;  %v4989_v7 = vsel %vm13586_vm11, %v11028_v57, %v4988_v61  ;;  %v4019_v61 = vld [vmem:[#allocation2 + $0x1c4] sm:$0x1] }
 0x30b   :  { %v3925_v30 = vpop.f32.mrf.mxu1  ;;  %v4291_v28 = vunpack.c.l.b16 %v4219_v6  ;;  %v5056_v60 = vunpack.c.l.b16 %v4993_v49  ;;  %v3735_v22 = vadd.f32 %v13902_v35, %v14060_v27  ;;  %v4292_v36 = vunpack.c.l.b16 %v4233_v15  ;;  %v12363_v49 = vld [vmem:[%s15438_s3 + $0x618] sm:$0xff] }
 0x30c   :  { %v14175_v24 = vadd.f32 %v3925_v30, %v3734_v16  ;;  %v14190_v16 = vpop.f32.mrf.mxu0  ;;  %v4251_v30 = vrot.slane %v4249_v63, 4  ;;  %v5055_v57 = vunpack.c.l.b16 %v4989_v7  ;;  %v4241_v63 = vor.u32 %v4240_v58, %v4237_v5  ;;  %v4904_v27 = vld [vmem:[#allocation2 + $0x178] sm:$0xe]  ;;  %10159 = vmatpush.bf16.msra.mxu0 %v12363_v49  ;;  %v4902_v7 = vld [vmem:[#allocation2 + $0x170] sm:$0xe] }
 0x30d   :  { %v14181_v9 = vpop.f32.mrf.mxu3  ;;  %15491 = vst [vmem:[#allocation14_spill] sm:$0xff] %v14190_v16  ;;  %v4301_v8 = vpack.c.b16 %v4292_v36, %v4291_v28  ;;  %v4244_v12 = vshll.u32 %v4019_v61, 16  ;;  %v4258_v35 = vshll.u32 %v4021_v55, 16  ;;  %v12271_v15 = vld [vmem:[%s15438_s3 + $0x3f8] sm:$0xff]  ;;  %v5000_v28 = vrot.slane %v4905_v4, 5 }
 0x30e   :  { %v5069_v34 = vpack.c.b16 %v5056_v60, %v5055_v57  ;;  %v4255_v20 = vor.u32 %v4254_v10, %v4251_v30  ;;  %v4903_v10 = vld [vmem:[#allocation2 + $0x174] sm:$0x1]  ;;  %7031 = vmatpush.bf16.msrb.mxu3 %v12271_v15  ;;  %v3736_v36 = vadd.f32 %v13931_v1, %v14080_v18  ;;  %v12247_v57 = vld [vmem:[%s15438_s3 + $0x378] sm:$0xff]  ;;  %v12218_v1 = vld [vmem:[#allocation2 + $0xcc] sm:$0xf0] }
 0x30f   :  { %v4246_v5 = vrot.slane %v4244_v12, 5  ;;  %v4260_v30 = vrot.slane %v4258_v35, 5  ;;  %v4996_v49 = vrot.slane %v4903_v10, 5  ;;  %6483 = vmatpush.bf16.msrb.mxu1 %v12247_v57  ;;  %v11770_v35 = vld [vmem:[#allocation2 + $0x80] sm:$0xf] }
 0x310   :  { %v4256_v58 = vrot.slane %v4255_v20, 4 }
 0x311   :  { %v3491_v2 = vpop.f32.mrf.mxu2  ;;  %8739 = vmatmul.bf16.gmra.mxu0 %v11767_v29  ;;  %v12362_v29 = vld [vmem:[%s15438_s3 + $0x610] sm:$0xff] }
 0x312   :  { %v14193_v32 = vadd.f32 %v3491_v2, %v14014_v3  ;;  %5596 = vmatmul.bf16.gmra.mxu3 %v11191_v21  ;;  %v11031_v21 = vrot.slane %v4904_v27, 9  ;;  %v4242_v2 = vrot.slane %v4241_v63, 4  ;;  %10160 = vmatpush.bf16.msra.mxu0 %v12362_v29  ;;  %v4261_v12 = vsel %vm12754_vm8, %v4256_v58, %v4260_v30  ;;  %v11194_v27 = vld [vmem:[#allocation2 + $0xc8] sm:$0xf]  ;;  %v12360_v29 = vld [vmem:[%s15438_s3 + $0x600] sm:$0xff] }
 0x313   :  { %v3928_v6 = vpop.f32.mrf.mxu1  ;;  %v11195_v15 = vor.u32 %v12218_v1, %v11194_v27  ;;  %v4294_v10 = vunpack.c.l.b16 %v4261_v12 }
 0x314   :  { %v14200_v42 = vadd.f32 %v3928_v6, %v3735_v22  ;;  %v14221_v61 = vpop.f32.mrf.mxu0  ;;  %v11030_v6 = vrot.slane %v4902_v7, 9  ;;  %v4247_v18 = vsel %vm12754_vm8, %v4242_v2, %v4246_v5  ;;  %v5001_v20 = vsel %vm13586_vm11, %v11031_v21, %v5000_v28 }
 0x315   :  { %v14202_v3 = vpop.f32.mrf.mxu3  ;;  %15492 = vst [vmem:[#allocation16_spill] sm:$0xff] %v14221_v61  ;;  %v4293_v7 = vunpack.c.l.b16 %v4247_v18  ;;  %v3737_v21 = vadd.f32 %v13943_v23, %v14098_v11  ;;  %v12254_v23 = vld [vmem:[%s15438_s3 + $0x3b0] sm:$0xff] }
 0x316   :  { %4397 = vmatmul.bf16.gmra.mxu2 %v4301_v8  ;;  %5149 = vmatmul.bf16.gmra.mxu1 %v5069_v34  ;;  %v12361_v8 = vld [vmem:[%s15438_s3 + $0x608] sm:$0xff]  ;;  %v4997_v52 = vsel %vm13586_vm11, %v11030_v6, %v4996_v49  ;;  %v4906_v49 = vld [vmem:[#allocation2 + $0x190] sm:$0xe] }
 0x317   :  { %10161 = vmatpush.bf16.msra.mxu0 %v12361_v8  ;;  %v5057_v28 = vunpack.c.l.b16 %v4997_v52  ;;  %v4907_v8 = vld [vmem:[#allocation2 + $0x194] sm:$0x1]  ;;  %6806 = vmatpush.bf16.msrb.mxu2 %v12254_v23  ;;  %v11032_v18 = vrot.slane %v4906_v49, 9  ;;  %v12200_v49 = vld [vmem:[#allocation2 + $0xc] sm:$0xf0] }
 0x318   :  { %v12270_v11 = vld [vmem:[%s15438_s3 + $0x3f0] sm:$0xff]  ;;  %v5004_v12 = vrot.slane %v4907_v8, 5 }
 0x319   :  { %v3494_v60 = vpop.f32.mrf.mxu2  ;;  %7032 = vmatpush.bf16.msrb.mxu3 %v12270_v11  ;;  %v12246_v52 = vld [vmem:[%s15438_s3 + $0x370] sm:$0xff]  ;;  %v3739_v11 = vadd.f32 %v13989_v17, %v14129_v56  ;;  %v4913_v17 = vld [vmem:[#allocation2 + $0x1ac] sm:$0x1] }
 0x31a   :  { %v14214_v22 = vadd.f32 %v3494_v60, %v14032_v40  ;;  %v12318_v40 = vld [vmem:[#allocation2 + $0x84] sm:$0xf0]  ;;  %v5058_v60 = vunpack.c.l.b16 %v5001_v20  ;;  %6484 = vmatpush.bf16.msrb.mxu1 %v12246_v52 }
 0x31b   :  { %v3930_v55 = vpop.f32.mrf.mxu1  ;;  %v11771_v4 = vor.u32 %v12318_v40, %v11770_v35  ;;  %10162 = vmatpush.bf16.msra.mxu0 %v12360_v29  ;;  %v4909_v40 = vld [vmem:[#allocation2 + $0x19c] sm:$0x1]  ;;  %v12253_v56 = vld [vmem:[%s15438_s3 + $0x3a8] sm:$0xff] }
 0x31c   :  { %v14226_v34 = vadd.f32 %v3930_v55, %v3736_v36  ;;  %v4302_v36 = vpack.c.b16 %v4294_v10, %v4293_v7  ;;  %v5070_v57 = vpack.c.b16 %v5058_v60, %v5057_v28  ;;  %v14248_v55 = vpop.f32.mrf.mxu0  ;;  %v5008_v35 = vrot.slane %v4909_v40, 5  ;;  %v11774_v7 = vld [vmem:[#allocation2 + $0x90] sm:$0xf]  ;;  %v12319_v10 = vld [vmem:[#allocation2 + $0x94] sm:$0xf0]  ;;  %6807 = vmatpush.bf16.msrb.mxu2 %v12253_v56 }
 0x31d   :  { %v14228_v63 = vpop.f32.mrf.mxu3  ;;  %15493 = vst [vmem:[#allocation18_spill] sm:$0xff] %v14248_v55  ;;  %v11775_v28 = vor.u32 %v12319_v10, %v11774_v7  ;;  %v9917_v40 = vld [vmem:[#allocation2 + $0x1c] sm:$0x1] }
 0x31e   :  { %v10000_v7 = vrot.slane %v9917_v40, 5  ;;  %v5016_v40 = vrot.slane %v4913_v17, 5  ;;  %v12201_v17 = vld [vmem:[#allocation2 + $0x1c] sm:$0xf0] }
 0x321   :  { %v3496_v2 = vpop.f32.mrf.mxu2  ;;  %8744 = vmatmul.bf16.gmra.mxu0 %v11771_v4  ;;  %v3738_v4 = vadd.f32 %v13970_v51, %v14115_v26  ;;  %v11198_v26 = vld [vmem:[#allocation2 + $0xd8] sm:$0xf] }
 0x322   :  { %v14242_v5 = vadd.f32 %v3496_v2, %v14069_v13  ;;  %5601 = vmatmul.bf16.gmra.mxu3 %v11195_v15  ;;  %v4908_v13 = vld [vmem:[#allocation2 + $0x198] sm:$0xe]  ;;  %v12219_v2 = vld [vmem:[#allocation2 + $0xdc] sm:$0xf0] }
 0x323   :  { %v3933_v58 = vpop.f32.mrf.mxu1  ;;  %v11033_v20 = vrot.slane %v4908_v13, 9  ;;  %v9916_v13 = vld [vmem:[#allocation2 + $0x18] sm:$0xe] }
 0x324   :  { %v14246_v30 = vadd.f32 %v3933_v58, %v3737_v21  ;;  %v14274_v51 = vpop.f32.mrf.mxu0  ;;  %v11199_v58 = vor.u32 %v12219_v2, %v11198_v26  ;;  %v4912_v26 = vld [vmem:[#allocation2 + $0x1a8] sm:$0xe] }
 0x325   :  { %v14250_v6 = vpop.f32.mrf.mxu3  ;;  %v5009_v21 = vsel %vm13586_vm11, %v11033_v20, %v5008_v35  ;;  %15494 = vst [vmem:[#allocation20_spill] sm:$0xff] %v14274_v51  ;;  %v9915_v35 = vld [vmem:[#allocation2 + $0x14] sm:$0x1]  ;;  %v9928_v51 = vld [vmem:[#allocation2 + $0x48] sm:$0xe] }
 0x326   :  { %4402 = vmatmul.bf16.gmra.mxu2 %v4302_v36  ;;  %5154 = vmatmul.bf16.gmra.mxu1 %v5070_v57  ;;  %v5060_v57 = vunpack.c.l.b16 %v5009_v21  ;;  %v9996_v21 = vrot.slane %v9915_v35, 5 }
 0x329   :  { %v3499_v1 = vpop.f32.mrf.mxu2 }
 0x32a   :  { %v14259_v27 = vadd.f32 %v3499_v1, %v14084_v62  ;;  %v5005_v62 = vsel %vm13586_vm11, %v11032_v18, %v5004_v12  ;;  %v11106_v1 = vld [vmem:[#allocation2 + $0x8] sm:$0xf]  ;;  %v9914_v18 = vld [vmem:[#allocation2 + $0x10] sm:$0xe] }
 0x32b   :  { %v3935_v29 = vpop.f32.mrf.mxu1  ;;  %v5059_v36 = vunpack.c.l.b16 %v5005_v62  ;;  %v11107_v20 = vor.u32 %v12200_v49, %v11106_v1  ;;  %v11984_v2 = vrot.slane %v9914_v18, 9  ;;  %v4910_v62 = vld [vmem:[#allocation2 + $0x1a0] sm:$0xe]  ;;  %v3740_v1 = vadd.f32 %v14019_v45, %v14148_v50  ;;  %v11202_v50 = vld [vmem:[#allocation2 + $0xf8] sm:$0xf] }
 0x32c   :  { %v14266_v15 = vadd.f32 %v3935_v29, %v3738_v4  ;;  %v11985_v29 = vrot.slane %v9916_v13, 9  ;;  %v11034_v49 = vrot.slane %v4910_v62, 9  ;;  %v11035_v13 = vrot.slane %v4912_v26, 9 }
 0x32d   :  { %v14268_v60 = vpop.f32.mrf.mxu3  ;;  %v5071_v52 = vpack.c.b16 %v5060_v57, %v5059_v36  ;;  %v14293_v36 = vpop.f32.mrf.mxu0  ;;  %v9997_v18 = vsel %vm13586_vm11, %v11984_v2, %v9996_v21 }
 0x32e   :  { %15495 = vst [vmem:[#allocation23_spill] sm:$0xff] %v14293_v36  ;;  %v5017_v45 = vsel %vm13586_vm11, %v11035_v13, %v5016_v40  ;;  %v12203_v36 = vld [vmem:[#allocation2 + $0x3c] sm:$0xf0] }
 0x32f   :  { %v5062_v26 = vunpack.c.l.b16 %v5017_v45 }
 0x331   :  { %v3501_v8 = vpop.f32.mrf.mxu2  ;;  %8749 = vmatmul.bf16.gmra.mxu0 %v11775_v28  ;;  %v12269_v28 = vld [vmem:[%s15438_s3 + $0x3e8] sm:$0xff] }
 0x332   :  { %v14277_v23 = vadd.f32 %v3501_v8, %v14106_v54  ;;  %5606 = vmatmul.bf16.gmra.mxu3 %v11199_v58  ;;  %v4911_v54 = vld [vmem:[#allocation2 + $0x1a4] sm:$0x1]  ;;  %v10001_v58 = vsel %vm13586_vm11, %v11985_v29, %v10000_v7  ;;  %v12220_v7 = vld [vmem:[#allocation2 + $0xfc] sm:$0xf0] }
 0x333   :  { %v3938_v12 = vpop.f32.mrf.mxu1  ;;  %v5012_v8 = vrot.slane %v4911_v54, 5  ;;  %7033 = vmatpush.bf16.msrb.mxu3 %v12269_v28  ;;  %v10076_v35 = vunpack.c.l.b16 %v10001_v58  ;;  %v11203_v54 = vor.u32 %v12220_v7, %v11202_v50  ;;  %v9920_v28 = vld [vmem:[#allocation2 + $0x28] sm:$0xe]  ;;  %v9921_v58 = vld [vmem:[#allocation2 + $0x2c] sm:$0x1] }
 0x334   :  { %v14281_v4 = vadd.f32 %v3938_v12, %v3739_v11  ;;  %v12245_v12 = vld [vmem:[%s15438_s3 + $0x368] sm:$0xff]  ;;  %v11987_v7 = vrot.slane %v9920_v28, 9  ;;  %v4915_v50 = vld [vmem:[#allocation2 + $0x1b4] sm:$0x1] }
 0x335   :  { %v14283_v10 = vpop.f32.mrf.mxu3  ;;  %6485 = vmatpush.bf16.msrb.mxu1 %v12245_v12  ;;  %v5013_v62 = vsel %vm13586_vm11, %v11034_v49, %v5012_v8  ;;  %v3741_v49 = vadd.f32 %v14042_v47, %v14168_v37  ;;  %v11110_v8 = vld [vmem:[#allocation2 + $0x18] sm:$0xf]  ;;  %v14318_v13 = vpop.f32.mrf.mxu0  ;;  %v9919_v12 = vld [vmem:[#allocation2 + $0x24] sm:$0x1]  ;;  %v4914_v37 = vld [vmem:[#allocation2 + $0x1b0] sm:$0xe] }
 0x336   :  { %5159 = vmatmul.bf16.gmra.mxu1 %v5071_v52  ;;  %5365 = vmatmul.bf16.vlgmr.msra.gmra.mxu2 %v11107_v20  ;;  %v5061_v21 = vunpack.c.l.b16 %v5013_v62  ;;  %15496 = vst [vmem:[#allocation31_spill] sm:$0xff] %v14318_v13  ;;  %v10004_v47 = vrot.slane %v9919_v12, 5 }
 0x339   :  { %v4368_v57 = vpop.f32.mrf.mxu2 }
 0x33a   :  { %v14296_v11 = vadd.f32 %v4368_v57, %v14121_v48  ;;  %v10075_v48 = vunpack.c.l.b16 %v9997_v18  ;;  %v11111_v18 = vor.u32 %v12201_v17, %v11110_v8  ;;  %v4916_v17 = vld [vmem:[#allocation2 + $0x1b8] sm:$0xe] }
 0x33b   :  { %v3940_v20 = vpop.f32.mrf.mxu1 }
 0x33c   :  { %v14305_v52 = vadd.f32 %v3940_v20, %v3740_v1  ;;  %v10091_v2 = vpack.c.b16 %v10076_v35, %v10075_v48  ;;  %v9918_v1 = vld [vmem:[#allocation2 + $0x20] sm:$0xe]  ;;  %v5072_v35 = vpack.c.b16 %v5062_v26, %v5061_v21  ;;  %v10008_v48 = vrot.slane %v9921_v58, 5 }
 0x33d   :  { %v14307_v29 = vpop.f32.mrf.mxu3  ;;  %v11986_v45 = vrot.slane %v9918_v1, 9  ;;  %v12268_v21 = vld [vmem:[%s15438_s3 + $0x3e0] sm:$0xff]  ;;  %v11036_v58 = vrot.slane %v4914_v37, 9  ;;  %v3742_v1 = vadd.f32 %v14072_v38, %v14193_v32  ;;  %v14350_v37 = vpop.f32.mrf.mxu0 }
 0x33e   :  { %v10009_v26 = vsel %vm13586_vm11, %v11987_v7, %v10008_v48  ;;  %7034 = vmatpush.bf16.msrb.mxu3 %v12268_v21  ;;  %15497 = vst [vmem:[#allocation32_spill] sm:$0xff] %v14350_v37 }
 0x33f   :  { %v10078_v12 = vunpack.c.l.b16 %v10009_v26 }
 0x341   :  { %v4370_v56 = vpop.f32.mrf.mxu2  ;;  %10163 = vmatmul.bf16.vlgmr.msra.gmra.mxu0 %v10091_v2  ;;  %v12252_v2 = vld [vmem:[%s15438_s3 + $0x3a0] sm:$0xff] }
 0x342   :  { %v14314_v57 = vadd.f32 %v4370_v56, %v14133_v43  ;;  %5611 = vmatmul.bf16.gmra.mxu3 %v11203_v54  ;;  %v12244_v43 = vld [vmem:[%s15438_s3 + $0x360] sm:$0xff]  ;;  %v12243_v54 = vld [vmem:[%s15438_s3 + $0x358] sm:$0xff]  ;;  %6808 = vmatpush.bf16.msrb.mxu2 %v12252_v2 }
 0x343   :  { %v3943_v40 = vpop.f32.mrf.mxu1  ;;  %6486 = vmatpush.bf16.msrb.mxu1 %v12244_v43  ;;  %v4917_v56 = vld [vmem:[#allocation2 + $0x1bc] sm:$0x1]  ;;  %v12242_v43 = vld [vmem:[%s15438_s3 + $0x350] sm:$0xff] }
 0x344   :  { %v14320_v20 = vadd.f32 %v3943_v40, %v3741_v49  ;;  %v5020_v49 = vrot.slane %v4915_v50, 5  ;;  %v10005_v40 = vsel %vm13586_vm11, %v11986_v45, %v10004_v47  ;;  %v5024_v7 = vrot.slane %v4917_v56, 5  ;;  %v12221_v50 = vld [vmem:[#allocation2 + $0x10c] sm:$0xf0]  ;;  %v11206_v45 = vld [vmem:[#allocation2 + $0x108] sm:$0xf] }
 0x345   :  { %v14325_v62 = vpop.f32.mrf.mxu3  ;;  %v10077_v38 = vunpack.c.l.b16 %v10005_v40  ;;  %v11207_v21 = vor.u32 %v12221_v50, %v11206_v45  ;;  %v9923_v50 = vld [vmem:[#allocation2 + $0x34] sm:$0x1] }
 0x346   :  { %5164 = vmatmul.bf16.gmra.mxu1 %v5072_v35  ;;  %5370 = vmatmul.bf16.gmra.mxu2 %v11111_v18  ;;  %v11037_v35 = vrot.slane %v4916_v17, 9  ;;  %v5021_v32 = vsel %vm13586_vm11, %v11036_v58, %v5020_v49  ;;  %v12202_v17 = vld [vmem:[#allocation2 + $0x2c] sm:$0xf0]  ;;  %v3743_v58 = vadd.f32 %v14086_v44, %v14214_v22  ;;  %v12240_v44 = vld [vmem:[%s15438_s3 + $0x340] sm:$0xff] }
 0x347   :  { %6487 = vmatpush.bf16.msrb.mxu1 %v12243_v54  ;;  %v10092_v47 = vpack.c.b16 %v10078_v12, %v10077_v38  ;;  %v12241_v54 = vld [vmem:[%s15438_s3 + $0x348] sm:$0xff]  ;;  %v5063_v26 = vunpack.c.l.b16 %v5021_v32  ;;  %v12267_v12 = vld [vmem:[%s15438_s3 + $0x3d8] sm:$0xff] }
 0x348   :  { %v5025_v2 = vsel %vm13586_vm11, %v11037_v35, %v5024_v7  ;;  %7035 = vmatpush.bf16.msrb.mxu3 %v12267_v12 }
 0x349   :  { %v4373_v28 = vpop.f32.mrf.mxu2  ;;  %v5064_v49 = vunpack.c.l.b16 %v5025_v2  ;;  %v4919_v2 = vld [vmem:[#allocation2 + $0x1c4] sm:$0x1] }
 0x34a   :  { %v14339_v8 = vadd.f32 %v4373_v28, %v14155_v31  ;;  %v9924_v28 = vld [vmem:[#allocation2 + $0x38] sm:$0xe] }
 0x34b   :  { %v3945_v18 = vpop.f32.mrf.mxu1  ;;  %6488 = vmatpush.bf16.msrb.mxu1 %v12242_v43  ;;  %v9922_v43 = vld [vmem:[#allocation2 + $0x30] sm:$0xe]  ;;  %v5073_v32 = vpack.c.b16 %v5064_v49, %v5063_v26  ;;  %v12251_v26 = vld [vmem:[%s15438_s3 + $0x398] sm:$0xff] }
 0x34c   :  { %v14345_v48 = vadd.f32 %v3945_v18, %v3742_v1  ;;  %v9925_v1 = vld [vmem:[#allocation2 + $0x3c] sm:$0x1]  ;;  %v11114_v18 = vld [vmem:[#allocation2 + $0x28] sm:$0xf]  ;;  %v6116_v49 = vld [vmem:[#allocation2 + $0xb0] sm:$0xf]  ;;  %6809 = vmatpush.bf16.msrb.mxu2 %v12251_v26 }
 0x34d   :  { %v14352_v31 = vpop.f32.mrf.mxu3  ;;  %v11115_v7 = vor.u32 %v12202_v17, %v11114_v18  ;;  %v10016_v45 = vrot.slane %v9925_v1, 5  ;;  %v11988_v17 = vrot.slane %v9922_v43, 9  ;;  %v14382_v1 = vpop.f32.mrf.mxu0 }
 0x34e   :  { %15498 = vst [vmem:[#allocation33_spill] sm:$0xff] %v14382_v1 }
 0x34f   :  { %6489 = vmatpush.bf16.msrb.mxu1 %v12241_v54  ;;  %v4921_v54 = vld [vmem:[#allocation2 + $0x1cc] sm:$0x1] }
 0x350   :  { %v5032_v43 = vrot.slane %v4921_v54, 5  ;;  %v12222_v54 = vld [vmem:[#allocation2 + $0x11c] sm:$0xf0] }
 0x351   :  { %v4375_v56 = vpop.f32.mrf.mxu2  ;;  %10168 = vmatmul.bf16.gmra.mxu0 %v10092_v47  ;;  %v4918_v47 = vld [vmem:[#allocation2 + $0x1c0] sm:$0xe] }
 0x352   :  { %v14362_v40 = vadd.f32 %v4375_v56, %v14175_v24  ;;  %5616 = vmatmul.bf16.gmra.mxu3 %v11207_v21  ;;  %v11989_v24 = vrot.slane %v9924_v28, 9  ;;  %v4920_v21 = vld [vmem:[#allocation2 + $0x1c8] sm:$0xe]  ;;  %v10012_v56 = vrot.slane %v9923_v50, 5  ;;  %v12266_v28 = vld [vmem:[%s15438_s3 + $0x3d0] sm:$0xff]  ;;  %v11038_v12 = vrot.slane %v4918_v47, 9 }
 0x353   :  { %v3948_v35 = vpop.f32.mrf.mxu1  ;;  %6490 = vmatpush.bf16.msrb.mxu1 %v12240_v44  ;;  %7036 = vmatpush.bf16.msrb.mxu3 %v12266_v28  ;;  %v6114_v28 = vld [vmem:[#allocation2 + $0xa8] sm:$0xf]  ;;  %v6177_v47 = vshrl.u32 %v6116_v49, 16 }
 0x354   :  { %v14369_v38 = vadd.f32 %v3948_v35, %v3743_v58  ;;  %v10017_v58 = vsel %vm13586_vm11, %v11989_v24, %v10016_v45  ;;  %v5028_v35 = vrot.slane %v4919_v2, 5  ;;  %v10013_v44 = vsel %vm13586_vm11, %v11988_v17, %v10012_v56  ;;  %v12265_v24 = vld [vmem:[%s15438_s3 + $0x3c8] sm:$0xff]  ;;  %v12264_v17 = vld [vmem:[%s15438_s3 + $0x3c0] sm:$0xff] }
 0x355   :  { %v14374_v22 = vpop.f32.mrf.mxu3  ;;  %v10080_v26 = vunpack.c.l.b16 %v10017_v58  ;;  %v9926_v56 = vld [vmem:[#allocation2 + $0x40] sm:$0xe]  ;;  %v9927_v58 = vld [vmem:[#allocation2 + $0x44] sm:$0x1]  ;;  %v6179_v1 = vrot.slane %v6177_v47, 4 }
 0x356   :  { %5169 = vmatmul.bf16.gmra.mxu1 %v5073_v32  ;;  %5375 = vmatmul.bf16.gmra.mxu2 %v11115_v7  ;;  %v11039_v7 = vrot.slane %v4920_v21, 9  ;;  %v3744_v32 = vadd.f32 %v14112_v53, %v14242_v5  ;;  %v6180_v21 = vshll.u32 %v6116_v49, 16  ;;  %v5029_v53 = vsel %vm13586_vm11, %v11038_v12, %v5028_v35  ;;  %v11210_v49 = vld [vmem:[#allocation2 + $0x118] sm:$0xf]  ;;  %v14407_v35 = vpop.f32.mrf.mxu0 }
 0x357   :  { %7037 = vmatpush.bf16.msrb.mxu3 %v12265_v24  ;;  %v11211_v37 = vor.u32 %v12222_v54, %v11210_v49  ;;  %v5065_v13 = vunpack.c.l.b16 %v5029_v53  ;;  %15499 = vst [vmem:[#allocation34_spill] sm:$0xff] %v14407_v35  ;;  %v11990_v55 = vrot.slane %v9926_v56, 9  ;;  %v10020_v61 = vrot.slane %v9927_v58, 5  ;;  %v6115_v56 = vld [vmem:[#allocation2 + $0xac] sm:$0x1] }
 0x358   :  { %v5033_v5 = vsel %vm13586_vm11, %v11039_v7, %v5032_v43  ;;  %v6182_v12 = vrot.slane %v6180_v21, 5  ;;  %v9929_v43 = vld [vmem:[#allocation2 + $0x4c] sm:$0x1]  ;;  %v11991_v53 = vrot.slane %v9928_v51, 9  ;;  %v12250_v51 = vld [vmem:[%s15438_s3 + $0x390] sm:$0xff] }
 0x359   :  { %v4378_v18 = vpop.f32.mrf.mxu2  ;;  %6810 = vmatpush.bf16.msrb.mxu2 %v12250_v51 }
 0x35a   :  { %v14387_v50 = vadd.f32 %v4378_v18, %v14200_v42  ;;  %v10079_v18 = vunpack.c.l.b16 %v10013_v44  ;;  %v5066_v44 = vunpack.c.l.b16 %v5033_v5  ;;  %v6117_v5 = vld [vmem:[#allocation2 + $0xb4] sm:$0x1]  ;;  %v6183_v58 = vor.u32 %v6182_v12, %v6179_v1 }
 0x35b   :  { %v3950_v45 = vpop.f32.mrf.mxu1  ;;  %7038 = vmatpush.bf16.msrb.mxu3 %v12264_v17 }
 0x35c   :  { %v14396_v2 = vadd.f32 %v3950_v45, %v3744_v32  ;;  %v6163_v32 = vshrl.u32 %v6114_v28, 16  ;;  %v6166_v45 = vshll.u32 %v6114_v28, 16  ;;  %v10093_v24 = vpack.c.b16 %v10080_v26, %v10079_v18  ;;  %v11118_v28 = vld [vmem:[#allocation2 + $0x38] sm:$0xf] }
 0x35d   :  { %v14398_v42 = vpop.f32.mrf.mxu3  ;;  %v3745_v26 = vadd.f32 %v14123_v0, %v14259_v27  ;;  %v11119_v21 = vor.u32 %v12203_v36, %v11118_v28  ;;  %v5074_v49 = vpack.c.b16 %v5066_v44, %v5065_v13  ;;  %v10021_v0 = vsel %vm13586_vm11, %v11990_v55, %v10020_v61  ;;  %v6118_v44 = vld [vmem:[#allocation2 + $0xb8] sm:$0xf] }
 0x35e   :  { %v6165_v47 = vrot.slane %v6163_v32, 4  ;;  %v6168_v54 = vrot.slane %v6166_v45, 5  ;;  %v6186_v27 = vshll.u32 %v6117_v5, 16  ;;  %v6172_v36 = vshll.u32 %v6115_v56, 16  ;;  %v6120_v32 = vld [vmem:[#allocation2 + $0xc0] sm:$0xf] }
 0x35f   :  { %v10081_v45 = vunpack.c.l.b16 %v10021_v0  ;;  %v3746_v61 = vadd.f32 %v14139_v39, %v14277_v23  ;;  %v6191_v5 = vshrl.u32 %v6118_v44, 16  ;;  %v11214_v23 = vld [vmem:[#allocation2 + $0x128] sm:$0xf] }
 0x361   :  { %v4380_v7 = vpop.f32.mrf.mxu2  ;;  %10173 = vmatmul.bf16.gmra.mxu0 %v10093_v24  ;;  %v10024_v24 = vrot.slane %v9929_v43, 5  ;;  %v14430_v43 = vpop.f32.mrf.mxu0  ;;  %v6193_v51 = vrot.slane %v6191_v5, 4 }
 0x362   :  { %v14410_v16 = vadd.f32 %v4380_v7, %v14226_v34  ;;  %5621 = vmatmul.bf16.gmra.mxu3 %v11211_v37  ;;  %v6169_v34 = vor.u32 %v6168_v54, %v6165_v47  ;;  %v6184_v37 = vrot.slane %v6183_v58, 4  ;;  %v6188_v7 = vrot.slane %v6186_v27, 5  ;;  %15500 = vst [vmem:[#allocation35_spill] sm:$0xff] %v14430_v43 }
 0x363   :  { %v3953_v18 = vpop.f32.mrf.mxu1  ;;  %v10025_v13 = vsel %vm13586_vm11, %v11991_v53, %v10024_v24  ;;  %v6174_v47 = vrot.slane %v6172_v36, 5  ;;  %v6205_v54 = vshrl.u32 %v6120_v32, 16  ;;  %v12223_v24 = vld [vmem:[#allocation2 + $0x12c] sm:$0xf0] }
 0x364   :  { %v14414_v17 = vadd.f32 %v3953_v18, %v3745_v26  ;;  %v6170_v55 = vrot.slane %v6169_v34, 4  ;;  %v10082_v28 = vunpack.c.l.b16 %v10025_v13  ;;  %v6208_v18 = vshll.u32 %v6120_v32, 16  ;;  %v12204_v32 = vld [vmem:[#allocation2 + $0x5c] sm:$0xf0] }
 0x365   :  { %v14416_v35 = vpop.f32.mrf.mxu3  ;;  %v6189_v53 = vsel %vm12754_vm8, %v6184_v37, %v6188_v7  ;;  %v6207_v0 = vrot.slane %v6205_v54, 4  ;;  %v11215_v27 = vor.u32 %v12223_v24, %v11214_v23  ;;  %v9931_v54 = vld [vmem:[#allocation2 + $0x64] sm:$0x1] }
 0x366   :  { %5174 = vmatmul.bf16.gmra.mxu1 %v5074_v49  ;;  %5380 = vmatmul.bf16.gmra.mxu2 %v11119_v21  ;;  %v6175_v39 = vsel %vm12754_vm8, %v6170_v55, %v6174_v47  ;;  %v10094_v56 = vpack.c.b16 %v10082_v28, %v10081_v45  ;;  %v6404_v58 = vunpack.c.l.b16 %v6189_v53  ;;  %v6210_v34 = vrot.slane %v6208_v18, 5  ;;  %v6121_v45 = vld [vmem:[#allocation2 + $0xc4] sm:$0x1]  ;;  %v9930_v47 = vld [vmem:[#allocation2 + $0x60] sm:$0xe] }
 0x367   :  { %v6403_v37 = vunpack.c.l.b16 %v6175_v39  ;;  %v4858_v55 = vadd.f32 %v14157_v14, %v14296_v11  ;;  %v6119_v39 = vld [vmem:[#allocation2 + $0xbc] sm:$0x1]  ;;  %v11992_v14 = vrot.slane %v9930_v47, 9  ;;  %v10028_v11 = vrot.slane %v9931_v54, 5 }
 0x368   :  { %v6211_v18 = vor.u32 %v6210_v34, %v6207_v0  ;;  %v6200_v0 = vshll.u32 %v6119_v39, 16  ;;  %v12256_v39 = vld [vmem:[#allocation2 + $0x14c] sm:$0xf0] }
 0x369   :  { %v4383_v1 = vpop.f32.mrf.mxu2  ;;  %v6419_v28 = vpack.c.b16 %v6404_v58, %v6403_v37  ;;  %v14447_v23 = vpop.f32.mrf.mxu0  ;;  %v12249_v58 = vld [vmem:[%s15438_s3 + $0x388] sm:$0xff] }
 0x36a   :  { %v14426_v12 = vadd.f32 %v4383_v1, %v14246_v30  ;;  %v6194_v30 = vshll.u32 %v6118_v44, 16  ;;  %v9932_v1 = vld [vmem:[#allocation2 + $0x68] sm:$0xe]  ;;  %v9933_v44 = vld [vmem:[#allocation2 + $0x6c] sm:$0x1]  ;;  %15501 = vst [vmem:[#allocation36_spill] sm:$0xff] %v14447_v23  ;;  %6811 = vmatpush.bf16.msrb.mxu2 %v12249_v58 }
 0x36b   :  { %v3955_v26 = vpop.f32.mrf.mxu1  ;;  %v10032_v24 = vrot.slane %v9933_v44, 5  ;;  %v6122_v44 = vld [vmem:[#allocation2 + $0xc8] sm:$0xf] }
 0x36c   :  { %v14432_v21 = vadd.f32 %v3955_v26, %v3746_v61  ;;  %v6196_v36 = vrot.slane %v6194_v30, 5  ;;  %v11122_v26 = vld [vmem:[#allocation2 + $0x58] sm:$0xf]  ;;  %v11993_v30 = vrot.slane %v9932_v1, 9 }
 0x36d   :  { %v14436_v49 = vpop.f32.mrf.mxu3  ;;  %v11123_v5 = vor.u32 %v12204_v32, %v11122_v26  ;;  %v6124_v32 = vld [vmem:[#allocation2 + $0xd0] sm:$0xf] }
 0x36e   :  { %v10033_v34 = vsel %vm13586_vm11, %v11993_v30, %v10032_v24  ;;  %v6233_v47 = vshrl.u32 %v6124_v32, 16  ;;  %v6236_v54 = vshll.u32 %v6124_v32, 16  ;;  %v6219_v30 = vshrl.u32 %v6122_v44, 16 }
 0x36f   :  { %v10084_v26 = vunpack.c.l.b16 %v10033_v34 }
 0x370   :  { %v6235_v58 = vrot.slane %v6233_v47, 4  ;;  %v6221_v32 = vrot.slane %v6219_v30, 4  ;;  %v11126_v47 = vld [vmem:[#allocation2 + $0x68] sm:$0xf]  ;;  %v9935_v30 = vld [vmem:[#allocation2 + $0x74] sm:$0x1] }
 0x371   :  { %v4385_v13 = vpop.f32.mrf.mxu2  ;;  %10178 = vmatmul.bf16.gmra.mxu0 %v10094_v56  ;;  %v6197_v56 = vor.u32 %v6196_v36, %v6193_v51  ;;  %v4859_v36 = vadd.f32 %v14181_v9, %v14314_v57 }
 0x372   :  { %v14441_v61 = vadd.f32 %v4385_v13, %v14266_v15  ;;  %5626 = vmatmul.bf16.gmra.mxu3 %v11215_v27  ;;  %v6214_v27 = vshll.u32 %v6121_v45, 16  ;;  %v6212_v13 = vrot.slane %v6211_v18, 4 }
 0x373   :  { %v5140_v7 = vpop.f32.mrf.mxu1  ;;  %v6198_v1 = vrot.slane %v6197_v56, 4  ;;  %v14471_v56 = vpop.f32.mrf.mxu0 }
 0x374   :  { %v14445_v53 = vadd.f32 %v5140_v7, %v4858_v55  ;;  %v10029_v55 = vsel %vm13586_vm11, %v11992_v14, %v10028_v11  ;;  %v6216_v45 = vrot.slane %v6214_v27, 5  ;;  %15502 = vst [vmem:[#allocation37_spill] sm:$0xff] %v14471_v56  ;;  %v11426_v14 = vld [vmem:[#allocation2 + $0x148] sm:$0xf] }
 0x375   :  { %v14449_v15 = vpop.f32.mrf.mxu3  ;;  %v10083_v9 = vunpack.c.l.b16 %v10029_v55  ;;  %v11427_v34 = vor.u32 %v12256_v39, %v11426_v14 }
 0x376   :  { %5385 = vmatmul.bf16.gmra.mxu2 %v11123_v5  ;;  %6491 = vmatmul.bf16.vlgmr.msrb.gmra.mxu1 %v6419_v28  ;;  %v6202_v28 = vrot.slane %v6200_v0, 5  ;;  %v6217_v5 = vsel %vm12754_vm8, %v6212_v13, %v6216_v45  ;;  %v6238_v0 = vrot.slane %v6236_v54, 5  ;;  %v9936_v45 = vld [vmem:[#allocation2 + $0x78] sm:$0xe] }
 0x377   :  { %v10095_v11 = vpack.c.b16 %v10084_v26, %v10083_v9  ;;  %v6406_v27 = vunpack.c.l.b16 %v6217_v5  ;;  %v6125_v26 = vld [vmem:[#allocation2 + $0xd4] sm:$0x1]  ;;  %v9934_v5 = vld [vmem:[#allocation2 + $0x70] sm:$0xe] }
 0x378   :  { %v6203_v57 = vsel %vm12754_vm8, %v6198_v1, %v6202_v28  ;;  %v4860_v1 = vadd.f32 %v14202_v3, %v14339_v8  ;;  %v10036_v3 = vrot.slane %v9935_v30, 5  ;;  %v6242_v8 = vshll.u32 %v6125_v26, 16 }
 0x379   :  { %v4388_v37 = vpop.f32.mrf.mxu2 }
 0x37a   :  { %v14457_v51 = vadd.f32 %v4388_v37, %v14281_v4  ;;  %v6222_v4 = vshll.u32 %v6122_v44, 16  ;;  %v12205_v44 = vld [vmem:[#allocation2 + $0x6c] sm:$0xf0] }
 0x37b   :  { %v5142_v7 = vpop.f32.mrf.mxu1  ;;  %v11127_v9 = vor.u32 %v12205_v44, %v11126_v47  ;;  %v6128_v44 = vld [vmem:[#allocation2 + $0xe0] sm:$0xf] }
 0x37c   :  { %v14463_v18 = vadd.f32 %v5142_v7, %v4859_v36  ;;  %v6224_v37 = vrot.slane %v6222_v4, 5  ;;  %v6405_v36 = vunpack.c.l.b16 %v6203_v57  ;;  %v9937_v7 = vld [vmem:[#allocation2 + $0x7c] sm:$0x1]  ;;  %v6239_v4 = vor.u32 %v6238_v0, %v6235_v58 }
 0x37d   :  { %v14467_v24 = vpop.f32.mrf.mxu3  ;;  %v11995_v57 = vrot.slane %v9936_v45, 9  ;;  %v10040_v14 = vrot.slane %v9937_v7, 5  ;;  %v6261_v30 = vshrl.u32 %v6128_v44, 16 }
 0x37e   :  { %v6420_v54 = vpack.c.b16 %v6406_v27, %v6405_v36  ;;  %v12248_v27 = vld [vmem:[%s15438_s3 + $0x380] sm:$0xff]  ;;  %v6240_v0 = vrot.slane %v6239_v4, 4  ;;  %v14487_v36 = vpop.f32.mrf.mxu0  ;;  %v6264_v4 = vshll.u32 %v6128_v44, 16 }
 0x37f   :  { %v10041_v58 = vsel %vm13586_vm11, %v11995_v57, %v10040_v14  ;;  %6812 = vmatpush.bf16.msrb.mxu2 %v12248_v27  ;;  %15503 = vst [vmem:[#allocation38_spill] sm:$0xff] %v14487_v36  ;;  %v6263_v27 = vrot.slane %v6261_v30, 4  ;;  %v11130_v30 = vld [vmem:[#allocation2 + $0x78] sm:$0xf] }
 0x381   :  { %v4390_v13 = vpop.f32.mrf.mxu2  ;;  %10183 = vmatmul.bf16.gmra.mxu0 %v10095_v11  ;;  %v6123_v11 = vld [vmem:[#allocation2 + $0xcc] sm:$0x1] }
 0x382   :  { %v14474_v55 = vadd.f32 %v4390_v13, %v14305_v52  ;;  %7039 = vmatmul.bf16.vlgmr.msrb.gmra.mxu3 %v11427_v34  ;;  %v6225_v52 = vor.u32 %v6224_v37, %v6221_v32  ;;  %v11994_v34 = vrot.slane %v9934_v5, 9  ;;  %v6228_v13 = vshll.u32 %v6123_v11, 16  ;;  %v6126_v37 = vld [vmem:[#allocation2 + $0xd8] sm:$0xf] }
 0x383   :  { %v5145_v28 = vpop.f32.mrf.mxu1  ;;  %v6247_v14 = vshrl.u32 %v6126_v37, 16 }
 0x384   :  { %v14478_v39 = vadd.f32 %v5145_v28, %v4860_v1  ;;  %v6226_v32 = vrot.slane %v6225_v52, 4  ;;  %v4861_v1 = vadd.f32 %v14228_v63, %v14362_v40  ;;  %v10037_v26 = vsel %vm13586_vm11, %v11994_v34, %v10036_v3  ;;  %v12257_v52 = vld [vmem:[#allocation2 + $0x15c] sm:$0xf0]  ;;  %v11430_v34 = vld [vmem:[#allocation2 + $0x158] sm:$0xf] }
 0x385   :  { %v14480_v56 = vpop.f32.mrf.mxu3  ;;  %v6244_v28 = vrot.slane %v6242_v8, 5  ;;  %v6230_v5 = vrot.slane %v6228_v13, 5  ;;  %v10085_v63 = vunpack.c.l.b16 %v10037_v26  ;;  %v6266_v13 = vrot.slane %v6264_v4, 5  ;;  %v6129_v26 = vld [vmem:[#allocation2 + $0xe4] sm:$0x1] }
 0x386   :  { %5390 = vmatmul.bf16.gmra.mxu2 %v11127_v9  ;;  %6496 = vmatmul.bf16.gmra.mxu1 %v6420_v54  ;;  %v10086_v54 = vunpack.c.l.b16 %v10041_v58  ;;  %v11431_v58 = vor.u32 %v12257_v52, %v11430_v34  ;;  %v6249_v44 = vrot.slane %v6247_v14, 4  ;;  %v9939_v14 = vld [vmem:[#allocation2 + $0x84] sm:$0x1] }
 0x387   :  { %v6245_v57 = vsel %vm12754_vm8, %v6240_v0, %v6244_v28  ;;  %v6231_v40 = vsel %vm12754_vm8, %v6226_v32, %v6230_v5  ;;  %v12206_v0 = vld [vmem:[#allocation2 + $0x7c] sm:$0xf0]  ;;  %v4862_v32 = vadd.f32 %v14250_v6, %v14387_v50  ;;  %v10044_v50 = vrot.slane %v9939_v14, 5 }
 0x388   :  { %v10096_v3 = vpack.c.b16 %v10086_v54, %v10085_v63  ;;  %v6408_v8 = vunpack.c.l.b16 %v6245_v57  ;;  %v6407_v28 = vunpack.c.l.b16 %v6231_v40  ;;  %v14509_v54 = vpop.f32.mrf.mxu0  ;;  %v9938_v57 = vld [vmem:[#allocation2 + $0x80] sm:$0xe]  ;;  %v11131_v63 = vor.u32 %v12206_v0, %v11130_v30 }
 0x389   :  { %v4393_v45 = vpop.f32.mrf.mxu2  ;;  %15504 = vst [vmem:[#allocation39_spill] sm:$0xff] %v14509_v54  ;;  %v11996_v6 = vrot.slane %v9938_v57, 9 }
 0x38a   :  { %v14490_v7 = vadd.f32 %v4393_v45, %v14320_v20  ;;  %v6250_v20 = vshll.u32 %v6126_v37, 16  ;;  %v9940_v37 = vld [vmem:[#allocation2 + $0x88] sm:$0xe]  ;;  %v6421_v4 = vpack.c.b16 %v6408_v8, %v6407_v28  ;;  %v12303_v8 = vld [vmem:[%s15438_s3 + $0x4b8] sm:$0xff] }
 0x38b   :  { %v5147_v47 = vpop.f32.mrf.mxu1  ;;  %v11997_v40 = vrot.slane %v9940_v37, 9  ;;  %8157 = vmatpush.bf16.msra.mxu2 %v12303_v8 }
 0x38c   :  { %v14496_v9 = vadd.f32 %v5147_v47, %v4861_v1  ;;  %v6252_v45 = vrot.slane %v6250_v20, 5  ;;  %v9941_v47 = vld [vmem:[#allocation2 + $0x8c] sm:$0x1]  ;;  %v6267_v20 = vor.u32 %v6266_v13, %v6263_v27  ;;  %v12311_v27 = vld [vmem:[%s15438_s3 + $0x4f8] sm:$0xff] }
 0x38d   :  { %v14500_v11 = vpop.f32.mrf.mxu3  ;;  %v10048_v34 = vrot.slane %v9941_v47, 5  ;;  %8479 = vmatpush.bf16.msra.mxu3 %v12311_v27 }
 0x38e   :  { %v6268_v0 = vrot.slane %v6267_v20, 4 }
 0x38f   :  { %v10049_v28 = vsel %vm13586_vm11, %v11997_v40, %v10048_v34 }
 0x390   :  { %v14537_v40 = vpop.f32.mrf.mxu0 }
 0x391   :  { %v4395_v1 = vpop.f32.mrf.mxu2  ;;  %10188 = vmatmul.bf16.gmra.mxu0 %v10096_v3  ;;  %15505 = vst [vmem:[#allocation40_spill] sm:$0xff] %v14537_v40  ;;  %v9944_v40 = vld [vmem:[#allocation2 + $0x98] sm:$0xe] }
 0x392   :  { %v14505_v36 = vadd.f32 %v4395_v1, %v14345_v48  ;;  %7044 = vmatmul.bf16.gmra.mxu3 %v11431_v58  ;;  %v6127_v48 = vld [vmem:[#allocation2 + $0xdc] sm:$0x1]  ;;  %v6253_v58 = vor.u32 %v6252_v45, %v6249_v44  ;;  %v6270_v1 = vshll.u32 %v6129_v26, 16  ;;  %v10045_v26 = vsel %vm13586_vm11, %v11996_v6, %v10044_v50  ;;  %v11434_v50 = vld [vmem:[#allocation2 + $0x168] sm:$0xf] }
 0x393   :  { %v5150_v5 = vpop.f32.mrf.mxu1  ;;  %v6256_v13 = vshll.u32 %v6127_v48, 16  ;;  %v10087_v34 = vunpack.c.l.b16 %v10045_v26  ;;  %v9945_v26 = vld [vmem:[#allocation2 + $0x9c] sm:$0x1] }
 0x394   :  { %v14511_v52 = vadd.f32 %v5150_v5, %v4862_v32  ;;  %v6254_v45 = vrot.slane %v6253_v58, 4  ;;  %v6272_v37 = vrot.slane %v6270_v1, 5  ;;  %v4863_v32 = vadd.f32 %v14268_v60, %v14410_v16  ;;  %v6132_v5 = vld [vmem:[#allocation2 + $0x100] sm:$0xf]  ;;  %v12258_v60 = vld [vmem:[#allocation2 + $0x16c] sm:$0xf0] }
 0x395   :  { %v14513_v3 = vpop.f32.mrf.mxu3  ;;  %v6258_v57 = vrot.slane %v6256_v13, 5  ;;  %v6289_v58 = vshrl.u32 %v6132_v5, 16  ;;  %v6292_v1 = vshll.u32 %v6132_v5, 16  ;;  %v4864_v5 = vadd.f32 %v14283_v10, %v14426_v12  ;;  %v6131_v10 = vld [vmem:[#allocation2 + $0xfc] sm:$0x1] }
 0x396   :  { %5395 = vmatmul.bf16.gmra.mxu2 %v11131_v63  ;;  %6501 = vmatmul.bf16.gmra.mxu1 %v6421_v4  ;;  %v10088_v4 = vunpack.c.l.b16 %v10049_v28  ;;  %v6273_v14 = vsel %vm12754_vm8, %v6268_v0, %v6272_v37  ;;  %v6130_v63 = vld [vmem:[#allocation2 + $0xf8] sm:$0xf]  ;;  %v11435_v0 = vor.u32 %v12258_v60, %v11434_v50  ;;  %v12207_v28 = vld [vmem:[#allocation2 + $0x8c] sm:$0xf0]  ;;  %v6564_v12 = vld [vmem:[#allocation2 + $0x8] sm:$0xe] }
 0x397   :  { %v6259_v48 = vsel %vm12754_vm8, %v6254_v45, %v6258_v57  ;;  %v6410_v6 = vunpack.c.l.b16 %v6273_v14  ;;  %v6275_v27 = vshrl.u32 %v6130_v63, 16  ;;  %v6278_v13 = vshll.u32 %v6130_v63, 16  ;;  %v9942_v37 = vld [vmem:[#allocation2 + $0x90] sm:$0xe] }
 0x398   :  { %v10097_v8 = vpack.c.b16 %v10088_v4, %v10087_v34  ;;  %v6291_v54 = vrot.slane %v6289_v58, 4  ;;  %v6294_v23 = vrot.slane %v6292_v1, 5  ;;  %v11134_v4 = vld [vmem:[#allocation2 + $0x88] sm:$0xf]  ;;  %v10056_v58 = vrot.slane %v9945_v26, 5 }
 0x399   :  { %v4398_v44 = vpop.f32.mrf.mxu2  ;;  %v11135_v63 = vor.u32 %v12207_v28, %v11134_v4  ;;  %v6277_v60 = vrot.slane %v6275_v27, 4  ;;  %v6280_v34 = vrot.slane %v6278_v13, 5  ;;  %v6133_v1 = vld [vmem:[#allocation2 + $0x104] sm:$0x1]  ;;  %v6565_v13 = vld [vmem:[#allocation2 + $0xc] sm:$0x1] }
 0x39a   :  { %v14524_v47 = vadd.f32 %v4398_v44, %v14369_v38  ;;  %v12295_v38 = vld [vmem:[%s15438_s3 + $0x478] sm:$0xff]  ;;  %v6409_v44 = vunpack.c.l.b16 %v6259_v48  ;;  %v6298_v27 = vshll.u32 %v6133_v1, 16 }
 0x39b   :  { %v5152_v30 = vpop.f32.mrf.mxu1  ;;  %7707 = vmatpush.bf16.msra.mxu1 %v12295_v38  ;;  %v11998_v38 = vrot.slane %v9942_v37, 9  ;;  %v6281_v28 = vor.u32 %v6280_v34, %v6277_v60  ;;  %v6646_v60 = vrot.slane %v6565_v13, 5  ;;  %v6136_v34 = vld [vmem:[#allocation2 + $0x110] sm:$0xf] }
 0x39c   :  { %v14532_v20 = vadd.f32 %v5152_v30, %v4863_v32  ;;  %v9943_v32 = vld [vmem:[#allocation2 + $0x94] sm:$0x1]  ;;  %v6422_v57 = vpack.c.b16 %v6410_v6, %v6409_v44  ;;  %v14552_v6 = vpop.f32.mrf.mxu0  ;;  %v6317_v13 = vshrl.u32 %v6136_v34, 16 }
 0x39d   :  { %v14539_v16 = vpop.f32.mrf.mxu3  ;;  %v10052_v50 = vrot.slane %v9943_v32, 5  ;;  %15506 = vst [vmem:[#allocation41_spill] sm:$0xff] %v14552_v6  ;;  %v12310_v44 = vld [vmem:[%s15438_s3 + $0x4f0] sm:$0xff]  ;;  %v7357_v6 = vld [vmem:[#allocation2 + $0x1a4] sm:$0x1] }
 0x39e   :  { %8480 = vmatpush.bf16.msra.mxu3 %v12310_v44 }
 0x3a1   :  { %v4400_v30 = vpop.f32.mrf.mxu2  ;;  %10193 = vmatmul.bf16.gmra.mxu0 %v10097_v8  ;;  %v11999_v8 = vrot.slane %v9944_v40, 9  ;;  %v12302_v40 = vld [vmem:[%s15438_s3 + $0x4b0] sm:$0xff] }
 0x3a2   :  { %v14544_v45 = vadd.f32 %v4400_v30, %v14396_v2  ;;  %7049 = vmatmul.bf16.gmra.mxu3 %v11435_v0  ;;  %v6295_v2 = vor.u32 %v6294_v23, %v6291_v54  ;;  %v6566_v0 = vld [vmem:[#allocation2 + $0x10] sm:$0xe]  ;;  %v6567_v30 = vld [vmem:[#allocation2 + $0x14] sm:$0x1]  ;;  %v10053_v23 = vsel %vm13586_vm11, %v11998_v38, %v10052_v50  ;;  %8158 = vmatpush.bf16.msra.mxu2 %v12302_v40  ;;  %v11438_v40 = vld [vmem:[#allocation2 + $0x178] sm:$0xf] }
 0x3a3   :  { %v5155_v14 = vpop.f32.mrf.mxu1  ;;  %v10057_v54 = vsel %vm13586_vm11, %v11999_v8, %v10056_v58  ;;  %v11345_v37 = vrot.slane %v6566_v0, 9  ;;  %v6650_v32 = vrot.slane %v6567_v30, 5  ;;  %v10089_v50 = vunpack.c.l.b16 %v10053_v23  ;;  %v6134_v30 = vld [vmem:[#allocation2 + $0x108] sm:$0xf] }
 0x3a4   :  { %v14548_v48 = vadd.f32 %v5155_v14, %v4864_v5  ;;  %v6284_v5 = vshll.u32 %v6131_v10, 16  ;;  %v6296_v4 = vrot.slane %v6295_v2, 4  ;;  %v4865_v14 = vadd.f32 %v14307_v29, %v14441_v61  ;;  %v12259_v29 = vld [vmem:[#allocation2 + $0x17c] sm:$0xf0] }
 0x3a5   :  { %v14550_v43 = vpop.f32.mrf.mxu3  ;;  %v10090_v1 = vunpack.c.l.b16 %v10057_v54  ;;  %v6282_v8 = vrot.slane %v6281_v28, 4  ;;  %v6300_v58 = vrot.slane %v6298_v27, 5  ;;  %v6651_v2 = vsel %vm13586_vm11, %v11345_v37, %v6650_v32 }
 0x3a6   :  { %5400 = vmatmul.bf16.gmra.mxu2 %v11135_v63  ;;  %6506 = vmatmul.bf16.gmra.mxu1 %v6422_v57  ;;  %v11344_v63 = vrot.slane %v6564_v12, 9  ;;  %v6286_v61 = vrot.slane %v6284_v5, 5  ;;  %v6320_v28 = vshll.u32 %v6136_v34, 16  ;;  %v6303_v54 = vshrl.u32 %v6134_v30, 16  ;;  %v14584_v5 = vpop.f32.mrf.mxu0 }
 0x3a7   :  { %v6301_v12 = vsel %vm12754_vm8, %v6296_v4, %v6300_v58  ;;  %v10098_v44 = vpack.c.b16 %v10090_v1, %v10089_v50  ;;  %v6306_v37 = vshll.u32 %v6134_v30, 16  ;;  %v11439_v32 = vor.u32 %v12259_v29, %v11438_v40  ;;  %15507 = vst [vmem:[#allocation42_spill] sm:$0xff] %v14584_v5  ;;  %v6135_v40 = vld [vmem:[#allocation2 + $0x10c] sm:$0x1] }
 0x3a8   :  { %v6647_v27 = vsel %vm13586_vm11, %v11344_v63, %v6646_v60  ;;  %v6287_v23 = vsel %vm12754_vm8, %v6282_v8, %v6286_v61  ;;  %v6319_v4 = vrot.slane %v6317_v13, 4  ;;  %v6322_v34 = vrot.slane %v6320_v28, 5  ;;  %v6137_v61 = vld [vmem:[#allocation2 + $0x114] sm:$0x1]  ;;  %v6570_v28 = vld [vmem:[#allocation2 + $0x20] sm:$0xe] }
 0x3a9   :  { %v4403_v26 = vpop.f32.mrf.mxu2  ;;  %v4866_v63 = vadd.f32 %v14325_v62, %v14457_v51  ;;  %v6411_v60 = vunpack.c.l.b16 %v6287_v23  ;;  %v6725_v50 = vunpack.c.l.b16 %v6647_v27  ;;  %v6305_v8 = vrot.slane %v6303_v54, 4  ;;  %v12301_v51 = vld [vmem:[%s15438_s3 + $0x4a8] sm:$0xff]  ;;  %v6568_v23 = vld [vmem:[#allocation2 + $0x18] sm:$0xe]  ;;  %v6569_v54 = vld [vmem:[#allocation2 + $0x1c] sm:$0x1] }
 0x3aa   :  { %v14565_v57 = vadd.f32 %v4403_v26, %v14414_v17  ;;  %v12294_v17 = vld [vmem:[%s15438_s3 + $0x470] sm:$0xff]  ;;  %v6412_v26 = vunpack.c.l.b16 %v6301_v12  ;;  %v6308_v30 = vrot.slane %v6306_v37, 5  ;;  %v6323_v13 = vor.u32 %v6322_v34, %v6319_v4  ;;  %v12309_v27 = vld [vmem:[%s15438_s3 + $0x4e8] sm:$0xff]  ;;  %8159 = vmatpush.bf16.msra.mxu2 %v12301_v51 }
 0x3ab   :  { %v5157_v38 = vpop.f32.mrf.mxu1  ;;  %7708 = vmatpush.bf16.msra.mxu1 %v12294_v17  ;;  %v6326_v62 = vshll.u32 %v6137_v61, 16  ;;  %v11347_v37 = vrot.slane %v6570_v28, 9  ;;  %8481 = vmatpush.bf16.msra.mxu3 %v12309_v27  ;;  %v4867_v34 = vadd.f32 %v14352_v31, %v14474_v55  ;;  %v11442_v61 = vld [vmem:[#allocation2 + $0x198] sm:$0xf]  ;;  %v12293_v31 = vld [vmem:[%s15438_s3 + $0x468] sm:$0xff] }
 0x3ac   :  { %v14569_v0 = vadd.f32 %v5157_v38, %v4865_v14  ;;  %v6726_v14 = vunpack.c.l.b16 %v6651_v2  ;;  %v6423_v2 = vpack.c.b16 %v6412_v26, %v6411_v60  ;;  %v6138_v28 = vld [vmem:[#allocation2 + $0x118] sm:$0xf]  ;;  %v12260_v55 = vld [vmem:[#allocation2 + $0x19c] sm:$0xf0] }
 0x3ad   :  { %v14576_v10 = vpop.f32.mrf.mxu3  ;;  %v6331_v27 = vshrl.u32 %v6138_v28, 16 }
 0x3ae   :  { %v6741_v29 = vpack.c.b16 %v6726_v14, %v6725_v50  ;;  %v6312_v14 = vshll.u32 %v6135_v40, 16 }
 0x3af   :  { %7709 = vmatpush.bf16.msra.mxu1 %v12293_v31 }
 0x3b1   :  { %v4405_v38 = vpop.f32.mrf.mxu2  ;;  %10198 = vmatmul.bf16.gmra.mxu0 %v10098_v44  ;;  %v6309_v44 = vor.u32 %v6308_v30, %v6305_v8  ;;  %v11346_v8 = vrot.slane %v6568_v23, 9  ;;  %v6654_v30 = vrot.slane %v6569_v54, 5  ;;  %v6334_v23 = vshll.u32 %v6138_v28, 16  ;;  %v6141_v28 = vld [vmem:[#allocation2 + $0x124] sm:$0x1] }
 0x3b2   :  { %v14587_v58 = vadd.f32 %v4405_v38, %v14432_v21  ;;  %7054 = vmatmul.bf16.gmra.mxu3 %v11439_v32  ;;  %v6571_v21 = vld [vmem:[#allocation2 + $0x24] sm:$0x1]  ;;  %v6324_v38 = vrot.slane %v6323_v13, 4  ;;  %v11443_v54 = vor.u32 %v12260_v55, %v11442_v61 }
 0x3b3   :  { %v5160_v1 = vpop.f32.mrf.mxu1  ;;  %v6658_v32 = vrot.slane %v6571_v21, 5  ;;  %v6310_v50 = vrot.slane %v6309_v44, 4  ;;  %v6314_v21 = vrot.slane %v6312_v14, 5  ;;  %v6655_v51 = vsel %vm13586_vm11, %v11346_v8, %v6654_v30 }
 0x3b4   :  { %v14591_v17 = vadd.f32 %v5160_v1, %v4866_v63  ;;  %v6140_v63 = vld [vmem:[#allocation2 + $0x120] sm:$0xf]  ;;  %v6328_v1 = vrot.slane %v6326_v62, 5  ;;  %v6336_v31 = vrot.slane %v6334_v23, 5  ;;  %v6573_v23 = vld [vmem:[#allocation2 + $0x2c] sm:$0x1] }
 0x3b5   :  { %v14593_v12 = vpop.f32.mrf.mxu3  ;;  %v6659_v13 = vsel %vm13586_vm11, %v11347_v37, %v6658_v32  ;;  %v6348_v44 = vshll.u32 %v6140_v63, 16  ;;  %v6315_v62 = vsel %vm12754_vm8, %v6310_v50, %v6314_v21  ;;  %v6575_v21 = vld [vmem:[#allocation2 + $0x34] sm:$0x1] }
 0x3b6   :  { %6511 = vmatmul.bf16.gmra.mxu1 %v6423_v2  ;;  %6813 = vmatmul.bf16.vlgmr.msrb.gmra.mxu2 %v6741_v29  ;;  %v6329_v40 = vsel %vm12754_vm8, %v6324_v38, %v6328_v1  ;;  %v6728_v32 = vunpack.c.l.b16 %v6659_v13  ;;  %v4868_v38 = vadd.f32 %v14374_v22, %v14490_v7  ;;  %v6333_v1 = vrot.slane %v6331_v27, 4  ;;  %v6574_v7 = vld [vmem:[#allocation2 + $0x30] sm:$0xe]  ;;  %v6572_v27 = vld [vmem:[#allocation2 + $0x28] sm:$0xe] }
 0x3b7   :  { %v6414_v37 = vunpack.c.l.b16 %v6329_v40  ;;  %v6350_v14 = vrot.slane %v6348_v44, 5  ;;  %v6139_v40 = vld [vmem:[#allocation2 + $0x11c] sm:$0x1]  ;;  %v12300_v44 = vld [vmem:[%s15438_s3 + $0x4a0] sm:$0xff] }
 0x3b8   :  { %8160 = vmatpush.bf16.msra.mxu2 %v12300_v44 }
 0x3b9   :  { %v5366_v26 = vpop.f32.mrf.mxu2 }
 0x3ba   :  { %v5406_v4 = vadd.f32 %v5366_v26, %v14445_v53 }
 0x3bb   :  { %v5162_v60 = vpop.f32.mrf.mxu1 }
 0x3bc   :  { %v14605_v2 = vadd.f32 %v14480_v56, %v5406_v4  ;;  %v14607_v29 = vadd.f32 %v5162_v60, %v4867_v34  ;;  %v6345_v56 = vshrl.u32 %v6140_v63, 16  ;;  %v6413_v63 = vunpack.c.l.b16 %v6315_v62  ;;  %v12291_v62 = vld [vmem:[%s15438_s3 + $0x458] sm:$0xff] }
 0x3bd   :  { %v14614_v53 = vpop.f32.mrf.mxu3  ;;  %v6727_v60 = vunpack.c.l.b16 %v6655_v51  ;;  %v12308_v51 = vld [vmem:[%s15438_s3 + $0x4e0] sm:$0xff] }
 0x3be   :  { %v6347_v4 = vrot.slane %v6345_v56, 4  ;;  %v6424_v61 = vpack.c.b16 %v6414_v37, %v6413_v63  ;;  %v6337_v56 = vor.u32 %v6336_v31, %v6333_v1  ;;  %v6666_v37 = vrot.slane %v6575_v21, 5  ;;  %8482 = vmatpush.bf16.msra.mxu3 %v12308_v51  ;;  %v12289_v51 = vld [vmem:[%s15438_s3 + $0x448] sm:$0xff] }
 0x3bf   :  { %v6742_v13 = vpack.c.b16 %v6728_v32, %v6727_v60  ;;  %v11348_v1 = vrot.slane %v6572_v27, 9  ;;  %v6662_v31 = vrot.slane %v6573_v23, 5 }
 0x3c0   :  { %v6351_v22 = vor.u32 %v6350_v14, %v6347_v4  ;;  %v6338_v60 = vrot.slane %v6337_v56, 4 }
 0x3c1   :  { %v5368_v26 = vpop.f32.mrf.mxu2 }
 0x3c2   :  { %v5407_v34 = vadd.f32 %v5368_v26, %v14463_v18  ;;  %7059 = vmatmul.bf16.gmra.mxu3 %v11443_v54  ;;  %v12292_v18 = vld [vmem:[%s15438_s3 + $0x460] sm:$0xff]  ;;  %v11349_v54 = vrot.slane %v6574_v7, 9  ;;  %v6340_v26 = vshll.u32 %v6139_v40, 16  ;;  %v6352_v4 = vrot.slane %v6351_v22, 4  ;;  %v12261_v22 = vld [vmem:[#allocation2 + $0x1ac] sm:$0xf0] }
 0x3c3   :  { %v5165_v50 = vpop.f32.mrf.mxu1  ;;  %7710 = vmatpush.bf16.msra.mxu1 %v12292_v18 }
 0x3c4   :  { %v14626_v8 = vadd.f32 %v14500_v11, %v5407_v34  ;;  %v14628_v30 = vadd.f32 %v5165_v50, %v4868_v38  ;;  %v6354_v11 = vshll.u32 %v6141_v28, 16  ;;  %v4869_v34 = vadd.f32 %v14398_v42, %v14505_v36  ;;  %v6144_v38 = vld [vmem:[#allocation2 + $0x130] sm:$0xf]  ;;  %v11446_v28 = vld [vmem:[#allocation2 + $0x1a8] sm:$0xf] }
 0x3c5   :  { %v14633_v55 = vpop.f32.mrf.mxu3  ;;  %v6667_v18 = vsel %vm13586_vm11, %v11349_v54, %v6666_v37  ;;  %v12290_v42 = vld [vmem:[%s15438_s3 + $0x450] sm:$0xff]  ;;  %v6342_v7 = vrot.slane %v6340_v26, 5  ;;  %v6376_v40 = vshll.u32 %v6144_v38, 16  ;;  %v11447_v27 = vor.u32 %v12261_v22, %v11446_v28  ;;  %v6579_v22 = vld [vmem:[#allocation2 + $0x44] sm:$0x1] }
 0x3c6   :  { %6516 = vmatmul.bf16.gmra.mxu1 %v6424_v61  ;;  %6818 = vmatmul.bf16.gmra.mxu2 %v6742_v13  ;;  %v6356_v50 = vrot.slane %v6354_v11, 5  ;;  %v6663_v11 = vsel %vm13586_vm11, %v11348_v1, %v6662_v31  ;;  %v6730_v54 = vunpack.c.l.b16 %v6667_v18 }
 0x3c7   :  { %7711 = vmatpush.bf16.msra.mxu1 %v12291_v62  ;;  %v6343_v56 = vsel %vm12754_vm8, %v6338_v60, %v6342_v7  ;;  %v6378_v26 = vrot.slane %v6376_v40, 5  ;;  %v12288_v7 = vld [vmem:[%s15438_s3 + $0x440] sm:$0xff] }
 0x3c8   :  { %v6357_v21 = vsel %vm12754_vm8, %v6352_v4, %v6356_v50 }
 0x3c9   :  { %v5371_v32 = vpop.f32.mrf.mxu2  ;;  %v6416_v23 = vunpack.c.l.b16 %v6357_v21  ;;  %v12299_v21 = vld [vmem:[%s15438_s3 + $0x498] sm:$0xff] }
 0x3ca   :  { %v5408_v14 = vadd.f32 %v5371_v32, %v14478_v39  ;;  %v6142_v39 = vld [vmem:[#allocation2 + $0x128] sm:$0xf]  ;;  %8161 = vmatpush.bf16.msra.mxu2 %v12299_v21 }
 0x3cb   :  { %v5167_v63 = vpop.f32.mrf.mxu1  ;;  %v6359_v44 = vshrl.u32 %v6142_v39, 16  ;;  %v6362_v62 = vshll.u32 %v6142_v39, 16  ;;  %7712 = vmatpush.bf16.msra.mxu1 %v12290_v42  ;;  %v6145_v39 = vld [vmem:[#allocation2 + $0x134] sm:$0x1] }
 0x3cc   :  { %v14648_v61 = vadd.f32 %v14513_v3, %v5408_v14  ;;  %v14650_v13 = vadd.f32 %v5167_v63, %v4869_v34  ;;  %v6373_v3 = vshrl.u32 %v6144_v38, 16  ;;  %v4870_v14 = vadd.f32 %v14416_v35, %v14524_v47  ;;  %v6578_v47 = vld [vmem:[#allocation2 + $0x40] sm:$0xe] }
 0x3cd   :  { %v14657_v36 = vpop.f32.mrf.mxu3  ;;  %v6415_v34 = vunpack.c.l.b16 %v6343_v56  ;;  %v6729_v38 = vunpack.c.l.b16 %v6663_v11  ;;  %v6361_v60 = vrot.slane %v6359_v44, 4  ;;  %v6364_v50 = vrot.slane %v6362_v62, 5  ;;  %v6576_v56 = vld [vmem:[#allocation2 + $0x38] sm:$0xe]  ;;  %v6577_v11 = vld [vmem:[#allocation2 + $0x3c] sm:$0x1] }
 0x3ce   :  { %v6375_v32 = vrot.slane %v6373_v3, 4  ;;  %v6382_v40 = vshll.u32 %v6145_v39, 16  ;;  %v12306_v44 = vld [vmem:[%s15438_s3 + $0x4d0] sm:$0xff]  ;;  %v11351_v62 = vrot.slane %v6578_v47, 9 }
 0x3cf   :  { %7713 = vmatpush.bf16.msra.mxu1 %v12289_v51  ;;  %v6425_v28 = vpack.c.b16 %v6416_v23, %v6415_v34  ;;  %v6743_v18 = vpack.c.b16 %v6730_v54, %v6729_v38  ;;  %v6365_v3 = vor.u32 %v6364_v50, %v6361_v60  ;;  %v6674_v51 = vrot.slane %v6579_v22, 5 }
 0x3d0   :  { %v6379_v35 = vor.u32 %v6378_v26, %v6375_v32  ;;  %v7340_v32 = vld [vmem:[#allocation2 + $0x150] sm:$0xf]  ;;  %v6670_v34 = vrot.slane %v6577_v11, 5  ;;  %v6384_v60 = vrot.slane %v6382_v40, 5 }
 0x3d1   :  { %v5373_v37 = vpop.f32.mrf.mxu2  ;;  %v7401_v39 = vshrl.u32 %v7340_v32, 16  ;;  %v7404_v22 = vshll.u32 %v7340_v32, 16 }
 0x3d2   :  { %v5409_v4 = vadd.f32 %v5373_v37, %v14496_v9  ;;  %7064 = vmatmul.bf16.gmra.mxu3 %v11447_v27  ;;  %v12307_v9 = vld [vmem:[%s15438_s3 + $0x4d8] sm:$0xff]  ;;  %v6380_v54 = vrot.slane %v6379_v35, 4  ;;  %v7338_v37 = vld [vmem:[#allocation2 + $0x148] sm:$0xf] }
 0x3d3   :  { %v5170_v63 = vpop.f32.mrf.mxu1  ;;  %8483 = vmatpush.bf16.msra.mxu3 %v12307_v9  ;;  %7714 = vmatpush.bf16.msra.mxu1 %v12288_v7 }
 0x3d4   :  { %v14672_v1 = vadd.f32 %v14539_v16, %v5409_v4  ;;  %v14674_v31 = vadd.f32 %v5170_v63, %v4870_v14  ;;  %v6143_v16 = vld [vmem:[#allocation2 + $0x12c] sm:$0x1]  ;;  %v4871_v4 = vadd.f32 %v14436_v49, %v14544_v45  ;;  %v11350_v14 = vrot.slane %v6576_v56, 9  ;;  %v11450_v49 = vld [vmem:[#allocation2 + $0x1b8] sm:$0xf] }
 0x3d5   :  { %v14679_v42 = vpop.f32.mrf.mxu3  ;;  %v6368_v23 = vshll.u32 %v6143_v16, 16  ;;  %v6366_v63 = vrot.slane %v6365_v3, 4  ;;  %v12262_v45 = vld [vmem:[#allocation2 + $0x1bc] sm:$0xf0]  ;;  %v6385_v47 = vsel %vm12754_vm8, %v6380_v54, %v6384_v60  ;;  %v7390_v16 = vshll.u32 %v7338_v37, 16 }
 0x3d6   :  { %6521 = vmatmul.bf16.gmra.mxu1 %v6425_v28  ;;  %6823 = vmatmul.bf16.gmra.mxu2 %v6743_v18  ;;  %v7387_v18 = vshrl.u32 %v7338_v37, 16  ;;  %v6671_v7 = vsel %vm13586_vm11, %v11350_v14, %v6670_v34  ;;  %v12304_v3 = vld [vmem:[%s15438_s3 + $0x4c0] sm:$0xff]  ;;  %v11451_v40 = vor.u32 %v12262_v45, %v11450_v49  ;;  %v6418_v56 = vunpack.c.l.b16 %v6385_v47  ;;  %v7341_v60 = vld [vmem:[#allocation2 + $0x154] sm:$0x1]  ;;  %v6580_v45 = vld [vmem:[#allocation2 + $0x58] sm:$0xe] }
 0x3d7   :  { %8484 = vmatpush.bf16.msra.mxu3 %v12306_v44  ;;  %v6370_v35 = vrot.slane %v6368_v23, 5  ;;  %v4872_v37 = vadd.f32 %v14449_v15, %v14565_v57  ;;  %v6583_v15 = vld [vmem:[#allocation2 + $0x64] sm:$0x1]  ;;  %v12298_v49 = vld [vmem:[%s15438_s3 + $0x490] sm:$0xff] }
 0x3d8   :  { %v7389_v23 = vrot.slane %v7387_v18, 4  ;;  %8162 = vmatpush.bf16.msra.mxu2 %v12298_v49  ;;  %v8239_v49 = vld [vmem:[#allocation2 + $0x14c] sm:$0x1] }
 0x3d9   :  { %v5376_v27 = vpop.f32.mrf.mxu2  ;;  %v6371_v21 = vsel %vm12754_vm8, %v6366_v63, %v6370_v35  ;;  %v6581_v35 = vld [vmem:[#allocation2 + $0x5c] sm:$0x1] }
 0x3da   :  { %v5410_v26 = vadd.f32 %v5376_v27, %v14511_v52  ;;  %v12305_v52 = vld [vmem:[%s15438_s3 + $0x4c8] sm:$0xff]  ;;  %v6731_v27 = vunpack.c.l.b16 %v6671_v7  ;;  %v6417_v32 = vunpack.c.l.b16 %v6371_v21  ;;  %v6682_v7 = vrot.slane %v6583_v15, 5  ;;  %v7342_v21 = vld [vmem:[#allocation2 + $0x158] sm:$0xf] }
 0x3db   :  { %v5172_v38 = vpop.f32.mrf.mxu1  ;;  %8485 = vmatpush.bf16.msra.mxu3 %v12305_v52  ;;  %v6582_v52 = vld [vmem:[#allocation2 + $0x60] sm:$0xe] }
 0x3dc   :  { %v14694_v50 = vadd.f32 %v14550_v43, %v5410_v26  ;;  %v14696_v28 = vadd.f32 %v5172_v38, %v4871_v4  ;;  %v6675_v43 = vsel %vm13586_vm11, %v11351_v62, %v6674_v51  ;;  %v7403_v62 = vrot.slane %v7401_v39, 4  ;;  %v7339_v39 = vld [vmem:[#allocation2 + $0x14c] sm:$0x1] }
 0x3dd   :  { %v14701_v9 = vpop.f32.mrf.mxu3  ;;  %v6732_v11 = vunpack.c.l.b16 %v6675_v43  ;;  %v7406_v51 = vrot.slane %v7404_v22, 5  ;;  %v7392_v26 = vrot.slane %v7390_v16, 5  ;;  %v6426_v38 = vpack.c.b16 %v6418_v56, %v6417_v32 }
 0x3de   :  { %v7396_v47 = vshll.u32 %v7339_v39, 16  ;;  %v11353_v22 = vrot.slane %v6582_v52, 9  ;;  %v7415_v32 = vshrl.u32 %v7342_v21, 16 }
 0x3df   :  { %8486 = vmatpush.bf16.msra.mxu3 %v12304_v3  ;;  %v6744_v63 = vpack.c.b16 %v6732_v11, %v6731_v27  ;;  %v7393_v57 = vor.u32 %v7392_v26, %v7389_v23  ;;  %v7344_v11 = vld [vmem:[#allocation2 + $0x160] sm:$0xf]  ;;  %v11352_v27 = vrot.slane %v6580_v45, 9  ;;  %v6678_v23 = vrot.slane %v6581_v35, 5 }
 0x3e0   :  { %v7417_v35 = vrot.slane %v7415_v32, 4 }
 0x3e1   :  { %v5378_v44 = vpop.f32.mrf.mxu2  ;;  %v7394_v56 = vrot.slane %v7393_v57, 4  ;;  %v6679_v39 = vsel %vm13586_vm11, %v11352_v27, %v6678_v23  ;;  %v8238_v57 = vld [vmem:[#allocation2 + $0x148] sm:$0xe]  ;;  %v8320_v27 = vrot.slane %v8239_v49, 5  ;;  %v7345_v23 = vld [vmem:[#allocation2 + $0x164] sm:$0x1] }
 0x3e2   :  { %v5411_v54 = vadd.f32 %v5378_v44, %v14532_v20  ;;  %7069 = vmatmul.bf16.gmra.mxu3 %v11451_v40  ;;  %v7407_v20 = vor.u32 %v7406_v51, %v7403_v62  ;;  %v4873_v40 = vadd.f32 %v14467_v24, %v14587_v58  ;;  %v6683_v24 = vsel %vm13586_vm11, %v11353_v22, %v6682_v7  ;;  %v15508_v7 = vld [vmem:[#allocation6_spill] sm:$0xff] }
 0x3e3   :  { %v5175_v4 = vpop.f32.mrf.mxu1  ;;  %v6734_v52 = vunpack.c.l.b16 %v6683_v24 }
 0x3e4   :  { %v14718_v14 = vadd.f32 %v14576_v10, %v5411_v54  ;;  %v14720_v34 = vadd.f32 %v5175_v4, %v4872_v37  ;;  %v7410_v10 = vshll.u32 %v7341_v60, 16  ;;  %v7408_v16 = vrot.slane %v7407_v20, 4  ;;  %v11454_v4 = vld [vmem:[#allocation2 + $0x1c8] sm:$0xf] }
 0x3e5   :  { %v14722_v18 = vpop.f32.mrf.mxu3  ;;  %v7398_v37 = vrot.slane %v7396_v47, 5  ;;  %v7418_v60 = vshll.u32 %v7342_v21, 16  ;;  %v6733_v21 = vunpack.c.l.b16 %v6679_v39 }
 0x3e6   :  { %6526 = vmatmul.bf16.gmra.mxu1 %v6426_v38  ;;  %6828 = vmatmul.bf16.gmra.mxu2 %v6744_v63  ;;  %v7412_v62 = vrot.slane %v7410_v10, 5  ;;  %v7429_v38 = vshrl.u32 %v7344_v11, 16  ;;  %v7432_v63 = vshll.u32 %v7344_v11, 16 }
 0x3e7   :  { %v6745_v32 = vpack.c.b16 %v6734_v52, %v6733_v21  ;;  %v6584_v52 = vld [vmem:[#allocation2 + $0x68] sm:$0xe] }
 0x3e8   :  { %v7413_v58 = vsel %vm12754_vm8, %v7408_v16, %v7412_v62  ;;  %v7431_v47 = vrot.slane %v7429_v38, 4  ;;  %v6082_v16 = vadd.f32 %v15508_v7, %v14605_v2  ;;  %v6586_v38 = vld [vmem:[#allocation2 + $0x70] sm:$0xe] }
 0x3e9   :  { %v5381_v43 = vpop.f32.mrf.mxu2  ;;  %v7628_v15 = vunpack.c.l.b16 %v7413_v58 }
 0x3ea   :  { %v5412_v3 = vadd.f32 %v5381_v43, %v14548_v48  ;;  %v12263_v48 = vld [vmem:[#allocation2 + $0x1cc] sm:$0xf0]  ;;  %v7434_v43 = vrot.slane %v7432_v63, 5  ;;  %v6587_v63 = vld [vmem:[#allocation2 + $0x74] sm:$0x1] }
 0x3eb   :  { %v5177_v44 = vpop.f32.mrf.mxu1  ;;  %v11455_v20 = vor.u32 %v12263_v48, %v11454_v4 }
 0x3ec   :  { %v14731_v51 = vadd.f32 %v14593_v12, %v5412_v3  ;;  %v14733_v54 = vadd.f32 %v5177_v44, %v4873_v40  ;;  %v7399_v12 = vsel %vm12754_vm8, %v7394_v56, %v7398_v37  ;;  %v8240_v3 = vld [vmem:[#allocation2 + $0x150] sm:$0xe]  ;;  %v8241_v40 = vld [vmem:[#allocation2 + $0x154] sm:$0x1]  ;;  %v7420_v56 = vrot.slane %v7418_v60, 5 }
 0x3ed   :  { %v14735_v26 = vpop.f32.mrf.mxu3  ;;  %v7627_v45 = vunpack.c.l.b16 %v7399_v12  ;;  %v11664_v44 = vrot.slane %v8238_v57, 9  ;;  %v11665_v24 = vrot.slane %v8240_v3, 9  ;;  %v8324_v2 = vrot.slane %v8241_v40, 5  ;;  %v7348_v57 = vld [vmem:[#allocation2 + $0x170] sm:$0xf] }
 0x3ee   :  { %v7435_v58 = vor.u32 %v7434_v43, %v7431_v47  ;;  %v7421_v12 = vor.u32 %v7420_v56, %v7417_v35  ;;  %v7438_v60 = vshll.u32 %v7345_v23, 16  ;;  %v6690_v47 = vrot.slane %v6587_v63, 5  ;;  %v7346_v3 = vld [vmem:[#allocation2 + $0x168] sm:$0xf]  ;;  %v8242_v63 = vld [vmem:[#allocation2 + $0x158] sm:$0xe] }
 0x3ef   :  { %v7643_v4 = vpack.c.b16 %v7628_v15, %v7627_v45  ;;  %v6585_v15 = vld [vmem:[#allocation2 + $0x6c] sm:$0x1]  ;;  %v11355_v45 = vrot.slane %v6586_v38, 9  ;;  %v11354_v56 = vrot.slane %v6584_v52, 9 }
 0x3f0   :  { %v7436_v35 = vrot.slane %v7435_v58, 4  ;;  %v7440_v21 = vrot.slane %v7438_v60, 5 }
 0x3f1   :  { %v5383_v10 = vpop.f32.mrf.mxu2 }
 0x3f2   :  { %v5413_v22 = vadd.f32 %v5383_v10, %v14569_v0  ;;  %7074 = vmatmul.bf16.gmra.mxu3 %v11455_v20  ;;  %v7343_v0 = vld [vmem:[#allocation2 + $0x15c] sm:$0x1]  ;;  %v8321_v20 = vsel %vm13586_vm11, %v11664_v44, %v8320_v27  ;;  %v8325_v10 = vsel %vm13586_vm11, %v11665_v24, %v8324_v2  ;;  %v7457_v44 = vshrl.u32 %v7348_v57, 16 }
 0x3f3   :  { %v6492_v11 = vpop.f32.mrf.mxu1  ;;  %v7424_v39 = vshll.u32 %v7343_v0, 16  ;;  %v7460_v27 = vshll.u32 %v7348_v57, 16  ;;  %v7443_v2 = vshrl.u32 %v7346_v3, 16  ;;  %v8399_v58 = vunpack.c.l.b16 %v8321_v20 }
 0x3f4   :  { %v14749_v62 = vadd.f32 %v14614_v53, %v5413_v22  ;;  %v14751_v37 = vadd.f32 %v6492_v11, %v6082_v16  ;;  %v12297_v53 = vld [vmem:[%s15438_s3 + $0x488] sm:$0xff]  ;;  %v15509_v22 = vld [vmem:[#allocation7_spill] sm:$0xff]  ;;  %v7422_v16 = vrot.slane %v7421_v12, 4  ;;  %v6686_v11 = vrot.slane %v6585_v15, 5 }
 0x3f5   :  { %v14753_v48 = vpop.f32.mrf.mxu3  ;;  %8163 = vmatpush.bf16.msra.mxu2 %v12297_v53  ;;  %v6083_v7 = vadd.f32 %v15509_v22, %v14626_v8  ;;  %v7426_v0 = vrot.slane %v7424_v39, 5  ;;  %v7441_v8 = vsel %vm12754_vm8, %v7436_v35, %v7440_v21  ;;  %v7446_v12 = vshll.u32 %v7346_v3, 16 }
 0x3f6   :  { %6833 = vmatmul.bf16.gmra.mxu2 %v6745_v32  ;;  %7715 = vmatmul.bf16.vlgmr.msra.gmra.mxu1 %v7643_v4  ;;  %v8400_v4 = vunpack.c.l.b16 %v8325_v10  ;;  %v6687_v60 = vsel %vm13586_vm11, %v11354_v56, %v6686_v11  ;;  %v7459_v53 = vrot.slane %v7457_v44, 4  ;;  %v7462_v39 = vrot.slane %v7460_v27, 5  ;;  %v8245_v10 = vld [vmem:[#allocation2 + $0x164] sm:$0x1] }
 0x3f7   :  { %v7427_v38 = vsel %vm12754_vm8, %v7422_v16, %v7426_v0  ;;  %v7630_v57 = vunpack.c.l.b16 %v7441_v8  ;;  %v11666_v20 = vrot.slane %v8242_v63, 9  ;;  %v7445_v22 = vrot.slane %v7443_v2, 4  ;;  %v15510_v16 = vld [vmem:[#allocation8_spill] sm:$0xff] }
 0x3f8   :  { %v8415_v52 = vpack.c.b16 %v8400_v4, %v8399_v58  ;;  %v7629_v35 = vunpack.c.l.b16 %v7427_v38  ;;  %v6084_v21 = vadd.f32 %v15510_v16, %v14648_v61  ;;  %v6735_v3 = vunpack.c.l.b16 %v6687_v60  ;;  %v7347_v58 = vld [vmem:[#allocation2 + $0x16c] sm:$0x1]  ;;  %v7350_v38 = vld [vmem:[#allocation2 + $0x178] sm:$0xf]  ;;  %v7352_v63 = vld [vmem:[#allocation2 + $0x180] sm:$0xf] }
 0x3f9   :  { %v5386_v49 = vpop.f32.mrf.mxu2  ;;  %v8332_v44 = vrot.slane %v8245_v10, 5  ;;  %v7463_v27 = vor.u32 %v7462_v39, %v7459_v53  ;;  %v6590_v61 = vld [vmem:[#allocation2 + $0x80] sm:$0xe]  ;;  %v7452_v53 = vshll.u32 %v7347_v58, 16  ;;  %v7471_v10 = vshrl.u32 %v7350_v38, 16 }
 0x3fa   :  { %v5414_v43 = vadd.f32 %v5386_v49, %v14591_v17  ;;  %v6691_v17 = vsel %vm13586_vm11, %v11355_v45, %v6690_v47  ;;  %v8244_v49 = vld [vmem:[#allocation2 + $0x160] sm:$0xe]  ;;  %v7349_v45 = vld [vmem:[#allocation2 + $0x174] sm:$0x1]  ;;  %v7644_v2 = vpack.c.b16 %v7630_v57, %v7629_v35  ;;  %v6588_v57 = vld [vmem:[#allocation2 + $0x78] sm:$0xe] }
 0x3fb   :  { %v6494_v40 = vpop.f32.mrf.mxu1  ;;  %v6736_v15 = vunpack.c.l.b16 %v6691_v17  ;;  %v11667_v11 = vrot.slane %v8244_v49, 9  ;;  %v7466_v4 = vshll.u32 %v7349_v45, 16  ;;  %v12296_v60 = vld [vmem:[%s15438_s3 + $0x480] sm:$0xff]  ;;  %v7464_v39 = vrot.slane %v7463_v27, 4  ;;  %v6589_v49 = vld [vmem:[#allocation2 + $0x7c] sm:$0x1] }
 0x3fc   :  { %v14766_v23 = vadd.f32 %v14633_v55, %v5414_v43  ;;  %v14768_v32 = vadd.f32 %v6494_v40, %v6083_v7  ;;  %v8243_v55 = vld [vmem:[#allocation2 + $0x15c] sm:$0x1]  ;;  %v7448_v40 = vrot.slane %v7446_v12, 5  ;;  %v7474_v45 = vshll.u32 %v7350_v38, 16  ;;  %8164 = vmatpush.bf16.msra.mxu2 %v12296_v60 }
 0x3fd   :  { %v14770_v24 = vpop.f32.mrf.mxu3  ;;  %v8328_v43 = vrot.slane %v8243_v55, 5  ;;  %v6746_v8 = vpack.c.b16 %v6736_v15, %v6735_v3  ;;  %v6591_v55 = vld [vmem:[#allocation2 + $0x84] sm:$0x1]  ;;  %v11357_v35 = vrot.slane %v6590_v61, 9  ;;  %v7488_v16 = vshll.u32 %v7352_v63, 16  ;;  %v15511_v3 = vld [vmem:[#allocation9_spill] sm:$0xff] }
 0x3fe   :  { %v7449_v12 = vor.u32 %v7448_v40, %v7445_v22  ;;  %v6698_v22 = vrot.slane %v6591_v55, 5  ;;  %v6085_v40 = vadd.f32 %v15511_v3, %v14672_v1  ;;  %v7473_v61 = vrot.slane %v7471_v10, 4 }
 0x3ff   :  { %v8329_v15 = vsel %vm13586_vm11, %v11666_v20, %v8328_v43  ;;  %v11356_v20 = vrot.slane %v6588_v57, 9  ;;  %v6694_v43 = vrot.slane %v6589_v49, 5  ;;  %v7476_v1 = vrot.slane %v7474_v45, 5  ;;  %v7351_v57 = vld [vmem:[#allocation2 + $0x17c] sm:$0x1] }
 0x401   :  { %v5388_v47 = vpop.f32.mrf.mxu2  ;;  %v6695_v49 = vsel %vm13586_vm11, %v11356_v20, %v6694_v43  ;;  %v7788_v20 = vld [vmem:[#allocation2 + $0x1e8] sm:$0xf]  ;;  %v7790_v43 = vld [vmem:[#allocation2 + $0x1f0] sm:$0xf] }
 0x402   :  { %v5415_v7 = vadd.f32 %v5388_v47, %v14607_v29  ;;  %8487 = vmatmul.bf16.vlgmr.msra.gmra.mxu3 %v8415_v52  ;;  %v7468_v52 = vrot.slane %v7466_v4, 5  ;;  %v7454_v4 = vrot.slane %v7452_v53, 5  ;;  %v8401_v53 = vunpack.c.l.b16 %v8329_v15 }
 0x403   :  { %v6497_v56 = vpop.f32.mrf.mxu1 }
 0x404   :  { %v14784_v0 = vadd.f32 %v14657_v36, %v5415_v7  ;;  %v14786_v17 = vadd.f32 %v6497_v56, %v6084_v21  ;;  %v8333_v36 = vsel %vm13586_vm11, %v11667_v11, %v8332_v44  ;;  %v7485_v7 = vshrl.u32 %v7352_v63, 16  ;;  %v8246_v44 = vld [vmem:[#allocation2 + $0x168] sm:$0xe]  ;;  %v8249_v63 = vld [vmem:[#allocation2 + $0x174] sm:$0x1] }
 0x405   :  { %v14788_v29 = vpop.f32.mrf.mxu3  ;;  %v8402_v56 = vunpack.c.l.b16 %v8333_v36  ;;  %v7450_v11 = vrot.slane %v7449_v12, 4  ;;  %v6699_v12 = vsel %vm13586_vm11, %v11357_v35, %v6698_v22  ;;  %v7490_v36 = vrot.slane %v7488_v16, 5 }
 0x406   :  { %6838 = vmatmul.bf16.gmra.mxu2 %v6746_v8  ;;  %7720 = vmatmul.bf16.gmra.mxu1 %v7644_v2  ;;  %v7469_v8 = vsel %vm12754_vm8, %v7464_v39, %v7468_v52  ;;  %v8247_v2 = vld [vmem:[#allocation2 + $0x16c] sm:$0x1]  ;;  %v7487_v60 = vrot.slane %v7485_v7, 4  ;;  %v11668_v52 = vrot.slane %v8246_v44, 9  ;;  %v8340_v45 = vrot.slane %v8249_v63, 5 }
 0x407   :  { %v7455_v39 = vsel %vm12754_vm8, %v7450_v11, %v7454_v4  ;;  %v8416_v3 = vpack.c.b16 %v8402_v56, %v8401_v53  ;;  %v7480_v7 = vshll.u32 %v7351_v57, 16  ;;  %v15512_v11 = vld [vmem:[#allocation10_spill] sm:$0xff]  ;;  %v6737_v4 = vunpack.c.l.b16 %v6695_v49 }
 0x408   :  { %v7631_v22 = vunpack.c.l.b16 %v7455_v39  ;;  %v7491_v15 = vor.u32 %v7490_v36, %v7487_v60  ;;  %v6086_v44 = vadd.f32 %v15512_v11, %v14694_v50  ;;  %v6595_v50 = vld [vmem:[#allocation2 + $0x94] sm:$0x1]  ;;  %v7837_v39 = vshrl.u32 %v7788_v20, 16  ;;  %v7356_v11 = vld [vmem:[#allocation2 + $0x1a0] sm:$0xf] }
 0x409   :  { %v5391_v47 = vpop.f32.mrf.mxu2  ;;  %v7840_v57 = vshll.u32 %v7788_v20, 16  ;;  %v7851_v49 = vshrl.u32 %v7790_v43, 16 }
 0x40a   :  { %v5416_v21 = vadd.f32 %v5391_v47, %v14628_v30  ;;  %v8248_v30 = vld [vmem:[#allocation2 + $0x170] sm:$0xe]  ;;  %v7632_v47 = vunpack.c.l.b16 %v7469_v8  ;;  %v7492_v53 = vrot.slane %v7491_v15, 4  ;;  %v7354_v15 = vld [vmem:[#allocation2 + $0x198] sm:$0xf] }
 0x40b   :  { %v6499_v27 = vpop.f32.mrf.mxu1  ;;  %v11669_v10 = vrot.slane %v8248_v30, 9 }
 0x40c   :  { %v14803_v58 = vadd.f32 %v14679_v42, %v5416_v21  ;;  %v14805_v38 = vadd.f32 %v6499_v27, %v6085_v40  ;;  %v8336_v42 = vrot.slane %v8247_v2, 5  ;;  %v7353_v21 = vld [vmem:[#allocation2 + $0x184] sm:$0x1]  ;;  %v6738_v40 = vunpack.c.l.b16 %v6699_v12  ;;  %v6594_v12 = vld [vmem:[#allocation2 + $0x90] sm:$0xe] }
 0x40d   :  { %v14807_v55 = vpop.f32.mrf.mxu3  ;;  %v7477_v27 = vor.u32 %v7476_v1, %v7473_v61  ;;  %v7494_v2 = vshll.u32 %v7353_v21, 16  ;;  %v7645_v30 = vpack.c.b16 %v7632_v47, %v7631_v22  ;;  %v8341_v63 = vsel %vm13586_vm11, %v11669_v10, %v8340_v45 }
 0x40e   :  { %v8337_v56 = vsel %vm13586_vm11, %v11668_v52, %v8336_v42  ;;  %v6747_v1 = vpack.c.b16 %v6738_v40, %v6737_v4  ;;  %v6592_v52 = vld [vmem:[#allocation2 + $0x88] sm:$0xe]  ;;  %v7482_v42 = vrot.slane %v7480_v7, 5  ;;  %v7854_v10 = vshll.u32 %v7790_v43, 16  ;;  %v12359_v40 = vld [vmem:[%s15438_s3 + $0x5f8] sm:$0xff] }
 0x40f   :  { %v7478_v60 = vrot.slane %v7477_v27, 4  ;;  %v7496_v47 = vrot.slane %v7494_v2, 5  ;;  %v11359_v45 = vrot.slane %v6594_v12, 9  ;;  %v6706_v21 = vrot.slane %v6595_v50, 5  ;;  %9833 = vmatpush.bf16.msrb.mxu3 %v12359_v40  ;;  %v15513_v43 = vld [vmem:[#allocation11_spill] sm:$0xff] }
 0x410   :  { %v8403_v27 = vunpack.c.l.b16 %v8337_v56  ;;  %v7842_v4 = vrot.slane %v7840_v57, 5  ;;  %v7853_v2 = vrot.slane %v7851_v49, 4  ;;  %v7856_v57 = vrot.slane %v7854_v10, 5 }
 0x411   :  { %v5393_v35 = vpop.f32.mrf.mxu2  ;;  %v7483_v22 = vsel %vm12754_vm8, %v7478_v60, %v7482_v42  ;;  %v6707_v50 = vsel %vm13586_vm11, %v11359_v45, %v6706_v21  ;;  %v8251_v60 = vld [vmem:[#allocation2 + $0x17c] sm:$0x1] }
 0x412   :  { %v5417_v16 = vadd.f32 %v5393_v35, %v14650_v13  ;;  %8492 = vmatmul.bf16.gmra.mxu3 %v8416_v3  ;;  %v12351_v3 = vld [vmem:[%s15438_s3 + $0x5b8] sm:$0xff]  ;;  %v8404_v35 = vunpack.c.l.b16 %v8341_v63  ;;  %v7857_v5 = vor.u32 %v7856_v57, %v7853_v2 }
 0x413   :  { %v6502_v8 = vpop.f32.mrf.mxu1  ;;  %9383 = vmatpush.bf16.msrb.mxu2 %v12351_v3  ;;  %v8250_v63 = vld [vmem:[#allocation2 + $0x178] sm:$0xe] }
 0x414   :  { %v14823_v61 = vadd.f32 %v14701_v9, %v5417_v16  ;;  %v14825_v13 = vadd.f32 %v6502_v8, %v6086_v44  ;;  %v6593_v9 = vld [vmem:[#allocation2 + $0x8c] sm:$0x1]  ;;  %v7497_v16 = vsel %vm12754_vm8, %v7492_v53, %v7496_v47  ;;  %v7839_v44 = vrot.slane %v7837_v39, 4 }
 0x415   :  { %v14827_v36 = vpop.f32.mrf.mxu3  ;;  %v6087_v8 = vadd.f32 %v15513_v43, %v14718_v14  ;;  %v6702_v56 = vrot.slane %v6593_v9, 5  ;;  %v7499_v53 = vshrl.u32 %v7354_v15, 16  ;;  %v7502_v39 = vshll.u32 %v7354_v15, 16 }
 0x416   :  { %6843 = vmatmul.bf16.gmra.mxu2 %v6747_v1  ;;  %7725 = vmatmul.bf16.gmra.mxu1 %v7645_v30  ;;  %v11358_v30 = vrot.slane %v6592_v52, 9  ;;  %v7789_v1 = vld [vmem:[#allocation2 + $0x1ec] sm:$0x1]  ;;  %v7513_v47 = vshrl.u32 %v7356_v11, 16  ;;  %v7516_v14 = vshll.u32 %v7356_v11, 16  ;;  %v12343_v52 = vld [vmem:[%s15438_s3 + $0x578] sm:$0xff]  ;;  %v8417_v3 = vpack.c.b16 %v8404_v35, %v8403_v27 }
 0x417   :  { %v11670_v45 = vrot.slane %v8250_v63, 9  ;;  %v7846_v21 = vshll.u32 %v7789_v1, 16  ;;  %v7634_v40 = vunpack.c.l.b16 %v7497_v16  ;;  %v8344_v15 = vrot.slane %v8251_v60, 5  ;;  %8933 = vmatpush.bf16.msrb.mxu1 %v12343_v52 }
 0x418   :  { %v6703_v10 = vsel %vm13586_vm11, %v11358_v30, %v6702_v56  ;;  %v6740_v43 = vunpack.c.l.b16 %v6707_v50  ;;  %v7633_v11 = vunpack.c.l.b16 %v7483_v22  ;;  %v7501_v59 = vrot.slane %v7499_v53, 4 }
 0x419   :  { %v5396_v7 = vpop.f32.mrf.mxu2  ;;  %v7504_v33 = vrot.slane %v7502_v39, 5  ;;  %v7515_v27 = vrot.slane %v7513_v47, 4  ;;  %v7518_v35 = vrot.slane %v7516_v14, 5  ;;  %v6739_v1 = vunpack.c.l.b16 %v6703_v10 }
 0x41a   :  { %v5418_v20 = vadd.f32 %v5396_v7, %v14674_v31  ;;  %v8252_v31 = vld [vmem:[#allocation2 + $0x180] sm:$0xe]  ;;  %v7791_v7 = vld [vmem:[#allocation2 + $0x1f4] sm:$0x1]  ;;  %v7848_v30 = vrot.slane %v7846_v21, 5  ;;  %v7646_v22 = vpack.c.b16 %v7634_v40, %v7633_v11  ;;  %v7522_v53 = vshll.u32 %v7357_v6, 16 }
 0x41b   :  { %v6504_v12 = vpop.f32.mrf.mxu1  ;;  %v7860_v16 = vshll.u32 %v7791_v7, 16  ;;  %v6748_v2 = vpack.c.b16 %v6740_v43, %v6739_v1  ;;  %v7858_v39 = vrot.slane %v7857_v5, 4  ;;  %v7505_v52 = vor.u32 %v7504_v33, %v7501_v59  ;;  %v12350_v7 = vld [vmem:[%s15438_s3 + $0x5b0] sm:$0xff] }
 0x41c   :  { %v14845_v49 = vadd.f32 %v14722_v18, %v5418_v20  ;;  %v14847_v42 = vadd.f32 %v6504_v12, %v6087_v8  ;;  %v8253_v18 = vld [vmem:[#allocation2 + $0x184] sm:$0x1]  ;;  %v7843_v20 = vor.u32 %v7842_v4, %v7839_v44  ;;  %v11671_v8 = vrot.slane %v8252_v31, 9  ;;  %v7355_v12 = vld [vmem:[#allocation2 + $0x19c] sm:$0x1]  ;;  %v15514_v44 = vld [vmem:[#allocation13_spill] sm:$0xff]  ;;  %9384 = vmatpush.bf16.msrb.mxu2 %v12350_v7 }
 0x41d   :  { %v14852_v9 = vpop.f32.mrf.mxu3  ;;  %v8348_v46 = vrot.slane %v8253_v18, 5  ;;  %v6088_v4 = vadd.f32 %v15514_v44, %v14731_v51  ;;  %v7508_v57 = vshll.u32 %v7355_v12, 16  ;;  %v7792_v31 = vld [vmem:[#allocation2 + $0x1f8] sm:$0xf]  ;;  %v7519_v21 = vor.u32 %v7518_v35, %v7515_v27 }
 0x41e   :  { %v7844_v50 = vrot.slane %v7843_v20, 4  ;;  %v7862_v10 = vrot.slane %v7860_v16, 5  ;;  %v8345_v51 = vsel %vm13586_vm11, %v11670_v45, %v8344_v15  ;;  %v7868_v59 = vshll.u32 %v7792_v31, 16  ;;  %v12358_v45 = vld [vmem:[%s15438_s3 + $0x5f0] sm:$0xff]  ;;  %v15515_v35 = vld [vmem:[#allocation15_spill] sm:$0xff] }
 0x41f   :  { %v8349_v6 = vsel %vm13586_vm11, %v11671_v8, %v8348_v46  ;;  %v7506_v15 = vrot.slane %v7505_v52, 4  ;;  %v7510_v46 = vrot.slane %v7508_v57, 5  ;;  %v7520_v20 = vrot.slane %v7519_v21, 4  ;;  %9834 = vmatpush.bf16.msrb.mxu3 %v12358_v45  ;;  %v7358_v16 = vld [vmem:[#allocation2 + $0x1a8] sm:$0xf] }
 0x420   :  { %v7849_v5 = vsel %vm12754_vm8, %v7844_v50, %v7848_v30  ;;  %v7863_v33 = vsel %vm12754_vm8, %v7858_v39, %v7862_v10  ;;  %v7524_v43 = vrot.slane %v7522_v53, 5  ;;  %v8405_v8 = vunpack.c.l.b16 %v8345_v51  ;;  %v7795_v39 = vld [vmem:[#allocation2 + $0x204] sm:$0x1]  ;;  %v7796_v52 = vld [vmem:[#allocation2 + $0x208] sm:$0xf] }
 0x421   :  { %v5398_v63 = vpop.f32.mrf.mxu2  ;;  %v8406_v12 = vunpack.c.l.b16 %v8349_v6  ;;  %v14883_v1 = vunpack.c.l.b16 %v7849_v5  ;;  %v14885_v30 = vunpack.c.l.b16 %v7863_v33  ;;  %v7870_v50 = vrot.slane %v7868_v59, 5  ;;  %v7798_v59 = vld [vmem:[#allocation2 + $0x210] sm:$0xf]  ;;  %v8254_v45 = vld [vmem:[#allocation2 + $0x198] sm:$0xe] }
 0x422   :  { %v5419_v56 = vadd.f32 %v5398_v63, %v14696_v28  ;;  %8497 = vmatmul.bf16.gmra.mxu3 %v8417_v3  ;;  %v7794_v28 = vld [vmem:[#allocation2 + $0x200] sm:$0xf]  ;;  %v6089_v63 = vadd.f32 %v15515_v35, %v14749_v62  ;;  %v7511_v62 = vsel %vm12754_vm8, %v7506_v15, %v7510_v46  ;;  %v7525_v53 = vsel %vm12754_vm8, %v7520_v20, %v7524_v43  ;;  %v8255_v15 = vld [vmem:[#allocation2 + $0x19c] sm:$0x1] }
 0x423   :  { %v6507_v60 = vpop.f32.mrf.mxu1  ;;  %v7879_v40 = vshrl.u32 %v7794_v28, 16  ;;  %v7882_v18 = vshll.u32 %v7794_v28, 16  ;;  %v7527_v28 = vshrl.u32 %v7358_v16, 16  ;;  %v7530_v10 = vshll.u32 %v7358_v16, 16  ;;  %v8256_v46 = vld [vmem:[#allocation2 + $0x1a0] sm:$0xe] }
 0x424   :  { %v14860_v47 = vadd.f32 %v14735_v26, %v5419_v56  ;;  %v14862_v14 = vadd.f32 %v6507_v60, %v6088_v4  ;;  %v7865_v26 = vshrl.u32 %v7792_v31, 16  ;;  %v7360_v56 = vld [vmem:[#allocation2 + $0x1b0] sm:$0xf]  ;;  %v14887_v4 = vld [vmem:[#allocation2 + $0x1fc] sm:$0x1]  ;;  %v8418_v6 = vpack.c.b16 %v8406_v12, %v8405_v8 }
 0x425   :  { %v14864_v3 = vpop.f32.mrf.mxu3  ;;  %v7881_v60 = vrot.slane %v7879_v40, 4  ;;  %v12342_v31 = vld [vmem:[%s15438_s3 + $0x570] sm:$0xff]  ;;  %v7544_v51 = vshll.u32 %v7360_v56, 16  ;;  %v8093_v5 = vpack.c.b16 %v14885_v30, %v14883_v1  ;;  %v7888_v33 = vshll.u32 %v7795_v39, 16  ;;  %v15516_v30 = vld [vmem:[#allocation17_spill] sm:$0xff] }
 0x426   :  { %6848 = vmatmul.bf16.gmra.mxu2 %v6748_v2  ;;  %7730 = vmatmul.bf16.gmra.mxu1 %v7646_v22  ;;  %v7867_v22 = vrot.slane %v7865_v26, 4  ;;  %v7884_v2 = vrot.slane %v7882_v18, 5  ;;  %v7874_v26 = vshll.u32 %v14887_v4, 16  ;;  %v7893_v40 = vshrl.u32 %v7796_v52, 16 }
 0x427   :  { %8934 = vmatpush.bf16.msrb.mxu1 %v12342_v31  ;;  %v7635_v18 = vunpack.c.l.b16 %v7511_v62  ;;  %v7636_v7 = vunpack.c.l.b16 %v7525_v53  ;;  %v7529_v35 = vrot.slane %v7527_v28, 4  ;;  %v7532_v8 = vrot.slane %v7530_v10, 5 }
 0x428   :  { %v7871_v20 = vor.u32 %v7870_v50, %v7867_v22  ;;  %v7885_v43 = vor.u32 %v7884_v2, %v7881_v60  ;;  %v6090_v16 = vadd.f32 %v15516_v30, %v14766_v23  ;;  %v7896_v4 = vshll.u32 %v7796_v52, 16 }
 0x429   :  { %v5401_v11 = vpop.f32.mrf.mxu2  ;;  %v7907_v62 = vshrl.u32 %v7798_v59, 16  ;;  %v11672_v39 = vrot.slane %v8254_v45, 9  ;;  %v8352_v22 = vrot.slane %v8255_v15, 5  ;;  %v11673_v50 = vrot.slane %v8256_v46, 9 }
 0x42a   :  { %v5420_v27 = vadd.f32 %v5401_v11, %v14720_v34  ;;  %v7910_v60 = vshll.u32 %v7798_v59, 16  ;;  %v7647_v28 = vpack.c.b16 %v7636_v7, %v7635_v18  ;;  %v7872_v52 = vrot.slane %v7871_v20, 4  ;;  %v12349_v59 = vld [vmem:[%s15438_s3 + $0x5a8] sm:$0xff]  ;;  %v7362_v20 = vld [vmem:[#allocation2 + $0x1b8] sm:$0xf] }
 0x42b   :  { %v6509_v44 = vpop.f32.mrf.mxu1  ;;  %v7886_v45 = vrot.slane %v7885_v43, 4  ;;  %v7876_v18 = vrot.slane %v7874_v26, 5  ;;  %v7890_v7 = vrot.slane %v7888_v33, 5  ;;  %v7895_v15 = vrot.slane %v7893_v40, 4  ;;  %v7364_v43 = vld [vmem:[#allocation2 + $0x1c0] sm:$0xf]  ;;  %9385 = vmatpush.bf16.msrb.mxu2 %v12349_v59 }
 0x42c   :  { %v14890_v57 = vadd.f32 %v14753_v48, %v5420_v27  ;;  %v14892_v34 = vadd.f32 %v6509_v44, %v6089_v63  ;;  %v7541_v48 = vshrl.u32 %v7360_v56, 16  ;;  %v8257_v27 = vld [vmem:[#allocation2 + $0x1a4] sm:$0x1]  ;;  %v7546_v63 = vrot.slane %v7544_v51, 5  ;;  %v7359_v56 = vld [vmem:[#allocation2 + $0x1ac] sm:$0x1] }
 0x42d   :  { %v14901_v21 = vpop.f32.mrf.mxu3  ;;  %v7361_v44 = vld [vmem:[#allocation2 + $0x1b4] sm:$0x1]  ;;  %v7536_v23 = vshll.u32 %v7359_v56, 16  ;;  %v7898_v46 = vrot.slane %v7896_v4, 5  ;;  %v15517_v40 = vld [vmem:[#allocation19_spill] sm:$0xff]  ;;  %v7891_v56 = vsel %vm12754_vm8, %v7886_v45, %v7890_v7  ;;  %v7555_v4 = vshrl.u32 %v7362_v20, 16 }
 0x42e   :  { %v7543_v12 = vrot.slane %v7541_v48, 4  ;;  %v7533_v48 = vor.u32 %v7532_v8, %v7529_v35  ;;  %v7912_v35 = vrot.slane %v7910_v60, 5  ;;  %v6091_v30 = vadd.f32 %v15517_v40, %v14784_v0  ;;  %v12341_v0 = vld [vmem:[%s15438_s3 + $0x568] sm:$0xff] }
 0x42f   :  { %v7797_v45 = vld [vmem:[#allocation2 + $0x20c] sm:$0x1]  ;;  %8935 = vmatpush.bf16.msrb.mxu1 %v12341_v0  ;;  %v7557_v59 = vrot.slane %v7555_v4, 4 }
 0x430   :  { %v7547_v51 = vor.u32 %v7546_v63, %v7543_v12  ;;  %v7534_v12 = vrot.slane %v7533_v48, 4  ;;  %v7538_v63 = vrot.slane %v7536_v23, 5  ;;  %v7799_v23 = vld [vmem:[#allocation2 + $0x214] sm:$0x1] }
 0x431   :  { %v5403_v11 = vpop.f32.mrf.mxu2 }
 0x432   :  { %v5421_v1 = vadd.f32 %v5403_v11, %v14733_v54  ;;  %8502 = vmatmul.bf16.gmra.mxu3 %v8418_v6  ;;  %v8356_v54 = vrot.slane %v8257_v27, 5  ;;  %v7550_v6 = vshll.u32 %v7361_v44, 16  ;;  %v8353_v11 = vsel %vm13586_vm11, %v11672_v39, %v8352_v22 }
 0x433   :  { %v6512_v53 = vpop.f32.mrf.mxu1  ;;  %v7909_v27 = vrot.slane %v7907_v62, 4  ;;  %v7558_v62 = vshll.u32 %v7362_v20, 16  ;;  %v7572_v39 = vshll.u32 %v7364_v43, 16 }
 0x434   :  { %v14910_v2 = vadd.f32 %v14770_v24, %v5421_v1  ;;  %v14912_v31 = vadd.f32 %v6512_v53, %v6090_v16  ;;  %v12357_v24 = vld [vmem:[%s15438_s3 + $0x5e8] sm:$0xff]  ;;  %v7548_v1 = vrot.slane %v7547_v51, 4  ;;  %v7552_v26 = vrot.slane %v7550_v6, 5 }
 0x435   :  { %v14914_v10 = vpop.f32.mrf.mxu3  ;;  %9835 = vmatpush.bf16.msrb.mxu3 %v12357_v24  ;;  %v7877_v16 = vsel %vm12754_vm8, %v7872_v52, %v7876_v18  ;;  %v7569_v53 = vshrl.u32 %v7364_v43, 16  ;;  %v7899_v51 = vor.u32 %v7898_v46, %v7895_v15  ;;  %v8080_v52 = vunpack.c.l.b16 %v7891_v56  ;;  %v7363_v43 = vld [vmem:[#allocation2 + $0x1bc] sm:$0x1]  ;;  %v8261_v56 = vld [vmem:[#allocation2 + $0x1b4] sm:$0x1] }
 0x436   :  { %7735 = vmatmul.bf16.gmra.mxu1 %v7647_v28  ;;  %8165 = vmatmul.bf16.vlgmr.msra.gmra.mxu2 %v8093_v5  ;;  %v8357_v5 = vsel %vm13586_vm11, %v11673_v50, %v8356_v54  ;;  %v7539_v54 = vsel %vm12754_vm8, %v7534_v12, %v7538_v63  ;;  %v7553_v48 = vsel %vm12754_vm8, %v7548_v1, %v7552_v26  ;;  %v8079_v6 = vunpack.c.l.b16 %v7877_v16  ;;  %v8260_v16 = vld [vmem:[#allocation2 + $0x1b0] sm:$0xe] }
 0x437   :  { %v8408_v60 = vunpack.c.l.b16 %v8357_v5  ;;  %v7560_v24 = vrot.slane %v7558_v62, 5  ;;  %v7571_v18 = vrot.slane %v7569_v53, 4  ;;  %v7574_v7 = vrot.slane %v7572_v39, 5 }
 0x438   :  { %v7637_v5 = vunpack.c.l.b16 %v7539_v54  ;;  %v7638_v20 = vunpack.c.l.b16 %v7553_v48  ;;  %v7916_v12 = vshll.u32 %v7799_v23, 16  ;;  %v14947_v1 = vrot.slane %v7899_v51, 4 }
 0x439   :  { %v6814_v8 = vpop.f32.mrf.mxu2  ;;  %v7902_v15 = vshll.u32 %v7797_v45, 16  ;;  %v8094_v40 = vpack.c.b16 %v8080_v52, %v8079_v6  ;;  %v7561_v4 = vor.u32 %v7560_v24, %v7557_v59  ;;  %v7564_v62 = vshll.u32 %v7363_v43, 16  ;;  %v7800_v52 = vld [vmem:[#allocation2 + $0x218] sm:$0xf]  ;;  %v12348_v45 = vld [vmem:[%s15438_s3 + $0x5a0] sm:$0xff] }
 0x43a   :  { %v6854_v33 = vadd.f32 %v6814_v8, %v14751_v37  ;;  %v8407_v37 = vunpack.c.l.b16 %v8353_v11  ;;  %v7365_v8 = vld [vmem:[#allocation2 + $0x1c4] sm:$0x1]  ;;  %v7575_v53 = vor.u32 %v7574_v7, %v7571_v18  ;;  %v7648_v0 = vpack.c.b16 %v7638_v20, %v7637_v5  ;;  %v12339_v5 = vld [vmem:[%s15438_s3 + $0x558] sm:$0xff]  ;;  %v7802_v20 = vld [vmem:[#allocation2 + $0x220] sm:$0xf]  ;;  %9386 = vmatpush.bf16.msrb.mxu2 %v12348_v45 }
 0x43b   :  { %v6514_v44 = vpop.f32.mrf.mxu1  ;;  %v7578_v39 = vshll.u32 %v7365_v8, 16  ;;  %v11675_v51 = vrot.slane %v8260_v16, 9  ;;  %v7904_v6 = vrot.slane %v7902_v15, 5  ;;  %v12356_v59 = vld [vmem:[%s15438_s3 + $0x5e0] sm:$0xff]  ;;  %v7562_v24 = vrot.slane %v7561_v4, 4 }
 0x43c   :  { %v14934_v22 = vadd.f32 %v14788_v29, %v6854_v33  ;;  %v14936_v50 = vadd.f32 %v6514_v44, %v6091_v30  ;;  %v7913_v29 = vor.u32 %v7912_v35, %v7909_v27  ;;  %v8419_v11 = vpack.c.b16 %v8408_v60, %v8407_v37  ;;  %v8258_v33 = vld [vmem:[#allocation2 + $0x1a8] sm:$0xe]  ;;  %v8259_v30 = vld [vmem:[#allocation2 + $0x1ac] sm:$0x1]  ;;  %9836 = vmatpush.bf16.msrb.mxu3 %v12356_v59 }
 0x43d   :  { %v14941_v28 = vpop.f32.mrf.mxu3  ;;  %v15518_v35 = vld [vmem:[#allocation21_spill] sm:$0xff]  ;;  %v11674_v48 = vrot.slane %v8258_v33, 9  ;;  %v8360_v23 = vrot.slane %v8259_v30, 5  ;;  %v7566_v18 = vrot.slane %v7564_v62, 5  ;;  %v7576_v7 = vrot.slane %v7575_v53, 4 }
 0x43e   :  { %v7914_v46 = vrot.slane %v7913_v29, 4  ;;  %v6092_v26 = vadd.f32 %v15518_v35, %v14803_v58  ;;  %v12340_v58 = vld [vmem:[%s15438_s3 + $0x560] sm:$0xff]  ;;  %v8364_v29 = vrot.slane %v8261_v56, 5  ;;  %v7921_v33 = vshrl.u32 %v7800_v52, 16 }
 0x43f   :  { %8936 = vmatpush.bf16.msrb.mxu1 %v12340_v58  ;;  %v8361_v8 = vsel %vm13586_vm11, %v11674_v48, %v8360_v23  ;;  %v7924_v30 = vshll.u32 %v7800_v52, 16  ;;  %v7567_v56 = vsel %vm12754_vm8, %v7562_v24, %v7566_v18  ;;  %v7935_v4 = vshrl.u32 %v7802_v20, 16  ;;  %v12337_v24 = vld [vmem:[%s15438_s3 + $0x548] sm:$0xff] }
 0x441   :  { %v6816_v63 = vpop.f32.mrf.mxu2  ;;  %v7937_v45 = vrot.slane %v7935_v4, 4 }
 0x442   :  { %v6855_v27 = vadd.f32 %v6816_v63, %v14768_v32  ;;  %8507 = vmatmul.bf16.gmra.mxu3 %v8419_v11  ;;  %v7918_v32 = vrot.slane %v7916_v12, 5  ;;  %v7580_v11 = vrot.slane %v7578_v39, 5  ;;  %v8365_v12 = vsel %vm13586_vm11, %v11675_v51, %v8364_v29  ;;  %v14994_v39 = vld [vmem:[#allocation2 + $0x21c] sm:$0x1] }
 0x443   :  { %v6517_v44 = vpop.f32.mrf.mxu1  ;;  %v7905_v63 = vsel %vm12754_vm8, %v14947_v1, %v7904_v6  ;;  %v7938_v1 = vshll.u32 %v7802_v20, 16  ;;  %8937 = vmatpush.bf16.msrb.mxu1 %v12339_v5  ;;  %v8410_v53 = vunpack.c.l.b16 %v8365_v12  ;;  %v7923_v6 = vrot.slane %v7921_v33, 4  ;;  %v8262_v20 = vld [vmem:[#allocation2 + $0x1b8] sm:$0xe] }
 0x444   :  { %v14953_v37 = vadd.f32 %v14807_v55, %v6855_v27  ;;  %v14955_v60 = vadd.f32 %v6517_v44, %v6092_v26  ;;  %v7919_v55 = vsel %vm12754_vm8, %v7914_v46, %v7918_v32  ;;  %v15519_v46 = vld [vmem:[#allocation24_spill] sm:$0xff]  ;;  %v7366_v26 = vld [vmem:[#allocation2 + $0x1c8] sm:$0xf]  ;;  %v7581_v44 = vsel %vm12754_vm8, %v7576_v7, %v7580_v11 }
 0x445   :  { %v14960_v54 = vpop.f32.mrf.mxu3  ;;  %v6093_v27 = vadd.f32 %v15519_v46, %v14823_v61  ;;  %v14983_v35 = vunpack.c.l.b16 %v7919_v55  ;;  %v8409_v61 = vunpack.c.l.b16 %v8361_v8  ;;  %v7583_v58 = vshrl.u32 %v7366_v26, 16  ;;  %v7803_v55 = vld [vmem:[#allocation2 + $0x224] sm:$0x1]  ;;  %v8264_v8 = vld [vmem:[#allocation2 + $0x1c0] sm:$0xe] }
 0x446   :  { %7740 = vmatmul.bf16.gmra.mxu1 %v7648_v0  ;;  %8170 = vmatmul.bf16.gmra.mxu2 %v8094_v40  ;;  %v7368_v40 = vld [vmem:[#allocation2 + $0x1d0] sm:$0xf]  ;;  %v7586_v48 = vshll.u32 %v7366_v26, 16  ;;  %v8081_v29 = vunpack.c.l.b16 %v7905_v63  ;;  %v7930_v52 = vshll.u32 %v14994_v39, 16  ;;  %v7940_v59 = vrot.slane %v7938_v1, 5 }
 0x447   :  { %v12338_v0 = vld [vmem:[%s15438_s3 + $0x550] sm:$0xff]  ;;  %v7597_v23 = vshrl.u32 %v7368_v40, 16  ;;  %v7600_v51 = vshll.u32 %v7368_v40, 16  ;;  %v8420_v18 = vpack.c.b16 %v8410_v53, %v8409_v61  ;;  %v7639_v7 = vunpack.c.l.b16 %v7567_v56  ;;  %v8265_v63 = vld [vmem:[#allocation2 + $0x1c4] sm:$0x1] }
 0x448   :  { %8938 = vmatpush.bf16.msrb.mxu1 %v12338_v0  ;;  %v7640_v11 = vunpack.c.l.b16 %v7581_v44  ;;  %v8095_v5 = vpack.c.b16 %v14983_v35, %v8081_v29  ;;  %v7585_v33 = vrot.slane %v7583_v58, 4  ;;  %v15520_v40 = vld [vmem:[#allocation26_spill] sm:$0xff]  ;;  %v7944_v4 = vshll.u32 %v7803_v55, 16 }
 0x449   :  { %v6819_v43 = vpop.f32.mrf.mxu2  ;;  %v7599_v46 = vrot.slane %v7597_v23, 4  ;;  %v7369_v56 = vld [vmem:[#allocation2 + $0x1d4] sm:$0x1]  ;;  %v11676_v1 = vrot.slane %v8262_v20, 9  ;;  %v11677_v53 = vrot.slane %v8264_v8, 9  ;;  %v7941_v39 = vor.u32 %v7940_v59, %v7937_v45  ;;  %v12336_v23 = vld [vmem:[%s15438_s3 + $0x540] sm:$0xff] }
 0x44a   :  { %v6856_v15 = vadd.f32 %v6819_v43, %v14786_v17  ;;  %v8263_v43 = vld [vmem:[#allocation2 + $0x1bc] sm:$0x1]  ;;  %v7606_v55 = vshll.u32 %v7369_v56, 16  ;;  %v7804_v20 = vld [vmem:[#allocation2 + $0x238] sm:$0xf] }
 0x44b   :  { %v6519_v16 = vpop.f32.mrf.mxu1  ;;  %v8368_v61 = vrot.slane %v8263_v43, 5  ;;  %v7942_v59 = vrot.slane %v7941_v39, 4  ;;  %v7949_v56 = vshrl.u32 %v7804_v20, 16 }
 0x44c   :  { %v14990_v17 = vadd.f32 %v14827_v36, %v6856_v15  ;;  %v14992_v62 = vadd.f32 %v6519_v16, %v6093_v27  ;;  %v7926_v36 = vrot.slane %v7924_v30, 5  ;;  %v7588_v15 = vrot.slane %v7586_v48, 5  ;;  %v7367_v16 = vld [vmem:[#allocation2 + $0x1cc] sm:$0x1]  ;;  %8939 = vmatpush.bf16.msrb.mxu1 %v12337_v24  ;;  %v12354_v24 = vld [vmem:[%s15438_s3 + $0x5d0] sm:$0xff] }
 0x44d   :  { %v14999_v32 = vpop.f32.mrf.mxu3  ;;  %v7602_v27 = vrot.slane %v7600_v51, 5  ;;  %v6094_v30 = vadd.f32 %v15520_v40, %v14845_v49  ;;  %v8372_v48 = vrot.slane %v8265_v63, 5  ;;  %v12355_v49 = vld [vmem:[%s15438_s3 + $0x5d8] sm:$0xff] }
 0x44e   :  { %v7927_v44 = vor.u32 %v7926_v36, %v7923_v6  ;;  %v7589_v29 = vor.u32 %v7588_v15, %v7585_v33  ;;  %v7592_v6 = vshll.u32 %v7367_v16, 16  ;;  %9837 = vmatpush.bf16.msrb.mxu3 %v12355_v49  ;;  %v7608_v33 = vrot.slane %v7606_v55, 5  ;;  %v8267_v55 = vld [vmem:[#allocation2 + $0x1cc] sm:$0x1] }
 0x44f   :  { %v7603_v36 = vor.u32 %v7602_v27, %v7599_v46  ;;  %v15521_v46 = vld [vmem:[#allocation27_spill] sm:$0xff] }
 0x450   :  { %v7928_v45 = vrot.slane %v7927_v44, 4  ;;  %8940 = vmatpush.bf16.msrb.mxu1 %v12336_v23  ;;  %v7590_v8 = vrot.slane %v7589_v29, 4  ;;  %v6095_v27 = vadd.f32 %v15521_v46, %v14860_v47  ;;  %v12353_v47 = vld [vmem:[%s15438_s3 + $0x5c8] sm:$0xff] }
 0x451   :  { %v6821_v12 = vpop.f32.mrf.mxu2  ;;  %v7604_v63 = vrot.slane %v7603_v36, 4  ;;  %v8266_v36 = vld [vmem:[#allocation2 + $0x1c8] sm:$0xe] }
 0x452   :  { %v6857_v26 = vadd.f32 %v6821_v12, %v14805_v38  ;;  %8512 = vmatmul.bf16.gmra.mxu3 %v8420_v18  ;;  %v7649_v38 = vpack.c.b16 %v7640_v11, %v7639_v7  ;;  %v8369_v18 = vsel %vm13586_vm11, %v11676_v1, %v8368_v61  ;;  %v8373_v7 = vsel %vm13586_vm11, %v11677_v53, %v8372_v48  ;;  %v12352_v48 = vld [vmem:[%s15438_s3 + $0x5c0] sm:$0xff] }
 0x453   :  { %v6522_v35 = vpop.f32.mrf.mxu1  ;;  %v7932_v11 = vrot.slane %v7930_v52, 5  ;;  %v7594_v12 = vrot.slane %v7592_v6, 5  ;;  %9838 = vmatpush.bf16.msrb.mxu3 %v12354_v24  ;;  %v7609_v53 = vsel %vm12754_vm8, %v7604_v63, %v7608_v33  ;;  %v7951_v24 = vrot.slane %v7949_v56, 4 }
 0x454   :  { %v15010_v0 = vadd.f32 %v14852_v9, %v6857_v26  ;;  %v15012_v58 = vadd.f32 %v6522_v35, %v6094_v30  ;;  %v12347_v9 = vld [vmem:[%s15438_s3 + $0x598] sm:$0xff]  ;;  %v7806_v26 = vld [vmem:[#allocation2 + $0x240] sm:$0xf]  ;;  %v8411_v30 = vunpack.c.l.b16 %v8369_v18  ;;  %v7952_v35 = vshll.u32 %v7804_v20, 16 }
 0x455   :  { %v15020_v51 = vpop.f32.mrf.mxu3  ;;  %9387 = vmatpush.bf16.msrb.mxu2 %v12347_v9  ;;  %v7933_v16 = vsel %vm12754_vm8, %v7928_v45, %v7932_v11  ;;  %v7595_v61 = vsel %vm12754_vm8, %v7590_v8, %v7594_v12  ;;  %v7963_v39 = vshrl.u32 %v7806_v26, 16  ;;  %v7642_v29 = vunpack.c.l.b16 %v7609_v53  ;;  %v8268_v9 = vld [vmem:[#allocation2 + $0x1d0] sm:$0xe]  ;;  %v7807_v8 = vld [vmem:[#allocation2 + $0x244] sm:$0x1] }
 0x456   :  { %7745 = vmatmul.bf16.gmra.mxu1 %v7649_v38  ;;  %8175 = vmatmul.bf16.gmra.mxu2 %v8095_v5  ;;  %v7946_v5 = vrot.slane %v7944_v4, 5  ;;  %v7966_v38 = vshll.u32 %v7806_v26, 16  ;;  %v7641_v23 = vunpack.c.l.b16 %v7595_v61  ;;  %v8083_v6 = vunpack.c.l.b16 %v7933_v16  ;;  %v9466_v16 = vld [vmem:[#allocation2 + $0xb8] sm:$0xf] }
 0x457   :  { %9839 = vmatpush.bf16.msrb.mxu3 %v12353_v47  ;;  %v7954_v18 = vrot.slane %v7952_v35, 5  ;;  %v6096_v20 = vadd.f32 %v13952_v41, %v14890_v57  ;;  %v11678_v33 = vrot.slane %v8266_v36, 9  ;;  %v11679_v46 = vrot.slane %v8268_v9, 9 }
 0x458   :  { %v7947_v52 = vsel %vm12754_vm8, %v7942_v59, %v7946_v5  ;;  %v8269_v59 = vld [vmem:[#allocation2 + $0x1d4] sm:$0x1]  ;;  %v7968_v11 = vrot.slane %v7966_v38, 5  ;;  %v9527_v61 = vshrl.u32 %v9466_v16, 16  ;;  %v9530_v53 = vshll.u32 %v9466_v16, 16 }
 0x459   :  { %v6824_v43 = vpop.f32.mrf.mxu2  ;;  %v7955_v41 = vor.u32 %v7954_v18, %v7951_v24  ;;  %v7810_v24 = vld [vmem:[#allocation2 + $0x250] sm:$0xf] }
 0x45a   :  { %v6858_v15 = vadd.f32 %v6824_v43, %v14825_v13  ;;  %v8412_v13 = vunpack.c.l.b16 %v8373_v7  ;;  %v7965_v7 = vrot.slane %v7963_v39, 4  ;;  %v7805_v43 = vld [vmem:[#allocation2 + $0x23c] sm:$0x1]  ;;  %v9529_v25 = vrot.slane %v9527_v61, 4 }
 0x45b   :  { %v6524_v40 = vpop.f32.mrf.mxu1  ;;  %9840 = vmatpush.bf16.msrb.mxu3 %v12352_v48  ;;  %v7958_v57 = vshll.u32 %v7805_v43, 16  ;;  %v7956_v48 = vrot.slane %v7955_v41, 4 }
 0x45c   :  { %v15040_v44 = vadd.f32 %v14864_v3, %v6858_v15  ;;  %v15042_v4 = vadd.f32 %v6524_v40, %v6095_v27  ;;  %v8084_v3 = vunpack.c.l.b16 %v7947_v52  ;;  %v8421_v49 = vpack.c.b16 %v8412_v13, %v8411_v30  ;;  %v9464_v27 = vld [vmem:[#allocation2 + $0xb0] sm:$0xf] }
 0x45d   :  { %v15047_v1 = vpop.f32.mrf.mxu3  ;;  %v8376_v15 = vrot.slane %v8267_v55, 5  ;;  %v7650_v30 = vpack.c.b16 %v7642_v29, %v7641_v23  ;;  %v7969_v56 = vor.u32 %v7968_v11, %v7965_v7  ;;  %v7972_v13 = vshll.u32 %v7807_v8, 16  ;;  %v15522_v55 = vld [vmem:[#allocation28_spill] sm:$0xff] }
 0x45e   :  { %v8096_v63 = vpack.c.b16 %v8084_v3, %v8083_v6  ;;  %v9513_v35 = vshrl.u32 %v9464_v27, 16  ;;  %v9516_v47 = vshll.u32 %v9464_v27, 16  ;;  %v7808_v6 = vld [vmem:[#allocation2 + $0x248] sm:$0xf]  ;;  %v6097_v9 = vadd.f32 %v15522_v55, %v14910_v2  ;;  %v9465_v27 = vld [vmem:[#allocation2 + $0xb4] sm:$0x1] }
 0x45f   :  { %v8377_v39 = vsel %vm13586_vm11, %v11678_v33, %v8376_v15  ;;  %v7970_v23 = vrot.slane %v7969_v56, 4  ;;  %v7974_v29 = vrot.slane %v7972_v13, 5  ;;  %v7977_v8 = vshrl.u32 %v7808_v6, 16  ;;  %v9467_v33 = vld [vmem:[#allocation2 + $0xbc] sm:$0x1] }
 0x460   :  { %v8413_v7 = vunpack.c.l.b16 %v8377_v39  ;;  %v7991_v15 = vshrl.u32 %v7810_v24, 16  ;;  %v9536_v56 = vshll.u32 %v9467_v33, 16 }
 0x461   :  { %v6826_v45 = vpop.f32.mrf.mxu2  ;;  %v7975_v2 = vsel %vm12754_vm8, %v7970_v23, %v7974_v29  ;;  %v7811_v23 = vld [vmem:[#allocation2 + $0x254] sm:$0x1] }
 0x462   :  { %v6859_v5 = vadd.f32 %v6826_v45, %v14847_v42  ;;  %8517 = vmatmul.bf16.gmra.mxu3 %v8421_v49  ;;  %v8380_v42 = vrot.slane %v8269_v59, 5  ;;  %v7960_v49 = vrot.slane %v7958_v57, 5  ;;  %v9515_v45 = vrot.slane %v9513_v35, 4  ;;  %v12328_v57 = vld [vmem:[#allocation2 + $0xb4] sm:$0xf0] }
 0x463   :  { %v6527_v12 = vpop.f32.mrf.mxu1  ;;  %v9518_v59 = vrot.slane %v9516_v47, 5  ;;  %v8086_v41 = vunpack.c.l.b16 %v7975_v2  ;;  %v11826_v35 = vld [vmem:[#allocation2 + $0xb0] sm:$0xf]  ;;  %v7979_v47 = vrot.slane %v7977_v8, 4  ;;  %v7993_v61 = vrot.slane %v7991_v15, 4 }
 0x464   :  { %v15060_v26 = vadd.f32 %v14901_v21, %v6859_v5  ;;  %v15062_v40 = vadd.f32 %v6527_v12, %v6096_v20  ;;  %v12346_v21 = vld [vmem:[%s15438_s3 + $0x590] sm:$0xff]  ;;  %v8381_v38 = vsel %vm13586_vm11, %v11679_v46, %v8380_v42  ;;  %v9532_v5 = vrot.slane %v9530_v53, 5 }
 0x465   :  { %v15064_v52 = vpop.f32.mrf.mxu3  ;;  %9388 = vmatpush.bf16.msrb.mxu2 %v12346_v21  ;;  %v8414_v11 = vunpack.c.l.b16 %v8381_v38  ;;  %v7980_v12 = vshll.u32 %v7808_v6, 16  ;;  %v7994_v46 = vshll.u32 %v7810_v24, 16  ;;  %v15523_v38 = vld [vmem:[#allocation29_spill] sm:$0xff]  ;;  %v11827_v6 = vor.u32 %v12328_v57, %v11826_v35 }
 0x466   :  { %7750 = vmatmul.bf16.gmra.mxu1 %v7650_v30  ;;  %8180 = vmatmul.bf16.gmra.mxu2 %v8096_v63  ;;  %v9519_v30 = vor.u32 %v9518_v59, %v9515_v45  ;;  %v9533_v42 = vor.u32 %v9532_v5, %v9529_v25  ;;  %v9538_v24 = vrot.slane %v9536_v56, 5  ;;  %v8000_v25 = vshll.u32 %v7811_v23, 16  ;;  %v9468_v5 = vld [vmem:[#allocation2 + $0xc0] sm:$0xf]  ;;  %v15524_v56 = vld [vmem:[#allocation30_spill] sm:$0xff] }
 0x467   :  { %v7982_v21 = vrot.slane %v7980_v12, 5  ;;  %v7996_v53 = vrot.slane %v7994_v46, 5  ;;  %v9541_v15 = vshrl.u32 %v9468_v5, 16  ;;  %v7812_v46 = vld [vmem:[#allocation2 + $0x258] sm:$0xf] }
 0x468   :  { %v9534_v55 = vrot.slane %v9533_v42, 4 }
 0x469   :  { %v6829_v3 = vpop.f32.mrf.mxu2 }
 0x46a   :  { %v6860_v36 = vadd.f32 %v6829_v3, %v14862_v14  ;;  %v7961_v14 = vsel %vm12754_vm8, %v7956_v48, %v7960_v49  ;;  %v7306_v3 = vadd.f32 %v15523_v38, %v14934_v22  ;;  %v9522_v48 = vshll.u32 %v9465_v27, 16  ;;  %v7809_v49 = vld [vmem:[#allocation2 + $0x24c] sm:$0x1] }
 0x46b   :  { %v6529_v18 = vpop.f32.mrf.mxu1  ;;  %v8085_v16 = vunpack.c.l.b16 %v7961_v14  ;;  %v7997_v22 = vor.u32 %v7996_v53, %v7993_v61  ;;  %v9539_v12 = vsel %vm12754_vm8, %v9534_v55, %v9538_v24  ;;  %v8008_v38 = vshll.u32 %v7812_v46, 16 }
 0x46c   :  { %v15077_v20 = vadd.f32 %v14914_v10, %v6860_v36  ;;  %v15079_v43 = vadd.f32 %v6529_v18, %v6097_v9  ;;  %v8422_v10 = vpack.c.b16 %v8414_v11, %v8413_v7  ;;  %v9520_v36 = vrot.slane %v9519_v30, 4  ;;  %v9470_v18 = vld [vmem:[#allocation2 + $0xc8] sm:$0xf] }
 0x46d   :  { %v15081_v63 = vpop.f32.mrf.mxu3  ;;  %v8097_v59 = vpack.c.b16 %v8086_v41, %v8085_v16  ;;  %v7983_v7 = vor.u32 %v7982_v21, %v7979_v47  ;;  %v7986_v11 = vshll.u32 %v7809_v49, 16  ;;  %v9524_v8 = vrot.slane %v9522_v48, 5  ;;  %v7814_v41 = vld [vmem:[#allocation2 + $0x260] sm:$0xf] }
 0x46e   :  { %v9555_v14 = vshrl.u32 %v9470_v18, 16  ;;  %v9558_v2 = vshll.u32 %v9470_v18, 16  ;;  %v8002_v16 = vrot.slane %v8000_v25, 5  ;;  %v9754_v35 = vunpack.c.l.b16 %v9539_v12  ;;  %v12329_v18 = vld [vmem:[#allocation2 + $0xc4] sm:$0xf0] }
 0x46f   :  { %v9525_v33 = vsel %vm12754_vm8, %v9520_v36, %v9524_v8  ;;  %v7984_v30 = vrot.slane %v7983_v7, 4  ;;  %v7988_v42 = vrot.slane %v7986_v11, 5  ;;  %v9544_v47 = vshll.u32 %v9468_v5, 16  ;;  %v9471_v36 = vld [vmem:[#allocation2 + $0xcc] sm:$0x1] }
 0x470   :  { %v9557_v61 = vrot.slane %v9555_v14, 4  ;;  %v9560_v53 = vrot.slane %v9558_v2, 5  ;;  %v8019_v49 = vshrl.u32 %v7814_v41, 16  ;;  %v8022_v23 = vshll.u32 %v7814_v41, 16  ;;  %v7813_v5 = vld [vmem:[#allocation2 + $0x25c] sm:$0x1] }
 0x471   :  { %v6831_v13 = vpop.f32.mrf.mxu2  ;;  %v9543_v55 = vrot.slane %v9541_v15, 4  ;;  %v8010_v11 = vrot.slane %v8008_v38, 5  ;;  %v7815_v8 = vld [vmem:[#allocation2 + $0x264] sm:$0x1]  ;;  %v11830_v2 = vld [vmem:[#allocation2 + $0xc0] sm:$0xf] }
 0x472   :  { %v6861_v39 = vadd.f32 %v6831_v13, %v14892_v34  ;;  %8522 = vmatmul.bf16.gmra.mxu3 %v8422_v10  ;;  %v7998_v10 = vrot.slane %v7997_v22, 4  ;;  %v7307_v13 = vadd.f32 %v15524_v56, %v14953_v37  ;;  %v7989_v37 = vsel %vm12754_vm8, %v7984_v30, %v7988_v42  ;;  %v15525_v15 = vld [vmem:[#allocation4_spill] sm:$0xff] }
 0x473   :  { %v7716_v29 = vpop.f32.mrf.mxu1  ;;  %v8087_v22 = vunpack.c.l.b16 %v7989_v37  ;;  %v8024_v12 = vrot.slane %v8022_v23, 5  ;;  %v11831_v30 = vor.u32 %v12329_v18, %v11830_v2  ;;  %v9469_v42 = vld [vmem:[#allocation2 + $0xc4] sm:$0x1]  ;;  %v8014_v56 = vshll.u32 %v7813_v5, 16  ;;  %v9472_v23 = vld [vmem:[#allocation2 + $0xd0] sm:$0xf] }
 0x474   :  { %v15091_v9 = vadd.f32 %v14941_v28, %v6861_v39  ;;  %v15093_v45 = vadd.f32 %v7716_v29, %v7306_v3  ;;  %v12345_v28 = vld [vmem:[%s15438_s3 + $0x588] sm:$0xff]  ;;  %v8005_v39 = vshrl.u32 %v7812_v46, 16  ;;  %v12344_v38 = vld [vmem:[%s15438_s3 + $0x580] sm:$0xff] }
 0x475   :  { %v15095_v34 = vpop.f32.mrf.mxu3  ;;  %9389 = vmatpush.bf16.msrb.mxu2 %v12345_v28  ;;  %v8021_v28 = vrot.slane %v8019_v49, 4  ;;  %v7816_v5 = vld [vmem:[#allocation2 + $0x268] sm:$0xf] }
 0x476   :  { %8185 = vmatmul.bf16.gmra.mxu2 %v8097_v59  ;;  %8941 = vmatmul.bf16.vlgmr.msrb.gmra.mxu1 %v11827_v6  ;;  %v8003_v6 = vsel %vm12754_vm8, %v7998_v10, %v8002_v16  ;;  %v9546_v59 = vrot.slane %v9544_v47, 5  ;;  %v8007_v7 = vrot.slane %v8005_v39, 4  ;;  %v9550_v39 = vshll.u32 %v9469_v42, 16 }
 0x477   :  { %v8088_v25 = vunpack.c.l.b16 %v8003_v6  ;;  %v8036_v42 = vshll.u32 %v7816_v5, 16 }
 0x478   :  { %v9547_v10 = vor.u32 %v9546_v59, %v9543_v55  ;;  %v9552_v18 = vrot.slane %v9550_v39, 5  ;;  %v9473_v39 = vld [vmem:[#allocation2 + $0xd4] sm:$0x1] }
 0x479   :  { %v6834_v27 = vpop.f32.mrf.mxu2  ;;  %9390 = vmatpush.bf16.msrb.mxu2 %v12344_v38 }
 0x47a   :  { %v6862_v57 = vadd.f32 %v6834_v27, %v14912_v31  ;;  %v9753_v31 = vunpack.c.l.b16 %v9525_v33  ;;  %v9564_v33 = vshll.u32 %v9471_v36, 16  ;;  %v7308_v27 = vadd.f32 %v15525_v15, %v14990_v17 }
 0x47b   :  { %v7718_v21 = vpop.f32.mrf.mxu1  ;;  %v9548_v49 = vrot.slane %v9547_v10, 4  ;;  %v8016_v36 = vrot.slane %v8014_v56, 5 }
 0x47c   :  { %v15108_v3 = vadd.f32 %v14960_v54, %v6862_v57  ;;  %v15110_v48 = vadd.f32 %v7718_v21, %v7307_v13  ;;  %v9769_v24 = vpack.c.b16 %v9754_v35, %v9753_v31  ;;  %v9561_v54 = vor.u32 %v9560_v53, %v9557_v61 }
 0x47d   :  { %v15112_v29 = vpop.f32.mrf.mxu3  ;;  %v8011_v57 = vor.u32 %v8010_v11, %v8007_v7  ;;  %v8028_v13 = vshll.u32 %v7815_v8, 16  ;;  %v8098_v21 = vpack.c.b16 %v8088_v25, %v8087_v22  ;;  %v8025_v61 = vor.u32 %v8024_v12, %v8021_v28  ;;  %v15526_v7 = vld [vmem:[#allocation22_spill] sm:$0xff] }
 0x47e   :  { %v9562_v41 = vrot.slane %v9561_v54, 4  ;;  %v9566_v17 = vrot.slane %v9564_v33, 5  ;;  %v7309_v11 = vadd.f32 %v15526_v7, %v15010_v0  ;;  %v9569_v22 = vshrl.u32 %v9472_v23, 16  ;;  %v7818_v8 = vld [vmem:[#allocation2 + $0x270] sm:$0xf] }
 0x47f   :  { %v8012_v6 = vrot.slane %v8011_v57, 4  ;;  %v8026_v55 = vrot.slane %v8025_v61, 4  ;;  %v8030_v59 = vrot.slane %v8028_v13, 5  ;;  %v9572_v25 = vshll.u32 %v9472_v23, 16  ;;  %v9475_v13 = vld [vmem:[#allocation2 + $0xdc] sm:$0x1] }
 0x480   :  { %v9553_v12 = vsel %vm12754_vm8, %v9548_v49, %v9552_v18  ;;  %v8047_v10 = vshrl.u32 %v7818_v8, 16  ;;  %v9571_v57 = vrot.slane %v9569_v22, 4  ;;  %v11834_v49 = vld [vmem:[#allocation2 + $0xd0] sm:$0xf]  ;;  %v8038_v23 = vrot.slane %v8036_v42, 5 }
 0x481   :  { %v6836_v14 = vpop.f32.mrf.mxu2  ;;  %v8031_v0 = vsel %vm12754_vm8, %v8026_v55, %v8030_v59  ;;  %v9574_v56 = vrot.slane %v9572_v25, 5  ;;  %v7817_v18 = vld [vmem:[#allocation2 + $0x26c] sm:$0x1]  ;;  %v9578_v22 = vshll.u32 %v9473_v39, 16 }
 0x482   :  { %v6863_v46 = vadd.f32 %v6836_v14, %v14936_v50  ;;  %9841 = vmatmul.bf16.vlgmr.msrb.gmra.mxu3 %v9769_v24  ;;  %v9474_v50 = vld [vmem:[#allocation2 + $0xd8] sm:$0xf]  ;;  %v8090_v61 = vunpack.c.l.b16 %v8031_v0 }
 0x483   :  { %v7721_v16 = vpop.f32.mrf.mxu1  ;;  %v9583_v31 = vshrl.u32 %v9474_v50, 16  ;;  %v9586_v37 = vshll.u32 %v9474_v50, 16  ;;  %v12330_v50 = vld [vmem:[#allocation2 + $0xd4] sm:$0xf0]  ;;  %v9575_v59 = vor.u32 %v9574_v56, %v9571_v57  ;;  %v9014_v57 = vld [vmem:[#allocation2 + $0x10] sm:$0xf] }
 0x484   :  { %v15122_v35 = vadd.f32 %v14999_v32, %v6863_v46  ;;  %v15124_v47 = vadd.f32 %v7721_v16, %v7308_v27  ;;  %v9567_v32 = vsel %vm12754_vm8, %v9562_v41, %v9566_v17  ;;  %v8050_v16 = vshll.u32 %v7818_v8, 16  ;;  %v9016_v0 = vld [vmem:[#allocation2 + $0x18] sm:$0xf] }
 0x485   :  { %v15126_v53 = vpop.f32.mrf.mxu3  ;;  %v9756_v14 = vunpack.c.l.b16 %v9567_v32  ;;  %v9585_v2 = vrot.slane %v9583_v31, 4  ;;  %v9588_v33 = vrot.slane %v9586_v37, 5  ;;  %v9755_v41 = vunpack.c.l.b16 %v9553_v12  ;;  %v9476_v12 = vld [vmem:[#allocation2 + $0xe0] sm:$0xf] }
 0x486   :  { %8190 = vmatmul.bf16.gmra.mxu2 %v8098_v21  ;;  %8946 = vmatmul.bf16.gmra.mxu1 %v11831_v30  ;;  %v8033_v30 = vshrl.u32 %v7816_v5, 16  ;;  %v8049_v31 = vrot.slane %v8047_v10, 4  ;;  %v8052_v37 = vrot.slane %v8050_v16, 5  ;;  %v9597_v10 = vshrl.u32 %v9476_v12, 16 }
 0x487   :  { %v9589_v17 = vor.u32 %v9588_v33, %v9585_v2  ;;  %v9580_v56 = vrot.slane %v9578_v22, 5 }
 0x488   :  { %v8035_v32 = vrot.slane %v8033_v30, 4  ;;  %v8053_v33 = vor.u32 %v8052_v37, %v8049_v31  ;;  %v9576_v30 = vrot.slane %v9575_v59, 4  ;;  %v9063_v37 = vshrl.u32 %v9014_v57, 16 }
 0x489   :  { %v6839_v24 = vpop.f32.mrf.mxu2 }
 0x48a   :  { %v6864_v54 = vadd.f32 %v6839_v24, %v14955_v60  ;;  %v8017_v60 = vsel %vm12754_vm8, %v8012_v6, %v8016_v36  ;;  %v15527_v36 = vld [vmem:[#allocation12_spill] sm:$0xff]  ;;  %v9592_v24 = vshll.u32 %v9475_v13, 16  ;;  %v8039_v2 = vor.u32 %v8038_v23, %v8035_v32  ;;  %v15528_v32 = vld [vmem:[#allocation5_spill] sm:$0xff] }
 0x48b   :  { %v7723_v28 = vpop.f32.mrf.mxu1  ;;  %v8089_v21 = vunpack.c.l.b16 %v8017_v60  ;;  %v7310_v55 = vadd.f32 %v15527_v36, %v15040_v44  ;;  %v8042_v44 = vshll.u32 %v7817_v18, 16  ;;  %v7311_v23 = vadd.f32 %v15528_v32, %v15060_v26 }
 0x48c   :  { %v15139_v46 = vadd.f32 %v15020_v51, %v6864_v54  ;;  %v15141_v15 = vadd.f32 %v7723_v28, %v7309_v11  ;;  %v9770_v51 = vpack.c.b16 %v9756_v14, %v9755_v41  ;;  %v7819_v54 = vld [vmem:[#allocation2 + $0x274] sm:$0x1]  ;;  %v11835_v11 = vor.u32 %v12330_v50, %v11834_v49 }
 0x48d   :  { %v15147_v27 = vpop.f32.mrf.mxu3  ;;  %v8099_v8 = vpack.c.b16 %v8090_v61, %v8089_v21  ;;  %v9590_v28 = vrot.slane %v9589_v17, 4  ;;  %v8056_v60 = vshll.u32 %v7819_v54, 16  ;;  %v9594_v42 = vrot.slane %v9592_v24, 5 }
 0x48e   :  { %v9080_v21 = vshll.u32 %v9016_v0, 16  ;;  %v8040_v50 = vrot.slane %v8039_v2, 4  ;;  %v8044_v39 = vrot.slane %v8042_v44, 5  ;;  %v8054_v17 = vrot.slane %v8053_v33, 4  ;;  %v9477_v2 = vld [vmem:[#allocation2 + $0xe4] sm:$0x1] }
 0x48f   :  { %v9595_v13 = vsel %vm12754_vm8, %v9590_v28, %v9594_v42  ;;  %v9581_v31 = vsel %vm12754_vm8, %v9576_v30, %v9580_v56  ;;  %v9599_v36 = vrot.slane %v9597_v10, 4  ;;  %v9017_v10 = vld [vmem:[#allocation2 + $0x1c] sm:$0x1]  ;;  %v9606_v56 = vshll.u32 %v9477_v2, 16 }
 0x490   :  { %v8045_v26 = vsel %vm12754_vm8, %v8040_v50, %v8044_v39 }
 0x491   :  { %v6841_v38 = vpop.f32.mrf.mxu2  ;;  %v8091_v30 = vunpack.c.l.b16 %v8045_v26 }
 0x492   :  { %v6865_v6 = vadd.f32 %v6841_v38, %v14992_v62  ;;  %9846 = vmatmul.bf16.gmra.mxu3 %v9770_v51  ;;  %v9478_v62 = vld [vmem:[#allocation2 + $0xe8] sm:$0xf]  ;;  %v9077_v51 = vshrl.u32 %v9016_v0, 16  ;;  %v8058_v38 = vrot.slane %v8056_v60, 5  ;;  %v9015_v60 = vld [vmem:[#allocation2 + $0x14] sm:$0x1] }
 0x493   :  { %v7726_v7 = vpop.f32.mrf.mxu1  ;;  %v9611_v16 = vshrl.u32 %v9478_v62, 16  ;;  %v9614_v41 = vshll.u32 %v9478_v62, 16  ;;  %v9757_v62 = vunpack.c.l.b16 %v9581_v31  ;;  %v9072_v39 = vshll.u32 %v9015_v60, 16 }
 0x494   :  { %v15153_v25 = vadd.f32 %v15047_v1, %v6865_v6  ;;  %v15155_v5 = vadd.f32 %v7726_v7, %v7310_v55  ;;  %v9600_v1 = vshll.u32 %v9476_v12, 16  ;;  %v9758_v7 = vunpack.c.l.b16 %v9595_v13 }
 0x495   :  { %v15157_v14 = vpop.f32.mrf.mxu3  ;;  %v9613_v59 = vrot.slane %v9611_v16, 4  ;;  %v9616_v24 = vrot.slane %v9614_v41, 5  ;;  %v9079_v28 = vrot.slane %v9077_v51, 4  ;;  %v9082_v12 = vrot.slane %v9080_v21, 5  ;;  %v11838_v41 = vld [vmem:[#allocation2 + $0xe0] sm:$0xf] }
 0x496   :  { %8195 = vmatmul.bf16.gmra.mxu2 %v8099_v8  ;;  %8951 = vmatmul.bf16.gmra.mxu1 %v11835_v11  ;;  %v9602_v55 = vrot.slane %v9600_v1, 5  ;;  %v9479_v11 = vld [vmem:[#allocation2 + $0xec] sm:$0x1]  ;;  %v8059_v8 = vsel %vm12754_vm8, %v8054_v17, %v8058_v38  ;;  %v9771_v0 = vpack.c.b16 %v9758_v7, %v9757_v62  ;;  %v9065_v1 = vrot.slane %v9063_v37, 4  ;;  %v9482_v7 = vld [vmem:[#allocation2 + $0x108] sm:$0xf] }
 0x497   :  { %v9620_v33 = vshll.u32 %v9479_v11, 16  ;;  %v8092_v42 = vunpack.c.l.b16 %v8059_v8  ;;  %v15529_v21 = vld [vmem:[#allocation25_spill] sm:$0xff]  ;;  %v9480_v8 = vld [vmem:[#allocation2 + $0x100] sm:$0xf] }
 0x498   :  { %v9603_v44 = vor.u32 %v9602_v55, %v9599_v36  ;;  %v7312_v50 = vadd.f32 %v15529_v21, %v15077_v20  ;;  %v9020_v20 = vld [vmem:[#allocation2 + $0x28] sm:$0xf]  ;;  %v9018_v62 = vld [vmem:[#allocation2 + $0x20] sm:$0xf] }
 0x499   :  { %v6844_v61 = vpop.f32.mrf.mxu2  ;;  %v9622_v32 = vrot.slane %v9620_v33, 5  ;;  %v9105_v33 = vshrl.u32 %v9020_v20, 16  ;;  %v9108_v60 = vshll.u32 %v9020_v20, 16 }
 0x49a   :  { %v6866_v49 = vadd.f32 %v6844_v61, %v15012_v58  ;;  %v9066_v58 = vshll.u32 %v9014_v57, 16  ;;  %v12331_v57 = vld [vmem:[#allocation2 + $0xe4] sm:$0xf0]  ;;  %v9083_v61 = vor.u32 %v9082_v12, %v9079_v28  ;;  %v9604_v38 = vrot.slane %v9603_v44, 4 }
 0x49b   :  { %v7728_v6 = vpop.f32.mrf.mxu1  ;;  %v11839_v36 = vor.u32 %v12331_v57, %v11838_v41  ;;  %v9639_v28 = vshrl.u32 %v9482_v7, 16  ;;  %v9642_v12 = vshll.u32 %v9482_v7, 16  ;;  %v9625_v41 = vshrl.u32 %v9480_v8, 16  ;;  %v9021_v7 = vld [vmem:[#allocation2 + $0x2c] sm:$0x1] }
 0x49c   :  { %v15167_v18 = vadd.f32 %v15064_v52, %v6866_v49  ;;  %v15169_v54 = vadd.f32 %v7728_v6, %v7311_v23  ;;  %v9617_v52 = vor.u32 %v9616_v24, %v9613_v59  ;;  %v9068_v13 = vrot.slane %v9066_v58, 5 }
 0x49d   :  { %v15171_v22 = vpop.f32.mrf.mxu3  ;;  %v9086_v23 = vshll.u32 %v9017_v10, 16  ;;  %v8100_v6 = vpack.c.b16 %v8092_v42, %v8091_v30  ;;  %v9084_v24 = vrot.slane %v9083_v61, 4  ;;  %v9074_v58 = vrot.slane %v9072_v39, 5  ;;  %v15530_v30 = vld [vmem:[#allocation14_spill] sm:$0xff] }
 0x49e   :  { %v9618_v49 = vrot.slane %v9617_v52, 4  ;;  %v9069_v59 = vor.u32 %v9068_v13, %v9065_v1  ;;  %v7313_v42 = vadd.f32 %v15530_v30, %v15091_v9  ;;  %v9628_v57 = vshll.u32 %v9480_v8, 16  ;;  %v9022_v30 = vld [vmem:[#allocation2 + $0x30] sm:$0xf] }
 0x49f   :  { %v9088_v26 = vrot.slane %v9086_v23, 5  ;;  %v9094_v13 = vshll.u32 %v9018_v62, 16  ;;  %v9641_v21 = vrot.slane %v9639_v28, 4  ;;  %v9107_v39 = vrot.slane %v9105_v33, 4 }
 0x4a0   :  { %v9070_v44 = vrot.slane %v9069_v59, 4  ;;  %v9630_v23 = vrot.slane %v9628_v57, 5 }
 0x4a1   :  { %v6846_v16 = vpop.f32.mrf.mxu2  ;;  %v9089_v52 = vsel %vm12754_vm8, %v9084_v24, %v9088_v26  ;;  %v9019_v24 = vld [vmem:[#allocation2 + $0x24] sm:$0x1] }
 0x4a2   :  { %v6867_v51 = vadd.f32 %v6846_v16, %v15042_v4  ;;  %9851 = vmatmul.bf16.gmra.mxu3 %v9771_v0  ;;  %v9608_v4 = vrot.slane %v9606_v56, 5  ;;  %v9091_v56 = vshrl.u32 %v9018_v62, 16  ;;  %v9304_v9 = vunpack.c.l.b16 %v9089_v52  ;;  %v15531_v26 = vld [vmem:[#allocation16_spill] sm:$0xff] }
 0x4a3   :  { %v7731_v17 = vpop.f32.mrf.mxu1  ;;  %v7314_v8 = vadd.f32 %v15531_v26, %v15108_v3  ;;  %v9486_v3 = vld [vmem:[#allocation2 + $0x118] sm:$0xf] }
 0x4a4   :  { %v15181_v31 = vadd.f32 %v15081_v63, %v6867_v51  ;;  %v15183_v37 = vadd.f32 %v7731_v17, %v7312_v50  ;;  %v9609_v11 = vsel %vm12754_vm8, %v9604_v38, %v9608_v4  ;;  %v9623_v63 = vsel %vm12754_vm8, %v9618_v49, %v9622_v32  ;;  %v9483_v49 = vld [vmem:[#allocation2 + $0x10c] sm:$0x1] }
 0x4a5   :  { %v15185_v55 = vpop.f32.mrf.mxu3  ;;  %v9759_v10 = vunpack.c.l.b16 %v9609_v11  ;;  %v9760_v1 = vunpack.c.l.b16 %v9623_v63  ;;  %v9644_v50 = vrot.slane %v9642_v12, 5  ;;  %v9110_v17 = vrot.slane %v9108_v60, 5  ;;  %v12332_v11 = vld [vmem:[#allocation2 + $0x104] sm:$0xf0]  ;;  %v9481_v12 = vld [vmem:[#allocation2 + $0x104] sm:$0x1] }
 0x4a6   :  { %8200 = vmatmul.bf16.gmra.mxu2 %v8100_v6  ;;  %8956 = vmatmul.bf16.gmra.mxu1 %v11839_v36  ;;  %v9627_v32 = vrot.slane %v9625_v41, 4  ;;  %v9093_v6 = vrot.slane %v9091_v56, 4  ;;  %v9096_v36 = vrot.slane %v9094_v13, 5  ;;  %v9648_v62 = vshll.u32 %v9483_v49, 16  ;;  %v9024_v56 = vld [vmem:[#allocation2 + $0x38] sm:$0xf] }
 0x4a7   :  { %v9772_v4 = vpack.c.b16 %v9760_v1, %v9759_v10  ;;  %v9645_v59 = vor.u32 %v9644_v50, %v9641_v21  ;;  %v9111_v63 = vor.u32 %v9110_v17, %v9107_v39  ;;  %v9100_v60 = vshll.u32 %v9019_v24, 16 }
 0x4a8   :  { %v9631_v52 = vor.u32 %v9630_v23, %v9627_v32  ;;  %v9097_v33 = vor.u32 %v9096_v36, %v9093_v6  ;;  %v9650_v57 = vrot.slane %v9648_v62, 5  ;;  %v9119_v13 = vshrl.u32 %v9022_v30, 16 }
 0x4a9   :  { %v6849_v2 = vpop.f32.mrf.mxu2  ;;  %v9646_v1 = vrot.slane %v9645_v59, 4  ;;  %v9112_v41 = vrot.slane %v9111_v63, 4  ;;  %v9122_v21 = vshll.u32 %v9022_v30, 16  ;;  %v9667_v49 = vshrl.u32 %v9486_v3, 16  ;;  %v9487_v30 = vld [vmem:[#allocation2 + $0x11c] sm:$0x1] }
 0x4aa   :  { %v6868_v0 = vadd.f32 %v6849_v2, %v15062_v40  ;;  %v9075_v40 = vsel %vm12754_vm8, %v9070_v44, %v9074_v58  ;;  %v11842_v44 = vld [vmem:[#allocation2 + $0x100] sm:$0xf]  ;;  %v9632_v50 = vrot.slane %v9631_v52, 4  ;;  %v9098_v17 = vrot.slane %v9097_v33, 4 }
 0x4ab   :  { %v7733_v16 = vpop.f32.mrf.mxu1  ;;  %v9670_v32 = vshll.u32 %v9486_v3, 16  ;;  %v9136_v59 = vshll.u32 %v9024_v56, 16  ;;  %v9124_v63 = vrot.slane %v9122_v21, 5 }
 0x4ac   :  { %v15197_v61 = vadd.f32 %v15095_v34, %v6868_v0  ;;  %v15199_v51 = vadd.f32 %v7733_v16, %v7313_v42  ;;  %v9303_v34 = vunpack.c.l.b16 %v9075_v40  ;;  %v9114_v0 = vshll.u32 %v9021_v7, 16  ;;  %v15532_v7 = vld [vmem:[#allocation18_spill] sm:$0xff] }
 0x4ad   :  { %v15203_v38 = vpop.f32.mrf.mxu3  ;;  %v9634_v16 = vshll.u32 %v9481_v12, 16  ;;  %v9102_v40 = vrot.slane %v9100_v60, 5  ;;  %v9672_v52 = vrot.slane %v9670_v32, 5  ;;  %v9138_v33 = vrot.slane %v9136_v59, 5 }
 0x4ae   :  { %v9319_v28 = vpack.c.b16 %v9304_v9, %v9303_v34  ;;  %v9116_v39 = vrot.slane %v9114_v0, 5  ;;  %v9484_v9 = vld [vmem:[#allocation2 + $0x110] sm:$0xf]  ;;  %v9133_v34 = vshrl.u32 %v9024_v56, 16 }
 0x4af   :  { %v9636_v36 = vrot.slane %v9634_v16, 5  ;;  %v9656_v12 = vshll.u32 %v9484_v9, 16  ;;  %v9023_v16 = vld [vmem:[#allocation2 + $0x34] sm:$0x1] }
 0x4b1   :  { %v6851_v20 = vpop.f32.mrf.mxu2  ;;  %v9637_v26 = vsel %vm12754_vm8, %v9632_v50, %v9636_v36  ;;  %v11846_v36 = vld [vmem:[#allocation2 + $0x110] sm:$0xf] }
 0x4b2   :  { %v6869_v58 = vadd.f32 %v6851_v20, %v15079_v43  ;;  %9856 = vmatmul.bf16.gmra.mxu3 %v9772_v4  ;;  %v11843_v43 = vor.u32 %v12332_v11, %v11842_v44  ;;  %v9117_v4 = vsel %vm12754_vm8, %v9112_v41, %v9116_v39  ;;  %v7315_v20 = vadd.f32 %v15532_v7, %v15122_v35 }
 0x4b3   :  { %v7736_v2 = vpop.f32.mrf.mxu1  ;;  %v9121_v11 = vrot.slane %v9119_v13, 4  ;;  %v9669_v44 = vrot.slane %v9667_v49, 4  ;;  %v9761_v60 = vunpack.c.l.b16 %v9637_v26  ;;  %v9103_v35 = vsel %vm12754_vm8, %v9098_v17, %v9102_v40  ;;  %v12333_v13 = vld [vmem:[#allocation2 + $0x114] sm:$0xf0]  ;;  %v9485_v40 = vld [vmem:[#allocation2 + $0x114] sm:$0x1] }
 0x4b4   :  { %v15209_v42 = vadd.f32 %v15112_v29, %v6869_v58  ;;  %v15211_v10 = vadd.f32 %v7736_v2, %v7314_v8  ;;  %v9651_v29 = vsel %vm12754_vm8, %v9646_v1, %v9650_v57  ;;  %v9306_v0 = vunpack.c.l.b16 %v9117_v4 }
 0x4b5   :  { %v15215_v23 = vpop.f32.mrf.mxu3  ;;  %v9762_v8 = vunpack.c.l.b16 %v9651_v29  ;;  %v9658_v1 = vrot.slane %v9656_v12, 5  ;;  %v9125_v41 = vor.u32 %v9124_v63, %v9121_v11  ;;  %v9673_v57 = vor.u32 %v9672_v52, %v9669_v44  ;;  %v15533_v29 = vld [vmem:[#allocation20_spill] sm:$0xff]  ;;  %v9028_v52 = vld [vmem:[#allocation2 + $0x48] sm:$0xf] }
 0x4b6   :  { %8961 = vmatmul.bf16.gmra.mxu1 %v11843_v43  ;;  %9391 = vmatmul.bf16.vlgmr.msrb.gmra.mxu2 %v9319_v28  ;;  %v9653_v28 = vshrl.u32 %v9484_v9, 16  ;;  %v9305_v21 = vunpack.c.l.b16 %v9103_v35  ;;  %v7316_v9 = vadd.f32 %v15533_v29, %v15139_v46  ;;  %v9676_v17 = vshll.u32 %v9487_v30, 16 }
 0x4b7   :  { %v9773_v3 = vpack.c.b16 %v9762_v8, %v9761_v60  ;;  %v9128_v49 = vshll.u32 %v9023_v16, 16  ;;  %v9126_v59 = vrot.slane %v9125_v41, 4  ;;  %v9674_v11 = vrot.slane %v9673_v57, 4 }
 0x4b8   :  { %v9655_v43 = vrot.slane %v9653_v28, 4  ;;  %v9320_v4 = vpack.c.b16 %v9306_v0, %v9305_v21  ;;  %v9662_v63 = vshll.u32 %v9485_v40, 16  ;;  %v9678_v26 = vrot.slane %v9676_v17, 5  ;;  %v9026_v28 = vld [vmem:[#allocation2 + $0x40] sm:$0xf] }
 0x4b9   :  { %v8166_v6 = vpop.f32.mrf.mxu2  ;;  %v9130_v8 = vrot.slane %v9128_v49, 5  ;;  %v9150_v16 = vshll.u32 %v9026_v28, 16 }
 0x4ba   :  { %v8206_v24 = vadd.f32 %v8166_v6, %v15093_v45  ;;  %v9135_v45 = vrot.slane %v9133_v34, 4  ;;  %v9659_v34 = vor.u32 %v9658_v1, %v9655_v43  ;;  %v9664_v30 = vrot.slane %v9662_v63, 5 }
 0x4bb   :  { %v7738_v58 = vpop.f32.mrf.mxu1  ;;  %v9147_v1 = vshrl.u32 %v9026_v28, 16  ;;  %v9029_v28 = vld [vmem:[#allocation2 + $0x4c] sm:$0x1] }
 0x4bc   :  { %v15225_v62 = vadd.f32 %v15126_v53, %v8206_v24  ;;  %v15227_v2 = vadd.f32 %v7738_v58, %v7315_v20  ;;  %v9025_v53 = vld [vmem:[#allocation2 + $0x3c] sm:$0x1]  ;;  %v9139_v50 = vor.u32 %v9138_v33, %v9135_v45  ;;  %v9490_v58 = vld [vmem:[#allocation2 + $0x128] sm:$0xf]  ;;  %v9660_v12 = vrot.slane %v9659_v34, 4 }
 0x4bd   :  { %v15234_v32 = vpop.f32.mrf.mxu3  ;;  %v9142_v24 = vshll.u32 %v9025_v53, 16  ;;  %v9679_v45 = vsel %vm12754_vm8, %v9674_v11, %v9678_v26  ;;  %v9488_v33 = vld [vmem:[#allocation2 + $0x120] sm:$0xf]  ;;  %v9695_v60 = vshrl.u32 %v9490_v58, 16  ;;  %v9698_v35 = vshll.u32 %v9490_v58, 16 }
 0x4be   :  { %v9140_v46 = vrot.slane %v9139_v50, 4  ;;  %v9161_v53 = vshrl.u32 %v9028_v52, 16  ;;  %v9665_v21 = vsel %vm12754_vm8, %v9660_v12, %v9664_v30  ;;  %v9764_v50 = vunpack.c.l.b16 %v9679_v45  ;;  %v9489_v26 = vld [vmem:[#allocation2 + $0x124] sm:$0x1] }
 0x4bf   :  { %v9144_v44 = vrot.slane %v9142_v24, 5  ;;  %v9684_v29 = vshll.u32 %v9488_v33, 16  ;;  %v9697_v17 = vrot.slane %v9695_v60, 4  ;;  %v9700_v49 = vrot.slane %v9698_v35, 5  ;;  %v15259_v24 = vpop.f32.mrf.mxu0 }
 0x4c0   :  { %v9149_v34 = vrot.slane %v9147_v1, 4 }
 0x4c1   :  { %v8168_v56 = vpop.f32.mrf.mxu2  ;;  %v9145_v43 = vsel %vm12754_vm8, %v9140_v46, %v9144_v44  ;;  %v9686_v63 = vrot.slane %v9684_v29, 5  ;;  %v9163_v46 = vrot.slane %v9161_v53, 4  ;;  %v12334_v44 = vld [vmem:[#allocation2 + $0x124] sm:$0xf0] }
 0x4c2   :  { %v8207_v39 = vadd.f32 %v8168_v56, %v15110_v48  ;;  %9861 = vmatmul.bf16.gmra.mxu3 %v9773_v3  ;;  %v11847_v48 = vor.u32 %v12333_v13, %v11846_v36  ;;  %v15534_v3 = vld [vmem:[#allocation23_spill] sm:$0xff]  ;;  %v9164_v56 = vshll.u32 %v9028_v52, 16 }
 0x4c3   :  { %v7741_v6 = vpop.f32.mrf.mxu1  ;;  %v7317_v57 = vadd.f32 %v15534_v3, %v15153_v25  ;;  %v9763_v25 = vunpack.c.l.b16 %v9665_v21  ;;  %v9170_v3 = vshll.u32 %v9029_v28, 16  ;;  %v9492_v21 = vld [vmem:[#allocation2 + $0x130] sm:$0xf] }
 0x4c4   :  { %v15237_v7 = vadd.f32 %v15147_v27, %v8207_v39  ;;  %v15239_v20 = vadd.f32 %v7741_v6, %v7316_v9  ;;  %v9131_v27 = vsel %vm12754_vm8, %v9126_v59, %v9130_v8  ;;  %v9681_v39 = vshrl.u32 %v9488_v33, 16  ;;  %v15535_v33 = vld [vmem:[#allocation31_spill] sm:$0xff] }
 0x4c5   :  { %v9308_v6 = vunpack.c.l.b16 %v9145_v43  ;;  %v9307_v36 = vunpack.c.l.b16 %v9131_v27  ;;  %v9152_v59 = vrot.slane %v9150_v16, 5  ;;  %v9774_v58 = vpack.c.b16 %v9764_v50, %v9763_v25  ;;  %v11850_v43 = vld [vmem:[#allocation2 + $0x120] sm:$0xf] }
 0x4c6   :  { %8966 = vmatmul.bf16.gmra.mxu1 %v11847_v48  ;;  %9396 = vmatmul.bf16.gmra.mxu2 %v9320_v4  ;;  %v9027_v4 = vld [vmem:[#allocation2 + $0x44] sm:$0x1]  ;;  %v9491_v48 = vld [vmem:[#allocation2 + $0x12c] sm:$0x1]  ;;  %v9683_v11 = vrot.slane %v9681_v39, 4  ;;  %v9701_v8 = vor.u32 %v9700_v49, %v9697_v17  ;;  %v7318_v60 = vadd.f32 %v15535_v33, %v15167_v18  ;;  %v9690_v16 = vshll.u32 %v9489_v26, 16 }
 0x4c7   :  { %v9321_v52 = vpack.c.b16 %v9308_v6, %v9307_v36  ;;  %v9156_v45 = vshll.u32 %v9027_v4, 16  ;;  %v9704_v35 = vshll.u32 %v9491_v48, 16  ;;  %v9494_v18 = vld [vmem:[#allocation2 + $0x138] sm:$0xf]  ;;  %v9172_v49 = vrot.slane %v9170_v3, 5  ;;  %v15273_v4 = vpop.f32.mrf.mxu0 }
 0x4c8   :  { %v9687_v1 = vor.u32 %v9686_v63, %v9683_v11  ;;  %v9692_v6 = vrot.slane %v9690_v16, 5  ;;  %v9032_v36 = vld [vmem:[#allocation2 + $0x68] sm:$0xf]  ;;  %v9712_v48 = vshll.u32 %v9492_v21, 16  ;;  %v9723_v11 = vshrl.u32 %v9494_v18, 16 }
 0x4c9   :  { %v8171_v0 = vpop.f32.mrf.mxu2  ;;  %v9158_v25 = vrot.slane %v9156_v45, 5  ;;  %v9726_v63 = vshll.u32 %v9494_v18, 16  ;;  %v9192_v33 = vshll.u32 %v9032_v36, 16  ;;  %v11854_v18 = vld [vmem:[#allocation2 + $0x130] sm:$0xf] }
 0x4ca   :  { %v8208_v41 = vadd.f32 %v8171_v0, %v15124_v47  ;;  %v15257_v47 = vpop.f32.mrf.mxu3  ;;  %v9153_v0 = vor.u32 %v9152_v59, %v9149_v34  ;;  %v9688_v39 = vrot.slane %v9687_v1, 4  ;;  %v9709_v59 = vshrl.u32 %v9492_v21, 16 }
 0x4cb   :  { %v7743_v13 = vpop.f32.mrf.mxu1 }
 0x4cc   :  { %v15253_v9 = vadd.f32 %v15157_v14, %v8208_v41  ;;  %v15255_v40 = vadd.f32 %v7743_v13, %v7317_v57  ;;  %v9166_v14 = vrot.slane %v9164_v56, 5  ;;  %v11851_v56 = vor.u32 %v12334_v44, %v11850_v43  ;;  %v9495_v43 = vld [vmem:[#allocation2 + $0x13c] sm:$0x1] }
 0x4cd   :  { %v9702_v13 = vrot.slane %v9701_v8, 4  ;;  %v9154_v29 = vrot.slane %v9153_v0, 4  ;;  %v9693_v8 = vsel %vm12754_vm8, %v9688_v39, %v9692_v6  ;;  %v9189_v44 = vshrl.u32 %v9032_v36, 16  ;;  %v12335_v39 = vld [vmem:[#allocation2 + $0x134] sm:$0xf0] }
 0x4ce   :  { %v9167_v41 = vor.u32 %v9166_v14, %v9163_v46  ;;  %v15536_v14 = vld [vmem:[#allocation32_spill] sm:$0xff]  ;;  %v9728_v0 = vrot.slane %v9726_v63, 5  ;;  %v9194_v6 = vrot.slane %v9192_v33, 5 }
 0x4cf   :  { %v9159_v28 = vsel %vm12754_vm8, %v9154_v29, %v9158_v25  ;;  %v15537_v25 = vld [vmem:[#allocation33_spill] sm:$0xff] }
 0x4d0   :  { %v9168_v17 = vrot.slane %v9167_v41, 4  ;;  %v9309_v3 = vunpack.c.l.b16 %v9159_v28  ;;  %v7320_v36 = vadd.f32 %v15537_v25, %v15197_v61  ;;  %v9031_v61 = vld [vmem:[#allocation2 + $0x64] sm:$0x1] }
 0x4d1   :  { %v8173_v12 = vpop.f32.mrf.mxu2 }
 0x4d2   :  { %v8209_v27 = vadd.f32 %v8173_v12, %v15141_v15  ;;  %9866 = vmatmul.bf16.gmra.mxu3 %v9774_v58  ;;  %v9706_v15 = vrot.slane %v9704_v35, 5  ;;  %v15269_v50 = vpop.f32.mrf.mxu3  ;;  %v7319_v58 = vadd.f32 %v15536_v14, %v15181_v31  ;;  %v9173_v12 = vsel %vm12754_vm8, %v9168_v17, %v9172_v49 }
 0x4d3   :  { %v7746_v30 = vpop.f32.mrf.mxu1  ;;  %v9711_v31 = vrot.slane %v9709_v59, 4  ;;  %v9725_v35 = vrot.slane %v9723_v11, 4  ;;  %v9732_v49 = vshll.u32 %v9495_v43, 16  ;;  %v15538_v43 = vld [vmem:[#allocation34_spill] sm:$0xff] }
 0x4d4   :  { %v15265_v57 = vadd.f32 %v15171_v22, %v8209_v27  ;;  %v15267_v53 = vadd.f32 %v7746_v30, %v7318_v60  ;;  %v9707_v22 = vsel %vm12754_vm8, %v9702_v13, %v9706_v15  ;;  %v9030_v27 = vld [vmem:[#allocation2 + $0x60] sm:$0xf]  ;;  %v9714_v60 = vrot.slane %v9712_v48, 5  ;;  %v9493_v13 = vld [vmem:[#allocation2 + $0x134] sm:$0x1] }
 0x4d5   :  { %v9765_v30 = vunpack.c.l.b16 %v9693_v8  ;;  %v9175_v1 = vshrl.u32 %v9030_v27, 16  ;;  %v9178_v16 = vshll.u32 %v9030_v27, 16  ;;  %v9191_v15 = vrot.slane %v9189_v44, 4  ;;  %v9033_v8 = vld [vmem:[#allocation2 + $0x6c] sm:$0x1] }
 0x4d6   :  { %8971 = vmatmul.bf16.gmra.mxu1 %v11851_v56  ;;  %9401 = vmatmul.bf16.gmra.mxu2 %v9321_v52  ;;  %v9310_v56 = vunpack.c.l.b16 %v9173_v12  ;;  %v9715_v29 = vor.u32 %v9714_v60, %v9711_v31  ;;  %v9729_v17 = vor.u32 %v9728_v0, %v9725_v35  ;;  %v9718_v48 = vshll.u32 %v9493_v13, 16 }
 0x4d7   :  { %v9177_v11 = vrot.slane %v9175_v1, 4  ;;  %v9180_v63 = vrot.slane %v9178_v16, 5  ;;  %v9734_v12 = vrot.slane %v9732_v49, 5  ;;  %v9195_v44 = vor.u32 %v9194_v6, %v9191_v15  ;;  %v9036_v16 = vld [vmem:[#allocation2 + $0x78] sm:$0xf] }
 0x4d8   :  { %v9716_v28 = vrot.slane %v9715_v29, 4  ;;  %v9198_v33 = vshll.u32 %v9033_v8, 16  ;;  %v9184_v35 = vshll.u32 %v9031_v61, 16  ;;  %v7321_v1 = vadd.f32 %v15538_v43, %v15209_v42  ;;  %v9034_v29 = vld [vmem:[#allocation2 + $0x70] sm:$0xf] }
 0x4d9   :  { %v8176_v34 = vpop.f32.mrf.mxu2  ;;  %v9181_v27 = vor.u32 %v9180_v63, %v9177_v11  ;;  %v9196_v0 = vrot.slane %v9195_v44, 4  ;;  %v9217_v49 = vshrl.u32 %v9036_v16, 16  ;;  %v9220_v6 = vshll.u32 %v9036_v16, 16  ;;  %v9037_v44 = vld [vmem:[#allocation2 + $0x7c] sm:$0x1] }
 0x4da   :  { %v8210_v46 = vadd.f32 %v8176_v34, %v15155_v5  ;;  %v9766_v5 = vunpack.c.l.b16 %v9707_v22  ;;  %v15294_v34 = vpop.f32.mrf.mxu0  ;;  %v9200_v13 = vrot.slane %v9198_v33, 5  ;;  %v9203_v25 = vshrl.u32 %v9034_v29, 16  ;;  %v9038_v16 = vld [vmem:[#allocation2 + $0x80] sm:$0xf] }
 0x4db   :  { %v7748_v26 = vpop.f32.mrf.mxu1  ;;  %v9219_v11 = vrot.slane %v9217_v49, 4  ;;  %v9222_v63 = vrot.slane %v9220_v6, 5 }
 0x4dc   :  { %v15285_v52 = vadd.f32 %v15185_v55, %v8210_v46  ;;  %v15287_v45 = vadd.f32 %v7748_v26, %v7319_v58  ;;  %v9775_v41 = vpack.c.b16 %v9766_v5, %v9765_v30  ;;  %v15289_v55 = vpop.f32.mrf.mxu3  ;;  %v11855_v58 = vor.u32 %v12335_v39, %v11854_v18 }
 0x4dd   :  { %v9322_v26 = vpack.c.b16 %v9310_v56, %v9309_v3  ;;  %v9720_v5 = vrot.slane %v9718_v48, 5  ;;  %v9182_v56 = vrot.slane %v9181_v27, 4  ;;  %v9201_v42 = vsel %vm12754_vm8, %v9196_v0, %v9200_v13  ;;  %v9035_v27 = vld [vmem:[#allocation2 + $0x74] sm:$0x1] }
 0x4de   :  { %v9205_v8 = vrot.slane %v9203_v25, 4 }
 0x4e1   :  { %v8178_v21 = vpop.f32.mrf.mxu2 }
 0x4e2   :  { %v8211_v22 = vadd.f32 %v8178_v21, %v15169_v54  ;;  %9871 = vmatmul.bf16.gmra.mxu3 %v9775_v41  ;;  %v9730_v54 = vrot.slane %v9729_v17, 4  ;;  %v15315_v17 = vpop.f32.mrf.mxu0 }
 0x4e3   :  { %v7751_v59 = vpop.f32.mrf.mxu1 }
 0x4e4   :  { %v15297_v46 = vadd.f32 %v15203_v38, %v8211_v22  ;;  %v15299_v14 = vadd.f32 %v7751_v59, %v7320_v36  ;;  %v9721_v38 = vsel %vm12754_vm8, %v9716_v28, %v9720_v5  ;;  %v9735_v60 = vsel %vm12754_vm8, %v9730_v54, %v9734_v12  ;;  %v15308_v41 = vpop.f32.mrf.mxu3 }
 0x4e5   :  { %v9767_v18 = vunpack.c.l.b16 %v9721_v38  ;;  %v9768_v39 = vunpack.c.l.b16 %v9735_v60  ;;  %v9206_v36 = vshll.u32 %v9034_v29, 16  ;;  %v9312_v59 = vunpack.c.l.b16 %v9201_v42 }
 0x4e6   :  { %8976 = vmatmul.bf16.gmra.mxu1 %v11855_v58  ;;  %9406 = vmatmul.bf16.gmra.mxu2 %v9322_v26  ;;  %v9223_v5 = vor.u32 %v9222_v63, %v9219_v11  ;;  %v9226_v38 = vshll.u32 %v9037_v44, 16  ;;  %v9041_v63 = vld [vmem:[#allocation2 + $0x8c] sm:$0x1] }
 0x4e7   :  { %v9208_v28 = vrot.slane %v9206_v36, 5 }
 0x4e9   :  { %v8181_v31 = vpop.f32.mrf.mxu2 }
 0x4ea   :  { %v8212_v30 = vadd.f32 %v8181_v31, %v15183_v37  ;;  %v9186_v37 = vrot.slane %v9184_v35, 5  ;;  %v15327_v33 = vpop.f32.mrf.mxu0  ;;  %v9209_v31 = vor.u32 %v9208_v28, %v9205_v8  ;;  %v9224_v35 = vrot.slane %v9223_v5, 4 }
 0x4eb   :  { %v7753_v3 = vpop.f32.mrf.mxu1  ;;  %v9254_v28 = vshll.u32 %v9041_v63, 16 }
 0x4ec   :  { %v15311_v15 = vadd.f32 %v15215_v23, %v8212_v30  ;;  %v15313_v21 = vadd.f32 %v7753_v3, %v7321_v1  ;;  %v9187_v22 = vsel %vm12754_vm8, %v9182_v56, %v9186_v37  ;;  %v9776_v23 = vpack.c.b16 %v9768_v39, %v9767_v18  ;;  %v15325_v61 = vpop.f32.mrf.mxu3  ;;  %v9040_v30 = vld [vmem:[#allocation2 + $0x88] sm:$0xf] }
 0x4ed   :  { %v9311_v26 = vunpack.c.l.b16 %v9187_v22  ;;  %v9210_v43 = vrot.slane %v9209_v31, 4  ;;  %v9245_v13 = vshrl.u32 %v9040_v30, 16  ;;  %v9248_v18 = vshll.u32 %v9040_v30, 16  ;;  %v9042_v31 = vld [vmem:[#allocation2 + $0x90] sm:$0xf] }
 0x4ee   :  { %v9231_v37 = vshrl.u32 %v9038_v16, 16  ;;  %v9259_v30 = vshrl.u32 %v9042_v31, 16 }
 0x4ef   :  { %v9323_v12 = vpack.c.b16 %v9312_v59, %v9311_v26  ;;  %v9250_v22 = vrot.slane %v9248_v18, 5 }
 0x4f0   :  { %v9261_v18 = vrot.slane %v9259_v30, 4 }
 0x4f1   :  { %v8183_v48 = vpop.f32.mrf.mxu2 }
 0x4f2   :  { %v8213_v58 = vadd.f32 %v8183_v48, %v15199_v51  ;;  %9876 = vmatmul.bf16.gmra.mxu3 %v9776_v23  ;;  %v9212_v51 = vshll.u32 %v9035_v27, 16  ;;  %v15339_v49 = vpop.f32.mrf.mxu0  ;;  %v9233_v23 = vrot.slane %v9231_v37, 4 }
 0x4f4   :  { %v15323_v54 = vadd.f32 %v15234_v32, %v8213_v58  ;;  %v9228_v32 = vrot.slane %v9226_v38, 5  ;;  %v9214_v3 = vrot.slane %v9212_v51, 5  ;;  %v15335_v39 = vpop.f32.mrf.mxu3  ;;  %v9039_v58 = vld [vmem:[#allocation2 + $0x84] sm:$0x1]  ;;  %v9044_v38 = vld [vmem:[#allocation2 + $0x98] sm:$0xf] }
 0x4f6   :  { %9411 = vmatmul.bf16.gmra.mxu2 %v9323_v12  ;;  %v9229_v56 = vsel %vm12754_vm8, %v9224_v35, %v9228_v32  ;;  %v9215_v29 = vsel %vm12754_vm8, %v9210_v43, %v9214_v3  ;;  %v9240_v12 = vshll.u32 %v9039_v58, 16  ;;  %v9262_v32 = vshll.u32 %v9042_v31, 16  ;;  %v8942_v58 = vpop.f32.mrf.mxu1 }
 0x4f7   :  { %v9314_v42 = vunpack.c.l.b16 %v9229_v56  ;;  %v9313_v36 = vunpack.c.l.b16 %v9215_v29  ;;  %v9276_v3 = vshll.u32 %v9044_v38, 16 }
 0x4f8   :  { %v9264_v29 = vrot.slane %v9262_v32, 5 }
 0x4f9   :  { %v8186_v60 = vpop.f32.mrf.mxu2  ;;  %v9324_v11 = vpack.c.b16 %v9314_v42, %v9313_v36  ;;  %v9043_v36 = vld [vmem:[#allocation2 + $0x94] sm:$0x1] }
 0x4fa   :  { %v8214_v0 = vadd.f32 %v8186_v60, %v15211_v10  ;;  %v9234_v10 = vshll.u32 %v9038_v16, 16  ;;  %v15346_v60 = vpop.f32.mrf.mxu0  ;;  %v9273_v16 = vshrl.u32 %v9044_v38, 16 }
 0x4fc   :  { %v15331_v1 = vadd.f32 %v15257_v47, %v8214_v0  ;;  %v9247_v47 = vrot.slane %v9245_v13, 4  ;;  %v9236_v59 = vrot.slane %v9234_v10, 5  ;;  %v8523_v44 = vpop.f32.mrf.mxu3  ;;  %v9242_v0 = vrot.slane %v9240_v12, 5 }
 0x4fd   :  { %v9275_v37 = vrot.slane %v9273_v16, 4  ;;  %v9278_v10 = vrot.slane %v9276_v3, 5 }
 0x4fe   :  { %v9251_v26 = vor.u32 %v9250_v22, %v9247_v47  ;;  %v9237_v8 = vor.u32 %v9236_v59, %v9233_v23  ;;  %v9265_v59 = vor.u32 %v9264_v29, %v9261_v18  ;;  %v8944_v30 = vpop.f32.mrf.mxu1 }
 0x500   :  { %v9252_v27 = vrot.slane %v9251_v26, 4  ;;  %v9238_v51 = vrot.slane %v9237_v8, 4  ;;  %v9268_v26 = vshll.u32 %v9043_v36, 16 }
 0x501   :  { %v8188_v6 = vpop.f32.mrf.mxu2 }
 0x502   :  { %v8215_v25 = vadd.f32 %v8188_v6, %v15227_v2  ;;  %v9243_v56 = vsel %vm12754_vm8, %v9238_v51, %v9242_v0  ;;  %v9045_v6 = vld [vmem:[#allocation2 + $0x9c] sm:$0x1]  ;;  %v15359_v23 = vpop.f32.mrf.mxu0 }
 0x503   :  { %v9315_v42 = vunpack.c.l.b16 %v9243_v56  ;;  %v9282_v63 = vshll.u32 %v9045_v6, 16 }
 0x504   :  { %v15343_v48 = vadd.f32 %v15269_v50, %v8215_v25  ;;  %v9256_v50 = vrot.slane %v9254_v28, 5  ;;  %v8525_v47 = vpop.f32.mrf.mxu3  ;;  %v9266_v28 = vrot.slane %v9265_v59, 4 }
 0x506   :  { %9416 = vmatmul.bf16.gmra.mxu2 %v9324_v11  ;;  %v9257_v43 = vsel %vm12754_vm8, %v9252_v27, %v9256_v50  ;;  %v9279_v11 = vor.u32 %v9278_v10, %v9275_v37  ;;  %v9270_v27 = vrot.slane %v9268_v26, 5 }
 0x508   :  { %v9280_v12 = vrot.slane %v9279_v11, 4 }
 0x509   :  { %v8191_v5 = vpop.f32.mrf.mxu2 }
 0x50a   :  { %v8216_v2 = vadd.f32 %v8191_v5, %v15239_v20  ;;  %v9316_v20 = vunpack.c.l.b16 %v9257_v43  ;;  %v10164_v51 = vpop.f32.mrf.mxu0 }
 0x50c   :  { %v15349_v35 = vadd.f32 %v15289_v55, %v8216_v2  ;;  %v9325_v25 = vpack.c.b16 %v9316_v20, %v9315_v42  ;;  %v9842_v31 = vpop.f32.mrf.mxu3  ;;  %v9271_v2 = vsel %vm12754_vm8, %v9266_v28, %v9270_v27 }
 0x50d   :  { %v9317_v50 = vunpack.c.l.b16 %v9271_v2 }
 0x511   :  { %v8193_v13 = vpop.f32.mrf.mxu2 }
 0x512   :  { %v8217_v55 = vadd.f32 %v8193_v13, %v15255_v40  ;;  %v9284_v40 = vrot.slane %v9282_v63, 5  ;;  %v10166_v3 = vpop.f32.mrf.mxu0  ;;  %v8947_v13 = vpop.f32.mrf.mxu1 }
 0x514   :  { %v15357_v22 = vadd.f32 %v15308_v41, %v8217_v55  ;;  %v9285_v38 = vsel %vm12754_vm8, %v9280_v12, %v9284_v40 }
 0x515   :  { %v9318_v0 = vunpack.c.l.b16 %v9285_v38 }
 0x516   :  { %9421 = vmatmul.bf16.gmra.mxu2 %v9325_v25 }
 0x517   :  { %v9326_v16 = vpack.c.b16 %v9318_v0, %v9317_v50 }
 0x519   :  { %v8196_v8 = vpop.f32.mrf.mxu2 }
 0x51a   :  { %v8218_v5 = vadd.f32 %v8196_v8, %v15267_v53  ;;  %v10169_v10 = vpop.f32.mrf.mxu0 }
 0x51c   :  { %v15363_v41 = vadd.f32 %v15325_v61, %v8218_v5  ;;  %v9844_v61 = vpop.f32.mrf.mxu3 }
 0x521   :  { %v8198_v43 = vpop.f32.mrf.mxu2 }
 0x522   :  { %v8219_v32 = vadd.f32 %v8198_v43, %v15287_v45  ;;  %v8949_v45 = vpop.f32.mrf.mxu1  ;;  %v10171_v11 = vpop.f32.mrf.mxu0 }
 0x524   :  { %v15371_v53 = vadd.f32 %v15335_v39, %v8219_v32  ;;  %v9847_v18 = vpop.f32.mrf.mxu3  ;;  %v15539_v39 = vld [vmem:[#allocation35_spill] sm:$0xff] }
 0x525   :  { %v8755_v42 = vadd.f32 %v15539_v39, %v15225_v62  ;;  %v15541_v62 = vld [vmem:[#allocation37_spill] sm:$0xff] }
 0x526   :  { %9426 = vmatmul.bf16.gmra.mxu2 %v9326_v16  ;;  %v8757_v2 = vadd.f32 %v15541_v62, %v15253_v9 }
 0x527   :  { %v8982_v25 = vadd.f32 %v8942_v58, %v8755_v42 }
 0x528   :  { %v8984_v43 = vadd.f32 %v8947_v13, %v8757_v2  ;;  %v15543_v13 = vld [vmem:[#allocation39_spill] sm:$0xff]  ;;  %v15545_v2 = vld [vmem:[#allocation41_spill] sm:$0xff] }
 0x529   :  { %v8201_v56 = vpop.f32.mrf.mxu2  ;;  %v8759_v42 = vadd.f32 %v15543_v13, %v15285_v52 }
 0x52a   :  { %v8220_v20 = vadd.f32 %v8201_v56, %v15299_v14  ;;  %v15540_v14 = vld [vmem:[#allocation36_spill] sm:$0xff]  ;;  %v8952_v63 = vpop.f32.mrf.mxu1  ;;  %v10174_v27 = vpop.f32.mrf.mxu0 }
 0x52c   :  { %v15374_v19 = vadd.f32 %v8523_v44, %v8220_v20  ;;  %v9849_v36 = vpop.f32.mrf.mxu3  ;;  %v8756_v44 = vadd.f32 %v15540_v14, %v15237_v7 }
 0x52e   :  { %v8983_v26 = vadd.f32 %v8944_v30, %v8756_v44  ;;  %v8986_v44 = vadd.f32 %v8952_v63, %v8759_v42 }
 0x531   :  { %v8203_v29 = vpop.f32.mrf.mxu2 }
 0x532   :  { %v8221_v37 = vadd.f32 %v8203_v29, %v15313_v21  ;;  %v8954_v50 = vpop.f32.mrf.mxu1 }
 0x534   :  { %v15377_v55 = vadd.f32 %v8525_v47, %v8221_v37  ;;  %v9852_v40 = vpop.f32.mrf.mxu3 }
 0x539   :  { %v9392_v6 = vpop.f32.mrf.mxu2 }
 0x53a   :  { %v9432_v59 = vadd.f32 %v9392_v6, %v8982_v25  ;;  %v8957_v20 = vpop.f32.mrf.mxu1 }
 0x53c   :  { %v9882_v8 = vadd.f32 %v9842_v31, %v9432_v59  ;;  %v15542_v31 = vld [vmem:[#allocation38_spill] sm:$0xff]  ;;  %v9854_v30 = vpop.f32.mrf.mxu3 }
 0x53e   :  { %v10204_v12 = vadd.f32 %v10164_v51, %v9882_v8  ;;  %v8758_v51 = vadd.f32 %v15542_v31, %v15265_v57 }
 0x540   :  { %v10252_v58 = vmax.f32 %v10204_v12, 0.0  ;;  %v8985_v16 = vadd.f32 %v8949_v45, %v8758_v51 }
 0x541   :  { %v9394_v28 = vpop.f32.mrf.mxu2 }
 0x542   :  { %v9433_v21 = vadd.f32 %v9394_v28, %v8983_v26  ;;  %v8959_v45 = vpop.f32.mrf.mxu1 }
 0x544   :  { %v9883_v47 = vadd.f32 %v9844_v61, %v9433_v21  ;;  %v9857_v59 = vpop.f32.mrf.mxu3 }
 0x546   :  { %v10205_v5 = vadd.f32 %v10166_v3, %v9883_v47  ;;  %v10176_v3 = vpop.f32.mrf.mxu0 }
 0x548   :  { %v10253_v38 = vmax.f32 %v10205_v5, 0.0 }
 0x549   :  { %v9397_v0 = vpop.f32.mrf.mxu2 }
 0x54a   :  { %v12371_v32 = vpack.c.bf16 %v10253_v38, %v10252_v58  ;;  %v9434_v7 = vadd.f32 %v9397_v0, %v8984_v43  ;;  %v8962_v62 = vpop.f32.mrf.mxu1  ;;  %v8761_v58 = vadd.f32 %v15545_v2, %v15311_v15 }
 0x54c   :  { %12372 = vst [vmem:[%s15440_s5] sm:$0xff] %v12371_v32   ;;  %v9884_v61 = vadd.f32 %v9847_v18, %v9434_v7  ;;  %v9859_v21 = vpop.f32.mrf.mxu3  ;;  %v8988_v32 = vadd.f32 %v8957_v20, %v8761_v58 }
 0x54e   :  { %v10206_v29 = vadd.f32 %v10169_v10, %v9884_v61  ;;  %v10179_v57 = vpop.f32.mrf.mxu0  ;;  %v15544_v10 = vld [vmem:[#allocation40_spill] sm:$0xff] }
 0x550   :  { %v10254_v6 = vmax.f32 %v10206_v29, 0.0  ;;  %v8763_v29 = vadd.f32 %v15259_v24, %v15331_v1 }
 0x551   :  { %v9399_v56 = vpop.f32.mrf.mxu2 }
 0x552   :  { %v9435_v9 = vadd.f32 %v9399_v56, %v8985_v16  ;;  %v8964_v16 = vpop.f32.mrf.mxu1 }
 0x554   :  { %v9885_v37 = vadd.f32 %v9849_v36, %v9435_v9  ;;  %v8760_v36 = vadd.f32 %v15544_v10, %v15297_v46 }
 0x556   :  { %v10207_v39 = vadd.f32 %v10171_v11, %v9885_v37  ;;  %v8987_v11 = vadd.f32 %v8954_v50, %v8760_v36  ;;  %v10181_v5 = vpop.f32.mrf.mxu0 }
 0x558   :  { %v10255_v25 = vmax.f32 %v10207_v39, 0.0 }
 0x559   :  { %v9402_v14 = vpop.f32.mrf.mxu2 }
 0x55a   :  { %v12376_v26 = vpack.c.bf16 %v10255_v25, %v10254_v6  ;;  %v9436_v18 = vadd.f32 %v9402_v14, %v8986_v44  ;;  %v8990_v6 = vadd.f32 %v8962_v62, %v8763_v29  ;;  %v8764_v14 = vadd.f32 %v15273_v4, %v15343_v48 }
 0x55c   :  { %12408 = vst [vmem:[%s15440_s5 + $0x8] sm:$0xff] %v12376_v26   ;;  %v9886_v8 = vadd.f32 %v9852_v40, %v9436_v18  ;;  %v9862_v40 = vpop.f32.mrf.mxu3  ;;  %v8991_v44 = vadd.f32 %v8964_v16, %v8764_v14  ;;  %v8770_v14 = vadd.f32 %v15359_v23, %v15377_v55 }
 0x55e   :  { %v10208_v12 = vadd.f32 %v10174_v27, %v9886_v8  ;;  %v15546_v27 = vld [vmem:[#allocation42_spill] sm:$0xff]  ;;  %v10184_v31 = vpop.f32.mrf.mxu0  ;;  %v8765_v8 = vadd.f32 %v15294_v34, %v15349_v35 }
 0x55f   :  { %v8762_v50 = vadd.f32 %v15546_v27, %v15323_v54  ;;  %v8967_v54 = vpop.f32.mrf.mxu1 }
 0x560   :  { %v10256_v38 = vmax.f32 %v10208_v12, 0.0  ;;  %v8992_v12 = vadd.f32 %v8967_v54, %v8765_v8 }
 0x561   :  { %v9404_v28 = vpop.f32.mrf.mxu2  ;;  %v8989_v51 = vadd.f32 %v8959_v45, %v8762_v50 }
 0x562   :  { %v9437_v52 = vadd.f32 %v9404_v28, %v8987_v11 }
 0x564   :  { %v9887_v47 = vadd.f32 %v9854_v30, %v9437_v52  ;;  %v9864_v20 = vpop.f32.mrf.mxu3 }
 0x566   :  { %v10209_v63 = vadd.f32 %v10176_v3, %v9887_v47  ;;  %v10186_v13 = vpop.f32.mrf.mxu0 }
 0x567   :  { %v8969_v36 = vpop.f32.mrf.mxu1 }
 0x568   :  { %v10257_v0 = vmax.f32 %v10209_v63, 0.0  ;;  %v8766_v63 = vadd.f32 %v15315_v17, %v15357_v22  ;;  %v8768_v22 = vadd.f32 %v15339_v49, %v15371_v53 }
 0x569   :  { %v9407_v43 = vpop.f32.mrf.mxu2 }
 0x56a   :  { %v12381_v7 = vpack.c.bf16 %v10257_v0, %v10256_v38  ;;  %v9438_v46 = vadd.f32 %v9407_v43, %v8988_v32  ;;  %v8993_v2 = vadd.f32 %v8969_v36, %v8766_v63 }
 0x56c   :  { %12409 = vst [vmem:[%s15440_s5 + $0x10] sm:$0xff] %v12381_v7   ;;  %v9888_v30 = vadd.f32 %v9857_v59, %v9438_v46  ;;  %v8767_v46 = vadd.f32 %v15327_v33, %v15363_v41 }
 0x56e   :  { %v10210_v3 = vadd.f32 %v10179_v57, %v9888_v30  ;;  %v9867_v57 = vpop.f32.mrf.mxu3  ;;  %v10189_v1 = vpop.f32.mrf.mxu0 }
 0x56f   :  { %v8972_v62 = vpop.f32.mrf.mxu1 }
 0x570   :  { %v10258_v37 = vmax.f32 %v10210_v3, 0.0 }
 0x571   :  { %v9409_v61 = vpop.f32.mrf.mxu2 }
 0x572   :  { %v9439_v15 = vadd.f32 %v9409_v61, %v8989_v51  ;;  %v8994_v51 = vadd.f32 %v8972_v62, %v8767_v46 }
 0x574   :  { %v9889_v56 = vadd.f32 %v9859_v21, %v9439_v15 }
 0x576   :  { %v10211_v9 = vadd.f32 %v10181_v5, %v9889_v56  ;;  %v9869_v5 = vpop.f32.mrf.mxu3  ;;  %v10191_v48 = vpop.f32.mrf.mxu0 }
 0x577   :  { %v8974_v50 = vpop.f32.mrf.mxu1 }
 0x578   :  { %v10259_v39 = vmax.f32 %v10211_v9, 0.0  ;;  %v8995_v61 = vadd.f32 %v8974_v50, %v8768_v22 }
 0x579   :  { %v9412_v42 = vpop.f32.mrf.mxu2 }
 0x57a   :  { %v12386_v25 = vpack.c.bf16 %v10259_v39, %v10258_v37  ;;  %v9440_v59 = vadd.f32 %v9412_v42, %v8990_v6  ;;  %v8769_v37 = vadd.f32 %v15346_v60, %v15374_v19 }
 0x57c   :  { %12410 = vst [vmem:[%s15440_s5 + $0x18] sm:$0xff] %v12386_v25   ;;  %v9890_v26 = vadd.f32 %v9862_v40, %v9440_v59 }
 0x57e   :  { %v10212_v45 = vadd.f32 %v10184_v31, %v9890_v26  ;;  %v9872_v43 = vpop.f32.mrf.mxu3  ;;  %v10194_v7 = vpop.f32.mrf.mxu0 }
 0x57f   :  { %v8977_v41 = vpop.f32.mrf.mxu1 }
 0x580   :  { %v10260_v28 = vmax.f32 %v10212_v45, 0.0  ;;  %v8996_v25 = vadd.f32 %v8977_v41, %v8769_v37 }
 0x581   :  { %v9414_v18 = vpop.f32.mrf.mxu2 }
 0x582   :  { %v9441_v24 = vadd.f32 %v9414_v18, %v8991_v44 }
 0x584   :  { %v9891_v10 = vadd.f32 %v9864_v20, %v9441_v24 }
 0x586   :  { %v10213_v11 = vadd.f32 %v10186_v13, %v9891_v10  ;;  %v9874_v16 = vpop.f32.mrf.mxu3  ;;  %v10196_v3 = vpop.f32.mrf.mxu0 }
 0x587   :  { %v8979_v59 = vpop.f32.mrf.mxu1 }
 0x588   :  { %v10261_v52 = vmax.f32 %v10213_v11, 0.0  ;;  %v8997_v44 = vadd.f32 %v8979_v59, %v8770_v14 }
 0x589   :  { %v9417_v21 = vpop.f32.mrf.mxu2 }
 0x58a   :  { %v12391_v47 = vpack.c.bf16 %v10261_v52, %v10260_v28  ;;  %v9442_v4 = vadd.f32 %v9417_v21, %v8992_v12 }
 0x58c   :  { %12411 = vst [vmem:[%s15440_s5 + $0x20] sm:$0xff] %v12391_v47   ;;  %v9892_v58 = vadd.f32 %v9867_v57, %v9442_v4 }
 0x58e   :  { %v10214_v35 = vadd.f32 %v10189_v1, %v9892_v58  ;;  %v9877_v42 = vpop.f32.mrf.mxu3  ;;  %v10199_v49 = vpop.f32.mrf.mxu0 }
 0x590   :  { %v10262_v40 = vmax.f32 %v10214_v35, 0.0 }
 0x591   :  { %v9419_v38 = vpop.f32.mrf.mxu2 }
 0x592   :  { %v9443_v34 = vadd.f32 %v9419_v38, %v8993_v2 }
 0x594   :  { %v9893_v0 = vadd.f32 %v9869_v5, %v9443_v34 }
 0x596   :  { %v10215_v32 = vadd.f32 %v10191_v48, %v9893_v0  ;;  %v9879_v19 = vpop.f32.mrf.mxu3  ;;  %v10201_v1 = vpop.f32.mrf.mxu0 }
 0x598   :  { %v10263_v27 = vmax.f32 %v10215_v32, 0.0 }
 0x599   :  { %v9422_v31 = vpop.f32.mrf.mxu2 }
 0x59a   :  { %v12396_v30 = vpack.c.bf16 %v10263_v27, %v10262_v40  ;;  %v9444_v17 = vadd.f32 %v9422_v31, %v8994_v51 }
 0x59c   :  { %12412 = vst [vmem:[%s15440_s5 + $0x28] sm:$0xff] %v12396_v30   ;;  %v9894_v15 = vadd.f32 %v9872_v43, %v9444_v17 }
 0x59e   :  { %v10216_v9 = vadd.f32 %v10194_v7, %v9894_v15 }
 0x5a0   :  { %v10264_v39 = vmax.f32 %v10216_v9, 0.0 }
 0x5a1   :  { %v9424_v56 = vpop.f32.mrf.mxu2 }
 0x5a2   :  { %v9445_v33 = vadd.f32 %v9424_v56, %v8995_v61 }
 0x5a4   :  { %v9895_v20 = vadd.f32 %v9874_v16, %v9445_v33 }
 0x5a6   :  { %v10217_v29 = vadd.f32 %v10196_v3, %v9895_v20 }
 0x5a8   :  { %v10265_v13 = vmax.f32 %v10217_v29, 0.0 }
 0x5a9   :  { %v9427_v6 = vpop.f32.mrf.mxu2 }
 0x5aa   :  { %v12401_v54 = vpack.c.bf16 %v10265_v13, %v10264_v39  ;;  %v9446_v53 = vadd.f32 %v9427_v6, %v8996_v25 }
 0x5ac   :  { %12413 = vst [vmem:[%s15440_s5 + $0x30] sm:$0xff] %v12401_v54   ;;  %v9896_v26 = vadd.f32 %v9877_v42, %v9446_v53 }
 0x5ae   :  { %v10218_v18 = vadd.f32 %v10199_v49, %v9896_v26 }
 0x5b0   :  { %v10266_v10 = vmax.f32 %v10218_v18, 0.0 }
 0x5b1   :  { %v9429_v57 = vpop.f32.mrf.mxu2 }
 0x5b2   :  { %v9447_v60 = vadd.f32 %v9429_v57, %v8997_v44 }
 0x5b4   :  { %v9897_v24 = vadd.f32 %v9879_v19, %v9447_v60 }
 0x5b6   :  { %v10219_v45 = vadd.f32 %v10201_v1, %v9897_v24 }
 0x5b8   :  { %v10267_v36 = vmax.f32 %v10219_v45, 0.0 }
 0x5ba   :  { %v12406_v11 = vpack.c.bf16 %v10267_v36, %v10266_v10 }
 0x5bc   :  { %12414 = vst [vmem:[%s15440_s5 + $0x38] sm:$0xff] %v12406_v11  }

// kernel: allcnnc_short_forward.3
= control target key start
LH: loop header
LB: loop body
LE: loop exit
PB: predicated region body
PF: predicated region fallthrough
CT: control target
= control target key end

     0   :  { %s9507_s0 = inlined_call_operand.vmem [shape: bf16[2,8192], index: 0, kind: input, shape index: {}]   ;;  %s9508_s1 = inlined_call_operand.vmem [shape: bf16[8192,128], index: 1, kind: input, shape index: {}]   ;;  %s9509_s2 = inlined_call_operand.vmem [shape: f32[1,128], index: 2, kind: input, shape index: {}]   ;;  %s9510_s3 = inlined_call_operand.vmem [shape: bf16[128,128], index: 3, kind: input, shape index: {}]   ;;  %s9511_s4 = inlined_call_operand.vmem [shape: f32[1,128], index: 4, kind: input, shape index: {}]   ;;  %s9512_s5 = inlined_call_operand.hbm [shape: f32[2,128], index: 5, kind: output, shape index: {}]  }
   0x1   :  { %v7322_v0 = vld [vmem:[%s9508_s1 + $0x38] sm:$0xff]  ;;  %v7321_v4 = vld [vmem:[%s9508_s1 + $0x30] sm:$0xff]  ;;  %v7320_v8 = vld [vmem:[%s9508_s1 + $0x28] sm:$0xff] }
   0x2   :  { %v7330_v1 = vld [vmem:[%s9508_s1 + $0x78] sm:$0xff]  ;;  %4273 = vmatpush.bf16.msra.mxu0 %v7322_v0  ;;  %v7329_v5 = vld [vmem:[%s9508_s1 + $0x70] sm:$0xff]  ;;  %v7328_v9 = vld [vmem:[%s9508_s1 + $0x68] sm:$0xff] }
   0x3   :  { %v7338_v2 = vld [vmem:[%s9508_s1 + $0xb8] sm:$0xff]  ;;  %4286 = vmatpush.bf16.msra.mxu1 %v7330_v1  ;;  %v7337_v6 = vld [vmem:[%s9508_s1 + $0xb0] sm:$0xff]  ;;  %v7336_v10 = vld [vmem:[%s9508_s1 + $0xa8] sm:$0xff] }
   0x4   :  { %v7346_v3 = vld [vmem:[%s9508_s1 + $0xf8] sm:$0xff]  ;;  %4299 = vmatpush.bf16.msra.mxu2 %v7338_v2  ;;  %v7345_v7 = vld [vmem:[%s9508_s1 + $0xf0] sm:$0xff]  ;;  %v7344_v11 = vld [vmem:[%s9508_s1 + $0xe8] sm:$0xff] }
   0x5   :  { %4312 = vmatpush.bf16.msra.mxu3 %v7346_v3  ;;  %v7319_v12 = vld [vmem:[%s9508_s1 + $0x20] sm:$0xff]  ;;  %v7318_v16 = vld [vmem:[%s9508_s1 + $0x18] sm:$0xff]  ;;  %v7317_v20 = vld [vmem:[%s9508_s1 + $0x10] sm:$0xff] }
   0x6   :  { %4274 = vmatpush.bf16.msra.mxu0 %v7321_v4  ;;  %v7327_v13 = vld [vmem:[%s9508_s1 + $0x60] sm:$0xff]  ;;  %v7326_v17 = vld [vmem:[%s9508_s1 + $0x58] sm:$0xff]  ;;  %v7325_v21 = vld [vmem:[%s9508_s1 + $0x50] sm:$0xff] }
   0x7   :  { %4287 = vmatpush.bf16.msra.mxu1 %v7329_v5  ;;  %v7335_v14 = vld [vmem:[%s9508_s1 + $0xa0] sm:$0xff]  ;;  %v7334_v18 = vld [vmem:[%s9508_s1 + $0x98] sm:$0xff]  ;;  %v7333_v23 = vld [vmem:[%s9508_s1 + $0x90] sm:$0xff] }
   0x8   :  { %4300 = vmatpush.bf16.msra.mxu2 %v7337_v6  ;;  %v7343_v15 = vld [vmem:[%s9508_s1 + $0xe0] sm:$0xff]  ;;  %v7342_v19 = vld [vmem:[%s9508_s1 + $0xd8] sm:$0xff]  ;;  %v7341_v24 = vld [vmem:[%s9508_s1 + $0xd0] sm:$0xff] }
   0x9   :  { %4313 = vmatpush.bf16.msra.mxu3 %v7345_v7  ;;  %v21_v22 = vld [vmem:[%s9507_s0] sm:$0xff] }
   0xa   :  { %4275 = vmatpush.bf16.msra.mxu0 %v7320_v8  ;;  %1058 = vst [vmem:[#allocation1] ss:$9 sm:$0xff] %v21_v22 }
   0xb   :  { %4288 = vmatpush.bf16.msra.mxu1 %v7328_v9 }
   0xc   :  { %4301 = vmatpush.bf16.msra.mxu2 %v7336_v10 }
   0xd   :  { %4314 = vmatpush.bf16.msra.mxu3 %v7344_v11 }
   0xe   :  { %4276 = vmatpush.bf16.msra.mxu0 %v7319_v12 }
   0xf   :  { %4289 = vmatpush.bf16.msra.mxu1 %v7327_v13 }
  0x10   :  { %4302 = vmatpush.bf16.msra.mxu2 %v7335_v14 }
  0x11   :  { %4315 = vmatpush.bf16.msra.mxu3 %v7343_v15 }
  0x12   :  { %4277 = vmatpush.bf16.msra.mxu0 %v7318_v16 }
  0x13   :  { %4290 = vmatpush.bf16.msra.mxu1 %v7326_v17 }
  0x14   :  { %4303 = vmatpush.bf16.msra.mxu2 %v7334_v18 }
  0x15   :  { %4316 = vmatpush.bf16.msra.mxu3 %v7342_v19 }
  0x16   :  { %10 = vsyncpa [#allocation3], 0  ;;  %4278 = vmatpush.bf16.msra.mxu0 %v7317_v20  ;;  %v7316_v25 = vld [vmem:[%s9508_s1 + $0x8] sm:$0xff]  ;;  %v7315_v29 = vld [vmem:[%s9508_s1] sm:$0xff]  ;;  %vm5193_vm1 = vcmask 1041408   ;;  %s5226_s21 = sshll.u32 %s9512_s5, 4  ;;  %s5227_s21 = int_to_ptr.hbm [resolvable:$true] %s5226_s21 }
  0x17   :  { %4291 = vmatpush.bf16.msra.mxu1 %v7325_v21  ;;  %v7324_v26 = vld [vmem:[%s9508_s1 + $0x48] sm:$0xff]  ;;  %v7323_v30 = vld [vmem:[%s9508_s1 + $0x40] sm:$0xff]  ;;  %v7354_v33 = vld [vmem:[%s9508_s1 + $0x138] sm:$0xff] }
  0x18   :  { %4304 = vmatpush.bf16.msra.mxu2 %v7333_v23  ;;  %v7332_v27 = vld [vmem:[%s9508_s1 + $0x88] sm:$0xff]  ;;  %v7331_v31 = vld [vmem:[%s9508_s1 + $0x80] sm:$0xff]  ;;  %v7362_v34 = vld [vmem:[%s9508_s1 + $0x178] sm:$0xff] }
  0x19   :  { %4317 = vmatpush.bf16.msra.mxu3 %v7341_v24  ;;  %v7340_v28 = vld [vmem:[%s9508_s1 + $0xc8] sm:$0xff]  ;;  %v7339_v32 = vld [vmem:[%s9508_s1 + $0xc0] sm:$0xff]  ;;  %v7370_v35 = vld [vmem:[%s9508_s1 + $0x1b8] sm:$0xff] }
  0x1a   :  { %4279 = vmatpush.bf16.msra.mxu0 %v7316_v25  ;;  %v7378_v36 = vld [vmem:[%s9508_s1 + $0x1f8] sm:$0xff]  ;;  %v7353_v37 = vld [vmem:[%s9508_s1 + $0x130] sm:$0xff]  ;;  %v1059_v39 = vld [vmem:[#allocation1] sm:$0xff] }
  0x1b   :  { %4292 = vmatpush.bf16.msra.mxu1 %v7324_v26  ;;  %v1061_v38 = vld [vmem:[#allocation1 + $0x12] sm:$0xff]  ;;  %v1062_v41 = vld [vmem:[#allocation1 + $0x1b] sm:$0xff]  ;;  %v1060_v42 = vld [vmem:[#allocation1 + $0x9] sm:$0xff] }
  0x1c   :  { %4305 = vmatpush.bf16.msra.mxu2 %v7332_v27  ;;  %v7361_v40 = vld [vmem:[%s9508_s1 + $0x170] sm:$0xff]  ;;  %v7352_v45 = vld [vmem:[%s9508_s1 + $0x128] sm:$0xff]  ;;  %v7351_v49 = vld [vmem:[%s9508_s1 + $0x120] sm:$0xff] }
  0x1d   :  { %4318 = vmatpush.bf16.msra.mxu3 %v7340_v28  ;;  %v7369_v43 = vld [vmem:[%s9508_s1 + $0x1b0] sm:$0xff]  ;;  %v7360_v46 = vld [vmem:[%s9508_s1 + $0x168] sm:$0xff]  ;;  %v7359_v50 = vld [vmem:[%s9508_s1 + $0x160] sm:$0xff] }
  0x1e   :  { %4280 = vmatpush.bf16.msra.mxu0 %v7315_v29  ;;  %v7377_v44 = vld [vmem:[%s9508_s1 + $0x1f0] sm:$0xff]  ;;  %v7368_v47 = vld [vmem:[%s9508_s1 + $0x1a8] sm:$0xff]  ;;  %v1066_v54 = vld [vmem:[#allocation1 + $0x3f] sm:$0xff] }
  0x1f   :  { %4293 = vmatpush.bf16.msra.mxu1 %v7323_v30  ;;  %v7376_v48 = vld [vmem:[%s9508_s1 + $0x1e8] sm:$0xff]  ;;  %v1065_v51 = vld [vmem:[#allocation1 + $0x36] sm:$0xff]  ;;  %v7367_v56 = vld [vmem:[%s9508_s1 + $0x1a0] sm:$0xff] }
  0x20   :  { %4306 = vmatpush.bf16.msra.mxu2 %v7331_v31  ;;  %v22_v52 = vld [vmem:[%s9507_s0 + $0x8] sm:$0xff]  ;;  %v7375_v57 = vld [vmem:[%s9508_s1 + $0x1e0] sm:$0xff]  ;;  %v7350_v58 = vld [vmem:[%s9508_s1 + $0x118] sm:$0xff] }
  0x21   :  { %4319 = vmatpush.bf16.msra.mxu3 %v7339_v32  ;;  %4281 = vmatmul.bf16.vlgmr.msra.gmra.mxu0 %v1059_v39  ;;  %v1063_v53 = vld [vmem:[#allocation1 + $0x24] sm:$0xff]  ;;  %v1064_v55 = vld [vmem:[#allocation1 + $0x2d] sm:$0xff]  ;;  %v7358_v59 = vld [vmem:[%s9508_s1 + $0x158] sm:$0xff] }
  0x22   :  { %4325 = vmatpush.bf16.msrb.mxu0 %v7354_v33  ;;  %4294 = vmatmul.bf16.vlgmr.msra.gmra.mxu1 %v1060_v42  ;;  %1068 = vst [vmem:[#allocation1] ss:$9 sm:$0xff] %v22_v52  ;;  %v7366_v60 = vld [vmem:[%s9508_s1 + $0x198] sm:$0xff]  ;;  %v7349_v62 = vld [vmem:[%s9508_s1 + $0x110] sm:$0xff]  ;;  %v7348_v2 = vld [vmem:[%s9508_s1 + $0x108] sm:$0xff] }
  0x23   :  { %4338 = vmatpush.bf16.msrb.mxu1 %v7362_v34  ;;  %4307 = vmatmul.bf16.vlgmr.msra.gmra.mxu2 %v1061_v38  ;;  %v7374_v61 = vld [vmem:[%s9508_s1 + $0x1d8] sm:$0xff]  ;;  %v7357_v63 = vld [vmem:[%s9508_s1 + $0x150] sm:$0xff]  ;;  %v7356_v3 = vld [vmem:[%s9508_s1 + $0x148] sm:$0xff] }
  0x24   :  { %4351 = vmatpush.bf16.msrb.mxu2 %v7370_v35  ;;  %4320 = vmatmul.bf16.vlgmr.msra.gmra.mxu3 %v1062_v41  ;;  %v7365_v0 = vld [vmem:[%s9508_s1 + $0x190] sm:$0xff]  ;;  %v7364_v4 = vld [vmem:[%s9508_s1 + $0x188] sm:$0xff]  ;;  %v7347_v6 = vld [vmem:[%s9508_s1 + $0x100] sm:$0xff] }
  0x25   :  { %4364 = vmatpush.bf16.msrb.mxu3 %v7378_v36  ;;  %v7373_v1 = vld [vmem:[%s9508_s1 + $0x1d0] sm:$0xff]  ;;  %v7372_v5 = vld [vmem:[%s9508_s1 + $0x1c8] sm:$0xff]  ;;  %v7355_v7 = vld [vmem:[%s9508_s1 + $0x140] sm:$0xff] }
  0x26   :  { %4326 = vmatpush.bf16.msrb.mxu0 %v7353_v37  ;;  %v7363_v8 = vld [vmem:[%s9508_s1 + $0x180] sm:$0xff]  ;;  %v7386_v10 = vld [vmem:[%s9508_s1 + $0x238] sm:$0xff]  ;;  %v7385_v14 = vld [vmem:[%s9508_s1 + $0x230] sm:$0xff] }
  0x27   :  { %4339 = vmatpush.bf16.msrb.mxu1 %v7361_v40  ;;  %v7371_v9 = vld [vmem:[%s9508_s1 + $0x1c0] sm:$0xff]  ;;  %v7394_v11 = vld [vmem:[%s9508_s1 + $0x278] sm:$0xff]  ;;  %v7393_v15 = vld [vmem:[%s9508_s1 + $0x270] sm:$0xff] }
  0x28   :  { %4352 = vmatpush.bf16.msrb.mxu2 %v7369_v43  ;;  %v7402_v12 = vld [vmem:[%s9508_s1 + $0x2b8] sm:$0xff]  ;;  %v7401_v16 = vld [vmem:[%s9508_s1 + $0x2b0] sm:$0xff]  ;;  %v7384_v18 = vld [vmem:[%s9508_s1 + $0x228] sm:$0xff] }
  0x29   :  { %4365 = vmatpush.bf16.msrb.mxu3 %v7377_v44  ;;  %v7410_v13 = vld [vmem:[%s9508_s1 + $0x2f8] sm:$0xff]  ;;  %v7409_v17 = vld [vmem:[%s9508_s1 + $0x2f0] sm:$0xff]  ;;  %v7392_v19 = vld [vmem:[%s9508_s1 + $0x268] sm:$0xff] }
  0x2a   :  { %4327 = vmatpush.bf16.msrb.mxu0 %v7352_v45  ;;  %v7400_v20 = vld [vmem:[%s9508_s1 + $0x2a8] sm:$0xff]  ;;  %v7383_v22 = vld [vmem:[%s9508_s1 + $0x220] sm:$0xff]  ;;  %v7382_v26 = vld [vmem:[%s9508_s1 + $0x218] sm:$0xff] }
  0x2b   :  { %4340 = vmatpush.bf16.msrb.mxu1 %v7360_v46  ;;  %v7408_v21 = vld [vmem:[%s9508_s1 + $0x2e8] sm:$0xff]  ;;  %v7391_v23 = vld [vmem:[%s9508_s1 + $0x260] sm:$0xff]  ;;  %v7390_v27 = vld [vmem:[%s9508_s1 + $0x258] sm:$0xff] }
  0x2c   :  { %4353 = vmatpush.bf16.msrb.mxu2 %v7368_v47  ;;  %v7399_v24 = vld [vmem:[%s9508_s1 + $0x2a0] sm:$0xff]  ;;  %v7398_v28 = vld [vmem:[%s9508_s1 + $0x298] sm:$0xff]  ;;  %v7381_v30 = vld [vmem:[%s9508_s1 + $0x210] sm:$0xff] }
  0x2d   :  { %4366 = vmatpush.bf16.msrb.mxu3 %v7376_v48  ;;  %v7407_v25 = vld [vmem:[%s9508_s1 + $0x2e0] sm:$0xff]  ;;  %v7406_v29 = vld [vmem:[%s9508_s1 + $0x2d8] sm:$0xff]  ;;  %v7389_v31 = vld [vmem:[%s9508_s1 + $0x250] sm:$0xff] }
  0x2e   :  { %4328 = vmatpush.bf16.msrb.mxu0 %v7351_v49  ;;  %v7397_v32 = vld [vmem:[%s9508_s1 + $0x290] sm:$0xff]  ;;  %v7380_v34 = vld [vmem:[%s9508_s1 + $0x208] sm:$0xff]  ;;  %v7379_v38 = vld [vmem:[%s9508_s1 + $0x200] sm:$0xff] }
  0x2f   :  { %4341 = vmatpush.bf16.msrb.mxu1 %v7359_v50  ;;  %v7405_v33 = vld [vmem:[%s9508_s1 + $0x2d0] sm:$0xff]  ;;  %v7388_v35 = vld [vmem:[%s9508_s1 + $0x248] sm:$0xff]  ;;  %v7387_v39 = vld [vmem:[%s9508_s1 + $0x240] sm:$0xff] }
  0x30   :  { %4354 = vmatpush.bf16.msrb.mxu2 %v7367_v56  ;;  %v7396_v36 = vld [vmem:[%s9508_s1 + $0x288] sm:$0xff]  ;;  %v7395_v40 = vld [vmem:[%s9508_s1 + $0x280] sm:$0xff]  ;;  %v7418_v42 = vld [vmem:[%s9508_s1 + $0x338] sm:$0xff] }
  0x31   :  { %4367 = vmatpush.bf16.msrb.mxu3 %v7375_v57  ;;  %v7404_v37 = vld [vmem:[%s9508_s1 + $0x2c8] sm:$0xff]  ;;  %v7403_v41 = vld [vmem:[%s9508_s1 + $0x2c0] sm:$0xff]  ;;  %v7426_v43 = vld [vmem:[%s9508_s1 + $0x378] sm:$0xff] }
  0x32   :  { %4329 = vmatpush.bf16.msrb.mxu0 %v7350_v58  ;;  %v7434_v44 = vld [vmem:[%s9508_s1 + $0x3b8] sm:$0xff]  ;;  %v1069_v46 = vld [vmem:[#allocation1] sm:$0xff]  ;;  %v1070_v48 = vld [vmem:[#allocation1 + $0x9] sm:$0xff] }
  0x33   :  { %4342 = vmatpush.bf16.msrb.mxu1 %v7358_v59  ;;  %v7442_v45 = vld [vmem:[%s9508_s1 + $0x3f8] sm:$0xff]  ;;  %v7417_v50 = vld [vmem:[%s9508_s1 + $0x330] sm:$0xff]  ;;  %v7432_v56 = vld [vmem:[%s9508_s1 + $0x3a8] sm:$0xff] }
  0x34   :  { %4355 = vmatpush.bf16.msrb.mxu2 %v7366_v60  ;;  %v1071_v47 = vld [vmem:[#allocation1 + $0x12] sm:$0xff]  ;;  %v1072_v49 = vld [vmem:[#allocation1 + $0x1b] sm:$0xff]  ;;  %v7440_v57 = vld [vmem:[%s9508_s1 + $0x3e8] sm:$0xff] }
  0x35   :  { %4368 = vmatpush.bf16.msrb.mxu3 %v7374_v61  ;;  %v7433_v52 = vld [vmem:[%s9508_s1 + $0x3b0] sm:$0xff]  ;;  %v7415_v58 = vld [vmem:[%s9508_s1 + $0x320] sm:$0xff] }
  0x36   :  { %4330 = vmatpush.bf16.msrb.mxu0 %v7349_v62  ;;  %v7423_v59 = vld [vmem:[%s9508_s1 + $0x360] sm:$0xff]  ;;  %v7414_v62 = vld [vmem:[%s9508_s1 + $0x318] sm:$0xff] }
  0x37   :  { %4343 = vmatpush.bf16.msrb.mxu1 %v7357_v63  ;;  %v7431_v60 = vld [vmem:[%s9508_s1 + $0x3a0] sm:$0xff]  ;;  %v7422_v63 = vld [vmem:[%s9508_s1 + $0x358] sm:$0xff] }
  0x38   :  { %4356 = vmatpush.bf16.msrb.mxu2 %v7365_v0  ;;  %v7439_v61 = vld [vmem:[%s9508_s1 + $0x3e0] sm:$0xff]  ;;  %v7430_v0 = vld [vmem:[%s9508_s1 + $0x398] sm:$0xff] }
  0x39   :  { %4369 = vmatpush.bf16.msrb.mxu3 %v7373_v1  ;;  %v7438_v1 = vld [vmem:[%s9508_s1 + $0x3d8] sm:$0xff] }
  0x3a   :  { %4331 = vmatpush.bf16.msrb.mxu0 %v7348_v2  ;;  %v7413_v2 = vld [vmem:[%s9508_s1 + $0x310] sm:$0xff] }
  0x3b   :  { %4344 = vmatpush.bf16.msrb.mxu1 %v7356_v3  ;;  %v7421_v3 = vld [vmem:[%s9508_s1 + $0x350] sm:$0xff] }
  0x3c   :  { %4357 = vmatpush.bf16.msrb.mxu2 %v7364_v4  ;;  %v7429_v4 = vld [vmem:[%s9508_s1 + $0x390] sm:$0xff] }
  0x3d   :  { %4370 = vmatpush.bf16.msrb.mxu3 %v7372_v5  ;;  %v7437_v5 = vld [vmem:[%s9508_s1 + $0x3d0] sm:$0xff] }
  0x3e   :  { %4332 = vmatpush.bf16.msrb.mxu0 %v7347_v6  ;;  %v7412_v6 = vld [vmem:[%s9508_s1 + $0x308] sm:$0xff] }
  0x3f   :  { %4345 = vmatpush.bf16.msrb.mxu1 %v7355_v7  ;;  %v7420_v7 = vld [vmem:[%s9508_s1 + $0x348] sm:$0xff] }
  0x40   :  { %4358 = vmatpush.bf16.msrb.mxu2 %v7363_v8  ;;  %v7428_v8 = vld [vmem:[%s9508_s1 + $0x388] sm:$0xff] }
  0x41   :  { %4371 = vmatpush.bf16.msrb.mxu3 %v7371_v9  ;;  %4333 = vmatmul.bf16.vlgmr.msrb.gmra.mxu0 %v1063_v53  ;;  %v7441_v53 = vld [vmem:[%s9508_s1 + $0x3f0] sm:$0xff]  ;;  %v7436_v9 = vld [vmem:[%s9508_s1 + $0x3c8] sm:$0xff] }
  0x42   :  { %4377 = vmatpush.bf16.msra.mxu0 %v7386_v10  ;;  %4346 = vmatmul.bf16.vlgmr.msrb.gmra.mxu1 %v1064_v55  ;;  %v7424_v55 = vld [vmem:[%s9508_s1 + $0x368] sm:$0xff] }
  0x43   :  { %4390 = vmatpush.bf16.msra.mxu1 %v7394_v11  ;;  %4359 = vmatmul.bf16.vlgmr.msrb.gmra.mxu2 %v1065_v51  ;;  %v7425_v51 = vld [vmem:[%s9508_s1 + $0x370] sm:$0xff]  ;;  %v1073_v10 = vld [vmem:[#allocation1 + $0x24] sm:$0xff] }
  0x44   :  { %4403 = vmatpush.bf16.msra.mxu2 %v7402_v12  ;;  %4372 = vmatmul.bf16.vlgmr.msrb.gmra.mxu3 %v1066_v54  ;;  %v7416_v54 = vld [vmem:[%s9508_s1 + $0x328] sm:$0xff]  ;;  %v1075_v11 = vld [vmem:[#allocation1 + $0x36] sm:$0xff] }
  0x45   :  { %4416 = vmatpush.bf16.msra.mxu3 %v7410_v13  ;;  %v1074_v12 = vld [vmem:[#allocation1 + $0x2d] sm:$0xff]  ;;  %v1076_v13 = vld [vmem:[#allocation1 + $0x3f] sm:$0xff] }
  0x46   :  { %4378 = vmatpush.bf16.msra.mxu0 %v7385_v14  ;;  %v23_v14 = vld [vmem:[%s9507_s0 + $0x10] sm:$0xff] }
  0x47   :  { %4391 = vmatpush.bf16.msra.mxu1 %v7393_v15  ;;  %1078 = vst [vmem:[#allocation1] ss:$9 sm:$0xff] %v23_v14  ;;  %v7411_v15 = vld [vmem:[%s9508_s1 + $0x300] sm:$0xff]  ;;  %v7494_v14 = vld [vmem:[%s9508_s1 + $0x598] sm:$0xff] }
  0x48   :  { %4404 = vmatpush.bf16.msra.mxu2 %v7401_v16  ;;  %v7419_v16 = vld [vmem:[%s9508_s1 + $0x340] sm:$0xff] }
  0x49   :  { %4417 = vmatpush.bf16.msra.mxu3 %v7409_v17  ;;  %v7427_v17 = vld [vmem:[%s9508_s1 + $0x380] sm:$0xff] }
  0x4a   :  { %4379 = vmatpush.bf16.msra.mxu0 %v7384_v18  ;;  %v7435_v18 = vld [vmem:[%s9508_s1 + $0x3c0] sm:$0xff] }
  0x4b   :  { %4392 = vmatpush.bf16.msra.mxu1 %v7392_v19  ;;  %v7450_v19 = vld [vmem:[%s9508_s1 + $0x438] sm:$0xff] }
  0x4c   :  { %4405 = vmatpush.bf16.msra.mxu2 %v7400_v20  ;;  %v7458_v20 = vld [vmem:[%s9508_s1 + $0x478] sm:$0xff] }
  0x4d   :  { %4418 = vmatpush.bf16.msra.mxu3 %v7408_v21  ;;  %v7466_v21 = vld [vmem:[%s9508_s1 + $0x4b8] sm:$0xff] }
  0x4e   :  { %4380 = vmatpush.bf16.msra.mxu0 %v7383_v22  ;;  %v7474_v22 = vld [vmem:[%s9508_s1 + $0x4f8] sm:$0xff] }
  0x4f   :  { %4393 = vmatpush.bf16.msra.mxu1 %v7391_v23  ;;  %v7449_v23 = vld [vmem:[%s9508_s1 + $0x430] sm:$0xff] }
  0x50   :  { %4406 = vmatpush.bf16.msra.mxu2 %v7399_v24  ;;  %v7457_v24 = vld [vmem:[%s9508_s1 + $0x470] sm:$0xff] }
  0x51   :  { %4419 = vmatpush.bf16.msra.mxu3 %v7407_v25  ;;  %v7465_v25 = vld [vmem:[%s9508_s1 + $0x4b0] sm:$0xff] }
  0x52   :  { %4381 = vmatpush.bf16.msra.mxu0 %v7382_v26  ;;  %v7473_v26 = vld [vmem:[%s9508_s1 + $0x4f0] sm:$0xff] }
  0x53   :  { %4394 = vmatpush.bf16.msra.mxu1 %v7390_v27  ;;  %v7448_v27 = vld [vmem:[%s9508_s1 + $0x428] sm:$0xff] }
  0x54   :  { %4407 = vmatpush.bf16.msra.mxu2 %v7398_v28  ;;  %v7456_v28 = vld [vmem:[%s9508_s1 + $0x468] sm:$0xff] }
  0x55   :  { %4420 = vmatpush.bf16.msra.mxu3 %v7406_v29  ;;  %v7464_v29 = vld [vmem:[%s9508_s1 + $0x4a8] sm:$0xff] }
  0x56   :  { %4382 = vmatpush.bf16.msra.mxu0 %v7381_v30  ;;  %v7472_v30 = vld [vmem:[%s9508_s1 + $0x4e8] sm:$0xff] }
  0x57   :  { %4395 = vmatpush.bf16.msra.mxu1 %v7389_v31  ;;  %v7447_v31 = vld [vmem:[%s9508_s1 + $0x420] sm:$0xff] }
  0x58   :  { %4408 = vmatpush.bf16.msra.mxu2 %v7397_v32  ;;  %v7455_v32 = vld [vmem:[%s9508_s1 + $0x460] sm:$0xff] }
  0x59   :  { %4421 = vmatpush.bf16.msra.mxu3 %v7405_v33  ;;  %v7463_v33 = vld [vmem:[%s9508_s1 + $0x4a0] sm:$0xff] }
  0x5a   :  { %4383 = vmatpush.bf16.msra.mxu0 %v7380_v34  ;;  %v7471_v34 = vld [vmem:[%s9508_s1 + $0x4e0] sm:$0xff] }
  0x5b   :  { %4396 = vmatpush.bf16.msra.mxu1 %v7388_v35  ;;  %v7446_v35 = vld [vmem:[%s9508_s1 + $0x418] sm:$0xff] }
  0x5c   :  { %4409 = vmatpush.bf16.msra.mxu2 %v7396_v36  ;;  %v7454_v36 = vld [vmem:[%s9508_s1 + $0x458] sm:$0xff] }
  0x5d   :  { %4422 = vmatpush.bf16.msra.mxu3 %v7404_v37  ;;  %v7462_v37 = vld [vmem:[%s9508_s1 + $0x498] sm:$0xff] }
  0x5e   :  { %4384 = vmatpush.bf16.msra.mxu0 %v7379_v38  ;;  %v7470_v38 = vld [vmem:[%s9508_s1 + $0x4d8] sm:$0xff] }
  0x5f   :  { %4397 = vmatpush.bf16.msra.mxu1 %v7387_v39  ;;  %v7445_v39 = vld [vmem:[%s9508_s1 + $0x410] sm:$0xff] }
  0x60   :  { %4410 = vmatpush.bf16.msra.mxu2 %v7395_v40  ;;  %v7453_v40 = vld [vmem:[%s9508_s1 + $0x450] sm:$0xff] }
  0x61   :  { %4423 = vmatpush.bf16.msra.mxu3 %v7403_v41  ;;  %4385 = vmatmul.bf16.vlgmr.msra.gmra.mxu0 %v1069_v46  ;;  %v7461_v41 = vld [vmem:[%s9508_s1 + $0x490] sm:$0xff]  ;;  %v7468_v46 = vld [vmem:[%s9508_s1 + $0x4c8] sm:$0xff] }
  0x62   :  { %4429 = vmatpush.bf16.msrb.mxu0 %v7418_v42  ;;  %4398 = vmatmul.bf16.vlgmr.msra.gmra.mxu1 %v1070_v48  ;;  %v7469_v42 = vld [vmem:[%s9508_s1 + $0x4d0] sm:$0xff]  ;;  %v7451_v48 = vld [vmem:[%s9508_s1 + $0x440] sm:$0xff] }
  0x63   :  { %4442 = vmatpush.bf16.msrb.mxu1 %v7426_v43  ;;  %4411 = vmatmul.bf16.vlgmr.msra.gmra.mxu2 %v1071_v47  ;;  %v7444_v43 = vld [vmem:[%s9508_s1 + $0x408] sm:$0xff]  ;;  %v7443_v47 = vld [vmem:[%s9508_s1 + $0x400] sm:$0xff] }
  0x64   :  { %4455 = vmatpush.bf16.msrb.mxu2 %v7434_v44  ;;  %4424 = vmatmul.bf16.vlgmr.msra.gmra.mxu3 %v1072_v49  ;;  %v7452_v44 = vld [vmem:[%s9508_s1 + $0x448] sm:$0xff]  ;;  %v7459_v49 = vld [vmem:[%s9508_s1 + $0x480] sm:$0xff] }
  0x65   :  { %4468 = vmatpush.bf16.msrb.mxu3 %v7442_v45  ;;  %v7460_v45 = vld [vmem:[%s9508_s1 + $0x488] sm:$0xff] }
  0x66   :  { %4430 = vmatpush.bf16.msrb.mxu0 %v7417_v50  ;;  %v7467_v50 = vld [vmem:[%s9508_s1 + $0x4c0] sm:$0xff] }
  0x67   :  { %4443 = vmatpush.bf16.msrb.mxu1 %v7425_v51  ;;  %v7482_v51 = vld [vmem:[%s9508_s1 + $0x538] sm:$0xff] }
  0x68   :  { %4456 = vmatpush.bf16.msrb.mxu2 %v7433_v52  ;;  %v7490_v52 = vld [vmem:[%s9508_s1 + $0x578] sm:$0xff] }
  0x69   :  { %4469 = vmatpush.bf16.msrb.mxu3 %v7441_v53  ;;  %v7498_v53 = vld [vmem:[%s9508_s1 + $0x5b8] sm:$0xff] }
  0x6a   :  { %4431 = vmatpush.bf16.msrb.mxu0 %v7416_v54  ;;  %v7506_v54 = vld [vmem:[%s9508_s1 + $0x5f8] sm:$0xff] }
  0x6b   :  { %4444 = vmatpush.bf16.msrb.mxu1 %v7424_v55  ;;  %v1079_v55 = vld [vmem:[#allocation1] sm:$0xff] }
  0x6c   :  { %4457 = vmatpush.bf16.msrb.mxu2 %v7432_v56  ;;  %v1081_v56 = vld [vmem:[#allocation1 + $0x12] sm:$0xff] }
  0x6d   :  { %4470 = vmatpush.bf16.msrb.mxu3 %v7440_v57  ;;  %v1080_v57 = vld [vmem:[#allocation1 + $0x9] sm:$0xff] }
  0x6e   :  { %4432 = vmatpush.bf16.msrb.mxu0 %v7415_v58  ;;  %v1082_v58 = vld [vmem:[#allocation1 + $0x1b] sm:$0xff] }
  0x6f   :  { %4445 = vmatpush.bf16.msrb.mxu1 %v7423_v59  ;;  %v7481_v59 = vld [vmem:[%s9508_s1 + $0x530] sm:$0xff] }
  0x70   :  { %4458 = vmatpush.bf16.msrb.mxu2 %v7431_v60  ;;  %v7489_v60 = vld [vmem:[%s9508_s1 + $0x570] sm:$0xff] }
  0x71   :  { %4471 = vmatpush.bf16.msrb.mxu3 %v7439_v61  ;;  %v7497_v61 = vld [vmem:[%s9508_s1 + $0x5b0] sm:$0xff] }
  0x72   :  { %4433 = vmatpush.bf16.msrb.mxu0 %v7414_v62  ;;  %v7505_v62 = vld [vmem:[%s9508_s1 + $0x5f0] sm:$0xff] }
  0x73   :  { %4446 = vmatpush.bf16.msrb.mxu1 %v7422_v63  ;;  %v7480_v63 = vld [vmem:[%s9508_s1 + $0x528] sm:$0xff] }
  0x74   :  { %4459 = vmatpush.bf16.msrb.mxu2 %v7430_v0  ;;  %v7488_v0 = vld [vmem:[%s9508_s1 + $0x568] sm:$0xff] }
  0x75   :  { %4472 = vmatpush.bf16.msrb.mxu3 %v7438_v1  ;;  %v7836_v1 = vld [vmem:[%s9509_s2] ss:$0 sm:$0xff] }
  0x76   :  { %4434 = vmatpush.bf16.msrb.mxu0 %v7413_v2  ;;  %v7496_v2 = vld [vmem:[%s9508_s1 + $0x5a8] sm:$0xff] }
  0x77   :  { %4447 = vmatpush.bf16.msrb.mxu1 %v7421_v3  ;;  %v7504_v3 = vld [vmem:[%s9508_s1 + $0x5e8] sm:$0xff] }
  0x78   :  { %4460 = vmatpush.bf16.msrb.mxu2 %v7429_v4 }
  0x79   :  { %4473 = vmatpush.bf16.msrb.mxu3 %v7437_v5  ;;  %v7479_v5 = vld [vmem:[%s9508_s1 + $0x520] sm:$0xff] }
  0x7a   :  { %4435 = vmatpush.bf16.msrb.mxu0 %v7412_v6  ;;  %v7487_v6 = vld [vmem:[%s9508_s1 + $0x560] sm:$0xff] }
  0x7b   :  { %4448 = vmatpush.bf16.msrb.mxu1 %v7420_v7 }
  0x7c   :  { %4461 = vmatpush.bf16.msrb.mxu2 %v7428_v8 }
  0x7d   :  { %4474 = vmatpush.bf16.msrb.mxu3 %v7436_v9  ;;  %v7495_v9 = vld [vmem:[%s9508_s1 + $0x5a0] sm:$0xff] }
  0x7e   :  { %4436 = vmatpush.bf16.msrb.mxu0 %v7411_v15  ;;  %v7502_v15 = vld [vmem:[%s9508_s1 + $0x5d8] sm:$0xff] }
  0x7f   :  { %4449 = vmatpush.bf16.msrb.mxu1 %v7419_v16 }
  0x80   :  { %4462 = vmatpush.bf16.msrb.mxu2 %v7427_v17 }
  0x81   :  { %4475 = vmatpush.bf16.msrb.mxu3 %v7435_v18  ;;  %4437 = vmatmul.bf16.vlgmr.msrb.gmra.mxu0 %v1073_v10  ;;  %v7503_v10 = vld [vmem:[%s9508_s1 + $0x5e0] sm:$0xff] }
  0x82   :  { %4481 = vmatpush.bf16.msra.mxu0 %v7450_v19  ;;  %4450 = vmatmul.bf16.vlgmr.msrb.gmra.mxu1 %v1074_v12  ;;  %v7478_v12 = vld [vmem:[%s9508_s1 + $0x518] sm:$0xff] }
  0x83   :  { %4494 = vmatpush.bf16.msra.mxu1 %v7458_v20  ;;  %4463 = vmatmul.bf16.vlgmr.msrb.gmra.mxu2 %v1075_v11  ;;  %v7477_v20 = vld [vmem:[%s9508_s1 + $0x510] sm:$0xff] }
  0x84   :  { %4507 = vmatpush.bf16.msra.mxu2 %v7466_v21  ;;  %4476 = vmatmul.bf16.vlgmr.msrb.gmra.mxu3 %v1076_v13  ;;  %v7486_v13 = vld [vmem:[%s9508_s1 + $0x558] sm:$0xff]  ;;  %v7485_v21 = vld [vmem:[%s9508_s1 + $0x550] sm:$0xff] }
  0x85   :  { %4520 = vmatpush.bf16.msra.mxu3 %v7474_v22 }
  0x86   :  { %4482 = vmatpush.bf16.msra.mxu0 %v7449_v23 }
  0x87   :  { %4495 = vmatpush.bf16.msra.mxu1 %v7457_v24  ;;  %v7493_v24 = vld [vmem:[%s9508_s1 + $0x590] sm:$0xff] }
  0x88   :  { %4508 = vmatpush.bf16.msra.mxu2 %v7465_v25  ;;  %v7501_v25 = vld [vmem:[%s9508_s1 + $0x5d0] sm:$0xff] }
  0x89   :  { %4521 = vmatpush.bf16.msra.mxu3 %v7473_v26  ;;  %v7476_v26 = vld [vmem:[%s9508_s1 + $0x508] sm:$0xff] }
  0x8a   :  { %4483 = vmatpush.bf16.msra.mxu0 %v7448_v27  ;;  %v7484_v27 = vld [vmem:[%s9508_s1 + $0x548] sm:$0xff] }
  0x8b   :  { %4496 = vmatpush.bf16.msra.mxu1 %v7456_v28  ;;  %v7492_v28 = vld [vmem:[%s9508_s1 + $0x588] sm:$0xff] }
  0x8c   :  { %4509 = vmatpush.bf16.msra.mxu2 %v7464_v29  ;;  %v7500_v29 = vld [vmem:[%s9508_s1 + $0x5c8] sm:$0xff] }
  0x8d   :  { %4522 = vmatpush.bf16.msra.mxu3 %v7472_v30  ;;  %v1083_v30 = vld [vmem:[#allocation1 + $0x24] sm:$0xff] }
  0x8e   :  { %4484 = vmatpush.bf16.msra.mxu0 %v7447_v31  ;;  %v1085_v31 = vld [vmem:[#allocation1 + $0x36] sm:$0xff] }
  0x8f   :  { %4497 = vmatpush.bf16.msra.mxu1 %v7455_v32 }
  0x90   :  { %4510 = vmatpush.bf16.msra.mxu2 %v7463_v33  ;;  %v1084_v33 = vld [vmem:[#allocation1 + $0x2d] sm:$0xff] }
  0x91   :  { %4523 = vmatpush.bf16.msra.mxu3 %v7471_v34  ;;  %v1086_v34 = vld [vmem:[#allocation1 + $0x3f] sm:$0xff] }
  0x92   :  { %4485 = vmatpush.bf16.msra.mxu0 %v7446_v35 }
  0x93   :  { %4498 = vmatpush.bf16.msra.mxu1 %v7454_v36  ;;  %v24_v36 = vld [vmem:[%s9507_s0 + $0x18] sm:$0xff] }
  0x94   :  { %4511 = vmatpush.bf16.msra.mxu2 %v7462_v37  ;;  %1088 = vst [vmem:[#allocation1] ss:$9 sm:$0xff] %v24_v36  ;;  %v7475_v37 = vld [vmem:[%s9508_s1 + $0x500] sm:$0xff]  ;;  %v7568_v36 = vld [vmem:[%s9508_s1 + $0x7e8] sm:$0xff] }
  0x95   :  { %4524 = vmatpush.bf16.msra.mxu3 %v7470_v38  ;;  %v7483_v38 = vld [vmem:[%s9508_s1 + $0x540] sm:$0xff] }
  0x96   :  { %4486 = vmatpush.bf16.msra.mxu0 %v7445_v39  ;;  %v7491_v39 = vld [vmem:[%s9508_s1 + $0x580] sm:$0xff] }
  0x97   :  { %4499 = vmatpush.bf16.msra.mxu1 %v7453_v40  ;;  %v7499_v40 = vld [vmem:[%s9508_s1 + $0x5c0] sm:$0xff] }
  0x98   :  { %4512 = vmatpush.bf16.msra.mxu2 %v7461_v41  ;;  %v7514_v41 = vld [vmem:[%s9508_s1 + $0x638] sm:$0xff] }
  0x99   :  { %4525 = vmatpush.bf16.msra.mxu3 %v7469_v42  ;;  %v7522_v42 = vld [vmem:[%s9508_s1 + $0x678] sm:$0xff] }
  0x9a   :  { %4487 = vmatpush.bf16.msra.mxu0 %v7444_v43  ;;  %v7530_v43 = vld [vmem:[%s9508_s1 + $0x6b8] sm:$0xff] }
  0x9b   :  { %4500 = vmatpush.bf16.msra.mxu1 %v7452_v44  ;;  %v7538_v44 = vld [vmem:[%s9508_s1 + $0x6f8] sm:$0xff] }
  0x9c   :  { %4513 = vmatpush.bf16.msra.mxu2 %v7460_v45  ;;  %v7513_v45 = vld [vmem:[%s9508_s1 + $0x630] sm:$0xff] }
  0x9d   :  { %4526 = vmatpush.bf16.msra.mxu3 %v7468_v46  ;;  %v7521_v46 = vld [vmem:[%s9508_s1 + $0x670] sm:$0xff] }
  0x9e   :  { %4488 = vmatpush.bf16.msra.mxu0 %v7443_v47  ;;  %v4282_v4 = vpop.f32.mrf.mxu0  ;;  %v7529_v47 = vld [vmem:[%s9508_s1 + $0x6b0] sm:$0xff] }
  0x9f   :  { %4501 = vmatpush.bf16.msra.mxu1 %v7451_v48  ;;  %v4283_v7 = vadd.f32 %v7836_v1, %v4282_v4  ;;  %v4295_v8 = vpop.f32.mrf.mxu1  ;;  %v7537_v48 = vld [vmem:[%s9508_s1 + $0x6f0] sm:$0xff] }
  0xa0   :  { %4514 = vmatpush.bf16.msra.mxu2 %v7459_v49  ;;  %v7512_v49 = vld [vmem:[%s9508_s1 + $0x628] sm:$0xff] }
  0xa1   :  { %4527 = vmatpush.bf16.msra.mxu3 %v7467_v50  ;;  %4489 = vmatmul.bf16.vlgmr.msra.gmra.mxu0 %v1079_v55  ;;  %v4296_v11 = vadd.f32 %v4295_v8, %v4283_v7  ;;  %v7520_v50 = vld [vmem:[%s9508_s1 + $0x668] sm:$0xff]  ;;  %v7519_v55 = vld [vmem:[%s9508_s1 + $0x660] sm:$0xff] }
  0xa2   :  { %4533 = vmatpush.bf16.msrb.mxu0 %v7482_v51  ;;  %4502 = vmatmul.bf16.vlgmr.msra.gmra.mxu1 %v1080_v57  ;;  %v7528_v51 = vld [vmem:[%s9508_s1 + $0x6a8] sm:$0xff] }
  0xa3   :  { %4546 = vmatpush.bf16.msrb.mxu1 %v7490_v52  ;;  %4515 = vmatmul.bf16.vlgmr.msra.gmra.mxu2 %v1081_v56  ;;  %v7536_v52 = vld [vmem:[%s9508_s1 + $0x6e8] sm:$0xff] }
  0xa4   :  { %4559 = vmatpush.bf16.msrb.mxu2 %v7498_v53  ;;  %4528 = vmatmul.bf16.vlgmr.msra.gmra.mxu3 %v1082_v58  ;;  %v7527_v58 = vld [vmem:[%s9508_s1 + $0x6a0] sm:$0xff] }
  0xa5   :  { %4572 = vmatpush.bf16.msrb.mxu3 %v7506_v54  ;;  %v7511_v54 = vld [vmem:[%s9508_s1 + $0x620] sm:$0xff] }
  0xa6   :  { %4534 = vmatpush.bf16.msrb.mxu0 %v7481_v59  ;;  %v4308_v16 = vpop.f32.mrf.mxu2  ;;  %v4284_v19 = vpop.f32.mrf.mxu0  ;;  %v7535_v59 = vld [vmem:[%s9508_s1 + $0x6e0] sm:$0xff] }
  0xa7   :  { %4547 = vmatpush.bf16.msrb.mxu1 %v7489_v60  ;;  %v4309_v17 = vadd.f32 %v4308_v16, %v4296_v11  ;;  %v4321_v18 = vpop.f32.mrf.mxu3  ;;  %v4297_v23 = vpop.f32.mrf.mxu1  ;;  %v7508_v11 = vld [vmem:[%s9508_s1 + $0x608] sm:$0xff]  ;;  %v7523_v19 = vld [vmem:[%s9508_s1 + $0x680] sm:$0xff] }
  0xa8   :  { %4560 = vmatpush.bf16.msrb.mxu2 %v7497_v61  ;;  %v7510_v61 = vld [vmem:[%s9508_s1 + $0x618] sm:$0xff] }
  0xa9   :  { %4573 = vmatpush.bf16.msrb.mxu3 %v7505_v62  ;;  %v8457_v22 = vadd.f32 %v4321_v18, %v4309_v17  ;;  %v7518_v62 = vld [vmem:[%s9508_s1 + $0x658] sm:$0xff]  ;;  %v7507_v17 = vld [vmem:[%s9508_s1 + $0x600] sm:$0xff] }
  0xaa   :  { %4535 = vmatpush.bf16.msrb.mxu0 %v7480_v63  ;;  %v7526_v63 = vld [vmem:[%s9508_s1 + $0x698] sm:$0xff]  ;;  %v7515_v18 = vld [vmem:[%s9508_s1 + $0x640] sm:$0xff] }
  0xab   :  { %4548 = vmatpush.bf16.msrb.mxu1 %v7488_v0  ;;  %v7534_v0 = vld [vmem:[%s9508_s1 + $0x6d8] sm:$0xff] }
  0xac   :  { %4561 = vmatpush.bf16.msrb.mxu2 %v7496_v2  ;;  %v7562_v23 = vld [vmem:[%s9508_s1 + $0x7b8] sm:$0xff] }
  0xad   :  { %4574 = vmatpush.bf16.msrb.mxu3 %v7504_v3 }
  0xae   :  { %4536 = vmatpush.bf16.msrb.mxu0 %v7479_v5  ;;  %v4310_v32 = vpop.f32.mrf.mxu2  ;;  %v7509_v5 = vld [vmem:[%s9508_s1 + $0x610] sm:$0xff] }
  0xaf   :  { %4549 = vmatpush.bf16.msrb.mxu1 %v7487_v6  ;;  %v4323_v35 = vpop.f32.mrf.mxu3  ;;  %v7517_v6 = vld [vmem:[%s9508_s1 + $0x650] sm:$0xff] }
  0xb0   :  { %4562 = vmatpush.bf16.msrb.mxu2 %v7495_v9  ;;  %v7525_v9 = vld [vmem:[%s9508_s1 + $0x690] sm:$0xff]  ;;  %v7560_v35 = vld [vmem:[%s9508_s1 + $0x7a8] sm:$0xff] }
  0xb1   :  { %4575 = vmatpush.bf16.msrb.mxu3 %v7503_v10  ;;  %v7533_v10 = vld [vmem:[%s9508_s1 + $0x6d0] sm:$0xff] }
  0xb2   :  { %4537 = vmatpush.bf16.msrb.mxu0 %v7478_v12  ;;  %v7516_v12 = vld [vmem:[%s9508_s1 + $0x648] sm:$0xff]  ;;  %v7569_v32 = vld [vmem:[%s9508_s1 + $0x7f0] sm:$0xff] }
  0xb3   :  { %4550 = vmatpush.bf16.msrb.mxu1 %v7486_v13  ;;  %v7524_v13 = vld [vmem:[%s9508_s1 + $0x688] sm:$0xff] }
  0xb4   :  { %4563 = vmatpush.bf16.msrb.mxu2 %v7494_v14  ;;  %v7532_v14 = vld [vmem:[%s9508_s1 + $0x6c8] sm:$0xff] }
  0xb5   :  { %4576 = vmatpush.bf16.msrb.mxu3 %v7502_v15 }
  0xb6   :  { %4538 = vmatpush.bf16.msrb.mxu0 %v7477_v20  ;;  %v7531_v20 = vld [vmem:[%s9508_s1 + $0x6c0] sm:$0xff] }
  0xb7   :  { %4551 = vmatpush.bf16.msrb.mxu1 %v7485_v21  ;;  %v7546_v21 = vld [vmem:[%s9508_s1 + $0x738] sm:$0xff] }
  0xb8   :  { %4564 = vmatpush.bf16.msrb.mxu2 %v7493_v24  ;;  %v7570_v24 = vld [vmem:[%s9508_s1 + $0x7f8] sm:$0xff] }
  0xb9   :  { %4577 = vmatpush.bf16.msrb.mxu3 %v7501_v25  ;;  %v1089_v25 = vld [vmem:[#allocation1] sm:$0xff] }
  0xba   :  { %4539 = vmatpush.bf16.msrb.mxu0 %v7476_v26  ;;  %v1091_v26 = vld [vmem:[#allocation1 + $0x12] sm:$0xff] }
  0xbb   :  { %4552 = vmatpush.bf16.msrb.mxu1 %v7484_v27  ;;  %v1090_v27 = vld [vmem:[#allocation1 + $0x9] sm:$0xff] }
  0xbc   :  { %4565 = vmatpush.bf16.msrb.mxu2 %v7492_v28  ;;  %v1092_v28 = vld [vmem:[#allocation1 + $0x1b] sm:$0xff] }
  0xbd   :  { %4578 = vmatpush.bf16.msrb.mxu3 %v7500_v29  ;;  %v7545_v29 = vld [vmem:[%s9508_s1 + $0x730] sm:$0xff] }
  0xbe   :  { %4540 = vmatpush.bf16.msrb.mxu0 %v7475_v37  ;;  %v4334_v53 = vpop.f32.mrf.mxu0 }
  0xbf   :  { %4553 = vmatpush.bf16.msrb.mxu1 %v7483_v38  ;;  %v4335_v56 = vadd.f32 %v4334_v53, %v8457_v22  ;;  %v4347_v57 = vpop.f32.mrf.mxu1  ;;  %v7554_v22 = vld [vmem:[%s9508_s1 + $0x778] sm:$0xff] }
  0xc0   :  { %4566 = vmatpush.bf16.msrb.mxu2 %v7491_v39  ;;  %v7543_v39 = vld [vmem:[%s9508_s1 + $0x720] sm:$0xff] }
  0xc1   :  { %4579 = vmatpush.bf16.msrb.mxu3 %v7499_v40  ;;  %4541 = vmatmul.bf16.vlgmr.msrb.gmra.mxu0 %v1083_v30  ;;  %v4348_v60 = vadd.f32 %v4347_v57, %v4335_v56  ;;  %v7553_v30 = vld [vmem:[%s9508_s1 + $0x770] sm:$0xff]  ;;  %v7551_v40 = vld [vmem:[%s9508_s1 + $0x760] sm:$0xff] }
  0xc2   :  { %4585 = vmatpush.bf16.msra.mxu0 %v7514_v41  ;;  %4554 = vmatmul.bf16.vlgmr.msrb.gmra.mxu1 %v1084_v33  ;;  %v7544_v33 = vld [vmem:[%s9508_s1 + $0x728] sm:$0xff]  ;;  %v7557_v57 = vld [vmem:[%s9508_s1 + $0x790] sm:$0xff] }
  0xc3   :  { %4598 = vmatpush.bf16.msra.mxu1 %v7522_v42  ;;  %4567 = vmatmul.bf16.vlgmr.msrb.gmra.mxu2 %v1085_v31  ;;  %v7561_v31 = vld [vmem:[%s9508_s1 + $0x7b0] sm:$0xff]  ;;  %v7559_v42 = vld [vmem:[%s9508_s1 + $0x7a0] sm:$0xff] }
  0xc4   :  { %4611 = vmatpush.bf16.msra.mxu2 %v7530_v43  ;;  %4580 = vmatmul.bf16.vlgmr.msrb.gmra.mxu3 %v1086_v34  ;;  %v7552_v34 = vld [vmem:[%s9508_s1 + $0x768] sm:$0xff]  ;;  %v7567_v43 = vld [vmem:[%s9508_s1 + $0x7e0] sm:$0xff] }
  0xc5   :  { %4624 = vmatpush.bf16.msra.mxu3 %v7538_v44 }
  0xc6   :  { %4586 = vmatpush.bf16.msra.mxu0 %v7513_v45  ;;  %v4360_v1 = vpop.f32.mrf.mxu2  ;;  %v4336_v4 = vpop.f32.mrf.mxu0  ;;  %v7542_v45 = vld [vmem:[%s9508_s1 + $0x718] sm:$0xff] }
  0xc7   :  { %4599 = vmatpush.bf16.msra.mxu1 %v7521_v46  ;;  %v4361_v2 = vadd.f32 %v4360_v1, %v4348_v60  ;;  %v4373_v3 = vpop.f32.mrf.mxu3  ;;  %v4349_v8 = vpop.f32.mrf.mxu1  ;;  %v7550_v46 = vld [vmem:[%s9508_s1 + $0x758] sm:$0xff]  ;;  %v7548_v60 = vld [vmem:[%s9508_s1 + $0x748] sm:$0xff] }
  0xc8   :  { %4612 = vmatpush.bf16.msra.mxu2 %v7529_v47  ;;  %v7558_v47 = vld [vmem:[%s9508_s1 + $0x798] sm:$0xff]  ;;  %v7555_v8 = vld [vmem:[%s9508_s1 + $0x780] sm:$0xff] }
  0xc9   :  { %4625 = vmatpush.bf16.msra.mxu3 %v7537_v48  ;;  %v4374_v7 = vadd.f32 %v4373_v3, %v4361_v2  ;;  %v7566_v48 = vld [vmem:[%s9508_s1 + $0x7d8] sm:$0xff]  ;;  %v1094_v2 = vld [vmem:[#allocation1 + $0x2d] sm:$0xff] }
  0xca   :  { %4587 = vmatpush.bf16.msra.mxu0 %v7512_v49  ;;  %v1096_v3 = vld [vmem:[#allocation1 + $0x3f] sm:$0xff] }
  0xcb   :  { %4600 = vmatpush.bf16.msra.mxu1 %v7520_v50 }
  0xcc   :  { %4613 = vmatpush.bf16.msra.mxu2 %v7528_v51 }
  0xcd   :  { %4626 = vmatpush.bf16.msra.mxu3 %v7536_v52 }
  0xce   :  { %4588 = vmatpush.bf16.msra.mxu0 %v7511_v54  ;;  %v4362_v15 = vpop.f32.mrf.mxu2  ;;  %v7541_v54 = vld [vmem:[%s9508_s1 + $0x710] sm:$0xff] }
  0xcf   :  { %4601 = vmatpush.bf16.msra.mxu1 %v7519_v55  ;;  %v4375_v16 = vpop.f32.mrf.mxu3  ;;  %v7549_v55 = vld [vmem:[%s9508_s1 + $0x750] sm:$0xff] }
  0xd0   :  { %4614 = vmatpush.bf16.msra.mxu2 %v7527_v58  ;;  %v7565_v58 = vld [vmem:[%s9508_s1 + $0x7d0] sm:$0xff] }
  0xd1   :  { %4627 = vmatpush.bf16.msra.mxu3 %v7535_v59  ;;  %v7540_v59 = vld [vmem:[%s9508_s1 + $0x708] sm:$0xff]  ;;  %v7585_v15 = vld [vmem:[%s9508_s1 + $0x870] sm:$0xff] }
  0xd2   :  { %4589 = vmatpush.bf16.msra.mxu0 %v7510_v61  ;;  %v7556_v61 = vld [vmem:[%s9508_s1 + $0x788] sm:$0xff]  ;;  %v7593_v16 = vld [vmem:[%s9508_s1 + $0x8b0] sm:$0xff] }
  0xd3   :  { %4602 = vmatpush.bf16.msra.mxu1 %v7518_v62  ;;  %v7564_v62 = vld [vmem:[%s9508_s1 + $0x7c8] sm:$0xff] }
  0xd4   :  { %4615 = vmatpush.bf16.msra.mxu2 %v7526_v63  ;;  %v1093_v63 = vld [vmem:[#allocation1 + $0x24] sm:$0xff] }
  0xd5   :  { %4628 = vmatpush.bf16.msra.mxu3 %v7534_v0  ;;  %v1095_v0 = vld [vmem:[#allocation1 + $0x36] sm:$0xff] }
  0xd6   :  { %4590 = vmatpush.bf16.msra.mxu0 %v7509_v5  ;;  %v25_v5 = vld [vmem:[%s9507_s0 + $0x20] sm:$0xff] }
  0xd7   :  { %4603 = vmatpush.bf16.msra.mxu1 %v7517_v6  ;;  %1098 = vst [vmem:[#allocation1] ss:$9 sm:$0xff] %v25_v5  ;;  %v7539_v6 = vld [vmem:[%s9508_s1 + $0x700] sm:$0xff]  ;;  %v7632_v5 = vld [vmem:[%s9508_s1 + $0x9e8] sm:$0xff] }
  0xd8   :  { %4616 = vmatpush.bf16.msra.mxu2 %v7525_v9  ;;  %v7563_v9 = vld [vmem:[%s9508_s1 + $0x7c0] sm:$0xff] }
  0xd9   :  { %4629 = vmatpush.bf16.msra.mxu3 %v7533_v10  ;;  %v7578_v10 = vld [vmem:[%s9508_s1 + $0x838] sm:$0xff] }
  0xda   :  { %4591 = vmatpush.bf16.msra.mxu0 %v7508_v11  ;;  %v7586_v11 = vld [vmem:[%s9508_s1 + $0x878] sm:$0xff] }
  0xdb   :  { %4604 = vmatpush.bf16.msra.mxu1 %v7516_v12  ;;  %v7594_v12 = vld [vmem:[%s9508_s1 + $0x8b8] sm:$0xff] }
  0xdc   :  { %4617 = vmatpush.bf16.msra.mxu2 %v7524_v13  ;;  %v7602_v13 = vld [vmem:[%s9508_s1 + $0x8f8] sm:$0xff] }
  0xdd   :  { %4630 = vmatpush.bf16.msra.mxu3 %v7532_v14  ;;  %v7577_v14 = vld [vmem:[%s9508_s1 + $0x830] sm:$0xff] }
  0xde   :  { %4592 = vmatpush.bf16.msra.mxu0 %v7507_v17  ;;  %v4386_v37 = vpop.f32.mrf.mxu0  ;;  %v7601_v17 = vld [vmem:[%s9508_s1 + $0x8f0] sm:$0xff] }
  0xdf   :  { %4605 = vmatpush.bf16.msra.mxu1 %v7515_v18  ;;  %v4387_v38 = vadd.f32 %v4386_v37, %v4374_v7  ;;  %v4399_v41 = vpop.f32.mrf.mxu1  ;;  %v7547_v7 = vld [vmem:[%s9508_s1 + $0x740] sm:$0xff]  ;;  %v7576_v18 = vld [vmem:[%s9508_s1 + $0x828] sm:$0xff] }
  0xe0   :  { %4618 = vmatpush.bf16.msra.mxu2 %v7523_v19  ;;  %v7584_v19 = vld [vmem:[%s9508_s1 + $0x868] sm:$0xff] }
  0xe1   :  { %4631 = vmatpush.bf16.msra.mxu3 %v7531_v20  ;;  %4593 = vmatmul.bf16.vlgmr.msra.gmra.mxu0 %v1089_v25  ;;  %v4400_v44 = vadd.f32 %v4399_v41, %v4387_v38  ;;  %v7592_v20 = vld [vmem:[%s9508_s1 + $0x8a8] sm:$0xff]  ;;  %v7583_v25 = vld [vmem:[%s9508_s1 + $0x860] sm:$0xff] }
  0xe2   :  { %4637 = vmatpush.bf16.msrb.mxu0 %v7546_v21  ;;  %4606 = vmatmul.bf16.vlgmr.msra.gmra.mxu1 %v1090_v27  ;;  %v7600_v21 = vld [vmem:[%s9508_s1 + $0x8e8] sm:$0xff]  ;;  %v7591_v27 = vld [vmem:[%s9508_s1 + $0x8a0] sm:$0xff] }
  0xe3   :  { %4650 = vmatpush.bf16.msrb.mxu1 %v7554_v22  ;;  %4619 = vmatmul.bf16.vlgmr.msra.gmra.mxu2 %v1091_v26 }
  0xe4   :  { %4663 = vmatpush.bf16.msrb.mxu2 %v7562_v23  ;;  %4632 = vmatmul.bf16.vlgmr.msra.gmra.mxu3 %v1092_v28  ;;  %v7599_v28 = vld [vmem:[%s9508_s1 + $0x8e0] sm:$0xff] }
  0xe5   :  { %4676 = vmatpush.bf16.msrb.mxu3 %v7570_v24  ;;  %v7575_v24 = vld [vmem:[%s9508_s1 + $0x820] sm:$0xff] }
  0xe6   :  { %4638 = vmatpush.bf16.msrb.mxu0 %v7545_v29  ;;  %v4412_v49 = vpop.f32.mrf.mxu2  ;;  %v4388_v52 = vpop.f32.mrf.mxu0 }
  0xe7   :  { %4651 = vmatpush.bf16.msrb.mxu1 %v7553_v30  ;;  %v4413_v50 = vadd.f32 %v4412_v49, %v4400_v44  ;;  %v4425_v51 = vpop.f32.mrf.mxu3  ;;  %v4401_v56 = vpop.f32.mrf.mxu1  ;;  %v7574_v30 = vld [vmem:[%s9508_s1 + $0x818] sm:$0xff]  ;;  %v7572_v44 = vld [vmem:[%s9508_s1 + $0x808] sm:$0xff]  ;;  %v7587_v52 = vld [vmem:[%s9508_s1 + $0x880] sm:$0xff] }
  0xe8   :  { %4664 = vmatpush.bf16.msrb.mxu2 %v7561_v31  ;;  %v7582_v31 = vld [vmem:[%s9508_s1 + $0x858] sm:$0xff] }
  0xe9   :  { %4677 = vmatpush.bf16.msrb.mxu3 %v7569_v32  ;;  %v8649_v53 = vadd.f32 %v4425_v51, %v4413_v50  ;;  %v7590_v32 = vld [vmem:[%s9508_s1 + $0x898] sm:$0xff]  ;;  %v7571_v50 = vld [vmem:[%s9508_s1 + $0x800] sm:$0xff] }
  0xea   :  { %4639 = vmatpush.bf16.msrb.mxu0 %v7544_v33  ;;  %v7598_v33 = vld [vmem:[%s9508_s1 + $0x8d8] sm:$0xff]  ;;  %v7579_v51 = vld [vmem:[%s9508_s1 + $0x840] sm:$0xff] }
  0xeb   :  { %4652 = vmatpush.bf16.msrb.mxu1 %v7552_v34  ;;  %v7626_v56 = vld [vmem:[%s9508_s1 + $0x9b8] sm:$0xff] }
  0xec   :  { %4665 = vmatpush.bf16.msrb.mxu2 %v7560_v35 }
  0xed   :  { %4678 = vmatpush.bf16.msrb.mxu3 %v7568_v36 }
  0xee   :  { %4640 = vmatpush.bf16.msrb.mxu0 %v7543_v39  ;;  %v4414_v1 = vpop.f32.mrf.mxu2  ;;  %v7573_v39 = vld [vmem:[%s9508_s1 + $0x810] sm:$0xff] }
  0xef   :  { %4653 = vmatpush.bf16.msrb.mxu1 %v7551_v40  ;;  %v4427_v4 = vpop.f32.mrf.mxu3  ;;  %v7581_v40 = vld [vmem:[%s9508_s1 + $0x850] sm:$0xff] }
  0xf0   :  { %4666 = vmatpush.bf16.msrb.mxu2 %v7559_v42  ;;  %v7589_v42 = vld [vmem:[%s9508_s1 + $0x890] sm:$0xff]  ;;  %v7624_v4 = vld [vmem:[%s9508_s1 + $0x9a8] sm:$0xff] }
  0xf1   :  { %4679 = vmatpush.bf16.msrb.mxu3 %v7567_v43  ;;  %v7597_v43 = vld [vmem:[%s9508_s1 + $0x8d0] sm:$0xff] }
  0xf2   :  { %4641 = vmatpush.bf16.msrb.mxu0 %v7542_v45  ;;  %v7580_v45 = vld [vmem:[%s9508_s1 + $0x848] sm:$0xff]  ;;  %v7633_v1 = vld [vmem:[%s9508_s1 + $0x9f0] sm:$0xff] }
  0xf3   :  { %4654 = vmatpush.bf16.msrb.mxu1 %v7550_v46  ;;  %v7588_v46 = vld [vmem:[%s9508_s1 + $0x888] sm:$0xff] }
  0xf4   :  { %4667 = vmatpush.bf16.msrb.mxu2 %v7558_v47  ;;  %v7596_v47 = vld [vmem:[%s9508_s1 + $0x8c8] sm:$0xff] }
  0xf5   :  { %4680 = vmatpush.bf16.msrb.mxu3 %v7566_v48 }
  0xf6   :  { %4642 = vmatpush.bf16.msrb.mxu0 %v7541_v54  ;;  %v7610_v54 = vld [vmem:[%s9508_s1 + $0x938] sm:$0xff] }
  0xf7   :  { %4655 = vmatpush.bf16.msrb.mxu1 %v7549_v55  ;;  %v7618_v55 = vld [vmem:[%s9508_s1 + $0x978] sm:$0xff] }
  0xf8   :  { %4668 = vmatpush.bf16.msrb.mxu2 %v7557_v57  ;;  %v7634_v57 = vld [vmem:[%s9508_s1 + $0x9f8] sm:$0xff] }
  0xf9   :  { %4681 = vmatpush.bf16.msrb.mxu3 %v7565_v58  ;;  %v1099_v58 = vld [vmem:[#allocation1] sm:$0xff] }
  0xfa   :  { %4643 = vmatpush.bf16.msrb.mxu0 %v7540_v59  ;;  %v1101_v59 = vld [vmem:[#allocation1 + $0x12] sm:$0xff] }
  0xfb   :  { %4656 = vmatpush.bf16.msrb.mxu1 %v7548_v60  ;;  %v1100_v60 = vld [vmem:[#allocation1 + $0x9] sm:$0xff] }
  0xfc   :  { %4669 = vmatpush.bf16.msrb.mxu2 %v7556_v61  ;;  %v1102_v61 = vld [vmem:[#allocation1 + $0x1b] sm:$0xff] }
  0xfd   :  { %4682 = vmatpush.bf16.msrb.mxu3 %v7564_v62  ;;  %v7609_v62 = vld [vmem:[%s9508_s1 + $0x930] sm:$0xff] }
  0xfe   :  { %4644 = vmatpush.bf16.msrb.mxu0 %v7539_v6  ;;  %v4438_v22 = vpop.f32.mrf.mxu0 }
  0xff   :  { %4657 = vmatpush.bf16.msrb.mxu1 %v7547_v7  ;;  %v4439_v23 = vadd.f32 %v4438_v22, %v8649_v53  ;;  %v4451_v26 = vpop.f32.mrf.mxu1  ;;  %v7595_v53 = vld [vmem:[%s9508_s1 + $0x8c0] sm:$0xff] }
 0x100   :  { %4670 = vmatpush.bf16.msrb.mxu2 %v7555_v8  ;;  %v7607_v8 = vld [vmem:[%s9508_s1 + $0x920] sm:$0xff] }
 0x101   :  { %4683 = vmatpush.bf16.msrb.mxu3 %v7563_v9  ;;  %4645 = vmatmul.bf16.vlgmr.msrb.gmra.mxu0 %v1093_v63  ;;  %v4452_v29 = vadd.f32 %v4451_v26, %v4439_v23  ;;  %v7617_v63 = vld [vmem:[%s9508_s1 + $0x970] sm:$0xff]  ;;  %v7615_v9 = vld [vmem:[%s9508_s1 + $0x960] sm:$0xff] }
 0x102   :  { %4689 = vmatpush.bf16.msra.mxu0 %v7578_v10  ;;  %4658 = vmatmul.bf16.vlgmr.msrb.gmra.mxu1 %v1094_v2  ;;  %v7608_v2 = vld [vmem:[%s9508_s1 + $0x928] sm:$0xff]  ;;  %v7605_v23 = vld [vmem:[%s9508_s1 + $0x910] sm:$0xff] }
 0x103   :  { %4702 = vmatpush.bf16.msra.mxu1 %v7586_v11  ;;  %4671 = vmatmul.bf16.vlgmr.msrb.gmra.mxu2 %v1095_v0  ;;  %v7625_v0 = vld [vmem:[%s9508_s1 + $0x9b0] sm:$0xff]  ;;  %v7623_v11 = vld [vmem:[%s9508_s1 + $0x9a0] sm:$0xff] }
 0x104   :  { %4715 = vmatpush.bf16.msra.mxu2 %v7594_v12  ;;  %4684 = vmatmul.bf16.vlgmr.msrb.gmra.mxu3 %v1096_v3  ;;  %v7616_v3 = vld [vmem:[%s9508_s1 + $0x968] sm:$0xff]  ;;  %v7631_v12 = vld [vmem:[%s9508_s1 + $0x9e0] sm:$0xff]  ;;  %v7621_v26 = vld [vmem:[%s9508_s1 + $0x990] sm:$0xff] }
 0x105   :  { %4728 = vmatpush.bf16.msra.mxu3 %v7602_v13 }
 0x106   :  { %4690 = vmatpush.bf16.msra.mxu0 %v7577_v14  ;;  %v4464_v34 = vpop.f32.mrf.mxu2  ;;  %v4440_v37 = vpop.f32.mrf.mxu0  ;;  %v7606_v14 = vld [vmem:[%s9508_s1 + $0x918] sm:$0xff] }
 0x107   :  { %4703 = vmatpush.bf16.msra.mxu1 %v7585_v15  ;;  %v4465_v35 = vadd.f32 %v4464_v34, %v4452_v29  ;;  %v4477_v36 = vpop.f32.mrf.mxu3  ;;  %v4453_v41 = vpop.f32.mrf.mxu1  ;;  %v7614_v15 = vld [vmem:[%s9508_s1 + $0x958] sm:$0xff]  ;;  %v7612_v29 = vld [vmem:[%s9508_s1 + $0x948] sm:$0xff] }
 0x108   :  { %4716 = vmatpush.bf16.msra.mxu2 %v7593_v16  ;;  %v7622_v16 = vld [vmem:[%s9508_s1 + $0x998] sm:$0xff]  ;;  %v7619_v41 = vld [vmem:[%s9508_s1 + $0x980] sm:$0xff] }
 0x109   :  { %4729 = vmatpush.bf16.msra.mxu3 %v7601_v17  ;;  %v4478_v38 = vadd.f32 %v4477_v36, %v4465_v35  ;;  %v7630_v17 = vld [vmem:[%s9508_s1 + $0x9d8] sm:$0xff]  ;;  %v1104_v35 = vld [vmem:[#allocation1 + $0x2d] sm:$0xff] }
 0x10a   :  { %4691 = vmatpush.bf16.msra.mxu0 %v7576_v18  ;;  %v1106_v36 = vld [vmem:[#allocation1 + $0x3f] sm:$0xff] }
 0x10b   :  { %4704 = vmatpush.bf16.msra.mxu1 %v7584_v19 }
 0x10c   :  { %4717 = vmatpush.bf16.msra.mxu2 %v7592_v20 }
 0x10d   :  { %4730 = vmatpush.bf16.msra.mxu3 %v7600_v21 }
 0x10e   :  { %4692 = vmatpush.bf16.msra.mxu0 %v7575_v24  ;;  %v4466_v48 = vpop.f32.mrf.mxu2  ;;  %v7613_v24 = vld [vmem:[%s9508_s1 + $0x950] sm:$0xff] }
 0x10f   :  { %4705 = vmatpush.bf16.msra.mxu1 %v7583_v25  ;;  %v4479_v49 = vpop.f32.mrf.mxu3  ;;  %v7649_v48 = vld [vmem:[%s9508_s1 + $0xa70] sm:$0xff] }
 0x110   :  { %4718 = vmatpush.bf16.msra.mxu2 %v7591_v27  ;;  %v7629_v27 = vld [vmem:[%s9508_s1 + $0x9d0] sm:$0xff] }
 0x111   :  { %4731 = vmatpush.bf16.msra.mxu3 %v7599_v28  ;;  %v7604_v28 = vld [vmem:[%s9508_s1 + $0x908] sm:$0xff]  ;;  %v7657_v49 = vld [vmem:[%s9508_s1 + $0xab0] sm:$0xff] }
 0x112   :  { %4693 = vmatpush.bf16.msra.mxu0 %v7574_v30  ;;  %v7620_v30 = vld [vmem:[%s9508_s1 + $0x988] sm:$0xff] }
 0x113   :  { %4706 = vmatpush.bf16.msra.mxu1 %v7582_v31  ;;  %v7628_v31 = vld [vmem:[%s9508_s1 + $0x9c8] sm:$0xff] }
 0x114   :  { %4719 = vmatpush.bf16.msra.mxu2 %v7590_v32  ;;  %v1103_v32 = vld [vmem:[#allocation1 + $0x24] sm:$0xff] }
 0x115   :  { %4732 = vmatpush.bf16.msra.mxu3 %v7598_v33  ;;  %v1105_v33 = vld [vmem:[#allocation1 + $0x36] sm:$0xff] }
 0x116   :  { %4694 = vmatpush.bf16.msra.mxu0 %v7573_v39  ;;  %v7603_v39 = vld [vmem:[%s9508_s1 + $0x900] sm:$0xff] }
 0x117   :  { %4707 = vmatpush.bf16.msra.mxu1 %v7581_v40  ;;  %v7611_v40 = vld [vmem:[%s9508_s1 + $0x940] sm:$0xff] }
 0x118   :  { %4720 = vmatpush.bf16.msra.mxu2 %v7589_v42  ;;  %v7627_v42 = vld [vmem:[%s9508_s1 + $0x9c0] sm:$0xff] }
 0x119   :  { %4733 = vmatpush.bf16.msra.mxu3 %v7597_v43  ;;  %v7642_v43 = vld [vmem:[%s9508_s1 + $0xa38] sm:$0xff] }
 0x11a   :  { %4695 = vmatpush.bf16.msra.mxu0 %v7572_v44  ;;  %v7650_v44 = vld [vmem:[%s9508_s1 + $0xa78] sm:$0xff] }
 0x11b   :  { %4708 = vmatpush.bf16.msra.mxu1 %v7580_v45  ;;  %v7658_v45 = vld [vmem:[%s9508_s1 + $0xab8] sm:$0xff] }
 0x11c   :  { %4721 = vmatpush.bf16.msra.mxu2 %v7588_v46  ;;  %v7666_v46 = vld [vmem:[%s9508_s1 + $0xaf8] sm:$0xff] }
 0x11d   :  { %4734 = vmatpush.bf16.msra.mxu3 %v7596_v47  ;;  %v7641_v47 = vld [vmem:[%s9508_s1 + $0xa30] sm:$0xff] }
 0x11e   :  { %4696 = vmatpush.bf16.msra.mxu0 %v7571_v50  ;;  %v4490_v6 = vpop.f32.mrf.mxu0  ;;  %v7665_v50 = vld [vmem:[%s9508_s1 + $0xaf0] sm:$0xff] }
 0x11f   :  { %4709 = vmatpush.bf16.msra.mxu1 %v7579_v51  ;;  %v4491_v7 = vadd.f32 %v4490_v6, %v4478_v38  ;;  %v4503_v10 = vpop.f32.mrf.mxu1  ;;  %v26_v38 = vld [vmem:[%s9507_s0 + $0x28] sm:$0xff] }
 0x120   :  { %4722 = vmatpush.bf16.msra.mxu2 %v7587_v52  ;;  %1108 = vst [vmem:[#allocation1] ss:$9 sm:$0xff] %v26_v38  ;;  %v7640_v51 = vld [vmem:[%s9508_s1 + $0xa28] sm:$0xff] }
 0x121   :  { %4735 = vmatpush.bf16.msra.mxu3 %v7595_v53  ;;  %4697 = vmatmul.bf16.vlgmr.msra.gmra.mxu0 %v1099_v58  ;;  %v4504_v13 = vadd.f32 %v4503_v10, %v4491_v7  ;;  %v7648_v52 = vld [vmem:[%s9508_s1 + $0xa68] sm:$0xff]  ;;  %v7647_v58 = vld [vmem:[%s9508_s1 + $0xa60] sm:$0xff] }
 0x122   :  { %4741 = vmatpush.bf16.msrb.mxu0 %v7610_v54  ;;  %4710 = vmatmul.bf16.vlgmr.msra.gmra.mxu1 %v1100_v60  ;;  %v7656_v53 = vld [vmem:[%s9508_s1 + $0xaa8] sm:$0xff]  ;;  %v7655_v60 = vld [vmem:[%s9508_s1 + $0xaa0] sm:$0xff] }
 0x123   :  { %4754 = vmatpush.bf16.msrb.mxu1 %v7618_v55  ;;  %4723 = vmatmul.bf16.vlgmr.msra.gmra.mxu2 %v1101_v59  ;;  %v7664_v54 = vld [vmem:[%s9508_s1 + $0xae8] sm:$0xff] }
 0x124   :  { %4767 = vmatpush.bf16.msrb.mxu2 %v7626_v56  ;;  %4736 = vmatmul.bf16.vlgmr.msra.gmra.mxu3 %v1102_v61  ;;  %v7663_v61 = vld [vmem:[%s9508_s1 + $0xae0] sm:$0xff]  ;;  %v7696_v38 = vld [vmem:[%s9508_s1 + $0xbe8] sm:$0xff] }
 0x125   :  { %4780 = vmatpush.bf16.msrb.mxu3 %v7634_v57  ;;  %v7639_v57 = vld [vmem:[%s9508_s1 + $0xa20] sm:$0xff] }
 0x126   :  { %4742 = vmatpush.bf16.msrb.mxu0 %v7609_v62  ;;  %v4516_v18 = vpop.f32.mrf.mxu2  ;;  %v4492_v21 = vpop.f32.mrf.mxu0 }
 0x127   :  { %4755 = vmatpush.bf16.msrb.mxu1 %v7617_v63  ;;  %v4517_v19 = vadd.f32 %v4516_v18, %v4504_v13  ;;  %v4529_v20 = vpop.f32.mrf.mxu3  ;;  %v4505_v25 = vpop.f32.mrf.mxu1  ;;  %v7638_v63 = vld [vmem:[%s9508_s1 + $0xa18] sm:$0xff]  ;;  %v7636_v13 = vld [vmem:[%s9508_s1 + $0xa08] sm:$0xff]  ;;  %v7651_v21 = vld [vmem:[%s9508_s1 + $0xa80] sm:$0xff] }
 0x128   :  { %4768 = vmatpush.bf16.msrb.mxu2 %v7625_v0  ;;  %v7646_v0 = vld [vmem:[%s9508_s1 + $0xa58] sm:$0xff] }
 0x129   :  { %4781 = vmatpush.bf16.msrb.mxu3 %v7633_v1  ;;  %v8847_v22 = vadd.f32 %v4529_v20, %v4517_v19  ;;  %v7654_v1 = vld [vmem:[%s9508_s1 + $0xa98] sm:$0xff]  ;;  %v7635_v19 = vld [vmem:[%s9508_s1 + $0xa00] sm:$0xff] }
 0x12a   :  { %4743 = vmatpush.bf16.msrb.mxu0 %v7608_v2  ;;  %v7662_v2 = vld [vmem:[%s9508_s1 + $0xad8] sm:$0xff]  ;;  %v7643_v20 = vld [vmem:[%s9508_s1 + $0xa40] sm:$0xff] }
 0x12b   :  { %4756 = vmatpush.bf16.msrb.mxu1 %v7616_v3  ;;  %v7690_v25 = vld [vmem:[%s9508_s1 + $0xbb8] sm:$0xff] }
 0x12c   :  { %4769 = vmatpush.bf16.msrb.mxu2 %v7624_v4 }
 0x12d   :  { %4782 = vmatpush.bf16.msrb.mxu3 %v7632_v5 }
 0x12e   :  { %4744 = vmatpush.bf16.msrb.mxu0 %v7607_v8  ;;  %v4518_v34 = vpop.f32.mrf.mxu2  ;;  %v7637_v8 = vld [vmem:[%s9508_s1 + $0xa10] sm:$0xff] }
 0x12f   :  { %4757 = vmatpush.bf16.msrb.mxu1 %v7615_v9  ;;  %v4531_v37 = vpop.f32.mrf.mxu3  ;;  %v7645_v9 = vld [vmem:[%s9508_s1 + $0xa50] sm:$0xff] }
 0x130   :  { %4770 = vmatpush.bf16.msrb.mxu2 %v7623_v11  ;;  %v7653_v11 = vld [vmem:[%s9508_s1 + $0xa90] sm:$0xff]  ;;  %v7688_v37 = vld [vmem:[%s9508_s1 + $0xba8] sm:$0xff] }
 0x131   :  { %4783 = vmatpush.bf16.msrb.mxu3 %v7631_v12  ;;  %v7661_v12 = vld [vmem:[%s9508_s1 + $0xad0] sm:$0xff] }
 0x132   :  { %4745 = vmatpush.bf16.msrb.mxu0 %v7606_v14  ;;  %v7644_v14 = vld [vmem:[%s9508_s1 + $0xa48] sm:$0xff]  ;;  %v7697_v34 = vld [vmem:[%s9508_s1 + $0xbf0] sm:$0xff] }
 0x133   :  { %4758 = vmatpush.bf16.msrb.mxu1 %v7614_v15  ;;  %v7652_v15 = vld [vmem:[%s9508_s1 + $0xa88] sm:$0xff] }
 0x134   :  { %4771 = vmatpush.bf16.msrb.mxu2 %v7622_v16  ;;  %v7660_v16 = vld [vmem:[%s9508_s1 + $0xac8] sm:$0xff] }
 0x135   :  { %4784 = vmatpush.bf16.msrb.mxu3 %v7630_v17 }
 0x136   :  { %4746 = vmatpush.bf16.msrb.mxu0 %v7605_v23  ;;  %v7674_v23 = vld [vmem:[%s9508_s1 + $0xb38] sm:$0xff] }
 0x137   :  { %4759 = vmatpush.bf16.msrb.mxu1 %v7613_v24  ;;  %v7682_v24 = vld [vmem:[%s9508_s1 + $0xb78] sm:$0xff] }
 0x138   :  { %4772 = vmatpush.bf16.msrb.mxu2 %v7621_v26  ;;  %v7698_v26 = vld [vmem:[%s9508_s1 + $0xbf8] sm:$0xff] }
 0x139   :  { %4785 = vmatpush.bf16.msrb.mxu3 %v7629_v27  ;;  %v1109_v27 = vld [vmem:[#allocation1] sm:$0xff] }
 0x13a   :  { %4747 = vmatpush.bf16.msrb.mxu0 %v7604_v28  ;;  %v1111_v28 = vld [vmem:[#allocation1 + $0x12] sm:$0xff] }
 0x13b   :  { %4760 = vmatpush.bf16.msrb.mxu1 %v7612_v29  ;;  %v1110_v29 = vld [vmem:[#allocation1 + $0x9] sm:$0xff] }
 0x13c   :  { %4773 = vmatpush.bf16.msrb.mxu2 %v7620_v30  ;;  %v1112_v30 = vld [vmem:[#allocation1 + $0x1b] sm:$0xff] }
 0x13d   :  { %4786 = vmatpush.bf16.msrb.mxu3 %v7628_v31  ;;  %v7673_v31 = vld [vmem:[%s9508_s1 + $0xb30] sm:$0xff] }
 0x13e   :  { %4748 = vmatpush.bf16.msrb.mxu0 %v7603_v39  ;;  %v4542_v55 = vpop.f32.mrf.mxu0 }
 0x13f   :  { %4761 = vmatpush.bf16.msrb.mxu1 %v7611_v40  ;;  %v4543_v56 = vadd.f32 %v4542_v55, %v8847_v22  ;;  %v4555_v59 = vpop.f32.mrf.mxu1  ;;  %v7659_v22 = vld [vmem:[%s9508_s1 + $0xac0] sm:$0xff] }
 0x140   :  { %4774 = vmatpush.bf16.msrb.mxu2 %v7619_v41  ;;  %v7671_v41 = vld [vmem:[%s9508_s1 + $0xb20] sm:$0xff] }
 0x141   :  { %4787 = vmatpush.bf16.msrb.mxu3 %v7627_v42  ;;  %4749 = vmatmul.bf16.vlgmr.msrb.gmra.mxu0 %v1103_v32  ;;  %v4556_v62 = vadd.f32 %v4555_v59, %v4543_v56  ;;  %v7681_v32 = vld [vmem:[%s9508_s1 + $0xb70] sm:$0xff]  ;;  %v7679_v42 = vld [vmem:[%s9508_s1 + $0xb60] sm:$0xff] }
 0x142   :  { %4793 = vmatpush.bf16.msra.mxu0 %v7642_v43  ;;  %4762 = vmatmul.bf16.vlgmr.msrb.gmra.mxu1 %v1104_v35  ;;  %v7672_v35 = vld [vmem:[%s9508_s1 + $0xb28] sm:$0xff]  ;;  %v7669_v56 = vld [vmem:[%s9508_s1 + $0xb10] sm:$0xff] }
 0x143   :  { %4806 = vmatpush.bf16.msra.mxu1 %v7650_v44  ;;  %4775 = vmatmul.bf16.vlgmr.msrb.gmra.mxu2 %v1105_v33  ;;  %v7689_v33 = vld [vmem:[%s9508_s1 + $0xbb0] sm:$0xff]  ;;  %v7687_v44 = vld [vmem:[%s9508_s1 + $0xba0] sm:$0xff] }
 0x144   :  { %4819 = vmatpush.bf16.msra.mxu2 %v7658_v45  ;;  %4788 = vmatmul.bf16.vlgmr.msrb.gmra.mxu3 %v1106_v36  ;;  %v7680_v36 = vld [vmem:[%s9508_s1 + $0xb68] sm:$0xff]  ;;  %v7695_v45 = vld [vmem:[%s9508_s1 + $0xbe0] sm:$0xff]  ;;  %v7685_v59 = vld [vmem:[%s9508_s1 + $0xb90] sm:$0xff] }
 0x145   :  { %4832 = vmatpush.bf16.msra.mxu3 %v7666_v46 }
 0x146   :  { %4794 = vmatpush.bf16.msra.mxu0 %v7641_v47  ;;  %v4568_v3 = vpop.f32.mrf.mxu2  ;;  %v4544_v6 = vpop.f32.mrf.mxu0  ;;  %v7670_v47 = vld [vmem:[%s9508_s1 + $0xb18] sm:$0xff] }
 0x147   :  { %4807 = vmatpush.bf16.msra.mxu1 %v7649_v48  ;;  %v4569_v4 = vadd.f32 %v4568_v3, %v4556_v62  ;;  %v4581_v5 = vpop.f32.mrf.mxu3  ;;  %v4557_v10 = vpop.f32.mrf.mxu1  ;;  %v7678_v48 = vld [vmem:[%s9508_s1 + $0xb58] sm:$0xff]  ;;  %v7676_v62 = vld [vmem:[%s9508_s1 + $0xb48] sm:$0xff] }
 0x148   :  { %4820 = vmatpush.bf16.msra.mxu2 %v7657_v49  ;;  %v7686_v49 = vld [vmem:[%s9508_s1 + $0xb98] sm:$0xff]  ;;  %v7683_v10 = vld [vmem:[%s9508_s1 + $0xb80] sm:$0xff] }
 0x149   :  { %4833 = vmatpush.bf16.msra.mxu3 %v7665_v50  ;;  %v4582_v7 = vadd.f32 %v4581_v5, %v4569_v4  ;;  %v7694_v50 = vld [vmem:[%s9508_s1 + $0xbd8] sm:$0xff]  ;;  %v1114_v4 = vld [vmem:[#allocation1 + $0x2d] sm:$0xff] }
 0x14a   :  { %4795 = vmatpush.bf16.msra.mxu0 %v7640_v51  ;;  %v1116_v5 = vld [vmem:[#allocation1 + $0x3f] sm:$0xff] }
 0x14b   :  { %4808 = vmatpush.bf16.msra.mxu1 %v7648_v52 }
 0x14c   :  { %4821 = vmatpush.bf16.msra.mxu2 %v7656_v53 }
 0x14d   :  { %4834 = vmatpush.bf16.msra.mxu3 %v7664_v54 }
 0x14e   :  { %4796 = vmatpush.bf16.msra.mxu0 %v7639_v57  ;;  %v4570_v17 = vpop.f32.mrf.mxu2  ;;  %v7677_v57 = vld [vmem:[%s9508_s1 + $0xb50] sm:$0xff] }
 0x14f   :  { %4809 = vmatpush.bf16.msra.mxu1 %v7647_v58  ;;  %v4583_v18 = vpop.f32.mrf.mxu3  ;;  %v7713_v17 = vld [vmem:[%s9508_s1 + $0xc70] sm:$0xff] }
 0x150   :  { %4822 = vmatpush.bf16.msra.mxu2 %v7655_v60  ;;  %v7693_v60 = vld [vmem:[%s9508_s1 + $0xbd0] sm:$0xff] }
 0x151   :  { %4835 = vmatpush.bf16.msra.mxu3 %v7663_v61  ;;  %v7668_v61 = vld [vmem:[%s9508_s1 + $0xb08] sm:$0xff]  ;;  %v7721_v18 = vld [vmem:[%s9508_s1 + $0xcb0] sm:$0xff] }
 0x152   :  { %4797 = vmatpush.bf16.msra.mxu0 %v7638_v63  ;;  %v7684_v63 = vld [vmem:[%s9508_s1 + $0xb88] sm:$0xff] }
 0x153   :  { %4810 = vmatpush.bf16.msra.mxu1 %v7646_v0  ;;  %v7692_v0 = vld [vmem:[%s9508_s1 + $0xbc8] sm:$0xff] }
 0x154   :  { %4823 = vmatpush.bf16.msra.mxu2 %v7654_v1  ;;  %v1113_v1 = vld [vmem:[#allocation1 + $0x24] sm:$0xff] }
 0x155   :  { %4836 = vmatpush.bf16.msra.mxu3 %v7662_v2  ;;  %v1115_v2 = vld [vmem:[#allocation1 + $0x36] sm:$0xff] }
 0x156   :  { %4798 = vmatpush.bf16.msra.mxu0 %v7637_v8  ;;  %v7667_v8 = vld [vmem:[%s9508_s1 + $0xb00] sm:$0xff] }
 0x157   :  { %4811 = vmatpush.bf16.msra.mxu1 %v7645_v9  ;;  %v7675_v9 = vld [vmem:[%s9508_s1 + $0xb40] sm:$0xff] }
 0x158   :  { %4824 = vmatpush.bf16.msra.mxu2 %v7653_v11  ;;  %v7691_v11 = vld [vmem:[%s9508_s1 + $0xbc0] sm:$0xff] }
 0x159   :  { %4837 = vmatpush.bf16.msra.mxu3 %v7661_v12  ;;  %v7706_v12 = vld [vmem:[%s9508_s1 + $0xc38] sm:$0xff] }
 0x15a   :  { %4799 = vmatpush.bf16.msra.mxu0 %v7636_v13  ;;  %v7714_v13 = vld [vmem:[%s9508_s1 + $0xc78] sm:$0xff] }
 0x15b   :  { %4812 = vmatpush.bf16.msra.mxu1 %v7644_v14  ;;  %v7722_v14 = vld [vmem:[%s9508_s1 + $0xcb8] sm:$0xff] }
 0x15c   :  { %4825 = vmatpush.bf16.msra.mxu2 %v7652_v15  ;;  %v7730_v15 = vld [vmem:[%s9508_s1 + $0xcf8] sm:$0xff] }
 0x15d   :  { %4838 = vmatpush.bf16.msra.mxu3 %v7660_v16  ;;  %v7705_v16 = vld [vmem:[%s9508_s1 + $0xc30] sm:$0xff] }
 0x15e   :  { %4800 = vmatpush.bf16.msra.mxu0 %v7635_v19  ;;  %v4594_v39 = vpop.f32.mrf.mxu0  ;;  %v7729_v19 = vld [vmem:[%s9508_s1 + $0xcf0] sm:$0xff] }
 0x15f   :  { %4813 = vmatpush.bf16.msra.mxu1 %v7643_v20  ;;  %v4595_v40 = vadd.f32 %v4594_v39, %v4582_v7  ;;  %v4607_v43 = vpop.f32.mrf.mxu1  ;;  %v27_v7 = vld [vmem:[%s9507_s0 + $0x30] sm:$0xff]  ;;  %v7704_v20 = vld [vmem:[%s9508_s1 + $0xc28] sm:$0xff] }
 0x160   :  { %4826 = vmatpush.bf16.msra.mxu2 %v7651_v21  ;;  %1118 = vst [vmem:[#allocation1] ss:$9 sm:$0xff] %v27_v7  ;;  %v7712_v21 = vld [vmem:[%s9508_s1 + $0xc68] sm:$0xff] }
 0x161   :  { %4839 = vmatpush.bf16.msra.mxu3 %v7659_v22  ;;  %4801 = vmatmul.bf16.vlgmr.msra.gmra.mxu0 %v1109_v27  ;;  %v4608_v46 = vadd.f32 %v4607_v43, %v4595_v40  ;;  %v7720_v22 = vld [vmem:[%s9508_s1 + $0xca8] sm:$0xff]  ;;  %v7711_v27 = vld [vmem:[%s9508_s1 + $0xc60] sm:$0xff] }
 0x162   :  { %4845 = vmatpush.bf16.msrb.mxu0 %v7674_v23  ;;  %4814 = vmatmul.bf16.vlgmr.msra.gmra.mxu1 %v1110_v29  ;;  %v7728_v23 = vld [vmem:[%s9508_s1 + $0xce8] sm:$0xff]  ;;  %v7719_v29 = vld [vmem:[%s9508_s1 + $0xca0] sm:$0xff] }
 0x163   :  { %4858 = vmatpush.bf16.msrb.mxu1 %v7682_v24  ;;  %4827 = vmatmul.bf16.vlgmr.msra.gmra.mxu2 %v1111_v28  ;;  %v7760_v7 = vld [vmem:[%s9508_s1 + $0xde8] sm:$0xff] }
 0x164   :  { %4871 = vmatpush.bf16.msrb.mxu2 %v7690_v25  ;;  %4840 = vmatmul.bf16.vlgmr.msra.gmra.mxu3 %v1112_v30  ;;  %v7727_v30 = vld [vmem:[%s9508_s1 + $0xce0] sm:$0xff] }
 0x165   :  { %4884 = vmatpush.bf16.msrb.mxu3 %v7698_v26  ;;  %v7703_v26 = vld [vmem:[%s9508_s1 + $0xc20] sm:$0xff] }
 0x166   :  { %4846 = vmatpush.bf16.msrb.mxu0 %v7673_v31  ;;  %v4620_v51 = vpop.f32.mrf.mxu2  ;;  %v4596_v54 = vpop.f32.mrf.mxu0 }
 0x167   :  { %4859 = vmatpush.bf16.msrb.mxu1 %v7681_v32  ;;  %v4621_v52 = vadd.f32 %v4620_v51, %v4608_v46  ;;  %v4633_v53 = vpop.f32.mrf.mxu3  ;;  %v4609_v58 = vpop.f32.mrf.mxu1  ;;  %v7702_v32 = vld [vmem:[%s9508_s1 + $0xc18] sm:$0xff]  ;;  %v7700_v46 = vld [vmem:[%s9508_s1 + $0xc08] sm:$0xff]  ;;  %v7715_v54 = vld [vmem:[%s9508_s1 + $0xc80] sm:$0xff] }
 0x168   :  { %4872 = vmatpush.bf16.msrb.mxu2 %v7689_v33  ;;  %v7710_v33 = vld [vmem:[%s9508_s1 + $0xc58] sm:$0xff] }
 0x169   :  { %4885 = vmatpush.bf16.msrb.mxu3 %v7697_v34  ;;  %v9045_v55 = vadd.f32 %v4633_v53, %v4621_v52  ;;  %v7718_v34 = vld [vmem:[%s9508_s1 + $0xc98] sm:$0xff]  ;;  %v7699_v52 = vld [vmem:[%s9508_s1 + $0xc00] sm:$0xff] }
 0x16a   :  { %4847 = vmatpush.bf16.msrb.mxu0 %v7672_v35  ;;  %v7726_v35 = vld [vmem:[%s9508_s1 + $0xcd8] sm:$0xff]  ;;  %v7707_v53 = vld [vmem:[%s9508_s1 + $0xc40] sm:$0xff] }
 0x16b   :  { %4860 = vmatpush.bf16.msrb.mxu1 %v7680_v36  ;;  %v7754_v58 = vld [vmem:[%s9508_s1 + $0xdb8] sm:$0xff] }
 0x16c   :  { %4873 = vmatpush.bf16.msrb.mxu2 %v7688_v37 }
 0x16d   :  { %4886 = vmatpush.bf16.msrb.mxu3 %v7696_v38 }
 0x16e   :  { %4848 = vmatpush.bf16.msrb.mxu0 %v7671_v41  ;;  %v4622_v3 = vpop.f32.mrf.mxu2  ;;  %v7701_v41 = vld [vmem:[%s9508_s1 + $0xc10] sm:$0xff] }
 0x16f   :  { %4861 = vmatpush.bf16.msrb.mxu1 %v7679_v42  ;;  %v4635_v6 = vpop.f32.mrf.mxu3  ;;  %v7709_v42 = vld [vmem:[%s9508_s1 + $0xc50] sm:$0xff] }
 0x170   :  { %4874 = vmatpush.bf16.msrb.mxu2 %v7687_v44  ;;  %v7717_v44 = vld [vmem:[%s9508_s1 + $0xc90] sm:$0xff]  ;;  %v7752_v6 = vld [vmem:[%s9508_s1 + $0xda8] sm:$0xff] }
 0x171   :  { %4887 = vmatpush.bf16.msrb.mxu3 %v7695_v45  ;;  %v7725_v45 = vld [vmem:[%s9508_s1 + $0xcd0] sm:$0xff] }
 0x172   :  { %4849 = vmatpush.bf16.msrb.mxu0 %v7670_v47  ;;  %v7708_v47 = vld [vmem:[%s9508_s1 + $0xc48] sm:$0xff]  ;;  %v7761_v3 = vld [vmem:[%s9508_s1 + $0xdf0] sm:$0xff] }
 0x173   :  { %4862 = vmatpush.bf16.msrb.mxu1 %v7678_v48  ;;  %v7716_v48 = vld [vmem:[%s9508_s1 + $0xc88] sm:$0xff] }
 0x174   :  { %4875 = vmatpush.bf16.msrb.mxu2 %v7686_v49  ;;  %v7724_v49 = vld [vmem:[%s9508_s1 + $0xcc8] sm:$0xff] }
 0x175   :  { %4888 = vmatpush.bf16.msrb.mxu3 %v7694_v50 }
 0x176   :  { %4850 = vmatpush.bf16.msrb.mxu0 %v7669_v56  ;;  %v7738_v56 = vld [vmem:[%s9508_s1 + $0xd38] sm:$0xff] }
 0x177   :  { %4863 = vmatpush.bf16.msrb.mxu1 %v7677_v57  ;;  %v7746_v57 = vld [vmem:[%s9508_s1 + $0xd78] sm:$0xff] }
 0x178   :  { %4876 = vmatpush.bf16.msrb.mxu2 %v7685_v59  ;;  %v7762_v59 = vld [vmem:[%s9508_s1 + $0xdf8] sm:$0xff] }
 0x179   :  { %4889 = vmatpush.bf16.msrb.mxu3 %v7693_v60  ;;  %v1119_v60 = vld [vmem:[#allocation1] sm:$0xff] }
 0x17a   :  { %4851 = vmatpush.bf16.msrb.mxu0 %v7668_v61  ;;  %v1121_v61 = vld [vmem:[#allocation1 + $0x12] sm:$0xff] }
 0x17b   :  { %4864 = vmatpush.bf16.msrb.mxu1 %v7676_v62  ;;  %v1120_v62 = vld [vmem:[#allocation1 + $0x9] sm:$0xff] }
 0x17c   :  { %4877 = vmatpush.bf16.msrb.mxu2 %v7684_v63  ;;  %v1122_v63 = vld [vmem:[#allocation1 + $0x1b] sm:$0xff] }
 0x17d   :  { %4890 = vmatpush.bf16.msrb.mxu3 %v7692_v0  ;;  %v7737_v0 = vld [vmem:[%s9508_s1 + $0xd30] sm:$0xff] }
 0x17e   :  { %4852 = vmatpush.bf16.msrb.mxu0 %v7667_v8  ;;  %v4646_v24 = vpop.f32.mrf.mxu0 }
 0x17f   :  { %4865 = vmatpush.bf16.msrb.mxu1 %v7675_v9  ;;  %v4647_v25 = vadd.f32 %v4646_v24, %v9045_v55  ;;  %v4659_v28 = vpop.f32.mrf.mxu1  ;;  %v7723_v55 = vld [vmem:[%s9508_s1 + $0xcc0] sm:$0xff] }
 0x180   :  { %4878 = vmatpush.bf16.msrb.mxu2 %v7683_v10  ;;  %v7735_v10 = vld [vmem:[%s9508_s1 + $0xd20] sm:$0xff] }
 0x181   :  { %4891 = vmatpush.bf16.msrb.mxu3 %v7691_v11  ;;  %4853 = vmatmul.bf16.vlgmr.msrb.gmra.mxu0 %v1113_v1  ;;  %v4660_v31 = vadd.f32 %v4659_v28, %v4647_v25  ;;  %v7745_v1 = vld [vmem:[%s9508_s1 + $0xd70] sm:$0xff]  ;;  %v7743_v11 = vld [vmem:[%s9508_s1 + $0xd60] sm:$0xff] }
 0x182   :  { %4897 = vmatpush.bf16.msra.mxu0 %v7706_v12  ;;  %4866 = vmatmul.bf16.vlgmr.msrb.gmra.mxu1 %v1114_v4  ;;  %v7736_v4 = vld [vmem:[%s9508_s1 + $0xd28] sm:$0xff]  ;;  %v7733_v25 = vld [vmem:[%s9508_s1 + $0xd10] sm:$0xff] }
 0x183   :  { %4910 = vmatpush.bf16.msra.mxu1 %v7714_v13  ;;  %4879 = vmatmul.bf16.vlgmr.msrb.gmra.mxu2 %v1115_v2  ;;  %v7753_v2 = vld [vmem:[%s9508_s1 + $0xdb0] sm:$0xff]  ;;  %v7751_v13 = vld [vmem:[%s9508_s1 + $0xda0] sm:$0xff] }
 0x184   :  { %4923 = vmatpush.bf16.msra.mxu2 %v7722_v14  ;;  %4892 = vmatmul.bf16.vlgmr.msrb.gmra.mxu3 %v1116_v5  ;;  %v7744_v5 = vld [vmem:[%s9508_s1 + $0xd68] sm:$0xff]  ;;  %v7759_v14 = vld [vmem:[%s9508_s1 + $0xde0] sm:$0xff]  ;;  %v7749_v28 = vld [vmem:[%s9508_s1 + $0xd90] sm:$0xff] }
 0x185   :  { %4936 = vmatpush.bf16.msra.mxu3 %v7730_v15 }
 0x186   :  { %4898 = vmatpush.bf16.msra.mxu0 %v7705_v16  ;;  %v4672_v36 = vpop.f32.mrf.mxu2  ;;  %v4648_v39 = vpop.f32.mrf.mxu0  ;;  %v7734_v16 = vld [vmem:[%s9508_s1 + $0xd18] sm:$0xff] }
 0x187   :  { %4911 = vmatpush.bf16.msra.mxu1 %v7713_v17  ;;  %v4673_v37 = vadd.f32 %v4672_v36, %v4660_v31  ;;  %v4685_v38 = vpop.f32.mrf.mxu3  ;;  %v4661_v43 = vpop.f32.mrf.mxu1  ;;  %v7742_v17 = vld [vmem:[%s9508_s1 + $0xd58] sm:$0xff]  ;;  %v7740_v31 = vld [vmem:[%s9508_s1 + $0xd48] sm:$0xff] }
 0x188   :  { %4924 = vmatpush.bf16.msra.mxu2 %v7721_v18  ;;  %v7750_v18 = vld [vmem:[%s9508_s1 + $0xd98] sm:$0xff]  ;;  %v7747_v43 = vld [vmem:[%s9508_s1 + $0xd80] sm:$0xff] }
 0x189   :  { %4937 = vmatpush.bf16.msra.mxu3 %v7729_v19  ;;  %v4686_v40 = vadd.f32 %v4685_v38, %v4673_v37  ;;  %v7758_v19 = vld [vmem:[%s9508_s1 + $0xdd8] sm:$0xff]  ;;  %v1124_v37 = vld [vmem:[#allocation1 + $0x2d] sm:$0xff] }
 0x18a   :  { %4899 = vmatpush.bf16.msra.mxu0 %v7704_v20  ;;  %v1126_v38 = vld [vmem:[#allocation1 + $0x3f] sm:$0xff] }
 0x18b   :  { %4912 = vmatpush.bf16.msra.mxu1 %v7712_v21 }
 0x18c   :  { %4925 = vmatpush.bf16.msra.mxu2 %v7720_v22 }
 0x18d   :  { %4938 = vmatpush.bf16.msra.mxu3 %v7728_v23 }
 0x18e   :  { %4900 = vmatpush.bf16.msra.mxu0 %v7703_v26  ;;  %v4674_v50 = vpop.f32.mrf.mxu2  ;;  %v7741_v26 = vld [vmem:[%s9508_s1 + $0xd50] sm:$0xff] }
 0x18f   :  { %4913 = vmatpush.bf16.msra.mxu1 %v7711_v27  ;;  %v4687_v51 = vpop.f32.mrf.mxu3  ;;  %v7777_v50 = vld [vmem:[%s9508_s1 + $0xe70] sm:$0xff] }
 0x190   :  { %4926 = vmatpush.bf16.msra.mxu2 %v7719_v29  ;;  %v7757_v29 = vld [vmem:[%s9508_s1 + $0xdd0] sm:$0xff] }
 0x191   :  { %4939 = vmatpush.bf16.msra.mxu3 %v7727_v30  ;;  %v7732_v30 = vld [vmem:[%s9508_s1 + $0xd08] sm:$0xff]  ;;  %v7785_v51 = vld [vmem:[%s9508_s1 + $0xeb0] sm:$0xff] }
 0x192   :  { %4901 = vmatpush.bf16.msra.mxu0 %v7702_v32  ;;  %v7748_v32 = vld [vmem:[%s9508_s1 + $0xd88] sm:$0xff] }
 0x193   :  { %4914 = vmatpush.bf16.msra.mxu1 %v7710_v33  ;;  %v7756_v33 = vld [vmem:[%s9508_s1 + $0xdc8] sm:$0xff] }
 0x194   :  { %4927 = vmatpush.bf16.msra.mxu2 %v7718_v34  ;;  %v1123_v34 = vld [vmem:[#allocation1 + $0x24] sm:$0xff] }
 0x195   :  { %4940 = vmatpush.bf16.msra.mxu3 %v7726_v35  ;;  %v1125_v35 = vld [vmem:[#allocation1 + $0x36] sm:$0xff] }
 0x196   :  { %4902 = vmatpush.bf16.msra.mxu0 %v7701_v41  ;;  %v7731_v41 = vld [vmem:[%s9508_s1 + $0xd00] sm:$0xff] }
 0x197   :  { %4915 = vmatpush.bf16.msra.mxu1 %v7709_v42  ;;  %v7739_v42 = vld [vmem:[%s9508_s1 + $0xd40] sm:$0xff] }
 0x198   :  { %4928 = vmatpush.bf16.msra.mxu2 %v7717_v44  ;;  %v7755_v44 = vld [vmem:[%s9508_s1 + $0xdc0] sm:$0xff] }
 0x199   :  { %4941 = vmatpush.bf16.msra.mxu3 %v7725_v45  ;;  %v7770_v45 = vld [vmem:[%s9508_s1 + $0xe38] sm:$0xff] }
 0x19a   :  { %4903 = vmatpush.bf16.msra.mxu0 %v7700_v46  ;;  %v7778_v46 = vld [vmem:[%s9508_s1 + $0xe78] sm:$0xff] }
 0x19b   :  { %4916 = vmatpush.bf16.msra.mxu1 %v7708_v47  ;;  %v7786_v47 = vld [vmem:[%s9508_s1 + $0xeb8] sm:$0xff] }
 0x19c   :  { %4929 = vmatpush.bf16.msra.mxu2 %v7716_v48  ;;  %v7794_v48 = vld [vmem:[%s9508_s1 + $0xef8] sm:$0xff] }
 0x19d   :  { %4942 = vmatpush.bf16.msra.mxu3 %v7724_v49  ;;  %v7769_v49 = vld [vmem:[%s9508_s1 + $0xe30] sm:$0xff] }
 0x19e   :  { %4904 = vmatpush.bf16.msra.mxu0 %v7699_v52  ;;  %v4698_v8 = vpop.f32.mrf.mxu0  ;;  %v7793_v52 = vld [vmem:[%s9508_s1 + $0xef0] sm:$0xff] }
 0x19f   :  { %4917 = vmatpush.bf16.msra.mxu1 %v7707_v53  ;;  %v4699_v9 = vadd.f32 %v4698_v8, %v4686_v40  ;;  %v4711_v12 = vpop.f32.mrf.mxu1  ;;  %v28_v40 = vld [vmem:[%s9507_s0 + $0x38] sm:$0xff]  ;;  %v7768_v53 = vld [vmem:[%s9508_s1 + $0xe28] sm:$0xff] }
 0x1a0   :  { %4930 = vmatpush.bf16.msra.mxu2 %v7715_v54  ;;  %1128 = vst [vmem:[#allocation1] ss:$9 sm:$0xff] %v28_v40  ;;  %v7776_v54 = vld [vmem:[%s9508_s1 + $0xe68] sm:$0xff] }
 0x1a1   :  { %4943 = vmatpush.bf16.msra.mxu3 %v7723_v55  ;;  %4905 = vmatmul.bf16.vlgmr.msra.gmra.mxu0 %v1119_v60  ;;  %v4712_v15 = vadd.f32 %v4711_v12, %v4699_v9  ;;  %v7784_v55 = vld [vmem:[%s9508_s1 + $0xea8] sm:$0xff]  ;;  %v7775_v60 = vld [vmem:[%s9508_s1 + $0xe60] sm:$0xff] }
 0x1a2   :  { %4949 = vmatpush.bf16.msrb.mxu0 %v7738_v56  ;;  %4918 = vmatmul.bf16.vlgmr.msra.gmra.mxu1 %v1120_v62  ;;  %v7792_v56 = vld [vmem:[%s9508_s1 + $0xee8] sm:$0xff]  ;;  %v7783_v62 = vld [vmem:[%s9508_s1 + $0xea0] sm:$0xff] }
 0x1a3   :  { %4962 = vmatpush.bf16.msrb.mxu1 %v7746_v57  ;;  %4931 = vmatmul.bf16.vlgmr.msra.gmra.mxu2 %v1121_v61  ;;  %v7824_v40 = vld [vmem:[%s9508_s1 + $0xfe8] sm:$0xff] }
 0x1a4   :  { %4975 = vmatpush.bf16.msrb.mxu2 %v7754_v58  ;;  %4944 = vmatmul.bf16.vlgmr.msra.gmra.mxu3 %v1122_v63  ;;  %v7791_v63 = vld [vmem:[%s9508_s1 + $0xee0] sm:$0xff] }
 0x1a5   :  { %4988 = vmatpush.bf16.msrb.mxu3 %v7762_v59  ;;  %v7767_v59 = vld [vmem:[%s9508_s1 + $0xe20] sm:$0xff] }
 0x1a6   :  { %4950 = vmatpush.bf16.msrb.mxu0 %v7737_v0  ;;  %v4724_v20 = vpop.f32.mrf.mxu2  ;;  %v4700_v23 = vpop.f32.mrf.mxu0 }
 0x1a7   :  { %4963 = vmatpush.bf16.msrb.mxu1 %v7745_v1  ;;  %v4725_v21 = vadd.f32 %v4724_v20, %v4712_v15  ;;  %v4737_v22 = vpop.f32.mrf.mxu3  ;;  %v4713_v27 = vpop.f32.mrf.mxu1  ;;  %v7766_v1 = vld [vmem:[%s9508_s1 + $0xe18] sm:$0xff]  ;;  %v7764_v15 = vld [vmem:[%s9508_s1 + $0xe08] sm:$0xff]  ;;  %v7779_v23 = vld [vmem:[%s9508_s1 + $0xe80] sm:$0xff] }
 0x1a8   :  { %4976 = vmatpush.bf16.msrb.mxu2 %v7753_v2  ;;  %v7774_v2 = vld [vmem:[%s9508_s1 + $0xe58] sm:$0xff] }
 0x1a9   :  { %4989 = vmatpush.bf16.msrb.mxu3 %v7761_v3  ;;  %v9243_v24 = vadd.f32 %v4737_v22, %v4725_v21  ;;  %v7782_v3 = vld [vmem:[%s9508_s1 + $0xe98] sm:$0xff]  ;;  %v7763_v21 = vld [vmem:[%s9508_s1 + $0xe00] sm:$0xff] }
 0x1aa   :  { %4951 = vmatpush.bf16.msrb.mxu0 %v7736_v4  ;;  %v7790_v4 = vld [vmem:[%s9508_s1 + $0xed8] sm:$0xff]  ;;  %v7771_v22 = vld [vmem:[%s9508_s1 + $0xe40] sm:$0xff] }
 0x1ab   :  { %4964 = vmatpush.bf16.msrb.mxu1 %v7744_v5  ;;  %v7818_v27 = vld [vmem:[%s9508_s1 + $0xfb8] sm:$0xff] }
 0x1ac   :  { %4977 = vmatpush.bf16.msrb.mxu2 %v7752_v6 }
 0x1ad   :  { %4990 = vmatpush.bf16.msrb.mxu3 %v7760_v7 }
 0x1ae   :  { %4952 = vmatpush.bf16.msrb.mxu0 %v7735_v10  ;;  %v4726_v36 = vpop.f32.mrf.mxu2  ;;  %v7765_v10 = vld [vmem:[%s9508_s1 + $0xe10] sm:$0xff] }
 0x1af   :  { %4965 = vmatpush.bf16.msrb.mxu1 %v7743_v11  ;;  %v4739_v39 = vpop.f32.mrf.mxu3  ;;  %v7773_v11 = vld [vmem:[%s9508_s1 + $0xe50] sm:$0xff] }
 0x1b0   :  { %4978 = vmatpush.bf16.msrb.mxu2 %v7751_v13  ;;  %v7781_v13 = vld [vmem:[%s9508_s1 + $0xe90] sm:$0xff]  ;;  %v7816_v39 = vld [vmem:[%s9508_s1 + $0xfa8] sm:$0xff] }
 0x1b1   :  { %4991 = vmatpush.bf16.msrb.mxu3 %v7759_v14  ;;  %v7789_v14 = vld [vmem:[%s9508_s1 + $0xed0] sm:$0xff] }
 0x1b2   :  { %4953 = vmatpush.bf16.msrb.mxu0 %v7734_v16  ;;  %v7772_v16 = vld [vmem:[%s9508_s1 + $0xe48] sm:$0xff]  ;;  %v7825_v36 = vld [vmem:[%s9508_s1 + $0xff0] sm:$0xff] }
 0x1b3   :  { %4966 = vmatpush.bf16.msrb.mxu1 %v7742_v17  ;;  %v7780_v17 = vld [vmem:[%s9508_s1 + $0xe88] sm:$0xff] }
 0x1b4   :  { %4979 = vmatpush.bf16.msrb.mxu2 %v7750_v18  ;;  %v7788_v18 = vld [vmem:[%s9508_s1 + $0xec8] sm:$0xff] }
 0x1b5   :  { %4992 = vmatpush.bf16.msrb.mxu3 %v7758_v19 }
 0x1b6   :  { %4954 = vmatpush.bf16.msrb.mxu0 %v7733_v25  ;;  %v7802_v25 = vld [vmem:[%s9508_s1 + $0xf38] sm:$0xff] }
 0x1b7   :  { %4967 = vmatpush.bf16.msrb.mxu1 %v7741_v26  ;;  %v7810_v26 = vld [vmem:[%s9508_s1 + $0xf78] sm:$0xff] }
 0x1b8   :  { %4980 = vmatpush.bf16.msrb.mxu2 %v7749_v28  ;;  %v7826_v28 = vld [vmem:[%s9508_s1 + $0xff8] sm:$0xff] }
 0x1b9   :  { %4993 = vmatpush.bf16.msrb.mxu3 %v7757_v29  ;;  %v1129_v29 = vld [vmem:[#allocation1] sm:$0xff] }
 0x1ba   :  { %4955 = vmatpush.bf16.msrb.mxu0 %v7732_v30  ;;  %v1131_v30 = vld [vmem:[#allocation1 + $0x12] sm:$0xff] }
 0x1bb   :  { %4968 = vmatpush.bf16.msrb.mxu1 %v7740_v31  ;;  %v1130_v31 = vld [vmem:[#allocation1 + $0x9] sm:$0xff] }
 0x1bc   :  { %4981 = vmatpush.bf16.msrb.mxu2 %v7748_v32  ;;  %v1132_v32 = vld [vmem:[#allocation1 + $0x1b] sm:$0xff] }
 0x1bd   :  { %4994 = vmatpush.bf16.msrb.mxu3 %v7756_v33  ;;  %v7801_v33 = vld [vmem:[%s9508_s1 + $0xf30] sm:$0xff] }
 0x1be   :  { %4956 = vmatpush.bf16.msrb.mxu0 %v7731_v41  ;;  %v4750_v57 = vpop.f32.mrf.mxu0 }
 0x1bf   :  { %4969 = vmatpush.bf16.msrb.mxu1 %v7739_v42  ;;  %v4751_v58 = vadd.f32 %v4750_v57, %v9243_v24  ;;  %v4763_v61 = vpop.f32.mrf.mxu1  ;;  %v7787_v24 = vld [vmem:[%s9508_s1 + $0xec0] sm:$0xff] }
 0x1c0   :  { %4982 = vmatpush.bf16.msrb.mxu2 %v7747_v43  ;;  %v7799_v43 = vld [vmem:[%s9508_s1 + $0xf20] sm:$0xff] }
 0x1c1   :  { %4995 = vmatpush.bf16.msrb.mxu3 %v7755_v44  ;;  %4957 = vmatmul.bf16.vlgmr.msrb.gmra.mxu0 %v1123_v34  ;;  %v4764_v0 = vadd.f32 %v4763_v61, %v4751_v58  ;;  %v7809_v34 = vld [vmem:[%s9508_s1 + $0xf70] sm:$0xff]  ;;  %v7807_v44 = vld [vmem:[%s9508_s1 + $0xf60] sm:$0xff] }
 0x1c2   :  { %5001 = vmatpush.bf16.msra.mxu0 %v7770_v45  ;;  %4970 = vmatmul.bf16.vlgmr.msrb.gmra.mxu1 %v1124_v37  ;;  %v7800_v37 = vld [vmem:[%s9508_s1 + $0xf28] sm:$0xff]  ;;  %v7797_v58 = vld [vmem:[%s9508_s1 + $0xf10] sm:$0xff] }
 0x1c3   :  { %5014 = vmatpush.bf16.msra.mxu1 %v7778_v46  ;;  %4983 = vmatmul.bf16.vlgmr.msrb.gmra.mxu2 %v1125_v35  ;;  %v7817_v35 = vld [vmem:[%s9508_s1 + $0xfb0] sm:$0xff]  ;;  %v7815_v46 = vld [vmem:[%s9508_s1 + $0xfa0] sm:$0xff] }
 0x1c4   :  { %5027 = vmatpush.bf16.msra.mxu2 %v7786_v47  ;;  %4996 = vmatmul.bf16.vlgmr.msrb.gmra.mxu3 %v1126_v38  ;;  %v7808_v38 = vld [vmem:[%s9508_s1 + $0xf68] sm:$0xff]  ;;  %v7823_v47 = vld [vmem:[%s9508_s1 + $0xfe0] sm:$0xff]  ;;  %v7813_v61 = vld [vmem:[%s9508_s1 + $0xf90] sm:$0xff] }
 0x1c5   :  { %5040 = vmatpush.bf16.msra.mxu3 %v7794_v48 }
 0x1c6   :  { %5002 = vmatpush.bf16.msra.mxu0 %v7769_v49  ;;  %v4776_v5 = vpop.f32.mrf.mxu2  ;;  %v4752_v8 = vpop.f32.mrf.mxu0  ;;  %v7798_v49 = vld [vmem:[%s9508_s1 + $0xf18] sm:$0xff] }
 0x1c7   :  { %5015 = vmatpush.bf16.msra.mxu1 %v7777_v50  ;;  %v4777_v6 = vadd.f32 %v4776_v5, %v4764_v0  ;;  %v4789_v7 = vpop.f32.mrf.mxu3  ;;  %v4765_v12 = vpop.f32.mrf.mxu1  ;;  %v7806_v50 = vld [vmem:[%s9508_s1 + $0xf58] sm:$0xff]  ;;  %v7804_v0 = vld [vmem:[%s9508_s1 + $0xf48] sm:$0xff]  ;;  %v7795_v5 = vld [vmem:[%s9508_s1 + $0xf00] sm:$0xff] }
 0x1c8   :  { %5028 = vmatpush.bf16.msra.mxu2 %v7785_v51  ;;  %v7814_v51 = vld [vmem:[%s9508_s1 + $0xf98] sm:$0xff]  ;;  %v7819_v8 = vld [vmem:[%s9508_s1 + $0xfc0] sm:$0xff] }
 0x1c9   :  { %5041 = vmatpush.bf16.msra.mxu3 %v7793_v52  ;;  %v4790_v9 = vadd.f32 %v4789_v7, %v4777_v6  ;;  %v7822_v52 = vld [vmem:[%s9508_s1 + $0xfd8] sm:$0xff]  ;;  %v7803_v6 = vld [vmem:[%s9508_s1 + $0xf40] sm:$0xff] }
 0x1ca   :  { %5003 = vmatpush.bf16.msra.mxu0 %v7768_v53  ;;  %v7811_v7 = vld [vmem:[%s9508_s1 + $0xf80] sm:$0xff] }
 0x1cb   :  { %5016 = vmatpush.bf16.msra.mxu1 %v7776_v54  ;;  %v1136_v12 = vld [vmem:[#allocation1 + $0x3f] sm:$0xff] }
 0x1cc   :  { %5029 = vmatpush.bf16.msra.mxu2 %v7784_v55 }
 0x1cd   :  { %5042 = vmatpush.bf16.msra.mxu3 %v7792_v56 }
 0x1ce   :  { %5004 = vmatpush.bf16.msra.mxu0 %v7767_v59  ;;  %v4778_v19 = vpop.f32.mrf.mxu2  ;;  %v7805_v59 = vld [vmem:[%s9508_s1 + $0xf50] sm:$0xff] }
 0x1cf   :  { %5017 = vmatpush.bf16.msra.mxu1 %v7775_v60  ;;  %v4791_v20 = vpop.f32.mrf.mxu3 }
 0x1d0   :  { %5030 = vmatpush.bf16.msra.mxu2 %v7783_v62  ;;  %v7821_v62 = vld [vmem:[%s9508_s1 + $0xfd0] sm:$0xff] }
 0x1d1   :  { %5043 = vmatpush.bf16.msra.mxu3 %v7791_v63  ;;  %v7796_v63 = vld [vmem:[%s9508_s1 + $0xf08] sm:$0xff] }
 0x1d2   :  { %5005 = vmatpush.bf16.msra.mxu0 %v7766_v1  ;;  %v7812_v1 = vld [vmem:[%s9508_s1 + $0xf88] sm:$0xff] }
 0x1d3   :  { %5018 = vmatpush.bf16.msra.mxu1 %v7774_v2  ;;  %v7820_v2 = vld [vmem:[%s9508_s1 + $0xfc8] sm:$0xff] }
 0x1d4   :  { %5031 = vmatpush.bf16.msra.mxu2 %v7782_v3 }
 0x1d5   :  { %5044 = vmatpush.bf16.msra.mxu3 %v7790_v4 }
 0x1d6   :  { %5006 = vmatpush.bf16.msra.mxu0 %v7765_v10  ;;  %v1134_v10 = vld [vmem:[#allocation1 + $0x2d] sm:$0xff] }
 0x1d7   :  { %5019 = vmatpush.bf16.msra.mxu1 %v7773_v11  ;;  %v1135_v11 = vld [vmem:[#allocation1 + $0x36] sm:$0xff] }
 0x1d8   :  { %5032 = vmatpush.bf16.msra.mxu2 %v7781_v13 }
 0x1d9   :  { %5045 = vmatpush.bf16.msra.mxu3 %v7789_v14 }
 0x1da   :  { %5007 = vmatpush.bf16.msra.mxu0 %v7764_v15 }
 0x1db   :  { %5020 = vmatpush.bf16.msra.mxu1 %v7772_v16 }
 0x1dc   :  { %5033 = vmatpush.bf16.msra.mxu2 %v7780_v17 }
 0x1dd   :  { %5046 = vmatpush.bf16.msra.mxu3 %v7788_v18 }
 0x1de   :  { %5008 = vmatpush.bf16.msra.mxu0 %v7763_v21  ;;  %v4802_v41 = vpop.f32.mrf.mxu0 }
 0x1df   :  { %5021 = vmatpush.bf16.msra.mxu1 %v7771_v22  ;;  %v4803_v42 = vadd.f32 %v4802_v41, %v4790_v9  ;;  %v4815_v45 = vpop.f32.mrf.mxu1  ;;  %v1133_v9 = vld [vmem:[#allocation1 + $0x24] sm:$0xff]  ;;  %v7834_v41 = vld [vmem:[%s9510_s3 + $0x38] sm:$0xff] }
 0x1e0   :  { %5034 = vmatpush.bf16.msra.mxu2 %v7779_v23 }
 0x1e1   :  { %5047 = vmatpush.bf16.msra.mxu3 %v7787_v24  ;;  %5009 = vmatmul.bf16.vlgmr.msra.gmra.mxu0 %v1129_v29  ;;  %v4816_v48 = vadd.f32 %v4815_v45, %v4803_v42  ;;  %v7832_v45 = vld [vmem:[%s9510_s3 + $0x28] sm:$0xff] }
 0x1e2   :  { %5053 = vmatpush.bf16.msrb.mxu0 %v7802_v25  ;;  %5022 = vmatmul.bf16.vlgmr.msra.gmra.mxu1 %v1130_v31 }
 0x1e3   :  { %5066 = vmatpush.bf16.msrb.mxu1 %v7810_v26  ;;  %5035 = vmatmul.bf16.vlgmr.msra.gmra.mxu2 %v1131_v30 }
 0x1e4   :  { %5079 = vmatpush.bf16.msrb.mxu2 %v7818_v27  ;;  %5048 = vmatmul.bf16.vlgmr.msra.gmra.mxu3 %v1132_v32 }
 0x1e5   :  { %5092 = vmatpush.bf16.msrb.mxu3 %v7826_v28 }
 0x1e6   :  { %5054 = vmatpush.bf16.msrb.mxu0 %v7801_v33  ;;  %v4828_v53 = vpop.f32.mrf.mxu2  ;;  %v4804_v56 = vpop.f32.mrf.mxu0 }
 0x1e7   :  { %5067 = vmatpush.bf16.msrb.mxu1 %v7809_v34  ;;  %v4829_v54 = vadd.f32 %v4828_v53, %v4816_v48  ;;  %v4841_v55 = vpop.f32.mrf.mxu3  ;;  %v4817_v60 = vpop.f32.mrf.mxu1  ;;  %v7831_v48 = vld [vmem:[%s9510_s3 + $0x20] sm:$0xff]  ;;  %v7828_v53 = vld [vmem:[%s9510_s3 + $0x8] sm:$0xff] }
 0x1e8   :  { %5080 = vmatpush.bf16.msrb.mxu2 %v7817_v35 }
 0x1e9   :  { %5093 = vmatpush.bf16.msrb.mxu3 %v7825_v36  ;;  %v4842_v57 = vadd.f32 %v4841_v55, %v4829_v54 }
 0x1ea   :  { %5055 = vmatpush.bf16.msrb.mxu0 %v7800_v37 }
 0x1eb   :  { %5068 = vmatpush.bf16.msrb.mxu1 %v7808_v38 }
 0x1ec   :  { %5081 = vmatpush.bf16.msrb.mxu2 %v7816_v39 }
 0x1ed   :  { %5094 = vmatpush.bf16.msrb.mxu3 %v7824_v40 }
 0x1ee   :  { %5056 = vmatpush.bf16.msrb.mxu0 %v7799_v43  ;;  %v4830_v3 = vpop.f32.mrf.mxu2 }
 0x1ef   :  { %5069 = vmatpush.bf16.msrb.mxu1 %v7807_v44  ;;  %v4843_v4 = vpop.f32.mrf.mxu3  ;;  %v7833_v44 = vld [vmem:[%s9510_s3 + $0x30] sm:$0xff] }
 0x1f0   :  { %5082 = vmatpush.bf16.msrb.mxu2 %v7815_v46 }
 0x1f1   :  { %5095 = vmatpush.bf16.msrb.mxu3 %v7823_v47 }
 0x1f2   :  { %5057 = vmatpush.bf16.msrb.mxu0 %v7798_v49  ;;  %v7830_v49 = vld [vmem:[%s9510_s3 + $0x18] sm:$0xff] }
 0x1f3   :  { %5070 = vmatpush.bf16.msrb.mxu1 %v7806_v50 }
 0x1f4   :  { %5083 = vmatpush.bf16.msrb.mxu2 %v7814_v51  ;;  %v7829_v51 = vld [vmem:[%s9510_s3 + $0x10] sm:$0xff] }
 0x1f5   :  { %5096 = vmatpush.bf16.msrb.mxu3 %v7822_v52 }
 0x1f6   :  { %5058 = vmatpush.bf16.msrb.mxu0 %v7797_v58  ;;  %v7827_v58 = vld [vmem:[%s9510_s3] sm:$0xff] }
 0x1f7   :  { %5071 = vmatpush.bf16.msrb.mxu1 %v7805_v59 }
 0x1f8   :  { %5084 = vmatpush.bf16.msrb.mxu2 %v7813_v61 }
 0x1f9   :  { %5097 = vmatpush.bf16.msrb.mxu3 %v7821_v62 }
 0x1fa   :  { %5059 = vmatpush.bf16.msrb.mxu0 %v7796_v63 }
 0x1fb   :  { %5072 = vmatpush.bf16.msrb.mxu1 %v7804_v0 }
 0x1fc   :  { %5085 = vmatpush.bf16.msrb.mxu2 %v7812_v1 }
 0x1fd   :  { %5098 = vmatpush.bf16.msrb.mxu3 %v7820_v2 }
 0x1fe   :  { %5060 = vmatpush.bf16.msrb.mxu0 %v7795_v5  ;;  %v4854_v13 = vpop.f32.mrf.mxu0 }
 0x1ff   :  { %5073 = vmatpush.bf16.msrb.mxu1 %v7803_v6  ;;  %v4855_v14 = vadd.f32 %v4854_v13, %v4842_v57  ;;  %v4867_v15 = vpop.f32.mrf.mxu1 }
 0x200   :  { %5086 = vmatpush.bf16.msrb.mxu2 %v7811_v7 }
 0x201   :  { %5099 = vmatpush.bf16.msrb.mxu3 %v7819_v8  ;;  %5061 = vmatmul.bf16.vlgmr.msrb.gmra.mxu0 %v1133_v9  ;;  %v4868_v16 = vadd.f32 %v4867_v15, %v4855_v14 }
 0x202   :  { %5074 = vmatmul.bf16.vlgmr.msrb.gmra.mxu1 %v1134_v10  ;;  %5175 = vmatpush.bf16.msra.mxu0 %v7834_v41 }
 0x203   :  { %5087 = vmatmul.bf16.vlgmr.msrb.gmra.mxu2 %v1135_v11 }
 0x204   :  { %5100 = vmatmul.bf16.vlgmr.msrb.gmra.mxu3 %v1136_v12 }
 0x206   :  { %v4880_v17 = vpop.f32.mrf.mxu2  ;;  %v4856_v20 = vpop.f32.mrf.mxu0  ;;  %5176 = vmatpush.bf16.msra.mxu0 %v7833_v44 }
 0x207   :  { %v4881_v18 = vadd.f32 %v4880_v17, %v4868_v16  ;;  %v4893_v19 = vpop.f32.mrf.mxu3  ;;  %v4869_v22 = vpop.f32.mrf.mxu1  ;;  %v7837_v20 = vld [vmem:[%s9511_s4] ss:$0 sm:$0xff]  ;;  %s7868_s4 = smov [#allocation2]  }
 0x208   :  { %s5224_s18 = sshll.u32 %s7868_s4, 4  ;;  %s5225_s18 = int_to_ptr.vmem [resolvable:$true] %s5224_s18 }
 0x209   :  { %v4894_v21 = vadd.f32 %v4893_v19, %v4881_v18  ;;  %v5189_v19 = vlaneseq }
 0x20a   :  { %5177 = vmatpush.bf16.msra.mxu0 %v7832_v45 }
 0x20e   :  { %v4882_v23 = vpop.f32.mrf.mxu2  ;;  %5178 = vmatpush.bf16.msra.mxu0 %v7831_v48 }
 0x20f   :  { %v4895_v24 = vpop.f32.mrf.mxu3 }
 0x212   :  { %5179 = vmatpush.bf16.msra.mxu0 %v7830_v49 }
 0x216   :  { %5180 = vmatpush.bf16.msra.mxu0 %v7829_v51 }
 0x21a   :  { %5181 = vmatpush.bf16.msra.mxu0 %v7828_v53 }
 0x21e   :  { %v4906_v25 = vpop.f32.mrf.mxu0  ;;  %5182 = vmatpush.bf16.msra.mxu0 %v7827_v58 }
 0x21f   :  { %v4907_v26 = vadd.f32 %v4906_v25, %v4894_v21  ;;  %v4919_v27 = vpop.f32.mrf.mxu1  ;;  %v5190_v21 = vand.u32 127, %v5189_v19 }
 0x221   :  { %v4920_v28 = vadd.f32 %v4919_v27, %v4907_v26  ;;  %vm5191_vm0 = vcmp.lt.s32.totalorder %v5190_v21, 10 }
 0x226   :  { %v4932_v29 = vpop.f32.mrf.mxu2  ;;  %v4908_v32 = vpop.f32.mrf.mxu0 }
 0x227   :  { %v4933_v30 = vadd.f32 %v4932_v29, %v4920_v28  ;;  %v4945_v31 = vpop.f32.mrf.mxu3  ;;  %v4921_v34 = vpop.f32.mrf.mxu1 }
 0x229   :  { %v4946_v33 = vadd.f32 %v4945_v31, %v4933_v30 }
 0x22e   :  { %v4934_v35 = vpop.f32.mrf.mxu2 }
 0x22f   :  { %v4947_v36 = vpop.f32.mrf.mxu3 }
 0x23e   :  { %v4958_v37 = vpop.f32.mrf.mxu0 }
 0x23f   :  { %v4971_v38 = vpop.f32.mrf.mxu1  ;;  %v4959_v55 = vadd.f32 %v4958_v37, %v4946_v33 }
 0x241   :  { %v4972_v60 = vadd.f32 %v4971_v38, %v4959_v55 }
 0x246   :  { %v4984_v39 = vpop.f32.mrf.mxu2  ;;  %v4960_v42 = vpop.f32.mrf.mxu0 }
 0x247   :  { %v4997_v40 = vpop.f32.mrf.mxu3  ;;  %v4973_v43 = vpop.f32.mrf.mxu1  ;;  %v4985_v61 = vadd.f32 %v4984_v39, %v4972_v60 }
 0x249   :  { %v4998_v0 = vadd.f32 %v4997_v40, %v4985_v61 }
 0x24e   :  { %v4986_v46 = vpop.f32.mrf.mxu2 }
 0x24f   :  { %v4999_v47 = vpop.f32.mrf.mxu3 }
 0x25e   :  { %v5010_v50 = vpop.f32.mrf.mxu0 }
 0x25f   :  { %v5023_v52 = vpop.f32.mrf.mxu1  ;;  %v5011_v1 = vadd.f32 %v5010_v50, %v4998_v0 }
 0x261   :  { %v5024_v2 = vadd.f32 %v5023_v52, %v5011_v1 }
 0x266   :  { %v5036_v54 = vpop.f32.mrf.mxu2  ;;  %v5012_v57 = vpop.f32.mrf.mxu0 }
 0x267   :  { %v5049_v56 = vpop.f32.mrf.mxu3  ;;  %v5025_v59 = vpop.f32.mrf.mxu1  ;;  %v5037_v3 = vadd.f32 %v5036_v54, %v5024_v2 }
 0x269   :  { %v5050_v4 = vadd.f32 %v5049_v56, %v5037_v3 }
 0x26e   :  { %v5038_v62 = vpop.f32.mrf.mxu2 }
 0x26f   :  { %v5051_v63 = vpop.f32.mrf.mxu3 }
 0x27e   :  { %v5062_v5 = vpop.f32.mrf.mxu0 }
 0x27f   :  { %v5075_v6 = vpop.f32.mrf.mxu1  ;;  %v5063_v7 = vadd.f32 %v5062_v5, %v5050_v4 }
 0x281   :  { %v5076_v8 = vadd.f32 %v5075_v6, %v5063_v7 }
 0x286   :  { %v5088_v9 = vpop.f32.mrf.mxu2  ;;  %v5064_v12 = vpop.f32.mrf.mxu0 }
 0x287   :  { %v5101_v10 = vpop.f32.mrf.mxu3  ;;  %v5089_v11 = vadd.f32 %v5088_v9, %v5076_v8  ;;  %v5077_v13 = vpop.f32.mrf.mxu1 }
 0x289   :  { %v5102_v14 = vadd.f32 %v5101_v10, %v5089_v11 }
 0x28b   :  { %v5105_v15 = vmax.f32 %v5102_v14, 0.0 }
 0x28d   :  { %v5106_v16 = vpack.c.bf16 %v5105_v15, %v5105_v15 }
 0x28e   :  { %v5090_v17 = vpop.f32.mrf.mxu2 }
 0x28f   :  { %v5103_v18 = vpop.f32.mrf.mxu3  ;;  %5183 = vmatmul.bf16.vlgmr.msra.gmra.mxu0 %v5106_v16 }
 0x30c   :  { %v5184_v22 = vpop.f32.mrf.mxu0 }
 0x30d   :  { %v5185_v23 = vadd.f32 %v7837_v20, %v5184_v22 }
 0x30f   :  { %v5188_v24 = vmax.f32 %v5185_v23, 0.0 }
 0x311   :  { %v5192_v25 = vsel %vm5191_vm0, %v5188_v24, -1e+30 }
 0x312   :  { %v5194_v26 = vsel %vm5193_vm1, %v5192_v25, -inf }
 0x313   :  { %5195 = vmax.xlane.f32.xlu0 %v5194_v26 }
 0x314   :  { %v5186_v27 = vpop.f32.mrf.mxu0 }
 0x386   :  { %v5196_v28 = vpop.xlane.xlu0 %5195 }
 0x387   :  { %v5197_v29 = vsub.f32 %v5192_v25, %v5196_v28 }
 0x389   :  { %v5198_v30 = vmul.f32 1.442695, %v5197_v29 }
 0x38b   :  { %7838 = vpow2.f32 %v5198_v30 }
 0x391   :  { %v7839_v31 = vpop.eup %7838 }
 0x392   :  { %v5200_v32 = vsel %vm5193_vm1, %v7839_v31, 0.0 }
 0x393   :  { %5201 = vadd.xlane.f32.xlu0 %v5200_v32 }
 0x406   :  { %v5202_v33 = vpop.xlane.xlu0 %5201 }
 0x407   :  { %7840 = vrcp.f32 %v5202_v33  ;;  %v5214_v37 = vand.u32 2147483648, %v5202_v33  ;;  %v5212_v39 = vand.u32 2147483647, %v5202_v33  ;;  %vm5208_vm3 = vweird.f32 %v5202_v33 }
 0x409   :  { %v5215_v41 = vor.u32 1.1754944e-38, %v5214_v37  ;;  %vm5213_vm5 = vcmp.eq.f32.partialorder %v5212_v39, 8.507059e+37 }
 0x40d   :  { %v7841_v34 = vpop.eup %7840 }
 0x40e   :  { %v5204_v35 = vmul.f32 %v7841_v34, %v5202_v33  ;;  %vm5209_vm2 = vweird.f32 %v7841_v34 }
 0x40f   :  { %vm5210_vm4 = vmor %vm5208_vm3, %vm5209_vm2 }
 0x410   :  { %v5205_v36 = vsub.f32 1.0, %v5204_v35 }
 0x412   :  { %v5206_v38 = vmul.f32 %v7841_v34, %v5205_v36 }
 0x414   :  { %v5207_v40 = vadd.f32 %v7841_v34, %v5206_v38 }
 0x416   :  { %v5211_v42 = vsel %vm5210_vm4, %v7841_v34, %v5207_v40 }
 0x417   :  { %v5216_v43 = vsel %vm5213_vm5, %v5215_v41, %v5211_v42 }
 0x418   :  { %v5217_v44 = vmul.f32 %v7839_v31, %v5216_v43 }
 0x41a   :  { %5218 = vst [vmem:[#allocation2] sm:$0x3] %v5217_v44 }
 0x41b   :  { %5229 = dma.vmem_to_hbm [thread:$0]  %s5225_s18, 32, %s5227_s21, [#allocation3]  }
 0x41c   :  { %7866 = dma.done.wait [#allocation3], 32  }
 0x41d   :  { %7867 = vsyncadd [#allocation3], 4294967264 }
 0x41e   :  { %5234 = vsyncpa [#allocation3], 1 }

</bundles_post_ra>
